<compile_context>
chip_gen: v6e
topology: v6e:2x2x1
jax: 0.10.0
libtpu: 0.0.40
codegen_flags: <defaults>
</compile_context>

<pallas_src>
import jax
import jax.numpy as jnp
from jax.experimental import pallas as pl
from jax.experimental.pallas import tpu as pltpu

_EPS = 1e-5


# ------------------------- Pallas kernels -----------------------------------

def _make_conv3x3_kernel(H, W, Cin, Cout, relu, with_residual):
    """Fused 3x3 conv (stride 1, pad 1) + folded BN(+Map) (+residual) (+ReLU).

    Refs per batch-element grid step:
      x_ref : (1, H+2, W+2, Cin)  halo-padded input block (f32)
      w_ref : (9, Cin, Cout)      tap-major weights (bf16)
      s_ref : (1, Cout)           folded scale (f32)
      b_ref : (1, Cout)           folded bias  (f32)
      r_ref : (1, H, W, Cout)     residual (only if with_residual)
      o_ref : (1, H, W, Cout)     output (f32)
    """
    M = H * W

    def kernel(*refs):
        if with_residual:
            x_ref, w_ref, s_ref, b_ref, r_ref, o_ref = refs
        else:
            x_ref, w_ref, s_ref, b_ref, o_ref = refs
            r_ref = None

        acc = None
        k = 0
        for dy in range(3):
            for dx in range(3):
                # Static slice of the resident VMEM block (shifted tap view).
                tap = x_ref[0, dy:dy + H, dx:dx + W, :]          # (H, W, Cin)
                tap = tap.reshape(M, Cin).astype(jnp.bfloat16)
                part = jnp.dot(tap, w_ref[k],
                               preferred_element_type=jnp.float32)
                acc = part if acc is None else acc + part
                k += 1

        y = acc * s_ref[...] + b_ref[...]                        # f32 epilogue
        if with_residual:
            y = y + r_ref[0].reshape(M, Cout)
        if relu:
            y = jnp.maximum(y, 0.0)
        o_ref[...] = y.reshape(1, H, W, Cout)

    return kernel


def _matmul_affine_kernel(x_ref, w_ref, s_ref, b_ref, o_ref):
    """1x1 conv as matmul + folded BN(+Map).  x:(M,Cin) w:(Cin,Cout) bf16."""
    y = jnp.dot(x_ref[...].astype(jnp.bfloat16), w_ref[...],
                preferred_element_type=jnp.float32)
    o_ref[...] = y * s_ref[...] + b_ref[...]


def _head_kernel(x_ref, w_ref, b_ref, o_ref):
    """Global average pool + Linear.  x:(N,S,C) w:(C,classes) b:(1,classes)."""
    feats = jnp.mean(x_ref[...], axis=1)                         # (N, C) f32
    y = jnp.dot(feats.astype(jnp.bfloat16), w_ref[...],
                preferred_element_type=jnp.float32)
    o_ref[...] = y + b_ref[...]


# ------------------------- Wrappers ------------------------------------------

def conv3x3_bn_act(x, w9, scale, bias, *, relu, residual=None):
    """x: (N,H,W,Cin) f32 NHWC.  w9: (9,Cin,Cout) bf16.  scale/bias: (1,Cout)."""
    N, H, W, Cin = x.shape
    Cout = w9.shape[-1]
    xp = jnp.pad(x, ((0, 0), (1, 1), (1, 1), (0, 0)))            # 1-pixel halo (~1x traffic)
    kernel = _make_conv3x3_kernel(H, W, Cin, Cout, relu, residual is not None)

    in_specs = [
        pl.BlockSpec((1, H + 2, W + 2, Cin), lambda n: (n, 0, 0, 0)),
        pl.BlockSpec((9, Cin, Cout), lambda n: (0, 0, 0)),
        pl.BlockSpec((1, Cout), lambda n: (0, 0)),
        pl.BlockSpec((1, Cout), lambda n: (0, 0)),
    ]
    args = [xp, w9, scale, bias]
    if residual is not None:
        in_specs.append(pl.BlockSpec((1, H, W, Cout), lambda n: (n, 0, 0, 0)))
        args.append(residual)

    return pl.pallas_call(
        kernel,
        out_shape=jax.ShapeDtypeStruct((N, H, W, Cout), jnp.float32),
        grid=(N,),
        in_specs=in_specs,
        out_specs=pl.BlockSpec((1, H, W, Cout), lambda n: (n, 0, 0, 0)),
        compiler_params=pltpu.CompilerParams(dimension_semantics=("parallel",)),
    )(*args)


def conv1x1_bn(x, w, scale, bias):
    """Shortcut: 1x1 conv + folded BN(+Map).  x already spatially subsampled."""
    N, H, W, Cin = x.shape
    Cout = w.shape[-1]
    M = N * H * W
    out = pl.pallas_call(
        _matmul_affine_kernel,
        out_shape=jax.ShapeDtypeStruct((M, Cout), jnp.float32),
        grid=(1,),
        in_specs=[pl.BlockSpec((M, Cin), lambda i: (0, 0)),
                  pl.BlockSpec((Cin, Cout), lambda i: (0, 0)),
                  pl.BlockSpec((1, Cout), lambda i: (0, 0)),
                  pl.BlockSpec((1, Cout), lambda i: (0, 0))],
        out_specs=pl.BlockSpec((M, Cout), lambda i: (0, 0)),
    )(x.reshape(M, Cin), w, scale, bias)
    return out.reshape(N, H, W, Cout)


def avgpool_linear(x, w_t, b):
    """Global avg pool + Linear, fused.  x: (N,H,W,C); w_t: (C,classes) bf16."""
    N, H, W, C = x.shape
    classes = w_t.shape[-1]
    return pl.pallas_call(
        _head_kernel,
        out_shape=jax.ShapeDtypeStruct((N, classes), jnp.float32),
        grid=(1,),
        in_specs=[pl.BlockSpec((N, H * W, C), lambda i: (0, 0, 0)),
                  pl.BlockSpec((C, classes), lambda i: (0, 0)),
                  pl.BlockSpec((1, classes), lambda i: (0, 0))],
        out_specs=pl.BlockSpec((N, classes), lambda i: (0, 0)),
    )(x.reshape(N, H * W, C), w_t, b)


# ------------------------- Parameters -----------------------------------------

def _conv_init(key, cout, cin, k):
    fan = cin * k * k
    return jax.random.normal(key, (cout, cin, k, k), jnp.float32) * (2.0 / fan) ** 0.5


def _bn_init(key, c):
    k1, k2, k3, k4 = jax.random.split(key, 4)
    return dict(gamma=jax.random.uniform(k1, (c,), jnp.float32, minval=0.5, maxval=1.5),
                beta=jax.random.normal(k2, (c,), jnp.float32) * 0.1,
                mean=jax.random.normal(k3, (c,), jnp.float32) * 0.1,
                var=jax.random.uniform(k4, (c,), jnp.float32, minval=0.5, maxval=1.5))


def init_raw_params(key, cfg, num_blocks, num_classes):
    """Mirrors ResNet_cifar_p.__init__ (PyTorch tensor layouts)."""
    keys = jax.random.split(key, 4)
    raw = dict(stem_w=_conv_init(keys[0], cfg['base'], 3, 3),
               stem_bn=_bn_init(keys[1], cfg['base']))
    blocks = []
    in_planes = cfg['base']
    layer_specs = [(cfg['l1'], num_blocks[0], 1, 0),
                   (cfg['l2'], num_blocks[1], 2, cfg['l2s']),
                   (cfg['l3'], num_blocks[2], 2, cfg['l3s'])]
    k = keys[2]
    for l_cfg, nb, first_stride, n_sc in layer_specs:
        strides = [first_stride] + [1] * (nb - 1)
        for lnum, stride in enumerate(strides):
            mid, out = l_cfg[2 * lnum], l_cfg[2 * lnum + 1]
            k, k1, k2, k3, k4, k5, k6 = jax.random.split(k, 7)
            blk = dict(stride=stride,
                       conv1=_conv_init(k1, mid, in_planes, 3), bn1=_bn_init(k2, mid),
                       conv2=_conv_init(k3, out, mid, 3), bn2=_bn_init(k4, out),
                       map=jnp.ones((out,), jnp.float32))        # MapLayer = ones
            if stride != 1:
                blk['sc_conv'] = _conv_init(k5, n_sc, in_planes, 1)
                blk['sc_bn'] = _bn_init(k6, n_sc)
                blk['sc_map'] = jnp.ones((n_sc,), jnp.float32)
            blocks.append(blk)
            in_planes = out
    raw['blocks'] = blocks
    kw, kb = jax.random.split(keys[3])
    feat = cfg['l3'][-1]
    raw['lin_w'] = jax.random.normal(kw, (num_classes, feat), jnp.float32) * (1.0 / feat) ** 0.5
    raw['lin_b'] = jax.random.normal(kb, (num_classes,), jnp.float32) * 0.01
    return raw


def _fold_bn(bn, map_=None):
    scale = bn['gamma'] / jnp.sqrt(bn['var'] + _EPS)
    bias = bn['beta'] - bn['mean'] * scale
    if map_ is not None:
        scale = scale * map_
        bias = bias * map_
    c = scale.shape[0]
    return (scale.reshape(1, c).astype(jnp.float32),
            bias.reshape(1, c).astype(jnp.float32))


def _conv3x3_to_taps(w):
    # torch (Cout, Cin, 3, 3) -> (9, Cin, Cout) bf16 (tap-major)
    cout, cin = w.shape[0], w.shape[1]
    return jnp.transpose(w, (2, 3, 1, 0)).reshape(9, cin, cout).astype(jnp.bfloat16)


def prepare_params(raw):
    """One-time conversion to kernel-ready tensors (done at param-prep time)."""
    s, b = _fold_bn(raw['stem_bn'])
    kp = dict(stem=dict(w=_conv3x3_to_taps(raw['stem_w']), s=s, b=b), blocks=[])
    strides = []
    for blk in raw['blocks']:
        s1, b1 = _fold_bn(blk['bn1'])
        s2, b2 = _fold_bn(blk['bn2'], blk['map'])
        kblk = dict(w1=_conv3x3_to_taps(blk['conv1']), s1=s1, b1=b1,
                    w2=_conv3x3_to_taps(blk['conv2']), s2=s2, b2=b2)
        if blk['stride'] != 1:
            ss, bs = _fold_bn(blk['sc_bn'], blk['sc_map'])
            kblk.update(ws=blk['sc_conv'][:, :, 0, 0].T.astype(jnp.bfloat16),
                        ss=ss, bs=bs)
        kp['blocks'].append(kblk)
        strides.append(blk['stride'])
    kp['lin_w_t'] = raw['lin_w'].T.astype(jnp.bfloat16)
    kp['lin_b'] = raw['lin_b'].reshape(1, -1).astype(jnp.float32)
    return kp, tuple(strides)


# ------------------------- Forward passes -------------------------------------

def resnet_cifar_p_forward(kp, strides, x_nchw):
    x = jnp.transpose(x_nchw, (0, 2, 3, 1))                      # NCHW -> NHWC
    # stem: conv -> bn -> relu
    x = conv3x3_bn_act(x, kp['stem']['w'], kp['stem']['s'], kp['stem']['b'], relu=True)
    for blk, stride in zip(kp['blocks'], strides):
        # conv1 -> bn1 -> relu
        y = conv3x3_bn_act(x, blk['w1'], blk['s1'], blk['b1'], relu=True)
        if stride != 1:
            y = y[:, ::2, ::2, :]                                # exact stride-2 subsample
            res = conv1x1_bn(x[:, ::2, ::2, :], blk['ws'], blk['ss'], blk['bs'])
        else:
            res = x                                              # identity shortcut
        # conv2 -> bn2 -> map -> +shortcut -> relu, all fused in one kernel
        x = conv3x3_bn_act(y, blk['w2'], blk['s2'], blk['b2'], relu=True, residual=res)
    return avgpool_linear(x, kp['lin_w_t'], kp['lin_b'])


def reference_forward(raw, x_nchw):
    """Pure-JAX NCHW reference of ResNet_cifar_p.forward (inference-mode BN).
    Conv/Linear operands are bf16-rounded with f32 accumulation so the check
    against the bf16-MXU Pallas path is apples-to-apples."""
    def bn(x, p):
        scale = p['gamma'] / jnp.sqrt(p['var'] + _EPS)
        bias = p['beta'] - p['mean'] * scale
        return x * scale[None, :, None, None] + bias[None, :, None, None]

    def conv(x, w, stride, pad):
        return jax.lax.conv_general_dilated(
            x.astype(jnp.bfloat16), w.astype(jnp.bfloat16),
            window_strides=(stride, stride), padding=((pad, pad), (pad, pad)),
            dimension_numbers=('NCHW', 'OIHW', 'NCHW'),
            preferred_element_type=jnp.float32)

    x = jax.nn.relu(bn(conv(x_nchw, raw['stem_w'], 1, 1), raw['stem_bn']))
    for blk in raw['blocks']:
        out = jax.nn.relu(bn(conv(x, blk['conv1'], blk['stride'], 1), blk['bn1']))
        out = bn(conv(out, blk['conv2'], 1, 1), blk['bn2']) * blk['map'][None, :, None, None]
        if blk['stride'] != 1:
            sc = bn(conv(x, blk['sc_conv'], blk['stride'], 0), blk['sc_bn'])
            sc = sc * blk['sc_map'][None, :, None, None]
        else:
            sc = x
        x = jax.nn.relu(out + sc)
    pooled = jnp.mean(x, axis=(2, 3))                            # F.avg_pool2d(full) + view
    return (jnp.dot(pooled.astype(jnp.bfloat16), raw['lin_w'].T.astype(jnp.bfloat16),
                    preferred_element_type=jnp.float32) + raw['lin_b'])


# ------------------------- Main ------------------------------------------------

if __name__ == "__main__":
    # Pruned-ResNet config in the format ResNet_cifar_p expects, at toy sizes.
    cfg = {'base': 16, 'l1': [16, 16], 'l2': [32, 32], 'l2s': 32,
           'l3': [64, 64], 'l3s': 64}
    num_blocks = [1, 1, 1]
    num_classes = 10

    key = jax.random.PRNGKey(0)
    kparams, kx = jax.random.split(key)
    raw = init_raw_params(kparams, cfg, num_blocks, num_classes)
    kp, strides = prepare_params(raw)

    x = jax.random.normal(kx, (2, 3, 16, 16), jnp.float32)       # NCHW like PyTorch

    fwd = jax.jit(lambda kp_, x_: resnet_cifar_p_forward(kp_, strides, x_))
    out = jax.block_until_ready(fwd(kp, x))

    ref = jax.block_until_ready(reference_forward(raw, x))
    assert out.shape == (2, num_classes), out.shape
    # Tolerance accounts for bf16 operand quantization + f32 accumulation-order
    # differences between the im2col-style kernel and the XLA conv reference.
    max_err = float(jnp.max(jnp.abs(out - ref)))
    assert jnp.allclose(out, ref, rtol=5e-3, atol=5e-3), max_err

    print("KERNEL_OK")
</pallas_src>

<mosaic_0001>
module attributes {stable_mosaic.version = 11 : i64} {
  func.func @kernel(%arg0: i32, %arg1: memref<1x18x18x3xf32, #tpu.memory_space<vmem>>, %arg2: memref<9x3x16xbf16, #tpu.memory_space<vmem>>, %arg3: memref<1x16xf32, #tpu.memory_space<vmem>>, %arg4: memref<1x16xf32, #tpu.memory_space<vmem>>, %arg5: memref<1x16x16x16xf32, #tpu.memory_space<vmem>>) attributes {dimension_semantics = [#tpu.dimension_semantics<parallel>], iteration_bounds = array<i64: 2>, scalar_prefetch = 0 : i64, scratch_operands = 0 : i64, tpu.core_type = #tpu.core_type<tc>, window_params = [{transform_indices = @transform_0, window_bounds = array<i64: 1, 18, 18, 3>}, {pipeline_mode = #tpu.pipeline_mode<synchronous>, transform_indices = @transform_1, window_bounds = array<i64: 9, 3, 16>}, {pipeline_mode = #tpu.pipeline_mode<synchronous>, transform_indices = @transform_2, window_bounds = array<i64: 1, 16>}, {pipeline_mode = #tpu.pipeline_mode<synchronous>, transform_indices = @transform_3, window_bounds = array<i64: 1, 16>}, {transform_indices = @transform_4, window_bounds = array<i64: 1, 16, 16, 16>}]} {
    %c0 = arith.constant 0 : index
    %c0_0 = arith.constant 0 : index
    %c0_1 = arith.constant 0 : index
    %c0_2 = arith.constant 0 : index
    %0 = vector.load %arg1[%c0, %c0_0, %c0_1, %c0_2] : memref<1x18x18x3xf32, #tpu.memory_space<vmem>>, vector<1x16x16x3xf32>
    %1 = vector.shape_cast %0 : vector<1x16x16x3xf32> to vector<16x16x3xf32>
    %2 = vector.shape_cast %1 : vector<16x16x3xf32> to vector<256x3xf32>
    %3 = arith.truncf %2 : vector<256x3xf32> to vector<256x3xbf16>
    %c0_3 = arith.constant 0 : index
    %c0_4 = arith.constant 0 : index
    %c0_5 = arith.constant 0 : index
    %4 = vector.load %arg2[%c0_3, %c0_4, %c0_5] : memref<9x3x16xbf16, #tpu.memory_space<vmem>>, vector<1x3x16xbf16>
    %5 = vector.shape_cast %4 : vector<1x3x16xbf16> to vector<3x16xbf16>
    %cst = arith.constant dense<0.000000e+00> : vector<256x16xf32>
    %6 = tpu.matmul %3, %5, %cst {dimension_numbers = #tpu.dot_dimension_numbers<[1], [0], [0], [1], [0, 0, 1, 1], [], []>} : vector<256x3xbf16>, vector<3x16xbf16>, vector<256x16xf32> -> vector<256x16xf32>
    %c0_6 = arith.constant 0 : index
    %c0_7 = arith.constant 0 : index
    %c1 = arith.constant 1 : index
    %c0_8 = arith.constant 0 : index
    %7 = vector.load %arg1[%c0_6, %c0_7, %c1, %c0_8] : memref<1x18x18x3xf32, #tpu.memory_space<vmem>>, vector<1x16x16x3xf32>
    %8 = vector.shape_cast %7 : vector<1x16x16x3xf32> to vector<16x16x3xf32>
    %9 = vector.shape_cast %8 : vector<16x16x3xf32> to vector<256x3xf32>
    %10 = arith.truncf %9 : vector<256x3xf32> to vector<256x3xbf16>
    %c1_9 = arith.constant 1 : index
    %c0_10 = arith.constant 0 : index
    %c0_11 = arith.constant 0 : index
    %11 = vector.load %arg2[%c1_9, %c0_10, %c0_11] : memref<9x3x16xbf16, #tpu.memory_space<vmem>>, vector<1x3x16xbf16>
    %12 = vector.shape_cast %11 : vector<1x3x16xbf16> to vector<3x16xbf16>
    %cst_12 = arith.constant dense<0.000000e+00> : vector<256x16xf32>
    %13 = tpu.matmul %10, %12, %cst_12 {dimension_numbers = #tpu.dot_dimension_numbers<[1], [0], [0], [1], [0, 0, 1, 1], [], []>} : vector<256x3xbf16>, vector<3x16xbf16>, vector<256x16xf32> -> vector<256x16xf32>
    %14 = arith.addf %6, %13 : vector<256x16xf32>
    %c0_13 = arith.constant 0 : index
    %c0_14 = arith.constant 0 : index
    %c2 = arith.constant 2 : index
    %c0_15 = arith.constant 0 : index
    %15 = vector.load %arg1[%c0_13, %c0_14, %c2, %c0_15] : memref<1x18x18x3xf32, #tpu.memory_space<vmem>>, vector<1x16x16x3xf32>
    %16 = vector.shape_cast %15 : vector<1x16x16x3xf32> to vector<16x16x3xf32>
    %17 = vector.shape_cast %16 : vector<16x16x3xf32> to vector<256x3xf32>
    %18 = arith.truncf %17 : vector<256x3xf32> to vector<256x3xbf16>
    %c2_16 = arith.constant 2 : index
    %c0_17 = arith.constant 0 : index
    %c0_18 = arith.constant 0 : index
    %19 = vector.load %arg2[%c2_16, %c0_17, %c0_18] : memref<9x3x16xbf16, #tpu.memory_space<vmem>>, vector<1x3x16xbf16>
    %20 = vector.shape_cast %19 : vector<1x3x16xbf16> to vector<3x16xbf16>
    %cst_19 = arith.constant dense<0.000000e+00> : vector<256x16xf32>
    %21 = tpu.matmul %18, %20, %cst_19 {dimension_numbers = #tpu.dot_dimension_numbers<[1], [0], [0], [1], [0, 0, 1, 1], [], []>} : vector<256x3xbf16>, vector<3x16xbf16>, vector<256x16xf32> -> vector<256x16xf32>
    %22 = arith.addf %14, %21 : vector<256x16xf32>
    %c0_20 = arith.constant 0 : index
    %c1_21 = arith.constant 1 : index
    %c0_22 = arith.constant 0 : index
    %c0_23 = arith.constant 0 : index
    %23 = vector.load %arg1[%c0_20, %c1_21, %c0_22, %c0_23] : memref<1x18x18x3xf32, #tpu.memory_space<vmem>>, vector<1x16x16x3xf32>
    %24 = vector.shape_cast %23 : vector<1x16x16x3xf32> to vector<16x16x3xf32>
    %25 = vector.shape_cast %24 : vector<16x16x3xf32> to vector<256x3xf32>
    %26 = arith.truncf %25 : vector<256x3xf32> to vector<256x3xbf16>
    %c3 = arith.constant 3 : index
    %c0_24 = arith.constant 0 : index
    %c0_25 = arith.constant 0 : index
    %27 = vector.load %arg2[%c3, %c0_24, %c0_25] : memref<9x3x16xbf16, #tpu.memory_space<vmem>>, vector<1x3x16xbf16>
    %28 = vector.shape_cast %27 : vector<1x3x16xbf16> to vector<3x16xbf16>
    %cst_26 = arith.constant dense<0.000000e+00> : vector<256x16xf32>
    %29 = tpu.matmul %26, %28, %cst_26 {dimension_numbers = #tpu.dot_dimension_numbers<[1], [0], [0], [1], [0, 0, 1, 1], [], []>} : vector<256x3xbf16>, vector<3x16xbf16>, vector<256x16xf32> -> vector<256x16xf32>
    %30 = arith.addf %22, %29 : vector<256x16xf32>
    %c0_27 = arith.constant 0 : index
    %c1_28 = arith.constant 1 : index
    %c1_29 = arith.constant 1 : index
    %c0_30 = arith.constant 0 : index
    %31 = vector.load %arg1[%c0_27, %c1_28, %c1_29, %c0_30] : memref<1x18x18x3xf32, #tpu.memory_space<vmem>>, vector<1x16x16x3xf32>
    %32 = vector.shape_cast %31 : vector<1x16x16x3xf32> to vector<16x16x3xf32>
    %33 = vector.shape_cast %32 : vector<16x16x3xf32> to vector<256x3xf32>
    %34 = arith.truncf %33 : vector<256x3xf32> to vector<256x3xbf16>
    %c4 = arith.constant 4 : index
    %c0_31 = arith.constant 0 : index
    %c0_32 = arith.constant 0 : index
    %35 = vector.load %arg2[%c4, %c0_31, %c0_32] : memref<9x3x16xbf16, #tpu.memory_space<vmem>>, vector<1x3x16xbf16>
    %36 = vector.shape_cast %35 : vector<1x3x16xbf16> to vector<3x16xbf16>
    %cst_33 = arith.constant dense<0.000000e+00> : vector<256x16xf32>
    %37 = tpu.matmul %34, %36, %cst_33 {dimension_numbers = #tpu.dot_dimension_numbers<[1], [0], [0], [1], [0, 0, 1, 1], [], []>} : vector<256x3xbf16>, vector<3x16xbf16>, vector<256x16xf32> -> vector<256x16xf32>
    %38 = arith.addf %30, %37 : vector<256x16xf32>
    %c0_34 = arith.constant 0 : index
    %c1_35 = arith.constant 1 : index
    %c2_36 = arith.constant 2 : index
    %c0_37 = arith.constant 0 : index
    %39 = vector.load %arg1[%c0_34, %c1_35, %c2_36, %c0_37] : memref<1x18x18x3xf32, #tpu.memory_space<vmem>>, vector<1x16x16x3xf32>
    %40 = vector.shape_cast %39 : vector<1x16x16x3xf32> to vector<16x16x3xf32>
    %41 = vector.shape_cast %40 : vector<16x16x3xf32> to vector<256x3xf32>
    %42 = arith.truncf %41 : vector<256x3xf32> to vector<256x3xbf16>
    %c5 = arith.constant 5 : index
    %c0_38 = arith.constant 0 : index
    %c0_39 = arith.constant 0 : index
    %43 = vector.load %arg2[%c5, %c0_38, %c0_39] : memref<9x3x16xbf16, #tpu.memory_space<vmem>>, vector<1x3x16xbf16>
    %44 = vector.shape_cast %43 : vector<1x3x16xbf16> to vector<3x16xbf16>
    %cst_40 = arith.constant dense<0.000000e+00> : vector<256x16xf32>
    %45 = tpu.matmul %42, %44, %cst_40 {dimension_numbers = #tpu.dot_dimension_numbers<[1], [0], [0], [1], [0, 0, 1, 1], [], []>} : vector<256x3xbf16>, vector<3x16xbf16>, vector<256x16xf32> -> vector<256x16xf32>
    %46 = arith.addf %38, %45 : vector<256x16xf32>
    %c0_41 = arith.constant 0 : index
    %c2_42 = arith.constant 2 : index
    %c0_43 = arith.constant 0 : index
    %c0_44 = arith.constant 0 : index
    %47 = vector.load %arg1[%c0_41, %c2_42, %c0_43, %c0_44] : memref<1x18x18x3xf32, #tpu.memory_space<vmem>>, vector<1x16x16x3xf32>
    %48 = vector.shape_cast %47 : vector<1x16x16x3xf32> to vector<16x16x3xf32>
    %49 = vector.shape_cast %48 : vector<16x16x3xf32> to vector<256x3xf32>
    %50 = arith.truncf %49 : vector<256x3xf32> to vector<256x3xbf16>
    %c6 = arith.constant 6 : index
    %c0_45 = arith.constant 0 : index
    %c0_46 = arith.constant 0 : index
    %51 = vector.load %arg2[%c6, %c0_45, %c0_46] : memref<9x3x16xbf16, #tpu.memory_space<vmem>>, vector<1x3x16xbf16>
    %52 = vector.shape_cast %51 : vector<1x3x16xbf16> to vector<3x16xbf16>
    %cst_47 = arith.constant dense<0.000000e+00> : vector<256x16xf32>
    %53 = tpu.matmul %50, %52, %cst_47 {dimension_numbers = #tpu.dot_dimension_numbers<[1], [0], [0], [1], [0, 0, 1, 1], [], []>} : vector<256x3xbf16>, vector<3x16xbf16>, vector<256x16xf32> -> vector<256x16xf32>
    %54 = arith.addf %46, %53 : vector<256x16xf32>
    %c0_48 = arith.constant 0 : index
    %c2_49 = arith.constant 2 : index
    %c1_50 = arith.constant 1 : index
    %c0_51 = arith.constant 0 : index
    %55 = vector.load %arg1[%c0_48, %c2_49, %c1_50, %c0_51] : memref<1x18x18x3xf32, #tpu.memory_space<vmem>>, vector<1x16x16x3xf32>
    %56 = vector.shape_cast %55 : vector<1x16x16x3xf32> to vector<16x16x3xf32>
    %57 = vector.shape_cast %56 : vector<16x16x3xf32> to vector<256x3xf32>
    %58 = arith.truncf %57 : vector<256x3xf32> to vector<256x3xbf16>
    %c7 = arith.constant 7 : index
    %c0_52 = arith.constant 0 : index
    %c0_53 = arith.constant 0 : index
    %59 = vector.load %arg2[%c7, %c0_52, %c0_53] : memref<9x3x16xbf16, #tpu.memory_space<vmem>>, vector<1x3x16xbf16>
    %60 = vector.shape_cast %59 : vector<1x3x16xbf16> to vector<3x16xbf16>
    %cst_54 = arith.constant dense<0.000000e+00> : vector<256x16xf32>
    %61 = tpu.matmul %58, %60, %cst_54 {dimension_numbers = #tpu.dot_dimension_numbers<[1], [0], [0], [1], [0, 0, 1, 1], [], []>} : vector<256x3xbf16>, vector<3x16xbf16>, vector<256x16xf32> -> vector<256x16xf32>
    %62 = arith.addf %54, %61 : vector<256x16xf32>
    %c0_55 = arith.constant 0 : index
    %c2_56 = arith.constant 2 : index
    %c2_57 = arith.constant 2 : index
    %c0_58 = arith.constant 0 : index
    %63 = vector.load %arg1[%c0_55, %c2_56, %c2_57, %c0_58] : memref<1x18x18x3xf32, #tpu.memory_space<vmem>>, vector<1x16x16x3xf32>
    %64 = vector.shape_cast %63 : vector<1x16x16x3xf32> to vector<16x16x3xf32>
    %65 = vector.shape_cast %64 : vector<16x16x3xf32> to vector<256x3xf32>
    %66 = arith.truncf %65 : vector<256x3xf32> to vector<256x3xbf16>
    %c8 = arith.constant 8 : index
    %c0_59 = arith.constant 0 : index
    %c0_60 = arith.constant 0 : index
    %67 = vector.load %arg2[%c8, %c0_59, %c0_60] : memref<9x3x16xbf16, #tpu.memory_space<vmem>>, vector<1x3x16xbf16>
    %68 = vector.shape_cast %67 : vector<1x3x16xbf16> to vector<3x16xbf16>
    %cst_61 = arith.constant dense<0.000000e+00> : vector<256x16xf32>
    %69 = tpu.matmul %66, %68, %cst_61 {dimension_numbers = #tpu.dot_dimension_numbers<[1], [0], [0], [1], [0, 0, 1, 1], [], []>} : vector<256x3xbf16>, vector<3x16xbf16>, vector<256x16xf32> -> vector<256x16xf32>
    %70 = arith.addf %62, %69 : vector<256x16xf32>
    %c0_62 = arith.constant 0 : index
    %c0_63 = arith.constant 0 : index
    %71 = vector.load %arg3[%c0_62, %c0_63] : memref<1x16xf32, #tpu.memory_space<vmem>>, vector<1x16xf32>
    %72 = vector.broadcast %71 : vector<1x16xf32> to vector<256x16xf32>
    %73 = arith.mulf %70, %72 : vector<256x16xf32>
    %c0_64 = arith.constant 0 : index
    %c0_65 = arith.constant 0 : index
    %74 = vector.load %arg4[%c0_64, %c0_65] : memref<1x16xf32, #tpu.memory_space<vmem>>, vector<1x16xf32>
    %75 = vector.broadcast %74 : vector<1x16xf32> to vector<256x16xf32>
    %76 = arith.addf %73, %75 : vector<256x16xf32>
    %cst_66 = arith.constant 0.000000e+00 : f32
    %77 = vector.broadcast %cst_66 : f32 to vector<256x16xf32>
    %78 = arith.maximumf %76, %77 : vector<256x16xf32>
    %79 = vector.shape_cast %78 : vector<256x16xf32> to vector<1x16x16x16xf32>
    %c0_67 = arith.constant 0 : index
    %c0_68 = arith.constant 0 : index
    %c0_69 = arith.constant 0 : index
    %c0_70 = arith.constant 0 : index
    %80 = vector.load %arg5[%c0_67, %c0_68, %c0_69, %c0_70] : memref<1x16x16x16xf32, #tpu.memory_space<vmem>>, vector<1x16x16x16xf32>
    tpu.vector_store %arg5[%c0_67, %c0_68, %c0_69, %c0_70], %79 {strides = array<i32>} : memref<1x16x16x16xf32, #tpu.memory_space<vmem>>, vector<1x16x16x16xf32>,
    return
  }
  func.func @transform_0(%arg0: i32) -> (i32, i32, i32, i32) {
    %c0_i32 = arith.constant 0 : i32
    %c0_i32_0 = arith.constant 0 : i32
    %c0_i32_1 = arith.constant 0 : i32
    %c0_i32_2 = arith.constant 0 : i32
    return %arg0, %c0_i32, %c0_i32_0, %c0_i32_1 : i32, i32, i32, i32
  }
  func.func @transform_1(%arg0: i32) -> (i32, i32, i32) {
    %c0_i32 = arith.constant 0 : i32
    %c0_i32_0 = arith.constant 0 : i32
    %c0_i32_1 = arith.constant 0 : i32
    %c0_i32_2 = arith.constant 0 : i32
    return %c0_i32, %c0_i32_0, %c0_i32_1 : i32, i32, i32
  }
  func.func @transform_2(%arg0: i32) -> (i32, i32) {
    %c0_i32 = arith.constant 0 : i32
    %c0_i32_0 = arith.constant 0 : i32
    %c0_i32_1 = arith.constant 0 : i32
    return %c0_i32, %c0_i32_0 : i32, i32
  }
  func.func @transform_3(%arg0: i32) -> (i32, i32) {
    %c0_i32 = arith.constant 0 : i32
    %c0_i32_0 = arith.constant 0 : i32
    %c0_i32_1 = arith.constant 0 : i32
    return %c0_i32, %c0_i32_0 : i32, i32
  }
  func.func @transform_4(%arg0: i32) -> (i32, i32, i32, i32) {
    %c0_i32 = arith.constant 0 : i32
    %c0_i32_0 = arith.constant 0 : i32
    %c0_i32_1 = arith.constant 0 : i32
    %c0_i32_2 = arith.constant 0 : i32
    return %arg0, %c0_i32, %c0_i32_0, %c0_i32_1 : i32, i32, i32, i32
  }
}

module attributes {stable_mosaic.version = 11 : i64} {
  func.func @kernel(%arg0: i32, %arg1: memref<1x18x18x16xf32, #tpu.memory_space<vmem>>, %arg2: memref<9x16x16xbf16, #tpu.memory_space<vmem>>, %arg3: memref<1x16xf32, #tpu.memory_space<vmem>>, %arg4: memref<1x16xf32, #tpu.memory_space<vmem>>, %arg5: memref<1x16x16x16xf32, #tpu.memory_space<vmem>>) attributes {dimension_semantics = [#tpu.dimension_semantics<parallel>], iteration_bounds = array<i64: 2>, scalar_prefetch = 0 : i64, scratch_operands = 0 : i64, tpu.core_type = #tpu.core_type<tc>, window_params = [{transform_indices = @transform_0, window_bounds = array<i64: 1, 18, 18, 16>}, {pipeline_mode = #tpu.pipeline_mode<synchronous>, transform_indices = @transform_1, window_bounds = array<i64: 9, 16, 16>}, {pipeline_mode = #tpu.pipeline_mode<synchronous>, transform_indices = @transform_2, window_bounds = array<i64: 1, 16>}, {pipeline_mode = #tpu.pipeline_mode<synchronous>, transform_indices = @transform_3, window_bounds = array<i64: 1, 16>}, {transform_indices = @transform_4, window_bounds = array<i64: 1, 16, 16, 16>}]} {
    %c0 = arith.constant 0 : index
    %c0_0 = arith.constant 0 : index
    %c0_1 = arith.constant 0 : index
    %c0_2 = arith.constant 0 : index
    %0 = vector.load %arg1[%c0, %c0_0, %c0_1, %c0_2] : memref<1x18x18x16xf32, #tpu.memory_space<vmem>>, vector<1x16x16x16xf32>
    %1 = vector.shape_cast %0 : vector<1x16x16x16xf32> to vector<16x16x16xf32>
    %2 = vector.shape_cast %1 : vector<16x16x16xf32> to vector<256x16xf32>
    %3 = arith.truncf %2 : vector<256x16xf32> to vector<256x16xbf16>
    %c0_3 = arith.constant 0 : index
    %c0_4 = arith.constant 0 : index
    %c0_5 = arith.constant 0 : index
    %4 = vector.load %arg2[%c0_3, %c0_4, %c0_5] : memref<9x16x16xbf16, #tpu.memory_space<vmem>>, vector<1x16x16xbf16>
    %5 = vector.shape_cast %4 : vector<1x16x16xbf16> to vector<16x16xbf16>
    %cst = arith.constant dense<0.000000e+00> : vector<256x16xf32>
    %6 = tpu.matmul %3, %5, %cst {dimension_numbers = #tpu.dot_dimension_numbers<[1], [0], [0], [1], [0, 0, 1, 1], [], []>} : vector<256x16xbf16>, vector<16x16xbf16>, vector<256x16xf32> -> vector<256x16xf32>
    %c0_6 = arith.constant 0 : index
    %c0_7 = arith.constant 0 : index
    %c1 = arith.constant 1 : index
    %c0_8 = arith.constant 0 : index
    %7 = vector.load %arg1[%c0_6, %c0_7, %c1, %c0_8] : memref<1x18x18x16xf32, #tpu.memory_space<vmem>>, vector<1x16x16x16xf32>
    %8 = vector.shape_cast %7 : vector<1x16x16x16xf32> to vector<16x16x16xf32>
    %9 = vector.shape_cast %8 : vector<16x16x16xf32> to vector<256x16xf32>
    %10 = arith.truncf %9 : vector<256x16xf32> to vector<256x16xbf16>
    %c1_9 = arith.constant 1 : index
    %c0_10 = arith.constant 0 : index
    %c0_11 = arith.constant 0 : index
    %11 = vector.load %arg2[%c1_9, %c0_10, %c0_11] : memref<9x16x16xbf16, #tpu.memory_space<vmem>>, vector<1x16x16xbf16>
    %12 = vector.shape_cast %11 : vector<1x16x16xbf16> to vector<16x16xbf16>
    %cst_12 = arith.constant dense<0.000000e+00> : vector<256x16xf32>
    %13 = tpu.matmul %10, %12, %cst_12 {dimension_numbers = #tpu.dot_dimension_numbers<[1], [0], [0], [1], [0, 0, 1, 1], [], []>} : vector<256x16xbf16>, vector<16x16xbf16>, vector<256x16xf32> -> vector<256x16xf32>
    %14 = arith.addf %6, %13 : vector<256x16xf32>
    %c0_13 = arith.constant 0 : index
    %c0_14 = arith.constant 0 : index
    %c2 = arith.constant 2 : index
    %c0_15 = arith.constant 0 : index
    %15 = vector.load %arg1[%c0_13, %c0_14, %c2, %c0_15] : memref<1x18x18x16xf32, #tpu.memory_space<vmem>>, vector<1x16x16x16xf32>
    %16 = vector.shape_cast %15 : vector<1x16x16x16xf32> to vector<16x16x16xf32>
    %17 = vector.shape_cast %16 : vector<16x16x16xf32> to vector<256x16xf32>
    %18 = arith.truncf %17 : vector<256x16xf32> to vector<256x16xbf16>
    %c2_16 = arith.constant 2 : index
    %c0_17 = arith.constant 0 : index
    %c0_18 = arith.constant 0 : index
    %19 = vector.load %arg2[%c2_16, %c0_17, %c0_18] : memref<9x16x16xbf16, #tpu.memory_space<vmem>>, vector<1x16x16xbf16>
    %20 = vector.shape_cast %19 : vector<1x16x16xbf16> to vector<16x16xbf16>
    %cst_19 = arith.constant dense<0.000000e+00> : vector<256x16xf32>
    %21 = tpu.matmul %18, %20, %cst_19 {dimension_numbers = #tpu.dot_dimension_numbers<[1], [0], [0], [1], [0, 0, 1, 1], [], []>} : vector<256x16xbf16>, vector<16x16xbf16>, vector<256x16xf32> -> vector<256x16xf32>
    %22 = arith.addf %14, %21 : vector<256x16xf32>
    %c0_20 = arith.constant 0 : index
    %c1_21 = arith.constant 1 : index
    %c0_22 = arith.constant 0 : index
    %c0_23 = arith.constant 0 : index
    %23 = vector.load %arg1[%c0_20, %c1_21, %c0_22, %c0_23] : memref<1x18x18x16xf32, #tpu.memory_space<vmem>>, vector<1x16x16x16xf32>
    %24 = vector.shape_cast %23 : vector<1x16x16x16xf32> to vector<16x16x16xf32>
    %25 = vector.shape_cast %24 : vector<16x16x16xf32> to vector<256x16xf32>
    %26 = arith.truncf %25 : vector<256x16xf32> to vector<256x16xbf16>
    %c3 = arith.constant 3 : index
    %c0_24 = arith.constant 0 : index
    %c0_25 = arith.constant 0 : index
    %27 = vector.load %arg2[%c3, %c0_24, %c0_25] : memref<9x16x16xbf16, #tpu.memory_space<vmem>>, vector<1x16x16xbf16>
    %28 = vector.shape_cast %27 : vector<1x16x16xbf16> to vector<16x16xbf16>
    %cst_26 = arith.constant dense<0.000000e+00> : vector<256x16xf32>
    %29 = tpu.matmul %26, %28, %cst_26 {dimension_numbers = #tpu.dot_dimension_numbers<[1], [0], [0], [1], [0, 0, 1, 1], [], []>} : vector<256x16xbf16>, vector<16x16xbf16>, vector<256x16xf32> -> vector<256x16xf32>
    %30 = arith.addf %22, %29 : vector<256x16xf32>
    %c0_27 = arith.constant 0 : index
    %c1_28 = arith.constant 1 : index
    %c1_29 = arith.constant 1 : index
    %c0_30 = arith.constant 0 : index
    %31 = vector.load %arg1[%c0_27, %c1_28, %c1_29, %c0_30] : memref<1x18x18x16xf32, #tpu.memory_space<vmem>>, vector<1x16x16x16xf32>
    %32 = vector.shape_cast %31 : vector<1x16x16x16xf32> to vector<16x16x16xf32>
    %33 = vector.shape_cast %32 : vector<16x16x16xf32> to vector<256x16xf32>
    %34 = arith.truncf %33 : vector<256x16xf32> to vector<256x16xbf16>
    %c4 = arith.constant 4 : index
    %c0_31 = arith.constant 0 : index
    %c0_32 = arith.constant 0 : index
    %35 = vector.load %arg2[%c4, %c0_31, %c0_32] : memref<9x16x16xbf16, #tpu.memory_space<vmem>>, vector<1x16x16xbf16>
    %36 = vector.shape_cast %35 : vector<1x16x16xbf16> to vector<16x16xbf16>
    %cst_33 = arith.constant dense<0.000000e+00> : vector<256x16xf32>
    %37 = tpu.matmul %34, %36, %cst_33 {dimension_numbers = #tpu.dot_dimension_numbers<[1], [0], [0], [1], [0, 0, 1, 1], [], []>} : vector<256x16xbf16>, vector<16x16xbf16>, vector<256x16xf32> -> vector<256x16xf32>
    %38 = arith.addf %30, %37 : vector<256x16xf32>
    %c0_34 = arith.constant 0 : index
    %c1_35 = arith.constant 1 : index
    %c2_36 = arith.constant 2 : index
    %c0_37 = arith.constant 0 : index
    %39 = vector.load %arg1[%c0_34, %c1_35, %c2_36, %c0_37] : memref<1x18x18x16xf32, #tpu.memory_space<vmem>>, vector<1x16x16x16xf32>
    %40 = vector.shape_cast %39 : vector<1x16x16x16xf32> to vector<16x16x16xf32>
    %41 = vector.shape_cast %40 : vector<16x16x16xf32> to vector<256x16xf32>
    %42 = arith.truncf %41 : vector<256x16xf32> to vector<256x16xbf16>
    %c5 = arith.constant 5 : index
    %c0_38 = arith.constant 0 : index
    %c0_39 = arith.constant 0 : index
    %43 = vector.load %arg2[%c5, %c0_38, %c0_39] : memref<9x16x16xbf16, #tpu.memory_space<vmem>>, vector<1x16x16xbf16>
    %44 = vector.shape_cast %43 : vector<1x16x16xbf16> to vector<16x16xbf16>
    %cst_40 = arith.constant dense<0.000000e+00> : vector<256x16xf32>
    %45 = tpu.matmul %42, %44, %cst_40 {dimension_numbers = #tpu.dot_dimension_numbers<[1], [0], [0], [1], [0, 0, 1, 1], [], []>} : vector<256x16xbf16>, vector<16x16xbf16>, vector<256x16xf32> -> vector<256x16xf32>
    %46 = arith.addf %38, %45 : vector<256x16xf32>
    %c0_41 = arith.constant 0 : index
    %c2_42 = arith.constant 2 : index
    %c0_43 = arith.constant 0 : index
    %c0_44 = arith.constant 0 : index
    %47 = vector.load %arg1[%c0_41, %c2_42, %c0_43, %c0_44] : memref<1x18x18x16xf32, #tpu.memory_space<vmem>>, vector<1x16x16x16xf32>
    %48 = vector.shape_cast %47 : vector<1x16x16x16xf32> to vector<16x16x16xf32>
    %49 = vector.shape_cast %48 : vector<16x16x16xf32> to vector<256x16xf32>
    %50 = arith.truncf %49 : vector<256x16xf32> to vector<256x16xbf16>
    %c6 = arith.constant 6 : index
    %c0_45 = arith.constant 0 : index
    %c0_46 = arith.constant 0 : index
    %51 = vector.load %arg2[%c6, %c0_45, %c0_46] : memref<9x16x16xbf16, #tpu.memory_space<vmem>>, vector<1x16x16xbf16>
    %52 = vector.shape_cast %51 : vector<1x16x16xbf16> to vector<16x16xbf16>
    %cst_47 = arith.constant dense<0.000000e+00> : vector<256x16xf32>
    %53 = tpu.matmul %50, %52, %cst_47 {dimension_numbers = #tpu.dot_dimension_numbers<[1], [0], [0], [1], [0, 0, 1, 1], [], []>} : vector<256x16xbf16>, vector<16x16xbf16>, vector<256x16xf32> -> vector<256x16xf32>
    %54 = arith.addf %46, %53 : vector<256x16xf32>
    %c0_48 = arith.constant 0 : index
    %c2_49 = arith.constant 2 : index
    %c1_50 = arith.constant 1 : index
    %c0_51 = arith.constant 0 : index
    %55 = vector.load %arg1[%c0_48, %c2_49, %c1_50, %c0_51] : memref<1x18x18x16xf32, #tpu.memory_space<vmem>>, vector<1x16x16x16xf32>
    %56 = vector.shape_cast %55 : vector<1x16x16x16xf32> to vector<16x16x16xf32>
    %57 = vector.shape_cast %56 : vector<16x16x16xf32> to vector<256x16xf32>
    %58 = arith.truncf %57 : vector<256x16xf32> to vector<256x16xbf16>
    %c7 = arith.constant 7 : index
    %c0_52 = arith.constant 0 : index
    %c0_53 = arith.constant 0 : index
    %59 = vector.load %arg2[%c7, %c0_52, %c0_53] : memref<9x16x16xbf16, #tpu.memory_space<vmem>>, vector<1x16x16xbf16>
    %60 = vector.shape_cast %59 : vector<1x16x16xbf16> to vector<16x16xbf16>
    %cst_54 = arith.constant dense<0.000000e+00> : vector<256x16xf32>
    %61 = tpu.matmul %58, %60, %cst_54 {dimension_numbers = #tpu.dot_dimension_numbers<[1], [0], [0], [1], [0, 0, 1, 1], [], []>} : vector<256x16xbf16>, vector<16x16xbf16>, vector<256x16xf32> -> vector<256x16xf32>
    %62 = arith.addf %54, %61 : vector<256x16xf32>
    %c0_55 = arith.constant 0 : index
    %c2_56 = arith.constant 2 : index
    %c2_57 = arith.constant 2 : index
    %c0_58 = arith.constant 0 : index
    %63 = vector.load %arg1[%c0_55, %c2_56, %c2_57, %c0_58] : memref<1x18x18x16xf32, #tpu.memory_space<vmem>>, vector<1x16x16x16xf32>
    %64 = vector.shape_cast %63 : vector<1x16x16x16xf32> to vector<16x16x16xf32>
    %65 = vector.shape_cast %64 : vector<16x16x16xf32> to vector<256x16xf32>
    %66 = arith.truncf %65 : vector<256x16xf32> to vector<256x16xbf16>
    %c8 = arith.constant 8 : index
    %c0_59 = arith.constant 0 : index
    %c0_60 = arith.constant 0 : index
    %67 = vector.load %arg2[%c8, %c0_59, %c0_60] : memref<9x16x16xbf16, #tpu.memory_space<vmem>>, vector<1x16x16xbf16>
    %68 = vector.shape_cast %67 : vector<1x16x16xbf16> to vector<16x16xbf16>
    %cst_61 = arith.constant dense<0.000000e+00> : vector<256x16xf32>
    %69 = tpu.matmul %66, %68, %cst_61 {dimension_numbers = #tpu.dot_dimension_numbers<[1], [0], [0], [1], [0, 0, 1, 1], [], []>} : vector<256x16xbf16>, vector<16x16xbf16>, vector<256x16xf32> -> vector<256x16xf32>
    %70 = arith.addf %62, %69 : vector<256x16xf32>
    %c0_62 = arith.constant 0 : index
    %c0_63 = arith.constant 0 : index
    %71 = vector.load %arg3[%c0_62, %c0_63] : memref<1x16xf32, #tpu.memory_space<vmem>>, vector<1x16xf32>
    %72 = vector.broadcast %71 : vector<1x16xf32> to vector<256x16xf32>
    %73 = arith.mulf %70, %72 : vector<256x16xf32>
    %c0_64 = arith.constant 0 : index
    %c0_65 = arith.constant 0 : index
    %74 = vector.load %arg4[%c0_64, %c0_65] : memref<1x16xf32, #tpu.memory_space<vmem>>, vector<1x16xf32>
    %75 = vector.broadcast %74 : vector<1x16xf32> to vector<256x16xf32>
    %76 = arith.addf %73, %75 : vector<256x16xf32>
    %cst_66 = arith.constant 0.000000e+00 : f32
    %77 = vector.broadcast %cst_66 : f32 to vector<256x16xf32>
    %78 = arith.maximumf %76, %77 : vector<256x16xf32>
    %79 = vector.shape_cast %78 : vector<256x16xf32> to vector<1x16x16x16xf32>
    %c0_67 = arith.constant 0 : index
    %c0_68 = arith.constant 0 : index
    %c0_69 = arith.constant 0 : index
    %c0_70 = arith.constant 0 : index
    %80 = vector.load %arg5[%c0_67, %c0_68, %c0_69, %c0_70] : memref<1x16x16x16xf32, #tpu.memory_space<vmem>>, vector<1x16x16x16xf32>
    tpu.vector_store %arg5[%c0_67, %c0_68, %c0_69, %c0_70], %79 {strides = array<i32>} : memref<1x16x16x16xf32, #tpu.memory_space<vmem>>, vector<1x16x16x16xf32>,
    return
  }
  func.func @transform_0(%arg0: i32) -> (i32, i32, i32, i32) {
    %c0_i32 = arith.constant 0 : i32
    %c0_i32_0 = arith.constant 0 : i32
    %c0_i32_1 = arith.constant 0 : i32
    %c0_i32_2 = arith.constant 0 : i32
    return %arg0, %c0_i32, %c0_i32_0, %c0_i32_1 : i32, i32, i32, i32
  }
  func.func @transform_1(%arg0: i32) -> (i32, i32, i32) {
    %c0_i32 = arith.constant 0 : i32
    %c0_i32_0 = arith.constant 0 : i32
    %c0_i32_1 = arith.constant 0 : i32
    %c0_i32_2 = arith.constant 0 : i32
    return %c0_i32, %c0_i32_0, %c0_i32_1 : i32, i32, i32
  }
  func.func @transform_2(%arg0: i32) -> (i32, i32) {
    %c0_i32 = arith.constant 0 : i32
    %c0_i32_0 = arith.constant 0 : i32
    %c0_i32_1 = arith.constant 0 : i32
    return %c0_i32, %c0_i32_0 : i32, i32
  }
  func.func @transform_3(%arg0: i32) -> (i32, i32) {
    %c0_i32 = arith.constant 0 : i32
    %c0_i32_0 = arith.constant 0 : i32
    %c0_i32_1 = arith.constant 0 : i32
    return %c0_i32, %c0_i32_0 : i32, i32
  }
  func.func @transform_4(%arg0: i32) -> (i32, i32, i32, i32) {
    %c0_i32 = arith.constant 0 : i32
    %c0_i32_0 = arith.constant 0 : i32
    %c0_i32_1 = arith.constant 0 : i32
    %c0_i32_2 = arith.constant 0 : i32
    return %arg0, %c0_i32, %c0_i32_0, %c0_i32_1 : i32, i32, i32, i32
  }
}

module attributes {stable_mosaic.version = 11 : i64} {
  func.func @kernel(%arg0: i32, %arg1: memref<1x18x18x16xf32, #tpu.memory_space<vmem>>, %arg2: memref<9x16x32xbf16, #tpu.memory_space<vmem>>, %arg3: memref<1x32xf32, #tpu.memory_space<vmem>>, %arg4: memref<1x32xf32, #tpu.memory_space<vmem>>, %arg5: memref<1x16x16x32xf32, #tpu.memory_space<vmem>>) attributes {dimension_semantics = [#tpu.dimension_semantics<parallel>], iteration_bounds = array<i64: 2>, scalar_prefetch = 0 : i64, scratch_operands = 0 : i64, tpu.core_type = #tpu.core_type<tc>, window_params = [{transform_indices = @transform_0, window_bounds = array<i64: 1, 18, 18, 16>}, {pipeline_mode = #tpu.pipeline_mode<synchronous>, transform_indices = @transform_1, window_bounds = array<i64: 9, 16, 32>}, {pipeline_mode = #tpu.pipeline_mode<synchronous>, transform_indices = @transform_2, window_bounds = array<i64: 1, 32>}, {pipeline_mode = #tpu.pipeline_mode<synchronous>, transform_indices = @transform_3, window_bounds = array<i64: 1, 32>}, {transform_indices = @transform_4, window_bounds = array<i64: 1, 16, 16, 32>}]} {
    %c0 = arith.constant 0 : index
    %c0_0 = arith.constant 0 : index
    %c0_1 = arith.constant 0 : index
    %c0_2 = arith.constant 0 : index
    %0 = vector.load %arg1[%c0, %c0_0, %c0_1, %c0_2] : memref<1x18x18x16xf32, #tpu.memory_space<vmem>>, vector<1x16x16x16xf32>
    %1 = vector.shape_cast %0 : vector<1x16x16x16xf32> to vector<16x16x16xf32>
    %2 = vector.shape_cast %1 : vector<16x16x16xf32> to vector<256x16xf32>
    %3 = arith.truncf %2 : vector<256x16xf32> to vector<256x16xbf16>
    %c0_3 = arith.constant 0 : index
    %c0_4 = arith.constant 0 : index
    %c0_5 = arith.constant 0 : index
    %4 = vector.load %arg2[%c0_3, %c0_4, %c0_5] : memref<9x16x32xbf16, #tpu.memory_space<vmem>>, vector<1x16x32xbf16>
    %5 = vector.shape_cast %4 : vector<1x16x32xbf16> to vector<16x32xbf16>
    %cst = arith.constant dense<0.000000e+00> : vector<256x32xf32>
    %6 = tpu.matmul %3, %5, %cst {dimension_numbers = #tpu.dot_dimension_numbers<[1], [0], [0], [1], [0, 0, 1, 1], [], []>} : vector<256x16xbf16>, vector<16x32xbf16>, vector<256x32xf32> -> vector<256x32xf32>
    %c0_6 = arith.constant 0 : index
    %c0_7 = arith.constant 0 : index
    %c1 = arith.constant 1 : index
    %c0_8 = arith.constant 0 : index
    %7 = vector.load %arg1[%c0_6, %c0_7, %c1, %c0_8] : memref<1x18x18x16xf32, #tpu.memory_space<vmem>>, vector<1x16x16x16xf32>
    %8 = vector.shape_cast %7 : vector<1x16x16x16xf32> to vector<16x16x16xf32>
    %9 = vector.shape_cast %8 : vector<16x16x16xf32> to vector<256x16xf32>
    %10 = arith.truncf %9 : vector<256x16xf32> to vector<256x16xbf16>
    %c1_9 = arith.constant 1 : index
    %c0_10 = arith.constant 0 : index
    %c0_11 = arith.constant 0 : index
    %11 = vector.load %arg2[%c1_9, %c0_10, %c0_11] : memref<9x16x32xbf16, #tpu.memory_space<vmem>>, vector<1x16x32xbf16>
    %12 = vector.shape_cast %11 : vector<1x16x32xbf16> to vector<16x32xbf16>
    %cst_12 = arith.constant dense<0.000000e+00> : vector<256x32xf32>
    %13 = tpu.matmul %10, %12, %cst_12 {dimension_numbers = #tpu.dot_dimension_numbers<[1], [0], [0], [1], [0, 0, 1, 1], [], []>} : vector<256x16xbf16>, vector<16x32xbf16>, vector<256x32xf32> -> vector<256x32xf32>
    %14 = arith.addf %6, %13 : vector<256x32xf32>
    %c0_13 = arith.constant 0 : index
    %c0_14 = arith.constant 0 : index
    %c2 = arith.constant 2 : index
    %c0_15 = arith.constant 0 : index
    %15 = vector.load %arg1[%c0_13, %c0_14, %c2, %c0_15] : memref<1x18x18x16xf32, #tpu.memory_space<vmem>>, vector<1x16x16x16xf32>
    %16 = vector.shape_cast %15 : vector<1x16x16x16xf32> to vector<16x16x16xf32>
    %17 = vector.shape_cast %16 : vector<16x16x16xf32> to vector<256x16xf32>
    %18 = arith.truncf %17 : vector<256x16xf32> to vector<256x16xbf16>
    %c2_16 = arith.constant 2 : index
    %c0_17 = arith.constant 0 : index
    %c0_18 = arith.constant 0 : index
    %19 = vector.load %arg2[%c2_16, %c0_17, %c0_18] : memref<9x16x32xbf16, #tpu.memory_space<vmem>>, vector<1x16x32xbf16>
    %20 = vector.shape_cast %19 : vector<1x16x32xbf16> to vector<16x32xbf16>
    %cst_19 = arith.constant dense<0.000000e+00> : vector<256x32xf32>
    %21 = tpu.matmul %18, %20, %cst_19 {dimension_numbers = #tpu.dot_dimension_numbers<[1], [0], [0], [1], [0, 0, 1, 1], [], []>} : vector<256x16xbf16>, vector<16x32xbf16>, vector<256x32xf32> -> vector<256x32xf32>
    %22 = arith.addf %14, %21 : vector<256x32xf32>
    %c0_20 = arith.constant 0 : index
    %c1_21 = arith.constant 1 : index
    %c0_22 = arith.constant 0 : index
    %c0_23 = arith.constant 0 : index
    %23 = vector.load %arg1[%c0_20, %c1_21, %c0_22, %c0_23] : memref<1x18x18x16xf32, #tpu.memory_space<vmem>>, vector<1x16x16x16xf32>
    %24 = vector.shape_cast %23 : vector<1x16x16x16xf32> to vector<16x16x16xf32>
    %25 = vector.shape_cast %24 : vector<16x16x16xf32> to vector<256x16xf32>
    %26 = arith.truncf %25 : vector<256x16xf32> to vector<256x16xbf16>
    %c3 = arith.constant 3 : index
    %c0_24 = arith.constant 0 : index
    %c0_25 = arith.constant 0 : index
    %27 = vector.load %arg2[%c3, %c0_24, %c0_25] : memref<9x16x32xbf16, #tpu.memory_space<vmem>>, vector<1x16x32xbf16>
    %28 = vector.shape_cast %27 : vector<1x16x32xbf16> to vector<16x32xbf16>
    %cst_26 = arith.constant dense<0.000000e+00> : vector<256x32xf32>
    %29 = tpu.matmul %26, %28, %cst_26 {dimension_numbers = #tpu.dot_dimension_numbers<[1], [0], [0], [1], [0, 0, 1, 1], [], []>} : vector<256x16xbf16>, vector<16x32xbf16>, vector<256x32xf32> -> vector<256x32xf32>
    %30 = arith.addf %22, %29 : vector<256x32xf32>
    %c0_27 = arith.constant 0 : index
    %c1_28 = arith.constant 1 : index
    %c1_29 = arith.constant 1 : index
    %c0_30 = arith.constant 0 : index
    %31 = vector.load %arg1[%c0_27, %c1_28, %c1_29, %c0_30] : memref<1x18x18x16xf32, #tpu.memory_space<vmem>>, vector<1x16x16x16xf32>
    %32 = vector.shape_cast %31 : vector<1x16x16x16xf32> to vector<16x16x16xf32>
    %33 = vector.shape_cast %32 : vector<16x16x16xf32> to vector<256x16xf32>
    %34 = arith.truncf %33 : vector<256x16xf32> to vector<256x16xbf16>
    %c4 = arith.constant 4 : index
    %c0_31 = arith.constant 0 : index
    %c0_32 = arith.constant 0 : index
    %35 = vector.load %arg2[%c4, %c0_31, %c0_32] : memref<9x16x32xbf16, #tpu.memory_space<vmem>>, vector<1x16x32xbf16>
    %36 = vector.shape_cast %35 : vector<1x16x32xbf16> to vector<16x32xbf16>
    %cst_33 = arith.constant dense<0.000000e+00> : vector<256x32xf32>
    %37 = tpu.matmul %34, %36, %cst_33 {dimension_numbers = #tpu.dot_dimension_numbers<[1], [0], [0], [1], [0, 0, 1, 1], [], []>} : vector<256x16xbf16>, vector<16x32xbf16>, vector<256x32xf32> -> vector<256x32xf32>
    %38 = arith.addf %30, %37 : vector<256x32xf32>
    %c0_34 = arith.constant 0 : index
    %c1_35 = arith.constant 1 : index
    %c2_36 = arith.constant 2 : index
    %c0_37 = arith.constant 0 : index
    %39 = vector.load %arg1[%c0_34, %c1_35, %c2_36, %c0_37] : memref<1x18x18x16xf32, #tpu.memory_space<vmem>>, vector<1x16x16x16xf32>
    %40 = vector.shape_cast %39 : vector<1x16x16x16xf32> to vector<16x16x16xf32>
    %41 = vector.shape_cast %40 : vector<16x16x16xf32> to vector<256x16xf32>
    %42 = arith.truncf %41 : vector<256x16xf32> to vector<256x16xbf16>
    %c5 = arith.constant 5 : index
    %c0_38 = arith.constant 0 : index
    %c0_39 = arith.constant 0 : index
    %43 = vector.load %arg2[%c5, %c0_38, %c0_39] : memref<9x16x32xbf16, #tpu.memory_space<vmem>>, vector<1x16x32xbf16>
    %44 = vector.shape_cast %43 : vector<1x16x32xbf16> to vector<16x32xbf16>
    %cst_40 = arith.constant dense<0.000000e+00> : vector<256x32xf32>
    %45 = tpu.matmul %42, %44, %cst_40 {dimension_numbers = #tpu.dot_dimension_numbers<[1], [0], [0], [1], [0, 0, 1, 1], [], []>} : vector<256x16xbf16>, vector<16x32xbf16>, vector<256x32xf32> -> vector<256x32xf32>
    %46 = arith.addf %38, %45 : vector<256x32xf32>
    %c0_41 = arith.constant 0 : index
    %c2_42 = arith.constant 2 : index
    %c0_43 = arith.constant 0 : index
    %c0_44 = arith.constant 0 : index
    %47 = vector.load %arg1[%c0_41, %c2_42, %c0_43, %c0_44] : memref<1x18x18x16xf32, #tpu.memory_space<vmem>>, vector<1x16x16x16xf32>
    %48 = vector.shape_cast %47 : vector<1x16x16x16xf32> to vector<16x16x16xf32>
    %49 = vector.shape_cast %48 : vector<16x16x16xf32> to vector<256x16xf32>
    %50 = arith.truncf %49 : vector<256x16xf32> to vector<256x16xbf16>
    %c6 = arith.constant 6 : index
    %c0_45 = arith.constant 0 : index
    %c0_46 = arith.constant 0 : index
    %51 = vector.load %arg2[%c6, %c0_45, %c0_46] : memref<9x16x32xbf16, #tpu.memory_space<vmem>>, vector<1x16x32xbf16>
    %52 = vector.shape_cast %51 : vector<1x16x32xbf16> to vector<16x32xbf16>
    %cst_47 = arith.constant dense<0.000000e+00> : vector<256x32xf32>
    %53 = tpu.matmul %50, %52, %cst_47 {dimension_numbers = #tpu.dot_dimension_numbers<[1], [0], [0], [1], [0, 0, 1, 1], [], []>} : vector<256x16xbf16>, vector<16x32xbf16>, vector<256x32xf32> -> vector<256x32xf32>
    %54 = arith.addf %46, %53 : vector<256x32xf32>
    %c0_48 = arith.constant 0 : index
    %c2_49 = arith.constant 2 : index
    %c1_50 = arith.constant 1 : index
    %c0_51 = arith.constant 0 : index
    %55 = vector.load %arg1[%c0_48, %c2_49, %c1_50, %c0_51] : memref<1x18x18x16xf32, #tpu.memory_space<vmem>>, vector<1x16x16x16xf32>
    %56 = vector.shape_cast %55 : vector<1x16x16x16xf32> to vector<16x16x16xf32>
    %57 = vector.shape_cast %56 : vector<16x16x16xf32> to vector<256x16xf32>
    %58 = arith.truncf %57 : vector<256x16xf32> to vector<256x16xbf16>
    %c7 = arith.constant 7 : index
    %c0_52 = arith.constant 0 : index
    %c0_53 = arith.constant 0 : index
    %59 = vector.load %arg2[%c7, %c0_52, %c0_53] : memref<9x16x32xbf16, #tpu.memory_space<vmem>>, vector<1x16x32xbf16>
    %60 = vector.shape_cast %59 : vector<1x16x32xbf16> to vector<16x32xbf16>
    %cst_54 = arith.constant dense<0.000000e+00> : vector<256x32xf32>
    %61 = tpu.matmul %58, %60, %cst_54 {dimension_numbers = #tpu.dot_dimension_numbers<[1], [0], [0], [1], [0, 0, 1, 1], [], []>} : vector<256x16xbf16>, vector<16x32xbf16>, vector<256x32xf32> -> vector<256x32xf32>
    %62 = arith.addf %54, %61 : vector<256x32xf32>
    %c0_55 = arith.constant 0 : index
    %c2_56 = arith.constant 2 : index
    %c2_57 = arith.constant 2 : index
    %c0_58 = arith.constant 0 : index
    %63 = vector.load %arg1[%c0_55, %c2_56, %c2_57, %c0_58] : memref<1x18x18x16xf32, #tpu.memory_space<vmem>>, vector<1x16x16x16xf32>
    %64 = vector.shape_cast %63 : vector<1x16x16x16xf32> to vector<16x16x16xf32>
    %65 = vector.shape_cast %64 : vector<16x16x16xf32> to vector<256x16xf32>
    %66 = arith.truncf %65 : vector<256x16xf32> to vector<256x16xbf16>
    %c8 = arith.constant 8 : index
    %c0_59 = arith.constant 0 : index
    %c0_60 = arith.constant 0 : index
    %67 = vector.load %arg2[%c8, %c0_59, %c0_60] : memref<9x16x32xbf16, #tpu.memory_space<vmem>>, vector<1x16x32xbf16>
    %68 = vector.shape_cast %67 : vector<1x16x32xbf16> to vector<16x32xbf16>
    %cst_61 = arith.constant dense<0.000000e+00> : vector<256x32xf32>
    %69 = tpu.matmul %66, %68, %cst_61 {dimension_numbers = #tpu.dot_dimension_numbers<[1], [0], [0], [1], [0, 0, 1, 1], [], []>} : vector<256x16xbf16>, vector<16x32xbf16>, vector<256x32xf32> -> vector<256x32xf32>
    %70 = arith.addf %62, %69 : vector<256x32xf32>
    %c0_62 = arith.constant 0 : index
    %c0_63 = arith.constant 0 : index
    %71 = vector.load %arg3[%c0_62, %c0_63] : memref<1x32xf32, #tpu.memory_space<vmem>>, vector<1x32xf32>
    %72 = vector.broadcast %71 : vector<1x32xf32> to vector<256x32xf32>
    %73 = arith.mulf %70, %72 : vector<256x32xf32>
    %c0_64 = arith.constant 0 : index
    %c0_65 = arith.constant 0 : index
    %74 = vector.load %arg4[%c0_64, %c0_65] : memref<1x32xf32, #tpu.memory_space<vmem>>, vector<1x32xf32>
    %75 = vector.broadcast %74 : vector<1x32xf32> to vector<256x32xf32>
    %76 = arith.addf %73, %75 : vector<256x32xf32>
    %cst_66 = arith.constant 0.000000e+00 : f32
    %77 = vector.broadcast %cst_66 : f32 to vector<256x32xf32>
    %78 = arith.maximumf %76, %77 : vector<256x32xf32>
    %79 = vector.shape_cast %78 : vector<256x32xf32> to vector<1x16x16x32xf32>
    %c0_67 = arith.constant 0 : index
    %c0_68 = arith.constant 0 : index
    %c0_69 = arith.constant 0 : index
    %c0_70 = arith.constant 0 : index
    %80 = vector.load %arg5[%c0_67, %c0_68, %c0_69, %c0_70] : memref<1x16x16x32xf32, #tpu.memory_space<vmem>>, vector<1x16x16x32xf32>
    tpu.vector_store %arg5[%c0_67, %c0_68, %c0_69, %c0_70], %79 {strides = array<i32>} : memref<1x16x16x32xf32, #tpu.memory_space<vmem>>, vector<1x16x16x32xf32>,
    return
  }
  func.func @transform_0(%arg0: i32) -> (i32, i32, i32, i32) {
    %c0_i32 = arith.constant 0 : i32
    %c0_i32_0 = arith.constant 0 : i32
    %c0_i32_1 = arith.constant 0 : i32
    %c0_i32_2 = arith.constant 0 : i32
    return %arg0, %c0_i32, %c0_i32_0, %c0_i32_1 : i32, i32, i32, i32
  }
  func.func @transform_1(%arg0: i32) -> (i32, i32, i32) {
    %c0_i32 = arith.constant 0 : i32
    %c0_i32_0 = arith.constant 0 : i32
    %c0_i32_1 = arith.constant 0 : i32
    %c0_i32_2 = arith.constant 0 : i32
    return %c0_i32, %c0_i32_0, %c0_i32_1 : i32, i32, i32
  }
  func.func @transform_2(%arg0: i32) -> (i32, i32) {
    %c0_i32 = arith.constant 0 : i32
    %c0_i32_0 = arith.constant 0 : i32
    %c0_i32_1 = arith.constant 0 : i32
    return %c0_i32, %c0_i32_0 : i32, i32
  }
  func.func @transform_3(%arg0: i32) -> (i32, i32) {
    %c0_i32 = arith.constant 0 : i32
    %c0_i32_0 = arith.constant 0 : i32
    %c0_i32_1 = arith.constant 0 : i32
    return %c0_i32, %c0_i32_0 : i32, i32
  }
  func.func @transform_4(%arg0: i32) -> (i32, i32, i32, i32) {
    %c0_i32 = arith.constant 0 : i32
    %c0_i32_0 = arith.constant 0 : i32
    %c0_i32_1 = arith.constant 0 : i32
    %c0_i32_2 = arith.constant 0 : i32
    return %arg0, %c0_i32, %c0_i32_0, %c0_i32_1 : i32, i32, i32, i32
  }
}

module attributes {stable_mosaic.version = 11 : i64} {
  func.func @kernel(%arg0: i32, %arg1: memref<1x18x18x16xf32, #tpu.memory_space<vmem>>, %arg2: memref<9x16x16xbf16, #tpu.memory_space<vmem>>, %arg3: memref<1x16xf32, #tpu.memory_space<vmem>>, %arg4: memref<1x16xf32, #tpu.memory_space<vmem>>, %arg5: memref<1x16x16x16xf32, #tpu.memory_space<vmem>>, %arg6: memref<1x16x16x16xf32, #tpu.memory_space<vmem>>) attributes {dimension_semantics = [#tpu.dimension_semantics<parallel>], iteration_bounds = array<i64: 2>, scalar_prefetch = 0 : i64, scratch_operands = 0 : i64, tpu.core_type = #tpu.core_type<tc>, window_params = [{transform_indices = @transform_0, window_bounds = array<i64: 1, 18, 18, 16>}, {pipeline_mode = #tpu.pipeline_mode<synchronous>, transform_indices = @transform_1, window_bounds = array<i64: 9, 16, 16>}, {pipeline_mode = #tpu.pipeline_mode<synchronous>, transform_indices = @transform_2, window_bounds = array<i64: 1, 16>}, {pipeline_mode = #tpu.pipeline_mode<synchronous>, transform_indices = @transform_3, window_bounds = array<i64: 1, 16>}, {transform_indices = @transform_4, window_bounds = array<i64: 1, 16, 16, 16>}, {transform_indices = @transform_5, window_bounds = array<i64: 1, 16, 16, 16>}]} {
    %c0 = arith.constant 0 : index
    %c0_0 = arith.constant 0 : index
    %c0_1 = arith.constant 0 : index
    %c0_2 = arith.constant 0 : index
    %0 = vector.load %arg1[%c0, %c0_0, %c0_1, %c0_2] : memref<1x18x18x16xf32, #tpu.memory_space<vmem>>, vector<1x16x16x16xf32>
    %1 = vector.shape_cast %0 : vector<1x16x16x16xf32> to vector<16x16x16xf32>
    %2 = vector.shape_cast %1 : vector<16x16x16xf32> to vector<256x16xf32>
    %3 = arith.truncf %2 : vector<256x16xf32> to vector<256x16xbf16>
    %c0_3 = arith.constant 0 : index
    %c0_4 = arith.constant 0 : index
    %c0_5 = arith.constant 0 : index
    %4 = vector.load %arg2[%c0_3, %c0_4, %c0_5] : memref<9x16x16xbf16, #tpu.memory_space<vmem>>, vector<1x16x16xbf16>
    %5 = vector.shape_cast %4 : vector<1x16x16xbf16> to vector<16x16xbf16>
    %cst = arith.constant dense<0.000000e+00> : vector<256x16xf32>
    %6 = tpu.matmul %3, %5, %cst {dimension_numbers = #tpu.dot_dimension_numbers<[1], [0], [0], [1], [0, 0, 1, 1], [], []>} : vector<256x16xbf16>, vector<16x16xbf16>, vector<256x16xf32> -> vector<256x16xf32>
    %c0_6 = arith.constant 0 : index
    %c0_7 = arith.constant 0 : index
    %c1 = arith.constant 1 : index
    %c0_8 = arith.constant 0 : index
    %7 = vector.load %arg1[%c0_6, %c0_7, %c1, %c0_8] : memref<1x18x18x16xf32, #tpu.memory_space<vmem>>, vector<1x16x16x16xf32>
    %8 = vector.shape_cast %7 : vector<1x16x16x16xf32> to vector<16x16x16xf32>
    %9 = vector.shape_cast %8 : vector<16x16x16xf32> to vector<256x16xf32>
    %10 = arith.truncf %9 : vector<256x16xf32> to vector<256x16xbf16>
    %c1_9 = arith.constant 1 : index
    %c0_10 = arith.constant 0 : index
    %c0_11 = arith.constant 0 : index
    %11 = vector.load %arg2[%c1_9, %c0_10, %c0_11] : memref<9x16x16xbf16, #tpu.memory_space<vmem>>, vector<1x16x16xbf16>
    %12 = vector.shape_cast %11 : vector<1x16x16xbf16> to vector<16x16xbf16>
    %cst_12 = arith.constant dense<0.000000e+00> : vector<256x16xf32>
    %13 = tpu.matmul %10, %12, %cst_12 {dimension_numbers = #tpu.dot_dimension_numbers<[1], [0], [0], [1], [0, 0, 1, 1], [], []>} : vector<256x16xbf16>, vector<16x16xbf16>, vector<256x16xf32> -> vector<256x16xf32>
    %14 = arith.addf %6, %13 : vector<256x16xf32>
    %c0_13 = arith.constant 0 : index
    %c0_14 = arith.constant 0 : index
    %c2 = arith.constant 2 : index
    %c0_15 = arith.constant 0 : index
    %15 = vector.load %arg1[%c0_13, %c0_14, %c2, %c0_15] : memref<1x18x18x16xf32, #tpu.memory_space<vmem>>, vector<1x16x16x16xf32>
    %16 = vector.shape_cast %15 : vector<1x16x16x16xf32> to vector<16x16x16xf32>
    %17 = vector.shape_cast %16 : vector<16x16x16xf32> to vector<256x16xf32>
    %18 = arith.truncf %17 : vector<256x16xf32> to vector<256x16xbf16>
    %c2_16 = arith.constant 2 : index
    %c0_17 = arith.constant 0 : index
    %c0_18 = arith.constant 0 : index
    %19 = vector.load %arg2[%c2_16, %c0_17, %c0_18] : memref<9x16x16xbf16, #tpu.memory_space<vmem>>, vector<1x16x16xbf16>
    %20 = vector.shape_cast %19 : vector<1x16x16xbf16> to vector<16x16xbf16>
    %cst_19 = arith.constant dense<0.000000e+00> : vector<256x16xf32>
    %21 = tpu.matmul %18, %20, %cst_19 {dimension_numbers = #tpu.dot_dimension_numbers<[1], [0], [0], [1], [0, 0, 1, 1], [], []>} : vector<256x16xbf16>, vector<16x16xbf16>, vector<256x16xf32> -> vector<256x16xf32>
    %22 = arith.addf %14, %21 : vector<256x16xf32>
    %c0_20 = arith.constant 0 : index
    %c1_21 = arith.constant 1 : index
    %c0_22 = arith.constant 0 : index
    %c0_23 = arith.constant 0 : index
    %23 = vector.load %arg1[%c0_20, %c1_21, %c0_22, %c0_23] : memref<1x18x18x16xf32, #tpu.memory_space<vmem>>, vector<1x16x16x16xf32>
    %24 = vector.shape_cast %23 : vector<1x16x16x16xf32> to vector<16x16x16xf32>
    %25 = vector.shape_cast %24 : vector<16x16x16xf32> to vector<256x16xf32>
    %26 = arith.truncf %25 : vector<256x16xf32> to vector<256x16xbf16>
    %c3 = arith.constant 3 : index
    %c0_24 = arith.constant 0 : index
    %c0_25 = arith.constant 0 : index
    %27 = vector.load %arg2[%c3, %c0_24, %c0_25] : memref<9x16x16xbf16, #tpu.memory_space<vmem>>, vector<1x16x16xbf16>
    %28 = vector.shape_cast %27 : vector<1x16x16xbf16> to vector<16x16xbf16>
    %cst_26 = arith.constant dense<0.000000e+00> : vector<256x16xf32>
    %29 = tpu.matmul %26, %28, %cst_26 {dimension_numbers = #tpu.dot_dimension_numbers<[1], [0], [0], [1], [0, 0, 1, 1], [], []>} : vector<256x16xbf16>, vector<16x16xbf16>, vector<256x16xf32> -> vector<256x16xf32>
    %30 = arith.addf %22, %29 : vector<256x16xf32>
    %c0_27 = arith.constant 0 : index
    %c1_28 = arith.constant 1 : index
    %c1_29 = arith.constant 1 : index
    %c0_30 = arith.constant 0 : index
    %31 = vector.load %arg1[%c0_27, %c1_28, %c1_29, %c0_30] : memref<1x18x18x16xf32, #tpu.memory_space<vmem>>, vector<1x16x16x16xf32>
    %32 = vector.shape_cast %31 : vector<1x16x16x16xf32> to vector<16x16x16xf32>
    %33 = vector.shape_cast %32 : vector<16x16x16xf32> to vector<256x16xf32>
    %34 = arith.truncf %33 : vector<256x16xf32> to vector<256x16xbf16>
    %c4 = arith.constant 4 : index
    %c0_31 = arith.constant 0 : index
    %c0_32 = arith.constant 0 : index
    %35 = vector.load %arg2[%c4, %c0_31, %c0_32] : memref<9x16x16xbf16, #tpu.memory_space<vmem>>, vector<1x16x16xbf16>
    %36 = vector.shape_cast %35 : vector<1x16x16xbf16> to vector<16x16xbf16>
    %cst_33 = arith.constant dense<0.000000e+00> : vector<256x16xf32>
    %37 = tpu.matmul %34, %36, %cst_33 {dimension_numbers = #tpu.dot_dimension_numbers<[1], [0], [0], [1], [0, 0, 1, 1], [], []>} : vector<256x16xbf16>, vector<16x16xbf16>, vector<256x16xf32> -> vector<256x16xf32>
    %38 = arith.addf %30, %37 : vector<256x16xf32>
    %c0_34 = arith.constant 0 : index
    %c1_35 = arith.constant 1 : index
    %c2_36 = arith.constant 2 : index
    %c0_37 = arith.constant 0 : index
    %39 = vector.load %arg1[%c0_34, %c1_35, %c2_36, %c0_37] : memref<1x18x18x16xf32, #tpu.memory_space<vmem>>, vector<1x16x16x16xf32>
    %40 = vector.shape_cast %39 : vector<1x16x16x16xf32> to vector<16x16x16xf32>
    %41 = vector.shape_cast %40 : vector<16x16x16xf32> to vector<256x16xf32>
    %42 = arith.truncf %41 : vector<256x16xf32> to vector<256x16xbf16>
    %c5 = arith.constant 5 : index
    %c0_38 = arith.constant 0 : index
    %c0_39 = arith.constant 0 : index
    %43 = vector.load %arg2[%c5, %c0_38, %c0_39] : memref<9x16x16xbf16, #tpu.memory_space<vmem>>, vector<1x16x16xbf16>
    %44 = vector.shape_cast %43 : vector<1x16x16xbf16> to vector<16x16xbf16>
    %cst_40 = arith.constant dense<0.000000e+00> : vector<256x16xf32>
    %45 = tpu.matmul %42, %44, %cst_40 {dimension_numbers = #tpu.dot_dimension_numbers<[1], [0], [0], [1], [0, 0, 1, 1], [], []>} : vector<256x16xbf16>, vector<16x16xbf16>, vector<256x16xf32> -> vector<256x16xf32>
    %46 = arith.addf %38, %45 : vector<256x16xf32>
    %c0_41 = arith.constant 0 : index
    %c2_42 = arith.constant 2 : index
    %c0_43 = arith.constant 0 : index
    %c0_44 = arith.constant 0 : index
    %47 = vector.load %arg1[%c0_41, %c2_42, %c0_43, %c0_44] : memref<1x18x18x16xf32, #tpu.memory_space<vmem>>, vector<1x16x16x16xf32>
    %48 = vector.shape_cast %47 : vector<1x16x16x16xf32> to vector<16x16x16xf32>
    %49 = vector.shape_cast %48 : vector<16x16x16xf32> to vector<256x16xf32>
    %50 = arith.truncf %49 : vector<256x16xf32> to vector<256x16xbf16>
    %c6 = arith.constant 6 : index
    %c0_45 = arith.constant 0 : index
    %c0_46 = arith.constant 0 : index
    %51 = vector.load %arg2[%c6, %c0_45, %c0_46] : memref<9x16x16xbf16, #tpu.memory_space<vmem>>, vector<1x16x16xbf16>
    %52 = vector.shape_cast %51 : vector<1x16x16xbf16> to vector<16x16xbf16>
    %cst_47 = arith.constant dense<0.000000e+00> : vector<256x16xf32>
    %53 = tpu.matmul %50, %52, %cst_47 {dimension_numbers = #tpu.dot_dimension_numbers<[1], [0], [0], [1], [0, 0, 1, 1], [], []>} : vector<256x16xbf16>, vector<16x16xbf16>, vector<256x16xf32> -> vector<256x16xf32>
    %54 = arith.addf %46, %53 : vector<256x16xf32>
    %c0_48 = arith.constant 0 : index
    %c2_49 = arith.constant 2 : index
    %c1_50 = arith.constant 1 : index
    %c0_51 = arith.constant 0 : index
    %55 = vector.load %arg1[%c0_48, %c2_49, %c1_50, %c0_51] : memref<1x18x18x16xf32, #tpu.memory_space<vmem>>, vector<1x16x16x16xf32>
    %56 = vector.shape_cast %55 : vector<1x16x16x16xf32> to vector<16x16x16xf32>
    %57 = vector.shape_cast %56 : vector<16x16x16xf32> to vector<256x16xf32>
    %58 = arith.truncf %57 : vector<256x16xf32> to vector<256x16xbf16>
    %c7 = arith.constant 7 : index
    %c0_52 = arith.constant 0 : index
    %c0_53 = arith.constant 0 : index
    %59 = vector.load %arg2[%c7, %c0_52, %c0_53] : memref<9x16x16xbf16, #tpu.memory_space<vmem>>, vector<1x16x16xbf16>
    %60 = vector.shape_cast %59 : vector<1x16x16xbf16> to vector<16x16xbf16>
    %cst_54 = arith.constant dense<0.000000e+00> : vector<256x16xf32>
    %61 = tpu.matmul %58, %60, %cst_54 {dimension_numbers = #tpu.dot_dimension_numbers<[1], [0], [0], [1], [0, 0, 1, 1], [], []>} : vector<256x16xbf16>, vector<16x16xbf16>, vector<256x16xf32> -> vector<256x16xf32>
    %62 = arith.addf %54, %61 : vector<256x16xf32>
    %c0_55 = arith.constant 0 : index
    %c2_56 = arith.constant 2 : index
    %c2_57 = arith.constant 2 : index
    %c0_58 = arith.constant 0 : index
    %63 = vector.load %arg1[%c0_55, %c2_56, %c2_57, %c0_58] : memref<1x18x18x16xf32, #tpu.memory_space<vmem>>, vector<1x16x16x16xf32>
    %64 = vector.shape_cast %63 : vector<1x16x16x16xf32> to vector<16x16x16xf32>
    %65 = vector.shape_cast %64 : vector<16x16x16xf32> to vector<256x16xf32>
    %66 = arith.truncf %65 : vector<256x16xf32> to vector<256x16xbf16>
    %c8 = arith.constant 8 : index
    %c0_59 = arith.constant 0 : index
    %c0_60 = arith.constant 0 : index
    %67 = vector.load %arg2[%c8, %c0_59, %c0_60] : memref<9x16x16xbf16, #tpu.memory_space<vmem>>, vector<1x16x16xbf16>
    %68 = vector.shape_cast %67 : vector<1x16x16xbf16> to vector<16x16xbf16>
    %cst_61 = arith.constant dense<0.000000e+00> : vector<256x16xf32>
    %69 = tpu.matmul %66, %68, %cst_61 {dimension_numbers = #tpu.dot_dimension_numbers<[1], [0], [0], [1], [0, 0, 1, 1], [], []>} : vector<256x16xbf16>, vector<16x16xbf16>, vector<256x16xf32> -> vector<256x16xf32>
    %70 = arith.addf %62, %69 : vector<256x16xf32>
    %c0_62 = arith.constant 0 : index
    %c0_63 = arith.constant 0 : index
    %71 = vector.load %arg3[%c0_62, %c0_63] : memref<1x16xf32, #tpu.memory_space<vmem>>, vector<1x16xf32>
    %72 = vector.broadcast %71 : vector<1x16xf32> to vector<256x16xf32>
    %73 = arith.mulf %70, %72 : vector<256x16xf32>
    %c0_64 = arith.constant 0 : index
    %c0_65 = arith.constant 0 : index
    %74 = vector.load %arg4[%c0_64, %c0_65] : memref<1x16xf32, #tpu.memory_space<vmem>>, vector<1x16xf32>
    %75 = vector.broadcast %74 : vector<1x16xf32> to vector<256x16xf32>
    %76 = arith.addf %73, %75 : vector<256x16xf32>
    %c0_66 = arith.constant 0 : index
    %c0_67 = arith.constant 0 : index
    %c0_68 = arith.constant 0 : index
    %c0_69 = arith.constant 0 : index
    %77 = vector.load %arg5[%c0_66, %c0_67, %c0_68, %c0_69] : memref<1x16x16x16xf32, #tpu.memory_space<vmem>>, vector<1x16x16x16xf32>
    %78 = vector.shape_cast %77 : vector<1x16x16x16xf32> to vector<16x16x16xf32>
    %79 = vector.shape_cast %78 : vector<16x16x16xf32> to vector<256x16xf32>
    %80 = arith.addf %76, %79 : vector<256x16xf32>
    %cst_70 = arith.constant 0.000000e+00 : f32
    %81 = vector.broadcast %cst_70 : f32 to vector<256x16xf32>
    %82 = arith.maximumf %80, %81 : vector<256x16xf32>
    %83 = vector.shape_cast %82 : vector<256x16xf32> to vector<1x16x16x16xf32>
    %c0_71 = arith.constant 0 : index
    %c0_72 = arith.constant 0 : index
    %c0_73 = arith.constant 0 : index
    %c0_74 = arith.constant 0 : index
    %84 = vector.load %arg6[%c0_71, %c0_72, %c0_73, %c0_74] : memref<1x16x16x16xf32, #tpu.memory_space<vmem>>, vector<1x16x16x16xf32>
    tpu.vector_store %arg6[%c0_71, %c0_72, %c0_73, %c0_74], %83 {strides = array<i32>} : memref<1x16x16x16xf32, #tpu.memory_space<vmem>>, vector<1x16x16x16xf32>,
    return
  }
  func.func @transform_0(%arg0: i32) -> (i32, i32, i32, i32) {
    %c0_i32 = arith.constant 0 : i32
    %c0_i32_0 = arith.constant 0 : i32
    %c0_i32_1 = arith.constant 0 : i32
    %c0_i32_2 = arith.constant 0 : i32
    return %arg0, %c0_i32, %c0_i32_0, %c0_i32_1 : i32, i32, i32, i32
  }
  func.func @transform_1(%arg0: i32) -> (i32, i32, i32) {
    %c0_i32 = arith.constant 0 : i32
    %c0_i32_0 = arith.constant 0 : i32
    %c0_i32_1 = arith.constant 0 : i32
    %c0_i32_2 = arith.constant 0 : i32
    return %c0_i32, %c0_i32_0, %c0_i32_1 : i32, i32, i32
  }
  func.func @transform_2(%arg0: i32) -> (i32, i32) {
    %c0_i32 = arith.constant 0 : i32
    %c0_i32_0 = arith.constant 0 : i32
    %c0_i32_1 = arith.constant 0 : i32
    return %c0_i32, %c0_i32_0 : i32, i32
  }
  func.func @transform_3(%arg0: i32) -> (i32, i32) {
    %c0_i32 = arith.constant 0 : i32
    %c0_i32_0 = arith.constant 0 : i32
    %c0_i32_1 = arith.constant 0 : i32
    return %c0_i32, %c0_i32_0 : i32, i32
  }
  func.func @transform_4(%arg0: i32) -> (i32, i32, i32, i32) {
    %c0_i32 = arith.constant 0 : i32
    %c0_i32_0 = arith.constant 0 : i32
    %c0_i32_1 = arith.constant 0 : i32
    %c0_i32_2 = arith.constant 0 : i32
    return %arg0, %c0_i32, %c0_i32_0, %c0_i32_1 : i32, i32, i32, i32
  }
  func.func @transform_5(%arg0: i32) -> (i32, i32, i32, i32) {
    %c0_i32 = arith.constant 0 : i32
    %c0_i32_0 = arith.constant 0 : i32
    %c0_i32_1 = arith.constant 0 : i32
    %c0_i32_2 = arith.constant 0 : i32
    return %arg0, %c0_i32, %c0_i32_0, %c0_i32_1 : i32, i32, i32, i32
  }
}

module attributes {stable_mosaic.version = 11 : i64} {
  func.func @_matmul_affine_kernel(%arg0: i32, %arg1: memref<128x16xf32, #tpu.memory_space<vmem>>, %arg2: memref<16x32xbf16, #tpu.memory_space<vmem>>, %arg3: memref<1x32xf32, #tpu.memory_space<vmem>>, %arg4: memref<1x32xf32, #tpu.memory_space<vmem>>, %arg5: memref<128x32xf32, #tpu.memory_space<vmem>>) attributes {dimension_semantics = [#tpu.dimension_semantics<arbitrary>], iteration_bounds = array<i64: 1>, scalar_prefetch = 0 : i64, scratch_operands = 0 : i64, tpu.core_type = #tpu.core_type<tc>, window_params = [{pipeline_mode = #tpu.pipeline_mode<synchronous>, transform_indices = @transform_0, window_bounds = array<i64: 128, 16>}, {pipeline_mode = #tpu.pipeline_mode<synchronous>, transform_indices = @transform_1, window_bounds = array<i64: 16, 32>}, {pipeline_mode = #tpu.pipeline_mode<synchronous>, transform_indices = @transform_2, window_bounds = array<i64: 1, 32>}, {pipeline_mode = #tpu.pipeline_mode<synchronous>, transform_indices = @transform_3, window_bounds = array<i64: 1, 32>}, {pipeline_mode = #tpu.pipeline_mode<synchronous>, transform_indices = @transform_4, window_bounds = array<i64: 128, 32>}]} {
    %c0 = arith.constant 0 : index
    %c0_0 = arith.constant 0 : index
    %0 = vector.load %arg1[%c0, %c0_0] : memref<128x16xf32, #tpu.memory_space<vmem>>, vector<128x16xf32>
    %1 = arith.truncf %0 : vector<128x16xf32> to vector<128x16xbf16>
    %c0_1 = arith.constant 0 : index
    %c0_2 = arith.constant 0 : index
    %2 = vector.load %arg2[%c0_1, %c0_2] : memref<16x32xbf16, #tpu.memory_space<vmem>>, vector<16x32xbf16>
    %cst = arith.constant dense<0.000000e+00> : vector<128x32xf32>
    %3 = tpu.matmul %1, %2, %cst {dimension_numbers = #tpu.dot_dimension_numbers<[1], [0], [0], [1], [0, 0, 1, 1], [], []>} : vector<128x16xbf16>, vector<16x32xbf16>, vector<128x32xf32> -> vector<128x32xf32>
    %c0_3 = arith.constant 0 : index
    %c0_4 = arith.constant 0 : index
    %4 = vector.load %arg3[%c0_3, %c0_4] : memref<1x32xf32, #tpu.memory_space<vmem>>, vector<1x32xf32>
    %5 = vector.broadcast %4 : vector<1x32xf32> to vector<128x32xf32>
    %6 = arith.mulf %3, %5 : vector<128x32xf32>
    %c0_5 = arith.constant 0 : index
    %c0_6 = arith.constant 0 : index
    %7 = vector.load %arg4[%c0_5, %c0_6] : memref<1x32xf32, #tpu.memory_space<vmem>>, vector<1x32xf32>
    %8 = vector.broadcast %7 : vector<1x32xf32> to vector<128x32xf32>
    %9 = arith.addf %6, %8 : vector<128x32xf32>
    %c0_7 = arith.constant 0 : index
    %c0_8 = arith.constant 0 : index
    %10 = vector.load %arg5[%c0_7, %c0_8] : memref<128x32xf32, #tpu.memory_space<vmem>>, vector<128x32xf32>
    tpu.vector_store %arg5[%c0_7, %c0_8], %9 {strides = array<i32>} : memref<128x32xf32, #tpu.memory_space<vmem>>, vector<128x32xf32>,
    return
  }
  func.func @transform_0(%arg0: i32) -> (i32, i32) {
    %c0_i32 = arith.constant 0 : i32
    %c0_i32_0 = arith.constant 0 : i32
    %c0_i32_1 = arith.constant 0 : i32
    return %c0_i32, %c0_i32_0 : i32, i32
  }
  func.func @transform_1(%arg0: i32) -> (i32, i32) {
    %c0_i32 = arith.constant 0 : i32
    %c0_i32_0 = arith.constant 0 : i32
    %c0_i32_1 = arith.constant 0 : i32
    return %c0_i32, %c0_i32_0 : i32, i32
  }
  func.func @transform_2(%arg0: i32) -> (i32, i32) {
    %c0_i32 = arith.constant 0 : i32
    %c0_i32_0 = arith.constant 0 : i32
    %c0_i32_1 = arith.constant 0 : i32
    return %c0_i32, %c0_i32_0 : i32, i32
  }
  func.func @transform_3(%arg0: i32) -> (i32, i32) {
    %c0_i32 = arith.constant 0 : i32
    %c0_i32_0 = arith.constant 0 : i32
    %c0_i32_1 = arith.constant 0 : i32
    return %c0_i32, %c0_i32_0 : i32, i32
  }
  func.func @transform_4(%arg0: i32) -> (i32, i32) {
    %c0_i32 = arith.constant 0 : i32
    %c0_i32_0 = arith.constant 0 : i32
    %c0_i32_1 = arith.constant 0 : i32
    return %c0_i32, %c0_i32_0 : i32, i32
  }
}

module attributes {stable_mosaic.version = 11 : i64} {
  func.func @kernel(%arg0: i32, %arg1: memref<1x10x10x32xf32, #tpu.memory_space<vmem>>, %arg2: memref<9x32x32xbf16, #tpu.memory_space<vmem>>, %arg3: memref<1x32xf32, #tpu.memory_space<vmem>>, %arg4: memref<1x32xf32, #tpu.memory_space<vmem>>, %arg5: memref<1x8x8x32xf32, #tpu.memory_space<vmem>>, %arg6: memref<1x8x8x32xf32, #tpu.memory_space<vmem>>) attributes {dimension_semantics = [#tpu.dimension_semantics<parallel>], iteration_bounds = array<i64: 2>, scalar_prefetch = 0 : i64, scratch_operands = 0 : i64, tpu.core_type = #tpu.core_type<tc>, window_params = [{transform_indices = @transform_0, window_bounds = array<i64: 1, 10, 10, 32>}, {pipeline_mode = #tpu.pipeline_mode<synchronous>, transform_indices = @transform_1, window_bounds = array<i64: 9, 32, 32>}, {pipeline_mode = #tpu.pipeline_mode<synchronous>, transform_indices = @transform_2, window_bounds = array<i64: 1, 32>}, {pipeline_mode = #tpu.pipeline_mode<synchronous>, transform_indices = @transform_3, window_bounds = array<i64: 1, 32>}, {transform_indices = @transform_4, window_bounds = array<i64: 1, 8, 8, 32>}, {transform_indices = @transform_5, window_bounds = array<i64: 1, 8, 8, 32>}]} {
    %c0 = arith.constant 0 : index
    %c0_0 = arith.constant 0 : index
    %c0_1 = arith.constant 0 : index
    %c0_2 = arith.constant 0 : index
    %0 = vector.load %arg1[%c0, %c0_0, %c0_1, %c0_2] : memref<1x10x10x32xf32, #tpu.memory_space<vmem>>, vector<1x8x8x32xf32>
    %1 = vector.shape_cast %0 : vector<1x8x8x32xf32> to vector<8x8x32xf32>
    %2 = vector.shape_cast %1 : vector<8x8x32xf32> to vector<64x32xf32>
    %3 = arith.truncf %2 : vector<64x32xf32> to vector<64x32xbf16>
    %c0_3 = arith.constant 0 : index
    %c0_4 = arith.constant 0 : index
    %c0_5 = arith.constant 0 : index
    %4 = vector.load %arg2[%c0_3, %c0_4, %c0_5] : memref<9x32x32xbf16, #tpu.memory_space<vmem>>, vector<1x32x32xbf16>
    %5 = vector.shape_cast %4 : vector<1x32x32xbf16> to vector<32x32xbf16>
    %cst = arith.constant dense<0.000000e+00> : vector<64x32xf32>
    %6 = tpu.matmul %3, %5, %cst {dimension_numbers = #tpu.dot_dimension_numbers<[1], [0], [0], [1], [0, 0, 1, 1], [], []>} : vector<64x32xbf16>, vector<32x32xbf16>, vector<64x32xf32> -> vector<64x32xf32>
    %c0_6 = arith.constant 0 : index
    %c0_7 = arith.constant 0 : index
    %c1 = arith.constant 1 : index
    %c0_8 = arith.constant 0 : index
    %7 = vector.load %arg1[%c0_6, %c0_7, %c1, %c0_8] : memref<1x10x10x32xf32, #tpu.memory_space<vmem>>, vector<1x8x8x32xf32>
    %8 = vector.shape_cast %7 : vector<1x8x8x32xf32> to vector<8x8x32xf32>
    %9 = vector.shape_cast %8 : vector<8x8x32xf32> to vector<64x32xf32>
    %10 = arith.truncf %9 : vector<64x32xf32> to vector<64x32xbf16>
    %c1_9 = arith.constant 1 : index
    %c0_10 = arith.constant 0 : index
    %c0_11 = arith.constant 0 : index
    %11 = vector.load %arg2[%c1_9, %c0_10, %c0_11] : memref<9x32x32xbf16, #tpu.memory_space<vmem>>, vector<1x32x32xbf16>
    %12 = vector.shape_cast %11 : vector<1x32x32xbf16> to vector<32x32xbf16>
    %cst_12 = arith.constant dense<0.000000e+00> : vector<64x32xf32>
    %13 = tpu.matmul %10, %12, %cst_12 {dimension_numbers = #tpu.dot_dimension_numbers<[1], [0], [0], [1], [0, 0, 1, 1], [], []>} : vector<64x32xbf16>, vector<32x32xbf16>, vector<64x32xf32> -> vector<64x32xf32>
    %14 = arith.addf %6, %13 : vector<64x32xf32>
    %c0_13 = arith.constant 0 : index
    %c0_14 = arith.constant 0 : index
    %c2 = arith.constant 2 : index
    %c0_15 = arith.constant 0 : index
    %15 = vector.load %arg1[%c0_13, %c0_14, %c2, %c0_15] : memref<1x10x10x32xf32, #tpu.memory_space<vmem>>, vector<1x8x8x32xf32>
    %16 = vector.shape_cast %15 : vector<1x8x8x32xf32> to vector<8x8x32xf32>
    %17 = vector.shape_cast %16 : vector<8x8x32xf32> to vector<64x32xf32>
    %18 = arith.truncf %17 : vector<64x32xf32> to vector<64x32xbf16>
    %c2_16 = arith.constant 2 : index
    %c0_17 = arith.constant 0 : index
    %c0_18 = arith.constant 0 : index
    %19 = vector.load %arg2[%c2_16, %c0_17, %c0_18] : memref<9x32x32xbf16, #tpu.memory_space<vmem>>, vector<1x32x32xbf16>
    %20 = vector.shape_cast %19 : vector<1x32x32xbf16> to vector<32x32xbf16>
    %cst_19 = arith.constant dense<0.000000e+00> : vector<64x32xf32>
    %21 = tpu.matmul %18, %20, %cst_19 {dimension_numbers = #tpu.dot_dimension_numbers<[1], [0], [0], [1], [0, 0, 1, 1], [], []>} : vector<64x32xbf16>, vector<32x32xbf16>, vector<64x32xf32> -> vector<64x32xf32>
    %22 = arith.addf %14, %21 : vector<64x32xf32>
    %c0_20 = arith.constant 0 : index
    %c1_21 = arith.constant 1 : index
    %c0_22 = arith.constant 0 : index
    %c0_23 = arith.constant 0 : index
    %23 = vector.load %arg1[%c0_20, %c1_21, %c0_22, %c0_23] : memref<1x10x10x32xf32, #tpu.memory_space<vmem>>, vector<1x8x8x32xf32>
    %24 = vector.shape_cast %23 : vector<1x8x8x32xf32> to vector<8x8x32xf32>
    %25 = vector.shape_cast %24 : vector<8x8x32xf32> to vector<64x32xf32>
    %26 = arith.truncf %25 : vector<64x32xf32> to vector<64x32xbf16>
    %c3 = arith.constant 3 : index
    %c0_24 = arith.constant 0 : index
    %c0_25 = arith.constant 0 : index
    %27 = vector.load %arg2[%c3, %c0_24, %c0_25] : memref<9x32x32xbf16, #tpu.memory_space<vmem>>, vector<1x32x32xbf16>
    %28 = vector.shape_cast %27 : vector<1x32x32xbf16> to vector<32x32xbf16>
    %cst_26 = arith.constant dense<0.000000e+00> : vector<64x32xf32>
    %29 = tpu.matmul %26, %28, %cst_26 {dimension_numbers = #tpu.dot_dimension_numbers<[1], [0], [0], [1], [0, 0, 1, 1], [], []>} : vector<64x32xbf16>, vector<32x32xbf16>, vector<64x32xf32> -> vector<64x32xf32>
    %30 = arith.addf %22, %29 : vector<64x32xf32>
    %c0_27 = arith.constant 0 : index
    %c1_28 = arith.constant 1 : index
    %c1_29 = arith.constant 1 : index
    %c0_30 = arith.constant 0 : index
    %31 = vector.load %arg1[%c0_27, %c1_28, %c1_29, %c0_30] : memref<1x10x10x32xf32, #tpu.memory_space<vmem>>, vector<1x8x8x32xf32>
    %32 = vector.shape_cast %31 : vector<1x8x8x32xf32> to vector<8x8x32xf32>
    %33 = vector.shape_cast %32 : vector<8x8x32xf32> to vector<64x32xf32>
    %34 = arith.truncf %33 : vector<64x32xf32> to vector<64x32xbf16>
    %c4 = arith.constant 4 : index
    %c0_31 = arith.constant 0 : index
    %c0_32 = arith.constant 0 : index
    %35 = vector.load %arg2[%c4, %c0_31, %c0_32] : memref<9x32x32xbf16, #tpu.memory_space<vmem>>, vector<1x32x32xbf16>
    %36 = vector.shape_cast %35 : vector<1x32x32xbf16> to vector<32x32xbf16>
    %cst_33 = arith.constant dense<0.000000e+00> : vector<64x32xf32>
    %37 = tpu.matmul %34, %36, %cst_33 {dimension_numbers = #tpu.dot_dimension_numbers<[1], [0], [0], [1], [0, 0, 1, 1], [], []>} : vector<64x32xbf16>, vector<32x32xbf16>, vector<64x32xf32> -> vector<64x32xf32>
    %38 = arith.addf %30, %37 : vector<64x32xf32>
    %c0_34 = arith.constant 0 : index
    %c1_35 = arith.constant 1 : index
    %c2_36 = arith.constant 2 : index
    %c0_37 = arith.constant 0 : index
    %39 = vector.load %arg1[%c0_34, %c1_35, %c2_36, %c0_37] : memref<1x10x10x32xf32, #tpu.memory_space<vmem>>, vector<1x8x8x32xf32>
    %40 = vector.shape_cast %39 : vector<1x8x8x32xf32> to vector<8x8x32xf32>
    %41 = vector.shape_cast %40 : vector<8x8x32xf32> to vector<64x32xf32>
    %42 = arith.truncf %41 : vector<64x32xf32> to vector<64x32xbf16>
    %c5 = arith.constant 5 : index
    %c0_38 = arith.constant 0 : index
    %c0_39 = arith.constant 0 : index
    %43 = vector.load %arg2[%c5, %c0_38, %c0_39] : memref<9x32x32xbf16, #tpu.memory_space<vmem>>, vector<1x32x32xbf16>
    %44 = vector.shape_cast %43 : vector<1x32x32xbf16> to vector<32x32xbf16>
    %cst_40 = arith.constant dense<0.000000e+00> : vector<64x32xf32>
    %45 = tpu.matmul %42, %44, %cst_40 {dimension_numbers = #tpu.dot_dimension_numbers<[1], [0], [0], [1], [0, 0, 1, 1], [], []>} : vector<64x32xbf16>, vector<32x32xbf16>, vector<64x32xf32> -> vector<64x32xf32>
    %46 = arith.addf %38, %45 : vector<64x32xf32>
    %c0_41 = arith.constant 0 : index
    %c2_42 = arith.constant 2 : index
    %c0_43 = arith.constant 0 : index
    %c0_44 = arith.constant 0 : index
    %47 = vector.load %arg1[%c0_41, %c2_42, %c0_43, %c0_44] : memref<1x10x10x32xf32, #tpu.memory_space<vmem>>, vector<1x8x8x32xf32>
    %48 = vector.shape_cast %47 : vector<1x8x8x32xf32> to vector<8x8x32xf32>
    %49 = vector.shape_cast %48 : vector<8x8x32xf32> to vector<64x32xf32>
    %50 = arith.truncf %49 : vector<64x32xf32> to vector<64x32xbf16>
    %c6 = arith.constant 6 : index
    %c0_45 = arith.constant 0 : index
    %c0_46 = arith.constant 0 : index
    %51 = vector.load %arg2[%c6, %c0_45, %c0_46] : memref<9x32x32xbf16, #tpu.memory_space<vmem>>, vector<1x32x32xbf16>
    %52 = vector.shape_cast %51 : vector<1x32x32xbf16> to vector<32x32xbf16>
    %cst_47 = arith.constant dense<0.000000e+00> : vector<64x32xf32>
    %53 = tpu.matmul %50, %52, %cst_47 {dimension_numbers = #tpu.dot_dimension_numbers<[1], [0], [0], [1], [0, 0, 1, 1], [], []>} : vector<64x32xbf16>, vector<32x32xbf16>, vector<64x32xf32> -> vector<64x32xf32>
    %54 = arith.addf %46, %53 : vector<64x32xf32>
    %c0_48 = arith.constant 0 : index
    %c2_49 = arith.constant 2 : index
    %c1_50 = arith.constant 1 : index
    %c0_51 = arith.constant 0 : index
    %55 = vector.load %arg1[%c0_48, %c2_49, %c1_50, %c0_51] : memref<1x10x10x32xf32, #tpu.memory_space<vmem>>, vector<1x8x8x32xf32>
    %56 = vector.shape_cast %55 : vector<1x8x8x32xf32> to vector<8x8x32xf32>
    %57 = vector.shape_cast %56 : vector<8x8x32xf32> to vector<64x32xf32>
    %58 = arith.truncf %57 : vector<64x32xf32> to vector<64x32xbf16>
    %c7 = arith.constant 7 : index
    %c0_52 = arith.constant 0 : index
    %c0_53 = arith.constant 0 : index
    %59 = vector.load %arg2[%c7, %c0_52, %c0_53] : memref<9x32x32xbf16, #tpu.memory_space<vmem>>, vector<1x32x32xbf16>
    %60 = vector.shape_cast %59 : vector<1x32x32xbf16> to vector<32x32xbf16>
    %cst_54 = arith.constant dense<0.000000e+00> : vector<64x32xf32>
    %61 = tpu.matmul %58, %60, %cst_54 {dimension_numbers = #tpu.dot_dimension_numbers<[1], [0], [0], [1], [0, 0, 1, 1], [], []>} : vector<64x32xbf16>, vector<32x32xbf16>, vector<64x32xf32> -> vector<64x32xf32>
    %62 = arith.addf %54, %61 : vector<64x32xf32>
    %c0_55 = arith.constant 0 : index
    %c2_56 = arith.constant 2 : index
    %c2_57 = arith.constant 2 : index
    %c0_58 = arith.constant 0 : index
    %63 = vector.load %arg1[%c0_55, %c2_56, %c2_57, %c0_58] : memref<1x10x10x32xf32, #tpu.memory_space<vmem>>, vector<1x8x8x32xf32>
    %64 = vector.shape_cast %63 : vector<1x8x8x32xf32> to vector<8x8x32xf32>
    %65 = vector.shape_cast %64 : vector<8x8x32xf32> to vector<64x32xf32>
    %66 = arith.truncf %65 : vector<64x32xf32> to vector<64x32xbf16>
    %c8 = arith.constant 8 : index
    %c0_59 = arith.constant 0 : index
    %c0_60 = arith.constant 0 : index
    %67 = vector.load %arg2[%c8, %c0_59, %c0_60] : memref<9x32x32xbf16, #tpu.memory_space<vmem>>, vector<1x32x32xbf16>
    %68 = vector.shape_cast %67 : vector<1x32x32xbf16> to vector<32x32xbf16>
    %cst_61 = arith.constant dense<0.000000e+00> : vector<64x32xf32>
    %69 = tpu.matmul %66, %68, %cst_61 {dimension_numbers = #tpu.dot_dimension_numbers<[1], [0], [0], [1], [0, 0, 1, 1], [], []>} : vector<64x32xbf16>, vector<32x32xbf16>, vector<64x32xf32> -> vector<64x32xf32>
    %70 = arith.addf %62, %69 : vector<64x32xf32>
    %c0_62 = arith.constant 0 : index
    %c0_63 = arith.constant 0 : index
    %71 = vector.load %arg3[%c0_62, %c0_63] : memref<1x32xf32, #tpu.memory_space<vmem>>, vector<1x32xf32>
    %72 = vector.broadcast %71 : vector<1x32xf32> to vector<64x32xf32>
    %73 = arith.mulf %70, %72 : vector<64x32xf32>
    %c0_64 = arith.constant 0 : index
    %c0_65 = arith.constant 0 : index
    %74 = vector.load %arg4[%c0_64, %c0_65] : memref<1x32xf32, #tpu.memory_space<vmem>>, vector<1x32xf32>
    %75 = vector.broadcast %74 : vector<1x32xf32> to vector<64x32xf32>
    %76 = arith.addf %73, %75 : vector<64x32xf32>
    %c0_66 = arith.constant 0 : index
    %c0_67 = arith.constant 0 : index
    %c0_68 = arith.constant 0 : index
    %c0_69 = arith.constant 0 : index
    %77 = vector.load %arg5[%c0_66, %c0_67, %c0_68, %c0_69] : memref<1x8x8x32xf32, #tpu.memory_space<vmem>>, vector<1x8x8x32xf32>
    %78 = vector.shape_cast %77 : vector<1x8x8x32xf32> to vector<8x8x32xf32>
    %79 = vector.shape_cast %78 : vector<8x8x32xf32> to vector<64x32xf32>
    %80 = arith.addf %76, %79 : vector<64x32xf32>
    %cst_70 = arith.constant 0.000000e+00 : f32
    %81 = vector.broadcast %cst_70 : f32 to vector<64x32xf32>
    %82 = arith.maximumf %80, %81 : vector<64x32xf32>
    %83 = vector.shape_cast %82 : vector<64x32xf32> to vector<1x8x8x32xf32>
    %c0_71 = arith.constant 0 : index
    %c0_72 = arith.constant 0 : index
    %c0_73 = arith.constant 0 : index
    %c0_74 = arith.constant 0 : index
    %84 = vector.load %arg6[%c0_71, %c0_72, %c0_73, %c0_74] : memref<1x8x8x32xf32, #tpu.memory_space<vmem>>, vector<1x8x8x32xf32>
    tpu.vector_store %arg6[%c0_71, %c0_72, %c0_73, %c0_74], %83 {strides = array<i32>} : memref<1x8x8x32xf32, #tpu.memory_space<vmem>>, vector<1x8x8x32xf32>,
    return
  }
  func.func @transform_0(%arg0: i32) -> (i32, i32, i32, i32) {
    %c0_i32 = arith.constant 0 : i32
    %c0_i32_0 = arith.constant 0 : i32
    %c0_i32_1 = arith.constant 0 : i32
    %c0_i32_2 = arith.constant 0 : i32
    return %arg0, %c0_i32, %c0_i32_0, %c0_i32_1 : i32, i32, i32, i32
  }
  func.func @transform_1(%arg0: i32) -> (i32, i32, i32) {
    %c0_i32 = arith.constant 0 : i32
    %c0_i32_0 = arith.constant 0 : i32
    %c0_i32_1 = arith.constant 0 : i32
    %c0_i32_2 = arith.constant 0 : i32
    return %c0_i32, %c0_i32_0, %c0_i32_1 : i32, i32, i32
  }
  func.func @transform_2(%arg0: i32) -> (i32, i32) {
    %c0_i32 = arith.constant 0 : i32
    %c0_i32_0 = arith.constant 0 : i32
    %c0_i32_1 = arith.constant 0 : i32
    return %c0_i32, %c0_i32_0 : i32, i32
  }
  func.func @transform_3(%arg0: i32) -> (i32, i32) {
    %c0_i32 = arith.constant 0 : i32
    %c0_i32_0 = arith.constant 0 : i32
    %c0_i32_1 = arith.constant 0 : i32
    return %c0_i32, %c0_i32_0 : i32, i32
  }
  func.func @transform_4(%arg0: i32) -> (i32, i32, i32, i32) {
    %c0_i32 = arith.constant 0 : i32
    %c0_i32_0 = arith.constant 0 : i32
    %c0_i32_1 = arith.constant 0 : i32
    %c0_i32_2 = arith.constant 0 : i32
    return %arg0, %c0_i32, %c0_i32_0, %c0_i32_1 : i32, i32, i32, i32
  }
  func.func @transform_5(%arg0: i32) -> (i32, i32, i32, i32) {
    %c0_i32 = arith.constant 0 : i32
    %c0_i32_0 = arith.constant 0 : i32
    %c0_i32_1 = arith.constant 0 : i32
    %c0_i32_2 = arith.constant 0 : i32
    return %arg0, %c0_i32, %c0_i32_0, %c0_i32_1 : i32, i32, i32, i32
  }
}

module attributes {stable_mosaic.version = 11 : i64} {
  func.func @kernel(%arg0: i32, %arg1: memref<1x10x10x32xf32, #tpu.memory_space<vmem>>, %arg2: memref<9x32x64xbf16, #tpu.memory_space<vmem>>, %arg3: memref<1x64xf32, #tpu.memory_space<vmem>>, %arg4: memref<1x64xf32, #tpu.memory_space<vmem>>, %arg5: memref<1x8x8x64xf32, #tpu.memory_space<vmem>>) attributes {dimension_semantics = [#tpu.dimension_semantics<parallel>], iteration_bounds = array<i64: 2>, scalar_prefetch = 0 : i64, scratch_operands = 0 : i64, tpu.core_type = #tpu.core_type<tc>, window_params = [{transform_indices = @transform_0, window_bounds = array<i64: 1, 10, 10, 32>}, {pipeline_mode = #tpu.pipeline_mode<synchronous>, transform_indices = @transform_1, window_bounds = array<i64: 9, 32, 64>}, {pipeline_mode = #tpu.pipeline_mode<synchronous>, transform_indices = @transform_2, window_bounds = array<i64: 1, 64>}, {pipeline_mode = #tpu.pipeline_mode<synchronous>, transform_indices = @transform_3, window_bounds = array<i64: 1, 64>}, {transform_indices = @transform_4, window_bounds = array<i64: 1, 8, 8, 64>}]} {
    %c0 = arith.constant 0 : index
    %c0_0 = arith.constant 0 : index
    %c0_1 = arith.constant 0 : index
    %c0_2 = arith.constant 0 : index
    %0 = vector.load %arg1[%c0, %c0_0, %c0_1, %c0_2] : memref<1x10x10x32xf32, #tpu.memory_space<vmem>>, vector<1x8x8x32xf32>
    %1 = vector.shape_cast %0 : vector<1x8x8x32xf32> to vector<8x8x32xf32>
    %2 = vector.shape_cast %1 : vector<8x8x32xf32> to vector<64x32xf32>
    %3 = arith.truncf %2 : vector<64x32xf32> to vector<64x32xbf16>
    %c0_3 = arith.constant 0 : index
    %c0_4 = arith.constant 0 : index
    %c0_5 = arith.constant 0 : index
    %4 = vector.load %arg2[%c0_3, %c0_4, %c0_5] : memref<9x32x64xbf16, #tpu.memory_space<vmem>>, vector<1x32x64xbf16>
    %5 = vector.shape_cast %4 : vector<1x32x64xbf16> to vector<32x64xbf16>
    %cst = arith.constant dense<0.000000e+00> : vector<64x64xf32>
    %6 = tpu.matmul %3, %5, %cst {dimension_numbers = #tpu.dot_dimension_numbers<[1], [0], [0], [1], [0, 0, 1, 1], [], []>} : vector<64x32xbf16>, vector<32x64xbf16>, vector<64x64xf32> -> vector<64x64xf32>
    %c0_6 = arith.constant 0 : index
    %c0_7 = arith.constant 0 : index
    %c1 = arith.constant 1 : index
    %c0_8 = arith.constant 0 : index
    %7 = vector.load %arg1[%c0_6, %c0_7, %c1, %c0_8] : memref<1x10x10x32xf32, #tpu.memory_space<vmem>>, vector<1x8x8x32xf32>
    %8 = vector.shape_cast %7 : vector<1x8x8x32xf32> to vector<8x8x32xf32>
    %9 = vector.shape_cast %8 : vector<8x8x32xf32> to vector<64x32xf32>
    %10 = arith.truncf %9 : vector<64x32xf32> to vector<64x32xbf16>
    %c1_9 = arith.constant 1 : index
    %c0_10 = arith.constant 0 : index
    %c0_11 = arith.constant 0 : index
    %11 = vector.load %arg2[%c1_9, %c0_10, %c0_11] : memref<9x32x64xbf16, #tpu.memory_space<vmem>>, vector<1x32x64xbf16>
    %12 = vector.shape_cast %11 : vector<1x32x64xbf16> to vector<32x64xbf16>
    %cst_12 = arith.constant dense<0.000000e+00> : vector<64x64xf32>
    %13 = tpu.matmul %10, %12, %cst_12 {dimension_numbers = #tpu.dot_dimension_numbers<[1], [0], [0], [1], [0, 0, 1, 1], [], []>} : vector<64x32xbf16>, vector<32x64xbf16>, vector<64x64xf32> -> vector<64x64xf32>
    %14 = arith.addf %6, %13 : vector<64x64xf32>
    %c0_13 = arith.constant 0 : index
    %c0_14 = arith.constant 0 : index
    %c2 = arith.constant 2 : index
    %c0_15 = arith.constant 0 : index
    %15 = vector.load %arg1[%c0_13, %c0_14, %c2, %c0_15] : memref<1x10x10x32xf32, #tpu.memory_space<vmem>>, vector<1x8x8x32xf32>
    %16 = vector.shape_cast %15 : vector<1x8x8x32xf32> to vector<8x8x32xf32>
    %17 = vector.shape_cast %16 : vector<8x8x32xf32> to vector<64x32xf32>
    %18 = arith.truncf %17 : vector<64x32xf32> to vector<64x32xbf16>
    %c2_16 = arith.constant 2 : index
    %c0_17 = arith.constant 0 : index
    %c0_18 = arith.constant 0 : index
    %19 = vector.load %arg2[%c2_16, %c0_17, %c0_18] : memref<9x32x64xbf16, #tpu.memory_space<vmem>>, vector<1x32x64xbf16>
    %20 = vector.shape_cast %19 : vector<1x32x64xbf16> to vector<32x64xbf16>
    %cst_19 = arith.constant dense<0.000000e+00> : vector<64x64xf32>
    %21 = tpu.matmul %18, %20, %cst_19 {dimension_numbers = #tpu.dot_dimension_numbers<[1], [0], [0], [1], [0, 0, 1, 1], [], []>} : vector<64x32xbf16>, vector<32x64xbf16>, vector<64x64xf32> -> vector<64x64xf32>
    %22 = arith.addf %14, %21 : vector<64x64xf32>
    %c0_20 = arith.constant 0 : index
    %c1_21 = arith.constant 1 : index
    %c0_22 = arith.constant 0 : index
    %c0_23 = arith.constant 0 : index
    %23 = vector.load %arg1[%c0_20, %c1_21, %c0_22, %c0_23] : memref<1x10x10x32xf32, #tpu.memory_space<vmem>>, vector<1x8x8x32xf32>
    %24 = vector.shape_cast %23 : vector<1x8x8x32xf32> to vector<8x8x32xf32>
    %25 = vector.shape_cast %24 : vector<8x8x32xf32> to vector<64x32xf32>
    %26 = arith.truncf %25 : vector<64x32xf32> to vector<64x32xbf16>
    %c3 = arith.constant 3 : index
    %c0_24 = arith.constant 0 : index
    %c0_25 = arith.constant 0 : index
    %27 = vector.load %arg2[%c3, %c0_24, %c0_25] : memref<9x32x64xbf16, #tpu.memory_space<vmem>>, vector<1x32x64xbf16>
    %28 = vector.shape_cast %27 : vector<1x32x64xbf16> to vector<32x64xbf16>
    %cst_26 = arith.constant dense<0.000000e+00> : vector<64x64xf32>
    %29 = tpu.matmul %26, %28, %cst_26 {dimension_numbers = #tpu.dot_dimension_numbers<[1], [0], [0], [1], [0, 0, 1, 1], [], []>} : vector<64x32xbf16>, vector<32x64xbf16>, vector<64x64xf32> -> vector<64x64xf32>
    %30 = arith.addf %22, %29 : vector<64x64xf32>
    %c0_27 = arith.constant 0 : index
    %c1_28 = arith.constant 1 : index
    %c1_29 = arith.constant 1 : index
    %c0_30 = arith.constant 0 : index
    %31 = vector.load %arg1[%c0_27, %c1_28, %c1_29, %c0_30] : memref<1x10x10x32xf32, #tpu.memory_space<vmem>>, vector<1x8x8x32xf32>
    %32 = vector.shape_cast %31 : vector<1x8x8x32xf32> to vector<8x8x32xf32>
    %33 = vector.shape_cast %32 : vector<8x8x32xf32> to vector<64x32xf32>
    %34 = arith.truncf %33 : vector<64x32xf32> to vector<64x32xbf16>
    %c4 = arith.constant 4 : index
    %c0_31 = arith.constant 0 : index
    %c0_32 = arith.constant 0 : index
    %35 = vector.load %arg2[%c4, %c0_31, %c0_32] : memref<9x32x64xbf16, #tpu.memory_space<vmem>>, vector<1x32x64xbf16>
    %36 = vector.shape_cast %35 : vector<1x32x64xbf16> to vector<32x64xbf16>
    %cst_33 = arith.constant dense<0.000000e+00> : vector<64x64xf32>
    %37 = tpu.matmul %34, %36, %cst_33 {dimension_numbers = #tpu.dot_dimension_numbers<[1], [0], [0], [1], [0, 0, 1, 1], [], []>} : vector<64x32xbf16>, vector<32x64xbf16>, vector<64x64xf32> -> vector<64x64xf32>
    %38 = arith.addf %30, %37 : vector<64x64xf32>
    %c0_34 = arith.constant 0 : index
    %c1_35 = arith.constant 1 : index
    %c2_36 = arith.constant 2 : index
    %c0_37 = arith.constant 0 : index
    %39 = vector.load %arg1[%c0_34, %c1_35, %c2_36, %c0_37] : memref<1x10x10x32xf32, #tpu.memory_space<vmem>>, vector<1x8x8x32xf32>
    %40 = vector.shape_cast %39 : vector<1x8x8x32xf32> to vector<8x8x32xf32>
    %41 = vector.shape_cast %40 : vector<8x8x32xf32> to vector<64x32xf32>
    %42 = arith.truncf %41 : vector<64x32xf32> to vector<64x32xbf16>
    %c5 = arith.constant 5 : index
    %c0_38 = arith.constant 0 : index
    %c0_39 = arith.constant 0 : index
    %43 = vector.load %arg2[%c5, %c0_38, %c0_39] : memref<9x32x64xbf16, #tpu.memory_space<vmem>>, vector<1x32x64xbf16>
    %44 = vector.shape_cast %43 : vector<1x32x64xbf16> to vector<32x64xbf16>
    %cst_40 = arith.constant dense<0.000000e+00> : vector<64x64xf32>
    %45 = tpu.matmul %42, %44, %cst_40 {dimension_numbers = #tpu.dot_dimension_numbers<[1], [0], [0], [1], [0, 0, 1, 1], [], []>} : vector<64x32xbf16>, vector<32x64xbf16>, vector<64x64xf32> -> vector<64x64xf32>
    %46 = arith.addf %38, %45 : vector<64x64xf32>
    %c0_41 = arith.constant 0 : index
    %c2_42 = arith.constant 2 : index
    %c0_43 = arith.constant 0 : index
    %c0_44 = arith.constant 0 : index
    %47 = vector.load %arg1[%c0_41, %c2_42, %c0_43, %c0_44] : memref<1x10x10x32xf32, #tpu.memory_space<vmem>>, vector<1x8x8x32xf32>
    %48 = vector.shape_cast %47 : vector<1x8x8x32xf32> to vector<8x8x32xf32>
    %49 = vector.shape_cast %48 : vector<8x8x32xf32> to vector<64x32xf32>
    %50 = arith.truncf %49 : vector<64x32xf32> to vector<64x32xbf16>
    %c6 = arith.constant 6 : index
    %c0_45 = arith.constant 0 : index
    %c0_46 = arith.constant 0 : index
    %51 = vector.load %arg2[%c6, %c0_45, %c0_46] : memref<9x32x64xbf16, #tpu.memory_space<vmem>>, vector<1x32x64xbf16>
    %52 = vector.shape_cast %51 : vector<1x32x64xbf16> to vector<32x64xbf16>
    %cst_47 = arith.constant dense<0.000000e+00> : vector<64x64xf32>
    %53 = tpu.matmul %50, %52, %cst_47 {dimension_numbers = #tpu.dot_dimension_numbers<[1], [0], [0], [1], [0, 0, 1, 1], [], []>} : vector<64x32xbf16>, vector<32x64xbf16>, vector<64x64xf32> -> vector<64x64xf32>
    %54 = arith.addf %46, %53 : vector<64x64xf32>
    %c0_48 = arith.constant 0 : index
    %c2_49 = arith.constant 2 : index
    %c1_50 = arith.constant 1 : index
    %c0_51 = arith.constant 0 : index
    %55 = vector.load %arg1[%c0_48, %c2_49, %c1_50, %c0_51] : memref<1x10x10x32xf32, #tpu.memory_space<vmem>>, vector<1x8x8x32xf32>
    %56 = vector.shape_cast %55 : vector<1x8x8x32xf32> to vector<8x8x32xf32>
    %57 = vector.shape_cast %56 : vector<8x8x32xf32> to vector<64x32xf32>
    %58 = arith.truncf %57 : vector<64x32xf32> to vector<64x32xbf16>
    %c7 = arith.constant 7 : index
    %c0_52 = arith.constant 0 : index
    %c0_53 = arith.constant 0 : index
    %59 = vector.load %arg2[%c7, %c0_52, %c0_53] : memref<9x32x64xbf16, #tpu.memory_space<vmem>>, vector<1x32x64xbf16>
    %60 = vector.shape_cast %59 : vector<1x32x64xbf16> to vector<32x64xbf16>
    %cst_54 = arith.constant dense<0.000000e+00> : vector<64x64xf32>
    %61 = tpu.matmul %58, %60, %cst_54 {dimension_numbers = #tpu.dot_dimension_numbers<[1], [0], [0], [1], [0, 0, 1, 1], [], []>} : vector<64x32xbf16>, vector<32x64xbf16>, vector<64x64xf32> -> vector<64x64xf32>
    %62 = arith.addf %54, %61 : vector<64x64xf32>
    %c0_55 = arith.constant 0 : index
    %c2_56 = arith.constant 2 : index
    %c2_57 = arith.constant 2 : index
    %c0_58 = arith.constant 0 : index
    %63 = vector.load %arg1[%c0_55, %c2_56, %c2_57, %c0_58] : memref<1x10x10x32xf32, #tpu.memory_space<vmem>>, vector<1x8x8x32xf32>
    %64 = vector.shape_cast %63 : vector<1x8x8x32xf32> to vector<8x8x32xf32>
    %65 = vector.shape_cast %64 : vector<8x8x32xf32> to vector<64x32xf32>
    %66 = arith.truncf %65 : vector<64x32xf32> to vector<64x32xbf16>
    %c8 = arith.constant 8 : index
    %c0_59 = arith.constant 0 : index
    %c0_60 = arith.constant 0 : index
    %67 = vector.load %arg2[%c8, %c0_59, %c0_60] : memref<9x32x64xbf16, #tpu.memory_space<vmem>>, vector<1x32x64xbf16>
    %68 = vector.shape_cast %67 : vector<1x32x64xbf16> to vector<32x64xbf16>
    %cst_61 = arith.constant dense<0.000000e+00> : vector<64x64xf32>
    %69 = tpu.matmul %66, %68, %cst_61 {dimension_numbers = #tpu.dot_dimension_numbers<[1], [0], [0], [1], [0, 0, 1, 1], [], []>} : vector<64x32xbf16>, vector<32x64xbf16>, vector<64x64xf32> -> vector<64x64xf32>
    %70 = arith.addf %62, %69 : vector<64x64xf32>
    %c0_62 = arith.constant 0 : index
    %c0_63 = arith.constant 0 : index
    %71 = vector.load %arg3[%c0_62, %c0_63] : memref<1x64xf32, #tpu.memory_space<vmem>>, vector<1x64xf32>
    %72 = vector.broadcast %71 : vector<1x64xf32> to vector<64x64xf32>
    %73 = arith.mulf %70, %72 : vector<64x64xf32>
    %c0_64 = arith.constant 0 : index
    %c0_65 = arith.constant 0 : index
    %74 = vector.load %arg4[%c0_64, %c0_65] : memref<1x64xf32, #tpu.memory_space<vmem>>, vector<1x64xf32>
    %75 = vector.broadcast %74 : vector<1x64xf32> to vector<64x64xf32>
    %76 = arith.addf %73, %75 : vector<64x64xf32>
    %cst_66 = arith.constant 0.000000e+00 : f32
    %77 = vector.broadcast %cst_66 : f32 to vector<64x64xf32>
    %78 = arith.maximumf %76, %77 : vector<64x64xf32>
    %79 = vector.shape_cast %78 : vector<64x64xf32> to vector<1x8x8x64xf32>
    %c0_67 = arith.constant 0 : index
    %c0_68 = arith.constant 0 : index
    %c0_69 = arith.constant 0 : index
    %c0_70 = arith.constant 0 : index
    %80 = vector.load %arg5[%c0_67, %c0_68, %c0_69, %c0_70] : memref<1x8x8x64xf32, #tpu.memory_space<vmem>>, vector<1x8x8x64xf32>
    tpu.vector_store %arg5[%c0_67, %c0_68, %c0_69, %c0_70], %79 {strides = array<i32>} : memref<1x8x8x64xf32, #tpu.memory_space<vmem>>, vector<1x8x8x64xf32>,
    return
  }
  func.func @transform_0(%arg0: i32) -> (i32, i32, i32, i32) {
    %c0_i32 = arith.constant 0 : i32
    %c0_i32_0 = arith.constant 0 : i32
    %c0_i32_1 = arith.constant 0 : i32
    %c0_i32_2 = arith.constant 0 : i32
    return %arg0, %c0_i32, %c0_i32_0, %c0_i32_1 : i32, i32, i32, i32
  }
  func.func @transform_1(%arg0: i32) -> (i32, i32, i32) {
    %c0_i32 = arith.constant 0 : i32
    %c0_i32_0 = arith.constant 0 : i32
    %c0_i32_1 = arith.constant 0 : i32
    %c0_i32_2 = arith.constant 0 : i32
    return %c0_i32, %c0_i32_0, %c0_i32_1 : i32, i32, i32
  }
  func.func @transform_2(%arg0: i32) -> (i32, i32) {
    %c0_i32 = arith.constant 0 : i32
    %c0_i32_0 = arith.constant 0 : i32
    %c0_i32_1 = arith.constant 0 : i32
    return %c0_i32, %c0_i32_0 : i32, i32
  }
  func.func @transform_3(%arg0: i32) -> (i32, i32) {
    %c0_i32 = arith.constant 0 : i32
    %c0_i32_0 = arith.constant 0 : i32
    %c0_i32_1 = arith.constant 0 : i32
    return %c0_i32, %c0_i32_0 : i32, i32
  }
  func.func @transform_4(%arg0: i32) -> (i32, i32, i32, i32) {
    %c0_i32 = arith.constant 0 : i32
    %c0_i32_0 = arith.constant 0 : i32
    %c0_i32_1 = arith.constant 0 : i32
    %c0_i32_2 = arith.constant 0 : i32
    return %arg0, %c0_i32, %c0_i32_0, %c0_i32_1 : i32, i32, i32, i32
  }
}

module attributes {stable_mosaic.version = 11 : i64} {
  func.func @_matmul_affine_kernel(%arg0: i32, %arg1: memref<32x32xf32, #tpu.memory_space<vmem>>, %arg2: memref<32x64xbf16, #tpu.memory_space<vmem>>, %arg3: memref<1x64xf32, #tpu.memory_space<vmem>>, %arg4: memref<1x64xf32, #tpu.memory_space<vmem>>, %arg5: memref<32x64xf32, #tpu.memory_space<vmem>>) attributes {dimension_semantics = [#tpu.dimension_semantics<arbitrary>], iteration_bounds = array<i64: 1>, scalar_prefetch = 0 : i64, scratch_operands = 0 : i64, tpu.core_type = #tpu.core_type<tc>, window_params = [{pipeline_mode = #tpu.pipeline_mode<synchronous>, transform_indices = @transform_0, window_bounds = array<i64: 32, 32>}, {pipeline_mode = #tpu.pipeline_mode<synchronous>, transform_indices = @transform_1, window_bounds = array<i64: 32, 64>}, {pipeline_mode = #tpu.pipeline_mode<synchronous>, transform_indices = @transform_2, window_bounds = array<i64: 1, 64>}, {pipeline_mode = #tpu.pipeline_mode<synchronous>, transform_indices = @transform_3, window_bounds = array<i64: 1, 64>}, {pipeline_mode = #tpu.pipeline_mode<synchronous>, transform_indices = @transform_4, window_bounds = array<i64: 32, 64>}]} {
    %c0 = arith.constant 0 : index
    %c0_0 = arith.constant 0 : index
    %0 = vector.load %arg1[%c0, %c0_0] : memref<32x32xf32, #tpu.memory_space<vmem>>, vector<32x32xf32>
    %1 = arith.truncf %0 : vector<32x32xf32> to vector<32x32xbf16>
    %c0_1 = arith.constant 0 : index
    %c0_2 = arith.constant 0 : index
    %2 = vector.load %arg2[%c0_1, %c0_2] : memref<32x64xbf16, #tpu.memory_space<vmem>>, vector<32x64xbf16>
    %cst = arith.constant dense<0.000000e+00> : vector<32x64xf32>
    %3 = tpu.matmul %1, %2, %cst {dimension_numbers = #tpu.dot_dimension_numbers<[1], [0], [0], [1], [0, 0, 1, 1], [], []>} : vector<32x32xbf16>, vector<32x64xbf16>, vector<32x64xf32> -> vector<32x64xf32>
    %c0_3 = arith.constant 0 : index
    %c0_4 = arith.constant 0 : index
    %4 = vector.load %arg3[%c0_3, %c0_4] : memref<1x64xf32, #tpu.memory_space<vmem>>, vector<1x64xf32>
    %5 = vector.broadcast %4 : vector<1x64xf32> to vector<32x64xf32>
    %6 = arith.mulf %3, %5 : vector<32x64xf32>
    %c0_5 = arith.constant 0 : index
    %c0_6 = arith.constant 0 : index
    %7 = vector.load %arg4[%c0_5, %c0_6] : memref<1x64xf32, #tpu.memory_space<vmem>>, vector<1x64xf32>
    %8 = vector.broadcast %7 : vector<1x64xf32> to vector<32x64xf32>
    %9 = arith.addf %6, %8 : vector<32x64xf32>
    %c0_7 = arith.constant 0 : index
    %c0_8 = arith.constant 0 : index
    %10 = vector.load %arg5[%c0_7, %c0_8] : memref<32x64xf32, #tpu.memory_space<vmem>>, vector<32x64xf32>
    tpu.vector_store %arg5[%c0_7, %c0_8], %9 {strides = array<i32>} : memref<32x64xf32, #tpu.memory_space<vmem>>, vector<32x64xf32>,
    return
  }
  func.func @transform_0(%arg0: i32) -> (i32, i32) {
    %c0_i32 = arith.constant 0 : i32
    %c0_i32_0 = arith.constant 0 : i32
    %c0_i32_1 = arith.constant 0 : i32
    return %c0_i32, %c0_i32_0 : i32, i32
  }
  func.func @transform_1(%arg0: i32) -> (i32, i32) {
    %c0_i32 = arith.constant 0 : i32
    %c0_i32_0 = arith.constant 0 : i32
    %c0_i32_1 = arith.constant 0 : i32
    return %c0_i32, %c0_i32_0 : i32, i32
  }
  func.func @transform_2(%arg0: i32) -> (i32, i32) {
    %c0_i32 = arith.constant 0 : i32
    %c0_i32_0 = arith.constant 0 : i32
    %c0_i32_1 = arith.constant 0 : i32
    return %c0_i32, %c0_i32_0 : i32, i32
  }
  func.func @transform_3(%arg0: i32) -> (i32, i32) {
    %c0_i32 = arith.constant 0 : i32
    %c0_i32_0 = arith.constant 0 : i32
    %c0_i32_1 = arith.constant 0 : i32
    return %c0_i32, %c0_i32_0 : i32, i32
  }
  func.func @transform_4(%arg0: i32) -> (i32, i32) {
    %c0_i32 = arith.constant 0 : i32
    %c0_i32_0 = arith.constant 0 : i32
    %c0_i32_1 = arith.constant 0 : i32
    return %c0_i32, %c0_i32_0 : i32, i32
  }
}

module attributes {stable_mosaic.version = 11 : i64} {
  func.func @kernel(%arg0: i32, %arg1: memref<1x6x6x64xf32, #tpu.memory_space<vmem>>, %arg2: memref<9x64x64xbf16, #tpu.memory_space<vmem>>, %arg3: memref<1x64xf32, #tpu.memory_space<vmem>>, %arg4: memref<1x64xf32, #tpu.memory_space<vmem>>, %arg5: memref<1x4x4x64xf32, #tpu.memory_space<vmem>>, %arg6: memref<1x4x4x64xf32, #tpu.memory_space<vmem>>) attributes {dimension_semantics = [#tpu.dimension_semantics<parallel>], iteration_bounds = array<i64: 2>, scalar_prefetch = 0 : i64, scratch_operands = 0 : i64, tpu.core_type = #tpu.core_type<tc>, window_params = [{transform_indices = @transform_0, window_bounds = array<i64: 1, 6, 6, 64>}, {pipeline_mode = #tpu.pipeline_mode<synchronous>, transform_indices = @transform_1, window_bounds = array<i64: 9, 64, 64>}, {pipeline_mode = #tpu.pipeline_mode<synchronous>, transform_indices = @transform_2, window_bounds = array<i64: 1, 64>}, {pipeline_mode = #tpu.pipeline_mode<synchronous>, transform_indices = @transform_3, window_bounds = array<i64: 1, 64>}, {transform_indices = @transform_4, window_bounds = array<i64: 1, 4, 4, 64>}, {transform_indices = @transform_5, window_bounds = array<i64: 1, 4, 4, 64>}]} {
    %c0 = arith.constant 0 : index
    %c0_0 = arith.constant 0 : index
    %c0_1 = arith.constant 0 : index
    %c0_2 = arith.constant 0 : index
    %0 = vector.load %arg1[%c0, %c0_0, %c0_1, %c0_2] : memref<1x6x6x64xf32, #tpu.memory_space<vmem>>, vector<1x4x4x64xf32>
    %1 = vector.shape_cast %0 : vector<1x4x4x64xf32> to vector<4x4x64xf32>
    %2 = vector.shape_cast %1 : vector<4x4x64xf32> to vector<16x64xf32>
    %3 = arith.truncf %2 : vector<16x64xf32> to vector<16x64xbf16>
    %c0_3 = arith.constant 0 : index
    %c0_4 = arith.constant 0 : index
    %c0_5 = arith.constant 0 : index
    %4 = vector.load %arg2[%c0_3, %c0_4, %c0_5] : memref<9x64x64xbf16, #tpu.memory_space<vmem>>, vector<1x64x64xbf16>
    %5 = vector.shape_cast %4 : vector<1x64x64xbf16> to vector<64x64xbf16>
    %cst = arith.constant dense<0.000000e+00> : vector<16x64xf32>
    %6 = tpu.matmul %3, %5, %cst {dimension_numbers = #tpu.dot_dimension_numbers<[1], [0], [0], [1], [0, 0, 1, 1], [], []>} : vector<16x64xbf16>, vector<64x64xbf16>, vector<16x64xf32> -> vector<16x64xf32>
    %c0_6 = arith.constant 0 : index
    %c0_7 = arith.constant 0 : index
    %c1 = arith.constant 1 : index
    %c0_8 = arith.constant 0 : index
    %7 = vector.load %arg1[%c0_6, %c0_7, %c1, %c0_8] : memref<1x6x6x64xf32, #tpu.memory_space<vmem>>, vector<1x4x4x64xf32>
    %8 = vector.shape_cast %7 : vector<1x4x4x64xf32> to vector<4x4x64xf32>
    %9 = vector.shape_cast %8 : vector<4x4x64xf32> to vector<16x64xf32>
    %10 = arith.truncf %9 : vector<16x64xf32> to vector<16x64xbf16>
    %c1_9 = arith.constant 1 : index
    %c0_10 = arith.constant 0 : index
    %c0_11 = arith.constant 0 : index
    %11 = vector.load %arg2[%c1_9, %c0_10, %c0_11] : memref<9x64x64xbf16, #tpu.memory_space<vmem>>, vector<1x64x64xbf16>
    %12 = vector.shape_cast %11 : vector<1x64x64xbf16> to vector<64x64xbf16>
    %cst_12 = arith.constant dense<0.000000e+00> : vector<16x64xf32>
    %13 = tpu.matmul %10, %12, %cst_12 {dimension_numbers = #tpu.dot_dimension_numbers<[1], [0], [0], [1], [0, 0, 1, 1], [], []>} : vector<16x64xbf16>, vector<64x64xbf16>, vector<16x64xf32> -> vector<16x64xf32>
    %14 = arith.addf %6, %13 : vector<16x64xf32>
    %c0_13 = arith.constant 0 : index
    %c0_14 = arith.constant 0 : index
    %c2 = arith.constant 2 : index
    %c0_15 = arith.constant 0 : index
    %15 = vector.load %arg1[%c0_13, %c0_14, %c2, %c0_15] : memref<1x6x6x64xf32, #tpu.memory_space<vmem>>, vector<1x4x4x64xf32>
    %16 = vector.shape_cast %15 : vector<1x4x4x64xf32> to vector<4x4x64xf32>
    %17 = vector.shape_cast %16 : vector<4x4x64xf32> to vector<16x64xf32>
    %18 = arith.truncf %17 : vector<16x64xf32> to vector<16x64xbf16>
    %c2_16 = arith.constant 2 : index
    %c0_17 = arith.constant 0 : index
    %c0_18 = arith.constant 0 : index
    %19 = vector.load %arg2[%c2_16, %c0_17, %c0_18] : memref<9x64x64xbf16, #tpu.memory_space<vmem>>, vector<1x64x64xbf16>
    %20 = vector.shape_cast %19 : vector<1x64x64xbf16> to vector<64x64xbf16>
    %cst_19 = arith.constant dense<0.000000e+00> : vector<16x64xf32>
    %21 = tpu.matmul %18, %20, %cst_19 {dimension_numbers = #tpu.dot_dimension_numbers<[1], [0], [0], [1], [0, 0, 1, 1], [], []>} : vector<16x64xbf16>, vector<64x64xbf16>, vector<16x64xf32> -> vector<16x64xf32>
    %22 = arith.addf %14, %21 : vector<16x64xf32>
    %c0_20 = arith.constant 0 : index
    %c1_21 = arith.constant 1 : index
    %c0_22 = arith.constant 0 : index
    %c0_23 = arith.constant 0 : index
    %23 = vector.load %arg1[%c0_20, %c1_21, %c0_22, %c0_23] : memref<1x6x6x64xf32, #tpu.memory_space<vmem>>, vector<1x4x4x64xf32>
    %24 = vector.shape_cast %23 : vector<1x4x4x64xf32> to vector<4x4x64xf32>
    %25 = vector.shape_cast %24 : vector<4x4x64xf32> to vector<16x64xf32>
    %26 = arith.truncf %25 : vector<16x64xf32> to vector<16x64xbf16>
    %c3 = arith.constant 3 : index
    %c0_24 = arith.constant 0 : index
    %c0_25 = arith.constant 0 : index
    %27 = vector.load %arg2[%c3, %c0_24, %c0_25] : memref<9x64x64xbf16, #tpu.memory_space<vmem>>, vector<1x64x64xbf16>
    %28 = vector.shape_cast %27 : vector<1x64x64xbf16> to vector<64x64xbf16>
    %cst_26 = arith.constant dense<0.000000e+00> : vector<16x64xf32>
    %29 = tpu.matmul %26, %28, %cst_26 {dimension_numbers = #tpu.dot_dimension_numbers<[1], [0], [0], [1], [0, 0, 1, 1], [], []>} : vector<16x64xbf16>, vector<64x64xbf16>, vector<16x64xf32> -> vector<16x64xf32>
    %30 = arith.addf %22, %29 : vector<16x64xf32>
    %c0_27 = arith.constant 0 : index
    %c1_28 = arith.constant 1 : index
    %c1_29 = arith.constant 1 : index
    %c0_30 = arith.constant 0 : index
    %31 = vector.load %arg1[%c0_27, %c1_28, %c1_29, %c0_30] : memref<1x6x6x64xf32, #tpu.memory_space<vmem>>, vector<1x4x4x64xf32>
    %32 = vector.shape_cast %31 : vector<1x4x4x64xf32> to vector<4x4x64xf32>
    %33 = vector.shape_cast %32 : vector<4x4x64xf32> to vector<16x64xf32>
    %34 = arith.truncf %33 : vector<16x64xf32> to vector<16x64xbf16>
    %c4 = arith.constant 4 : index
    %c0_31 = arith.constant 0 : index
    %c0_32 = arith.constant 0 : index
    %35 = vector.load %arg2[%c4, %c0_31, %c0_32] : memref<9x64x64xbf16, #tpu.memory_space<vmem>>, vector<1x64x64xbf16>
    %36 = vector.shape_cast %35 : vector<1x64x64xbf16> to vector<64x64xbf16>
    %cst_33 = arith.constant dense<0.000000e+00> : vector<16x64xf32>
    %37 = tpu.matmul %34, %36, %cst_33 {dimension_numbers = #tpu.dot_dimension_numbers<[1], [0], [0], [1], [0, 0, 1, 1], [], []>} : vector<16x64xbf16>, vector<64x64xbf16>, vector<16x64xf32> -> vector<16x64xf32>
    %38 = arith.addf %30, %37 : vector<16x64xf32>
    %c0_34 = arith.constant 0 : index
    %c1_35 = arith.constant 1 : index
    %c2_36 = arith.constant 2 : index
    %c0_37 = arith.constant 0 : index
    %39 = vector.load %arg1[%c0_34, %c1_35, %c2_36, %c0_37] : memref<1x6x6x64xf32, #tpu.memory_space<vmem>>, vector<1x4x4x64xf32>
    %40 = vector.shape_cast %39 : vector<1x4x4x64xf32> to vector<4x4x64xf32>
    %41 = vector.shape_cast %40 : vector<4x4x64xf32> to vector<16x64xf32>
    %42 = arith.truncf %41 : vector<16x64xf32> to vector<16x64xbf16>
    %c5 = arith.constant 5 : index
    %c0_38 = arith.constant 0 : index
    %c0_39 = arith.constant 0 : index
    %43 = vector.load %arg2[%c5, %c0_38, %c0_39] : memref<9x64x64xbf16, #tpu.memory_space<vmem>>, vector<1x64x64xbf16>
    %44 = vector.shape_cast %43 : vector<1x64x64xbf16> to vector<64x64xbf16>
    %cst_40 = arith.constant dense<0.000000e+00> : vector<16x64xf32>
    %45 = tpu.matmul %42, %44, %cst_40 {dimension_numbers = #tpu.dot_dimension_numbers<[1], [0], [0], [1], [0, 0, 1, 1], [], []>} : vector<16x64xbf16>, vector<64x64xbf16>, vector<16x64xf32> -> vector<16x64xf32>
    %46 = arith.addf %38, %45 : vector<16x64xf32>
    %c0_41 = arith.constant 0 : index
    %c2_42 = arith.constant 2 : index
    %c0_43 = arith.constant 0 : index
    %c0_44 = arith.constant 0 : index
    %47 = vector.load %arg1[%c0_41, %c2_42, %c0_43, %c0_44] : memref<1x6x6x64xf32, #tpu.memory_space<vmem>>, vector<1x4x4x64xf32>
    %48 = vector.shape_cast %47 : vector<1x4x4x64xf32> to vector<4x4x64xf32>
    %49 = vector.shape_cast %48 : vector<4x4x64xf32> to vector<16x64xf32>
    %50 = arith.truncf %49 : vector<16x64xf32> to vector<16x64xbf16>
    %c6 = arith.constant 6 : index
    %c0_45 = arith.constant 0 : index
    %c0_46 = arith.constant 0 : index
    %51 = vector.load %arg2[%c6, %c0_45, %c0_46] : memref<9x64x64xbf16, #tpu.memory_space<vmem>>, vector<1x64x64xbf16>
    %52 = vector.shape_cast %51 : vector<1x64x64xbf16> to vector<64x64xbf16>
    %cst_47 = arith.constant dense<0.000000e+00> : vector<16x64xf32>
    %53 = tpu.matmul %50, %52, %cst_47 {dimension_numbers = #tpu.dot_dimension_numbers<[1], [0], [0], [1], [0, 0, 1, 1], [], []>} : vector<16x64xbf16>, vector<64x64xbf16>, vector<16x64xf32> -> vector<16x64xf32>
    %54 = arith.addf %46, %53 : vector<16x64xf32>
    %c0_48 = arith.constant 0 : index
    %c2_49 = arith.constant 2 : index
    %c1_50 = arith.constant 1 : index
    %c0_51 = arith.constant 0 : index
    %55 = vector.load %arg1[%c0_48, %c2_49, %c1_50, %c0_51] : memref<1x6x6x64xf32, #tpu.memory_space<vmem>>, vector<1x4x4x64xf32>
    %56 = vector.shape_cast %55 : vector<1x4x4x64xf32> to vector<4x4x64xf32>
    %57 = vector.shape_cast %56 : vector<4x4x64xf32> to vector<16x64xf32>
    %58 = arith.truncf %57 : vector<16x64xf32> to vector<16x64xbf16>
    %c7 = arith.constant 7 : index
    %c0_52 = arith.constant 0 : index
    %c0_53 = arith.constant 0 : index
    %59 = vector.load %arg2[%c7, %c0_52, %c0_53] : memref<9x64x64xbf16, #tpu.memory_space<vmem>>, vector<1x64x64xbf16>
    %60 = vector.shape_cast %59 : vector<1x64x64xbf16> to vector<64x64xbf16>
    %cst_54 = arith.constant dense<0.000000e+00> : vector<16x64xf32>
    %61 = tpu.matmul %58, %60, %cst_54 {dimension_numbers = #tpu.dot_dimension_numbers<[1], [0], [0], [1], [0, 0, 1, 1], [], []>} : vector<16x64xbf16>, vector<64x64xbf16>, vector<16x64xf32> -> vector<16x64xf32>
    %62 = arith.addf %54, %61 : vector<16x64xf32>
    %c0_55 = arith.constant 0 : index
    %c2_56 = arith.constant 2 : index
    %c2_57 = arith.constant 2 : index
    %c0_58 = arith.constant 0 : index
    %63 = vector.load %arg1[%c0_55, %c2_56, %c2_57, %c0_58] : memref<1x6x6x64xf32, #tpu.memory_space<vmem>>, vector<1x4x4x64xf32>
    %64 = vector.shape_cast %63 : vector<1x4x4x64xf32> to vector<4x4x64xf32>
    %65 = vector.shape_cast %64 : vector<4x4x64xf32> to vector<16x64xf32>
    %66 = arith.truncf %65 : vector<16x64xf32> to vector<16x64xbf16>
    %c8 = arith.constant 8 : index
    %c0_59 = arith.constant 0 : index
    %c0_60 = arith.constant 0 : index
    %67 = vector.load %arg2[%c8, %c0_59, %c0_60] : memref<9x64x64xbf16, #tpu.memory_space<vmem>>, vector<1x64x64xbf16>
    %68 = vector.shape_cast %67 : vector<1x64x64xbf16> to vector<64x64xbf16>
    %cst_61 = arith.constant dense<0.000000e+00> : vector<16x64xf32>
    %69 = tpu.matmul %66, %68, %cst_61 {dimension_numbers = #tpu.dot_dimension_numbers<[1], [0], [0], [1], [0, 0, 1, 1], [], []>} : vector<16x64xbf16>, vector<64x64xbf16>, vector<16x64xf32> -> vector<16x64xf32>
    %70 = arith.addf %62, %69 : vector<16x64xf32>
    %c0_62 = arith.constant 0 : index
    %c0_63 = arith.constant 0 : index
    %71 = vector.load %arg3[%c0_62, %c0_63] : memref<1x64xf32, #tpu.memory_space<vmem>>, vector<1x64xf32>
    %72 = vector.broadcast %71 : vector<1x64xf32> to vector<16x64xf32>
    %73 = arith.mulf %70, %72 : vector<16x64xf32>
    %c0_64 = arith.constant 0 : index
    %c0_65 = arith.constant 0 : index
    %74 = vector.load %arg4[%c0_64, %c0_65] : memref<1x64xf32, #tpu.memory_space<vmem>>, vector<1x64xf32>
    %75 = vector.broadcast %74 : vector<1x64xf32> to vector<16x64xf32>
    %76 = arith.addf %73, %75 : vector<16x64xf32>
    %c0_66 = arith.constant 0 : index
    %c0_67 = arith.constant 0 : index
    %c0_68 = arith.constant 0 : index
    %c0_69 = arith.constant 0 : index
    %77 = vector.load %arg5[%c0_66, %c0_67, %c0_68, %c0_69] : memref<1x4x4x64xf32, #tpu.memory_space<vmem>>, vector<1x4x4x64xf32>
    %78 = vector.shape_cast %77 : vector<1x4x4x64xf32> to vector<4x4x64xf32>
    %79 = vector.shape_cast %78 : vector<4x4x64xf32> to vector<16x64xf32>
    %80 = arith.addf %76, %79 : vector<16x64xf32>
    %cst_70 = arith.constant 0.000000e+00 : f32
    %81 = vector.broadcast %cst_70 : f32 to vector<16x64xf32>
    %82 = arith.maximumf %80, %81 : vector<16x64xf32>
    %83 = vector.shape_cast %82 : vector<16x64xf32> to vector<1x4x4x64xf32>
    %c0_71 = arith.constant 0 : index
    %c0_72 = arith.constant 0 : index
    %c0_73 = arith.constant 0 : index
    %c0_74 = arith.constant 0 : index
    %84 = vector.load %arg6[%c0_71, %c0_72, %c0_73, %c0_74] : memref<1x4x4x64xf32, #tpu.memory_space<vmem>>, vector<1x4x4x64xf32>
    tpu.vector_store %arg6[%c0_71, %c0_72, %c0_73, %c0_74], %83 {strides = array<i32>} : memref<1x4x4x64xf32, #tpu.memory_space<vmem>>, vector<1x4x4x64xf32>,
    return
  }
  func.func @transform_0(%arg0: i32) -> (i32, i32, i32, i32) {
    %c0_i32 = arith.constant 0 : i32
    %c0_i32_0 = arith.constant 0 : i32
    %c0_i32_1 = arith.constant 0 : i32
    %c0_i32_2 = arith.constant 0 : i32
    return %arg0, %c0_i32, %c0_i32_0, %c0_i32_1 : i32, i32, i32, i32
  }
  func.func @transform_1(%arg0: i32) -> (i32, i32, i32) {
    %c0_i32 = arith.constant 0 : i32
    %c0_i32_0 = arith.constant 0 : i32
    %c0_i32_1 = arith.constant 0 : i32
    %c0_i32_2 = arith.constant 0 : i32
    return %c0_i32, %c0_i32_0, %c0_i32_1 : i32, i32, i32
  }
  func.func @transform_2(%arg0: i32) -> (i32, i32) {
    %c0_i32 = arith.constant 0 : i32
    %c0_i32_0 = arith.constant 0 : i32
    %c0_i32_1 = arith.constant 0 : i32
    return %c0_i32, %c0_i32_0 : i32, i32
  }
  func.func @transform_3(%arg0: i32) -> (i32, i32) {
    %c0_i32 = arith.constant 0 : i32
    %c0_i32_0 = arith.constant 0 : i32
    %c0_i32_1 = arith.constant 0 : i32
    return %c0_i32, %c0_i32_0 : i32, i32
  }
  func.func @transform_4(%arg0: i32) -> (i32, i32, i32, i32) {
    %c0_i32 = arith.constant 0 : i32
    %c0_i32_0 = arith.constant 0 : i32
    %c0_i32_1 = arith.constant 0 : i32
    %c0_i32_2 = arith.constant 0 : i32
    return %arg0, %c0_i32, %c0_i32_0, %c0_i32_1 : i32, i32, i32, i32
  }
  func.func @transform_5(%arg0: i32) -> (i32, i32, i32, i32) {
    %c0_i32 = arith.constant 0 : i32
    %c0_i32_0 = arith.constant 0 : i32
    %c0_i32_1 = arith.constant 0 : i32
    %c0_i32_2 = arith.constant 0 : i32
    return %arg0, %c0_i32, %c0_i32_0, %c0_i32_1 : i32, i32, i32, i32
  }
}

module attributes {stable_mosaic.version = 11 : i64} {
  func.func @_head_kernel(%arg0: i32, %arg1: memref<2x16x64xf32, #tpu.memory_space<vmem>>, %arg2: memref<64x10xbf16, #tpu.memory_space<vmem>>, %arg3: memref<1x10xf32, #tpu.memory_space<vmem>>, %arg4: memref<2x10xf32, #tpu.memory_space<vmem>>) attributes {dimension_semantics = [#tpu.dimension_semantics<arbitrary>], iteration_bounds = array<i64: 1>, scalar_prefetch = 0 : i64, scratch_operands = 0 : i64, tpu.core_type = #tpu.core_type<tc>, window_params = [{pipeline_mode = #tpu.pipeline_mode<synchronous>, transform_indices = @transform_0, window_bounds = array<i64: 2, 16, 64>}, {pipeline_mode = #tpu.pipeline_mode<synchronous>, transform_indices = @transform_1, window_bounds = array<i64: 64, 10>}, {pipeline_mode = #tpu.pipeline_mode<synchronous>, transform_indices = @transform_2, window_bounds = array<i64: 1, 10>}, {pipeline_mode = #tpu.pipeline_mode<synchronous>, transform_indices = @transform_3, window_bounds = array<i64: 2, 10>}]} {
    %c0 = arith.constant 0 : index
    %c0_0 = arith.constant 0 : index
    %c0_1 = arith.constant 0 : index
    %0 = vector.load %arg1[%c0, %c0_0, %c0_1] : memref<2x16x64xf32, #tpu.memory_space<vmem>>, vector<2x16x64xf32>
    %cst = arith.constant dense<0.000000e+00> : vector<2x64xf32>
    %1 = vector.multi_reduction <add>, %0, %cst [1] : vector<2x16x64xf32> to vector<2x64xf32>
    %cst_2 = arith.constant 1.600000e+01 : f32
    %2 = vector.broadcast %cst_2 : f32 to vector<2x64xf32>
    %3 = arith.divf %1, %2 : vector<2x64xf32>
    %4 = arith.truncf %3 : vector<2x64xf32> to vector<2x64xbf16>
    %c0_3 = arith.constant 0 : index
    %c0_4 = arith.constant 0 : index
    %5 = vector.load %arg2[%c0_3, %c0_4] : memref<64x10xbf16, #tpu.memory_space<vmem>>, vector<64x10xbf16>
    %cst_5 = arith.constant dense<0.000000e+00> : vector<2x10xf32>
    %6 = tpu.matmul %4, %5, %cst_5 {dimension_numbers = #tpu.dot_dimension_numbers<[1], [0], [0], [1], [0, 0, 1, 1], [], []>} : vector<2x64xbf16>, vector<64x10xbf16>, vector<2x10xf32> -> vector<2x10xf32>
    %c0_6 = arith.constant 0 : index
    %c0_7 = arith.constant 0 : index
    %7 = vector.load %arg3[%c0_6, %c0_7] : memref<1x10xf32, #tpu.memory_space<vmem>>, vector<1x10xf32>
    %8 = vector.broadcast %7 : vector<1x10xf32> to vector<2x10xf32>
    %9 = arith.addf %6, %8 : vector<2x10xf32>
    %c0_8 = arith.constant 0 : index
    %c0_9 = arith.constant 0 : index
    %10 = vector.load %arg4[%c0_8, %c0_9] : memref<2x10xf32, #tpu.memory_space<vmem>>, vector<2x10xf32>
    tpu.vector_store %arg4[%c0_8, %c0_9], %9 {strides = array<i32>} : memref<2x10xf32, #tpu.memory_space<vmem>>, vector<2x10xf32>,
    return
  }
  func.func @transform_0(%arg0: i32) -> (i32, i32, i32) {
    %c0_i32 = arith.constant 0 : i32
    %c0_i32_0 = arith.constant 0 : i32
    %c0_i32_1 = arith.constant 0 : i32
    %c0_i32_2 = arith.constant 0 : i32
    return %c0_i32, %c0_i32_0, %c0_i32_1 : i32, i32, i32
  }
  func.func @transform_1(%arg0: i32) -> (i32, i32) {
    %c0_i32 = arith.constant 0 : i32
    %c0_i32_0 = arith.constant 0 : i32
    %c0_i32_1 = arith.constant 0 : i32
    return %c0_i32, %c0_i32_0 : i32, i32
  }
  func.func @transform_2(%arg0: i32) -> (i32, i32) {
    %c0_i32 = arith.constant 0 : i32
    %c0_i32_0 = arith.constant 0 : i32
    %c0_i32_1 = arith.constant 0 : i32
    return %c0_i32, %c0_i32_0 : i32, i32
  }
  func.func @transform_3(%arg0: i32) -> (i32, i32) {
    %c0_i32 = arith.constant 0 : i32
    %c0_i32_0 = arith.constant 0 : i32
    %c0_i32_1 = arith.constant 0 : i32
    return %c0_i32, %c0_i32_0 : i32, i32
  }
}

</mosaic_0001>

<bundles_post_ra>
// kernel: _lambda_.10
= control target key start
LH: loop header
LB: loop body
LE: loop exit
PB: predicated region body
PF: predicated region fallthrough
CT: control target
= control target key end

     0   :  { %s3847_s15 = smov 0   ;;  %s5019_s0 = inlined_call_operand.vmem [shape: f32[2,18,18,3], index: 0, kind: input, shape index: {}]   ;;  %s5020_s1 = inlined_call_operand.vmem [shape: bf16[9,3,16], index: 1, kind: input, shape index: {}]   ;;  %s5021_s2 = inlined_call_operand.vmem [shape: f32[1,16], index: 2, kind: input, shape index: {}]   ;;  %s5022_s3 = inlined_call_operand.vmem [shape: f32[1,16], index: 3, kind: input, shape index: {}]   ;;  %s5023_s4 = inlined_call_operand.vmem [shape: f32[2,16,16,16], index: 4, kind: output, shape index: {}]  }
   0x1 LB: > { %s2985_s16 = sadd.s32 4294967295, %s3819_s15   ;;  %p2989_p0 = scmp.ge.s32.totalorder %s3819_s15, 1  ;;  %s3819_s15 = sphi %s3847_s15, %s14_s15  }
   0x2   : > { %p162_p1 = scmp.lt.s32.totalorder %s3819_s15, 3 }
   0x4   : > { %p163_p2 = pnand %p2989_p0, %p162_p1 }
   0x6   : > { %166 = sbr.rel (%p163_p2) target bundleno = 513 (0x201), region = 36 }
   0xb   : > { %v2993_v0 = vld [vmem:[%s5020_s1 + $0x2] sm:$0x3]  ;;  %vm347_vm0 = vcmask 1040384   ;;  %vm348_vm1 = vcmask 1041408   ;;  %p188_p3 = scmp.lt.s32.totalorder %s2985_s16, 1  ;;  %v3821_v1 = vmov 65535  }
   0xc   : > { %v349_v2 = vsel %vm347_vm0, 4294967295, %v3821_v1  ;;  %v247_v3 = vld [vmem:[%s5020_s1] sm:$0x3]  ;;  %v3026_v4 = vld [vmem:[%s5020_s1 + $0x4] sm:$0x3]  ;;  %vm298_vm2 = vcmask 23552  }
   0xd   : > { %v3864_v5 = vsel %vm348_vm1, %v349_v2, 0  ;;  %s5107_s16 = smov (!%p188_p3, %s2985_s16), 1  ;;  %v3075_v9 = vld [vmem:[%s5020_s1 + $0x6] sm:$0x3]  ;;  %v3124_v10 = vld [vmem:[%s5020_s1 + $0x8] sm:$0x3] }
   0xe   : > { %v352_v6 = vand.u32 %v2993_v0, %v3864_v5  ;;  %v564_v7 = vand.u32 %v3864_v5, %v247_v3  ;;  %v826_v8 = vand.u32 %v3026_v4, %v3864_v5  ;;  %s3803_s23 = smul.u32 432, %s5107_s16  ;;  %v3903_v27 = vand.u32 %v3075_v9, %v3864_v5  ;;  %s3341_s19 = sshll.u32 %s5107_s16, 8 }
   0xf   : > { %v3914_v30 = vand.u32 %v3124_v10, %v3864_v5  ;;  %s4815_s21 = scalar_lea.vmem %s5023_s4, %s3341_s19  ;;  %vm2897_vm3 = vcmask 130048  }
  0x10   : > { %3801 = vmatprep.subr.bf16.mxu1 %v352_v6  ;;  %3495 = vmatprep.subr.bf16.mxu0 %v352_v6  ;;  %s3875_s26 = scalar_lea.vmem %s5019_s0, %s3803_s23 }
  0x11   : > { %3802 = vmatpush3.bf16.msra.mxu1 %v352_v6  ;;  %3496 = vmatpush3.bf16.msra.mxu0 %v352_v6  ;;  %v248_v11 = vld [vmem:[%s3875_s26 + $0x1] sm:$0xff]  ;;  %v249_v12 = vld [vmem:[%s3875_s26 + $0x9] sm:$0xff]  ;;  %v250_v16 = vld [vmem:[%s3875_s26 + $0x19] sm:$0xff] }
  0x12   : > { %v264_v13 = vld [vmem:[%s3875_s26 + $0xc1] sm:$0xff]  ;;  %3529 = vmatprep.subr.bf16.mxu1 %v564_v7  ;;  %3563 = vmatprep.subr.bf16.mxu0 %v826_v8  ;;  %v280_v14 = vpack.c.bf16 %v249_v12, %v248_v11  ;;  %v265_v15 = vld [vmem:[%s3875_s26 + $0xc9] sm:$0xff]  ;;  %v266_v20 = vld [vmem:[%s3875_s26 + $0xd9] sm:$0xff] }
  0x13   : > { %v251_v17 = vld [vmem:[%s3875_s26 + $0x21] sm:$0xff]  ;;  %v3889_v18 = vpack.c.bf16 %v265_v15, %v264_v13  ;;  %v252_v22 = vld [vmem:[%s3875_s26 + $0x31] sm:$0xff]  ;;  %v253_v24 = vld [vmem:[%s3875_s26 + $0x39] sm:$0xff] }
  0x14   : > { %v3891_v19 = vpack.c.bf16 %v251_v17, %v250_v16  ;;  %v267_v21 = vld [vmem:[%s3875_s26 + $0xe1] sm:$0xff]  ;;  %3497 = vmatprep.mubr.msk.bf16.mxu0 %vm298_vm2, %v280_v14  ;;  %v268_v25 = vld [vmem:[%s3875_s26 + $0xf1] sm:$0xff]  ;;  %v269_v26 = vld [vmem:[%s3875_s26 + $0xf9] sm:$0xff]  ;;  %v3909_v28 = vpack.c.bf16 %v253_v24, %v252_v22 }
  0x15   : > { %v3897_v23 = vpack.c.bf16 %v267_v21, %v266_v20  ;;  %3513 = vmatprep.mubr.msk.bf16.mxu1 %vm298_vm2, %v3889_v18  ;;  %v3911_v29 = vpack.c.bf16 %v269_v26, %v268_v25  ;;  %v254_v31 = vld [vmem:[%s3875_s26 + $0x49] sm:$0xff]  ;;  %v255_v32 = vld [vmem:[%s3875_s26 + $0x51] sm:$0xff]  ;;  %v256_v35 = vld [vmem:[%s3875_s26 + $0x61] sm:$0xff] }
  0x16   : > { %3498 = vmatmul.mubr.msk.bf16.vlgmr.msra.gmra.mxu0 %vm298_vm2, %v3891_v19  ;;  %v270_v33 = vld [vmem:[%s3875_s26 + $0x109] sm:$0xff]  ;;  %v271_v34 = vld [vmem:[%s3875_s26 + $0x111] sm:$0xff]  ;;  %v272_v37 = vld [vmem:[%s3875_s26 + $0x121] sm:$0xff]  ;;  %v3931_v39 = vpack.c.bf16 %v255_v32, %v254_v31 }
  0x17   : > { %3514 = vmatmul.mubr.msk.bf16.vlgmr.msra.gmra.mxu1 %vm298_vm2, %v3897_v23  ;;  %3564 = vmatpush3.bf16.msra.mxu0 %v826_v8  ;;  %v257_v36 = vld [vmem:[%s3875_s26 + $0x69] sm:$0xff]  ;;  %v3934_v40 = vpack.c.bf16 %v271_v34, %v270_v33  ;;  %v258_v43 = vld [vmem:[%s3875_s26 + $0x79] sm:$0xff]  ;;  %v259_v44 = vld [vmem:[%s3875_s26 + $0x81] sm:$0xff] }
  0x18   : > { %3530 = vmatpush3.bf16.msra.mxu1 %v564_v7  ;;  %3501 = vmatprep.mubr.msk.bf16.mxu0 %vm298_vm2, %v3909_v28  ;;  %v273_v38 = vld [vmem:[%s3875_s26 + $0x129] sm:$0xff]  ;;  %v3936_v41 = vpack.c.bf16 %v257_v36, %v256_v35  ;;  %v274_v45 = vld [vmem:[%s3875_s26 + $0x139] sm:$0xff]  ;;  %v275_v46 = vld [vmem:[%s3875_s26 + $0x141] sm:$0xff]  ;;  %v3956_v51 = vpack.c.bf16 %v259_v44, %v258_v43 }
  0x19   : > { %3517 = vmatprep.mubr.msk.bf16.mxu1 %vm298_vm2, %v3911_v29  ;;  %3597 = vmatprep.subr.bf16.mxu1 %v3903_v27  ;;  %v3938_v42 = vpack.c.bf16 %v273_v38, %v272_v37  ;;  %v260_v47 = vld [vmem:[%s3875_s26 + $0x91] sm:$0xff]  ;;  %v261_v48 = vld [vmem:[%s3875_s26 + $0x99] sm:$0xff]  ;;  %v3958_v52 = vpack.c.bf16 %v275_v46, %v274_v45  ;;  %v262_v55 = vld [vmem:[%s3875_s26 + $0xa9] sm:$0xff] }
  0x1a   : > { %3631 = vmatprep.subr.bf16.mxu0 %v3914_v30  ;;  %v276_v49 = vld [vmem:[%s3875_s26 + $0x151] sm:$0xff]  ;;  %v277_v50 = vld [vmem:[%s3875_s26 + $0x159] sm:$0xff]  ;;  %v3960_v53 = vpack.c.bf16 %v261_v48, %v260_v47  ;;  %v278_v57 = vld [vmem:[%s3875_s26 + $0x169] sm:$0xff] }
  0x1b   : > { %v3962_v54 = vpack.c.bf16 %v277_v50, %v276_v49  ;;  %v263_v56 = vld [vmem:[%s3875_s26 + $0xb1] sm:$0xff]  ;;  %v727_v59 = vld [vmem:[%s3875_s26 + $0x2] sm:$0xff]  ;;  %v729_v3 = vld [vmem:[%s3875_s26 + $0x1a] sm:$0xff] }
  0x1c   : > { %v279_v58 = vld [vmem:[%s3875_s26 + $0x171] sm:$0xff]  ;;  %v199_v61 = vld [vmem:[%s3875_s26] sm:$0xff]  ;;  %v200_v62 = vld [vmem:[%s3875_s26 + $0x8] sm:$0xff]  ;;  %v3980_v63 = vpack.c.bf16 %v263_v56, %v262_v55 }
  0x1d   : > { %v728_v60 = vld [vmem:[%s3875_s26 + $0xa] sm:$0xff]  ;;  %v3982_v0 = vpack.c.bf16 %v279_v58, %v278_v57  ;;  %v231_v2 = vpack.c.bf16 %v200_v62, %v199_v61  ;;  %v730_v4 = vld [vmem:[%s3875_s26 + $0x22] sm:$0xff]  ;;  %v201_v6 = vld [vmem:[%s3875_s26 + $0x18] sm:$0xff] }
  0x1e   : > { %3502 = vmatmul.mubr.msk.bf16.gmra.mxu0 %vm298_vm2, %v3931_v39  ;;  %v759_v1 = vpack.c.bf16 %v728_v60, %v727_v59  ;;  %v202_v7 = vld [vmem:[%s3875_s26 + $0x20] sm:$0xff]  ;;  %v203_v8 = vld [vmem:[%s3875_s26 + $0x30] sm:$0xff]  ;;  %v204_v9 = vld [vmem:[%s3875_s26 + $0x38] sm:$0xff]  ;;  %v3996_v10 = vpack.c.bf16 %v730_v4, %v729_v3 }
  0x1f   : > { %3518 = vmatmul.mubr.msk.bf16.gmra.mxu1 %vm298_vm2, %v3934_v40  ;;  %3505 = vmatprep.mubr.msk.bf16.mxu0 %vm298_vm2, %v3936_v41  ;;  %v731_v11 = vld [vmem:[%s3875_s26 + $0x32] sm:$0xff]  ;;  %v732_v12 = vld [vmem:[%s3875_s26 + $0x3a] sm:$0xff]  ;;  %v3173_v13 = vld [vmem:[%s5020_s1 + $0xa] sm:$0x3]  ;;  %v4003_v14 = vpack.c.bf16 %v202_v7, %v201_v6  ;;  %v4008_v16 = vpack.c.bf16 %v204_v9, %v203_v8 }
  0x20   : > { %3521 = vmatprep.mubr.msk.bf16.mxu1 %vm298_vm2, %v3938_v42  ;;  %v3222_v15 = vld [vmem:[%s5020_s1 + $0xc] sm:$0x3]  ;;  %v4010_v17 = vpack.c.bf16 %v732_v12, %v731_v11  ;;  %v4013_v20 = vand.u32 %v3173_v13, %v3864_v5  ;;  %v734_v25 = vld [vmem:[%s3875_s26 + $0x52] sm:$0xff]  ;;  %v735_v31 = vld [vmem:[%s3875_s26 + $0x62] sm:$0xff] }
  0x21   : > { %v4018_v21 = vand.u32 %v3222_v15, %v3864_v5  ;;  %v205_v22 = vld [vmem:[%s3875_s26 + $0x48] sm:$0xff]  ;;  %v206_v26 = vld [vmem:[%s3875_s26 + $0x50] sm:$0xff]  ;;  %v207_v33 = vld [vmem:[%s3875_s26 + $0x60] sm:$0xff] }
  0x22   : > { %v733_v24 = vld [vmem:[%s3875_s26 + $0x4a] sm:$0xff]  ;;  %v4040_v34 = vpack.c.bf16 %v206_v26, %v205_v22  ;;  %v209_v37 = vld [vmem:[%s3875_s26 + $0x78] sm:$0xff]  ;;  %v738_v43 = vld [vmem:[%s3875_s26 + $0x82] sm:$0xff] }
  0x23   : > { %v736_v32 = vld [vmem:[%s3875_s26 + $0x6a] sm:$0xff]  ;;  %v737_v38 = vld [vmem:[%s3875_s26 + $0x7a] sm:$0xff]  ;;  %v739_v45 = vld [vmem:[%s3875_s26 + $0x92] sm:$0xff] }
  0x24   : > { %v4042_v35 = vpack.c.bf16 %v736_v32, %v735_v31  ;;  %v210_v44 = vld [vmem:[%s3875_s26 + $0x80] sm:$0xff]  ;;  %v211_v47 = vld [vmem:[%s3875_s26 + $0x90] sm:$0xff]  ;;  %v212_v48 = vld [vmem:[%s3875_s26 + $0x98] sm:$0xff]  ;;  %v4062_v49 = vpack.c.bf16 %v738_v43, %v737_v38 }
  0x25   : > { %v740_v46 = vld [vmem:[%s3875_s26 + $0x9a] sm:$0xff]  ;;  %v4064_v50 = vpack.c.bf16 %v210_v44, %v209_v37  ;;  %v4068_v56 = vpack.c.bf16 %v212_v48, %v211_v47  ;;  %v213_v57 = vld [vmem:[%s3875_s26 + $0xa8] sm:$0xff]  ;;  %v742_v59 = vld [vmem:[%s3875_s26 + $0xb2] sm:$0xff] }
  0x26   : > { %3506 = vmatmul.mubr.msk.bf16.gmra.mxu0 %vm298_vm2, %v3956_v51  ;;  %v4066_v55 = vpack.c.bf16 %v740_v46, %v739_v45  ;;  %v741_v58 = vld [vmem:[%s3875_s26 + $0xaa] sm:$0xff]  ;;  %v743_v61 = vld [vmem:[%s3875_s26 + $0xc2] sm:$0xff]  ;;  %v217_v8 = vld [vmem:[%s3875_s26 + $0xd8] sm:$0xff] }
  0x27   : > { %3522 = vmatmul.mubr.msk.bf16.gmra.mxu1 %vm298_vm2, %v3958_v52  ;;  %3509 = vmatprep.mubr.msk.bf16.mxu0 %vm298_vm2, %v3960_v53  ;;  %v214_v60 = vld [vmem:[%s3875_s26 + $0xb0] sm:$0xff]  ;;  %v4086_v3 = vpack.c.bf16 %v742_v59, %v741_v58  ;;  %v745_v9 = vld [vmem:[%s3875_s26 + $0xda] sm:$0xff]  ;;  %v746_v11 = vld [vmem:[%s3875_s26 + $0xe2] sm:$0xff] }
  0x28   : > { %3525 = vmatprep.mubr.msk.bf16.mxu1 %vm298_vm2, %v3962_v54  ;;  %v744_v62 = vld [vmem:[%s3875_s26 + $0xca] sm:$0xff]  ;;  %v4088_v4 = vpack.c.bf16 %v214_v60, %v213_v57  ;;  %v218_v12 = vld [vmem:[%s3875_s26 + $0xe0] sm:$0xff]  ;;  %v747_v13 = vld [vmem:[%s3875_s26 + $0xf2] sm:$0xff] }
  0x29   : > { %v4090_v6 = vpack.c.bf16 %v744_v62, %v743_v61  ;;  %v748_v15 = vld [vmem:[%s3875_s26 + $0xfa] sm:$0xff]  ;;  %v219_v22 = vld [vmem:[%s3875_s26 + $0xf0] sm:$0xff]  ;;  %v4112_v26 = vpack.c.bf16 %v218_v12, %v217_v8  ;;  %v751_v43 = vld [vmem:[%s3875_s26 + $0x122] sm:$0xff] }
  0x2a   : > { %v4114_v31 = vpack.c.bf16 %v748_v15, %v747_v13  ;;  %v750_v37 = vld [vmem:[%s3875_s26 + $0x112] sm:$0xff]  ;;  %v752_v44 = vld [vmem:[%s3875_s26 + $0x12a] sm:$0xff]  ;;  %v223_v45 = vld [vmem:[%s3875_s26 + $0x120] sm:$0xff] }
  0x2b   : > { %v222_v38 = vld [vmem:[%s3875_s26 + $0x110] sm:$0xff]  ;;  %v224_v46 = vld [vmem:[%s3875_s26 + $0x128] sm:$0xff]  ;;  %v4138_v57 = vpack.c.bf16 %v752_v44, %v751_v43  ;;  %v225_v59 = vld [vmem:[%s3875_s26 + $0x138] sm:$0xff] }
  0x2c   : > { %v4140_v58 = vpack.c.bf16 %v224_v46, %v223_v45  ;;  %v753_v60 = vld [vmem:[%s3875_s26 + $0x13a] sm:$0xff]  ;;  %v754_v61 = vld [vmem:[%s3875_s26 + $0x142] sm:$0xff]  ;;  %v227_v8 = vld [vmem:[%s3875_s26 + $0x150] sm:$0xff] }
  0x2d   : > { %v226_v62 = vld [vmem:[%s3875_s26 + $0x140] sm:$0xff]  ;;  %v3271_v43 = vld [vmem:[%s5020_s1 + $0xe] sm:$0x3]  ;;  %v3320_v44 = vld [vmem:[%s5020_s1 + $0x10] sm:$0x3] }
  0x2e   : > { %3510 = vmatmul.mubr.msk.bf16.gmra.mxu0 %vm298_vm2, %v3980_v63  ;;  %v4160_v12 = vpack.c.bf16 %v226_v62, %v225_v59  ;;  %v2298_v45 = vand.u32 %v3271_v43, %v3864_v5  ;;  %v2592_v46 = vand.u32 %v3320_v44, %v3864_v5  ;;  %v3122_v5 = vld [vmem:[%s3875_s26 + $0x181] sm:$0xff] }
  0x2f   : > { %3526 = vmatmul.mubr.msk.bf16.gmra.mxu1 %vm298_vm2, %v3982_v0  ;;  %3565 = vmatprep.mubr.msk.bf16.mxu0 %vm298_vm2, %v759_v1  ;;  %v215_v1 = vld [vmem:[%s3875_s26 + $0xc0] sm:$0xff] }
  0x30   : > { %3531 = vmatprep.mubr.msk.bf16.mxu1 %vm298_vm2, %v231_v2  ;;  %v216_v2 = vld [vmem:[%s3875_s26 + $0xc8] sm:$0xff] }
  0x31   : > { %v4092_v7 = vpack.c.bf16 %v216_v2, %v215_v1  ;;  %v755_v1 = vld [vmem:[%s3875_s26 + $0x152] sm:$0xff]  ;;  %v756_v2 = vld [vmem:[%s3875_s26 + $0x15a] sm:$0xff]  ;;  %v3171_v59 = vld [vmem:[%s3875_s26 + $0x182] sm:$0xff] }
  0x32   : > { %v4162_v13 = vpack.c.bf16 %v756_v2, %v755_v1 }
  0x36   : > { %3566 = vmatmul.mubr.msk.bf16.vlgmr.msra.gmra.mxu0 %vm298_vm2, %v3996_v10 }
  0x37   : > { %3532 = vmatmul.mubr.msk.bf16.vlgmr.msra.gmra.mxu1 %vm298_vm2, %v4003_v14  ;;  %3632 = vmatpush3.bf16.msra.mxu0 %v3914_v30  ;;  %v208_v30 = vld [vmem:[%s3875_s26 + $0x68] sm:$0xff] }
  0x38   : > { %3598 = vmatpush3.bf16.msra.mxu1 %v3903_v27  ;;  %3535 = vmatprep.mubr.msk.bf16.mxu1 %vm298_vm2, %v4008_v16  ;;  %v4037_v27 = vpack.c.bf16 %v734_v25, %v733_v24  ;;  %v4044_v36 = vpack.c.bf16 %v208_v30, %v207_v33  ;;  %v220_v24 = vld [vmem:[%s3875_s26 + $0xf8] sm:$0xff]  ;;  %v4110_v25 = vpack.c.bf16 %v746_v11, %v745_v9  ;;  %v221_v33 = vld [vmem:[%s3875_s26 + $0x108] sm:$0xff] }
  0x39   : > { %3569 = vmatprep.mubr.msk.bf16.mxu0 %vm298_vm2, %v4010_v17  ;;  %3665 = vmatprep.subr.bf16.mxu1 %v4013_v20  ;;  %v4116_v32 = vpack.c.bf16 %v220_v24, %v219_v22  ;;  %v749_v30 = vld [vmem:[%s3875_s26 + $0x10a] sm:$0xff]  ;;  %v4136_v48 = vpack.c.bf16 %v222_v38, %v221_v33  ;;  %v228_v9 = vld [vmem:[%s3875_s26 + $0x158] sm:$0xff]  ;;  %v4158_v11 = vpack.c.bf16 %v754_v61, %v753_v60 }
  0x3a   : > { %3699 = vmatprep.subr.bf16.mxu0 %v4018_v21  ;;  %v4134_v47 = vpack.c.bf16 %v750_v37, %v749_v30  ;;  %v4164_v15 = vpack.c.bf16 %v228_v9, %v227_v8  ;;  %v757_v22 = vld [vmem:[%s3875_s26 + $0x16a] sm:$0xff]  ;;  %v758_v24 = vld [vmem:[%s3875_s26 + $0x172] sm:$0xff] }
  0x3b   : > { %v229_v33 = vld [vmem:[%s3875_s26 + $0x168] sm:$0xff]  ;;  %v230_v30 = vld [vmem:[%s3875_s26 + $0x170] sm:$0xff]  ;;  %v4178_v37 = vpack.c.bf16 %v758_v24, %v757_v22 }
  0x3c   : > { %v4180_v38 = vpack.c.bf16 %v230_v30, %v229_v33  ;;  %v3172_v60 = vld [vmem:[%s3875_s26 + $0x18a] sm:$0xff] }
  0x3d   : > { %v4366_v8 = vpack.c.bf16 %v3172_v60, %v3171_v59 }
  0x3e   : > { %3570 = vmatmul.mubr.msk.bf16.gmra.mxu0 %vm298_vm2, %v4037_v27 }
  0x3f   : > { %3536 = vmatmul.mubr.msk.bf16.gmra.mxu1 %vm298_vm2, %v4040_v34  ;;  %3573 = vmatprep.mubr.msk.bf16.mxu0 %vm298_vm2, %v4042_v35 }
  0x40   : > { %3539 = vmatprep.mubr.msk.bf16.mxu1 %vm298_vm2, %v4044_v36 }
  0x46   : > { %3574 = vmatmul.mubr.msk.bf16.gmra.mxu0 %vm298_vm2, %v4062_v49 }
  0x47   : > { %3540 = vmatmul.mubr.msk.bf16.gmra.mxu1 %vm298_vm2, %v4064_v50  ;;  %3577 = vmatprep.mubr.msk.bf16.mxu0 %vm298_vm2, %v4066_v55 }
  0x48   : > { %3543 = vmatprep.mubr.msk.bf16.mxu1 %vm298_vm2, %v4068_v56 }
  0x4e   : > { %3578 = vmatmul.mubr.msk.bf16.gmra.mxu0 %vm298_vm2, %v4086_v3 }
  0x4f   : > { %3544 = vmatmul.mubr.msk.bf16.gmra.mxu1 %vm298_vm2, %v4088_v4  ;;  %3581 = vmatprep.mubr.msk.bf16.mxu0 %vm298_vm2, %v4090_v6 }
  0x50   : > { %3547 = vmatprep.mubr.msk.bf16.mxu1 %vm298_vm2, %v4092_v7 }
  0x56   : > { %3582 = vmatmul.mubr.msk.bf16.gmra.mxu0 %vm298_vm2, %v4110_v25 }
  0x57   : > { %3548 = vmatmul.mubr.msk.bf16.gmra.mxu1 %vm298_vm2, %v4112_v26  ;;  %3585 = vmatprep.mubr.msk.bf16.mxu0 %vm298_vm2, %v4114_v31 }
  0x58   : > { %3551 = vmatprep.mubr.msk.bf16.mxu1 %vm298_vm2, %v4116_v32 }
  0x5e   : > { %3586 = vmatmul.mubr.msk.bf16.gmra.mxu0 %vm298_vm2, %v4134_v47 }
  0x5f   : > { %3552 = vmatmul.mubr.msk.bf16.gmra.mxu1 %vm298_vm2, %v4136_v48  ;;  %3589 = vmatprep.mubr.msk.bf16.mxu0 %vm298_vm2, %v4138_v57 }
  0x60   : > { %3555 = vmatprep.mubr.msk.bf16.mxu1 %vm298_vm2, %v4140_v58 }
  0x66   : > { %3590 = vmatmul.mubr.msk.bf16.gmra.mxu0 %vm298_vm2, %v4158_v11 }
  0x67   : > { %3556 = vmatmul.mubr.msk.bf16.gmra.mxu1 %vm298_vm2, %v4160_v12  ;;  %3593 = vmatprep.mubr.msk.bf16.mxu0 %vm298_vm2, %v4162_v13 }
  0x68   : > { %3559 = vmatprep.mubr.msk.bf16.mxu1 %vm298_vm2, %v4164_v15 }
  0x6e   : > { %3594 = vmatmul.mubr.msk.bf16.gmra.mxu0 %vm298_vm2, %v4178_v37 }
  0x6f   : > { %3560 = vmatmul.mubr.msk.bf16.gmra.mxu1 %vm298_vm2, %v4180_v38  ;;  %3633 = vmatprep.mubr.msk.bf16.mxu0 %vm298_vm2, %v3891_v19  ;;  %v3073_v19 = vld [vmem:[%s3875_s26 + $0x180] sm:$0xff] }
  0x70   : > { %3599 = vmatprep.mubr.msk.bf16.mxu1 %vm298_vm2, %v4003_v14 }
  0x76   : > { %3634 = vmatmul.mubr.msk.bf16.vlgmr.msra.gmra.mxu0 %vm298_vm2, %v3909_v28 }
  0x77   : > { %3600 = vmatmul.mubr.msk.bf16.vlgmr.msra.gmra.mxu1 %vm298_vm2, %v4008_v16  ;;  %3700 = vmatpush3.bf16.msra.mxu0 %v4018_v21 }
  0x78   : > { %3666 = vmatpush3.bf16.msra.mxu1 %v4013_v20  ;;  %3603 = vmatprep.mubr.msk.bf16.mxu1 %vm298_vm2, %v4040_v34 }
  0x79   : > { %3637 = vmatprep.mubr.msk.bf16.mxu0 %vm298_vm2, %v3931_v39  ;;  %3733 = vmatprep.subr.bf16.mxu1 %v2298_v45 }
  0x7a   : > { %3767 = vmatprep.subr.bf16.mxu0 %v2592_v46 }
  0x7e   : > { %3638 = vmatmul.mubr.msk.bf16.gmra.mxu0 %vm298_vm2, %v3936_v41 }
  0x7f   : > { %3604 = vmatmul.mubr.msk.bf16.gmra.mxu1 %vm298_vm2, %v4044_v36  ;;  %3641 = vmatprep.mubr.msk.bf16.mxu0 %vm298_vm2, %v3956_v51 }
  0x80   : > { %3607 = vmatprep.mubr.msk.bf16.mxu1 %vm298_vm2, %v4064_v50 }
  0x86   : > { %3642 = vmatmul.mubr.msk.bf16.gmra.mxu0 %vm298_vm2, %v3960_v53 }
  0x87   : > { %3608 = vmatmul.mubr.msk.bf16.gmra.mxu1 %vm298_vm2, %v4068_v56  ;;  %3645 = vmatprep.mubr.msk.bf16.mxu0 %vm298_vm2, %v3980_v63 }
  0x88   : > { %3611 = vmatprep.mubr.msk.bf16.mxu1 %vm298_vm2, %v4088_v4 }
  0x8e   : > { %3646 = vmatmul.mubr.msk.bf16.gmra.mxu0 %vm298_vm2, %v3889_v18  ;;  %v3123_v18 = vld [vmem:[%s3875_s26 + $0x189] sm:$0xff] }
  0x8f   : > { %3612 = vmatmul.mubr.msk.bf16.gmra.mxu1 %vm298_vm2, %v4092_v7  ;;  %3649 = vmatprep.mubr.msk.bf16.mxu0 %vm298_vm2, %v3897_v23  ;;  %v3074_v23 = vld [vmem:[%s3875_s26 + $0x188] sm:$0xff] }
  0x90   : > { %3615 = vmatprep.mubr.msk.bf16.mxu1 %vm298_vm2, %v4112_v26 }
  0x96   : > { %3650 = vmatmul.mubr.msk.bf16.gmra.mxu0 %vm298_vm2, %v3911_v29  ;;  %v4260_v29 = vpack.c.bf16 %v3123_v18, %v3122_v5  ;;  %v3247_v5 = vld [vmem:[%s3875_s26 + $0x91] sm:$0xff]  ;;  %v3248_v18 = vld [vmem:[%s3875_s26 + $0x99] sm:$0xff] }
  0x97   : > { %3616 = vmatmul.mubr.msk.bf16.gmra.mxu1 %vm298_vm2, %v4116_v32  ;;  %3653 = vmatprep.mubr.msk.bf16.mxu0 %vm298_vm2, %v3934_v40  ;;  %v1069_v40 = vpack.c.bf16 %v3074_v23, %v3073_v19 }
  0x98   : > { %3619 = vmatprep.mubr.msk.bf16.mxu1 %vm298_vm2, %v4136_v48 }
  0x9e   : > { %3654 = vmatmul.mubr.msk.bf16.gmra.mxu0 %vm298_vm2, %v3938_v42 }
  0x9f   : > { %3620 = vmatmul.mubr.msk.bf16.gmra.mxu1 %vm298_vm2, %v4140_v58  ;;  %3657 = vmatprep.mubr.msk.bf16.mxu0 %vm298_vm2, %v3958_v52 }
  0xa0   : > { %3623 = vmatprep.mubr.msk.bf16.mxu1 %vm298_vm2, %v4160_v12 }
  0xa6   : > { %3658 = vmatmul.mubr.msk.bf16.gmra.mxu0 %vm298_vm2, %v3962_v54 }
  0xa7   : > { %3624 = vmatmul.mubr.msk.bf16.gmra.mxu1 %vm298_vm2, %v4164_v15  ;;  %3661 = vmatprep.mubr.msk.bf16.mxu0 %vm298_vm2, %v3982_v0 }
  0xa8   : > { %3627 = vmatprep.mubr.msk.bf16.mxu1 %vm298_vm2, %v4180_v38 }
  0xae   : > { %3662 = vmatmul.mubr.msk.bf16.gmra.mxu0 %vm298_vm2, %v4260_v29 }
  0xaf   : > { %3628 = vmatmul.mubr.msk.bf16.gmra.mxu1 %vm298_vm2, %v1069_v40  ;;  %3701 = vmatprep.mubr.msk.bf16.mxu0 %vm298_vm2, %v4008_v16 }
  0xb0   : > { %3667 = vmatprep.mubr.msk.bf16.mxu1 %vm298_vm2, %v3996_v10 }
  0xb6   : > { %3702 = vmatmul.mubr.msk.bf16.vlgmr.msra.gmra.mxu0 %vm298_vm2, %v4040_v34 }
  0xb7   : > { %3668 = vmatmul.mubr.msk.bf16.vlgmr.msra.gmra.mxu1 %vm298_vm2, %v4010_v17  ;;  %3768 = vmatpush3.bf16.msra.mxu0 %v2592_v46 }
  0xb8   : > { %3734 = vmatpush3.bf16.msra.mxu1 %v2298_v45  ;;  %3671 = vmatprep.mubr.msk.bf16.mxu1 %vm298_vm2, %v4037_v27 }
  0xb9   : > { %3705 = vmatprep.mubr.msk.bf16.mxu0 %vm298_vm2, %v4044_v36 }
  0xbe   : > { %3706 = vmatmul.mubr.msk.bf16.gmra.mxu0 %vm298_vm2, %v4064_v50 }
  0xbf   : > { %3672 = vmatmul.mubr.msk.bf16.gmra.mxu1 %vm298_vm2, %v4042_v35  ;;  %3709 = vmatprep.mubr.msk.bf16.mxu0 %vm298_vm2, %v4068_v56 }
  0xc0   : > { %3675 = vmatprep.mubr.msk.bf16.mxu1 %vm298_vm2, %v4062_v49 }
  0xc6   : > { %3710 = vmatmul.mubr.msk.bf16.gmra.mxu0 %vm298_vm2, %v4088_v4 }
  0xc7   : > { %3676 = vmatmul.mubr.msk.bf16.gmra.mxu1 %vm298_vm2, %v4066_v55  ;;  %3713 = vmatprep.mubr.msk.bf16.mxu0 %vm298_vm2, %v4092_v7 }
  0xc8   : > { %3679 = vmatprep.mubr.msk.bf16.mxu1 %vm298_vm2, %v4086_v3 }
  0xce   : > { %3714 = vmatmul.mubr.msk.bf16.gmra.mxu0 %vm298_vm2, %v4112_v26 }
  0xcf   : > { %3680 = vmatmul.mubr.msk.bf16.gmra.mxu1 %vm298_vm2, %v4090_v6  ;;  %3717 = vmatprep.mubr.msk.bf16.mxu0 %vm298_vm2, %v4116_v32  ;;  %v3220_v32 = vld [vmem:[%s3875_s26 + $0x198] sm:$0xff] }
  0xd0   : > { %3683 = vmatprep.mubr.msk.bf16.mxu1 %vm298_vm2, %v4110_v25 }
  0xd6   : > { %v3499_v42 = vpop.f32.mrf.mxu0  ;;  %3718 = vmatmul.mubr.msk.bf16.gmra.mxu0 %vm298_vm2, %v4136_v48  ;;  %v3221_v48 = vld [vmem:[%s3875_s26 + $0x1a0] sm:$0xff] }
  0xd7   : > { %v4303_v52 = vpop.f32.mrf.mxu1  ;;  %3684 = vmatmul.mubr.msk.bf16.gmra.mxu1 %vm298_vm2, %v4114_v31  ;;  %3721 = vmatprep.mubr.msk.bf16.mxu0 %vm298_vm2, %v4140_v58  ;;  %v1952_v1 = vpack.c.bf16 %v3221_v48, %v3220_v32 }
  0xd8   : > { %v388_v53 = vpop.f32.mrf.mxu0  ;;  %3687 = vmatprep.mubr.msk.bf16.mxu1 %vm298_vm2, %v4134_v47 }
  0xd9   : > { %v4311_v54 = vpop.f32.mrf.mxu1 }
  0xda   : > { %v3500_v63 = vpop.f32.mrf.mxu0 }
  0xdb   : > { %v4313_v0 = vpop.f32.mrf.mxu1 }
  0xdc   : > { %v4315_v10 = vpop.f32.mrf.mxu0 }
  0xdd   : > { %v4317_v14 = vpop.f32.mrf.mxu1 }
  0xde   : > { %v4319_v16 = vpop.f32.mrf.mxu0  ;;  %3722 = vmatmul.mubr.msk.bf16.gmra.mxu0 %vm298_vm2, %v4160_v12 }
  0xdf   : > { %v4323_v20 = vpop.f32.mrf.mxu1  ;;  %3688 = vmatmul.mubr.msk.bf16.gmra.mxu1 %vm298_vm2, %v4138_v57  ;;  %3725 = vmatprep.mubr.msk.bf16.mxu0 %vm298_vm2, %v4164_v15 }
  0xe0   : > { %v4329_v21 = vpop.f32.mrf.mxu0  ;;  %3691 = vmatprep.mubr.msk.bf16.mxu1 %vm298_vm2, %v4158_v11 }
  0xe1   : > { %v4333_v34 = vpop.f32.mrf.mxu1 }
  0xe2   : > { %v4335_v36 = vpop.f32.mrf.mxu0 }
  0xe3   : > { %v4337_v50 = vpop.f32.mrf.mxu1 }
  0xe4   : > { %v4339_v56 = vpop.f32.mrf.mxu0 }
  0xe5   : > { %v4341_v4 = vpop.f32.mrf.mxu1 }
  0xe6   : > { %v4343_v7 = vpop.f32.mrf.mxu0  ;;  %3726 = vmatmul.mubr.msk.bf16.gmra.mxu0 %vm298_vm2, %v4180_v38 }
  0xe7   : > { %v4347_v26 = vpop.f32.mrf.mxu1  ;;  %3692 = vmatmul.mubr.msk.bf16.gmra.mxu1 %vm298_vm2, %v4162_v13  ;;  %3729 = vmatprep.mubr.msk.bf16.mxu0 %vm298_vm2, %v1069_v40 }
  0xe8   : > { %v4354_v58 = vpop.f32.mrf.mxu0  ;;  %3695 = vmatprep.mubr.msk.bf16.mxu1 %vm298_vm2, %v4178_v37 }
  0xe9   : > { %v4360_v61 = vpop.f32.mrf.mxu1 }
  0xea   : > { %v4362_v62 = vpop.f32.mrf.mxu0 }
  0xeb   : > { %v4364_v2 = vpop.f32.mrf.mxu1 }
  0xec   : > { %v4368_v9 = vpop.f32.mrf.mxu0 }
  0xed   : > { %v4370_v12 = vpop.f32.mrf.mxu1 }
  0xee   : > { %v4372_v15 = vpop.f32.mrf.mxu0  ;;  %3730 = vmatmul.mubr.msk.bf16.gmra.mxu0 %vm298_vm2, %v1952_v1 }
  0xef   : > { %v4375_v22 = vpop.f32.mrf.mxu1  ;;  %3696 = vmatmul.mubr.msk.bf16.gmra.mxu1 %vm298_vm2, %v4366_v8  ;;  %3769 = vmatprep.mubr.msk.bf16.mxu0 %vm298_vm2, %v4010_v17 }
  0xf0   : > { %v4381_v24 = vpop.f32.mrf.mxu0  ;;  %3735 = vmatprep.mubr.msk.bf16.mxu1 %vm298_vm2, %v3909_v28 }
  0xf1   : > { %v4385_v33 = vpop.f32.mrf.mxu1 }
  0xf2   : > { %v4387_v30 = vpop.f32.mrf.mxu0 }
  0xf3   : > { %v4389_v37 = vpop.f32.mrf.mxu1 }
  0xf4   : > { %v4391_v38 = vpop.f32.mrf.mxu0 }
  0xf5   : > { %v4393_v43 = vpop.f32.mrf.mxu1 }
  0xf6   : > { %v3567_v44 = vpop.f32.mrf.mxu0  ;;  %3770 = vmatmul.mubr.msk.bf16.vlgmr.msra.gmra.mxu0 %vm298_vm2, %v4037_v27 }
  0xf7   : > { %v3533_v17 = vpop.f32.mrf.mxu1  ;;  %3736 = vmatmul.mubr.msk.bf16.vlgmr.msra.gmra.mxu1 %vm298_vm2, %v3931_v39  ;;  %3773 = vmatprep.mubr.msk.bf16.mxu0 %vm298_vm2, %v4042_v35  ;;  %v2235_v35 = vpack.c.bf16 %v3248_v18, %v3247_v5 }
  0xf8   : > { %v609_v28 = vadd.f32 %v3533_v17, %v3499_v42  ;;  %v862_v45 = vpop.f32.mrf.mxu0  ;;  %3739 = vmatprep.mubr.msk.bf16.mxu1 %vm298_vm2, %v3936_v41  ;;  %v3249_v17 = vld [vmem:[%s3875_s26 + $0xa9] sm:$0xff] }
  0xf9   : > { %v600_v46 = vpop.f32.mrf.mxu1 }
  0xfa   : > { %v4405_v19 = vadd.f32 %v3567_v44, %v609_v28  ;;  %v601_v23 = vadd.f32 %v600_v46, %v388_v53  ;;  %v3568_v40 = vpop.f32.mrf.mxu0  ;;  %v3252_v46 = vld [vmem:[%s3875_s26 + $0xc9] sm:$0xff] }
  0xfb   : > { %v3534_v27 = vpop.f32.mrf.mxu1 }
  0xfc   : > { %v4407_v32 = vadd.f32 %v862_v45, %v601_v23  ;;  %v612_v39 = vadd.f32 %v3534_v27, %v3500_v63  ;;  %v865_v48 = vpop.f32.mrf.mxu0  ;;  %v3251_v45 = vld [vmem:[%s3875_s26 + $0xc1] sm:$0xff] }
  0xfd   : > { %v603_v42 = vpop.f32.mrf.mxu1  ;;  %v2237_v27 = vpack.c.bf16 %v3252_v46, %v3251_v45 }
  0xfe   : > { %v4409_v59 = vadd.f32 %v3568_v40, %v612_v39  ;;  %v604_v41 = vadd.f32 %v603_v42, %v4315_v10  ;;  %v3571_v60 = vpop.f32.mrf.mxu0  ;;  %3774 = vmatmul.mubr.msk.bf16.gmra.mxu0 %vm298_vm2, %v4062_v49  ;;  %v3250_v10 = vld [vmem:[%s3875_s26 + $0xb1] sm:$0xff] }
  0xff   : > { %v3537_v53 = vpop.f32.mrf.mxu1  ;;  %3740 = vmatmul.mubr.msk.bf16.gmra.mxu1 %vm298_vm2, %v3956_v51  ;;  %3777 = vmatprep.mubr.msk.bf16.mxu0 %vm298_vm2, %v4066_v55  ;;  %v2236_v23 = vpack.c.bf16 %v3250_v10, %v3249_v17  ;;  %v3256_v17 = vld [vmem:[%s3875_s26 + $0xf9] sm:$0xff] }
 0x100   : > { %v4418_v63 = vadd.f32 %v865_v48, %v604_v41  ;;  %v625_v1 = vadd.f32 %v3537_v53, %v4319_v16  ;;  %v878_v44 = vpop.f32.mrf.mxu0  ;;  %3743 = vmatprep.mubr.msk.bf16.mxu1 %vm298_vm2, %v2235_v35  ;;  %v3253_v53 = vld [vmem:[%s3875_s26 + $0xd9] sm:$0xff] }
 0x101   : > { %v616_v28 = vpop.f32.mrf.mxu1 }
 0x102   : > { %v4426_v49 = vadd.f32 %v3571_v60, %v625_v1  ;;  %v617_v5 = vadd.f32 %v616_v28, %v4329_v21  ;;  %v3572_v51 = vpop.f32.mrf.mxu0  ;;  %v3254_v1 = vld [vmem:[%s3875_s26 + $0xe1] sm:$0xff] }
 0x103   : > { %v3538_v18 = vpop.f32.mrf.mxu1  ;;  %v2238_v46 = vpack.c.bf16 %v3254_v1, %v3253_v53 }
 0x104   : > { %v4429_v55 = vadd.f32 %v878_v44, %v617_v5  ;;  %v628_v16 = vadd.f32 %v3538_v18, %v4335_v36  ;;  %v881_v40 = vpop.f32.mrf.mxu0  ;;  %v3255_v44 = vld [vmem:[%s3875_s26 + $0xf1] sm:$0xff] }
 0x105   : > { %v619_v39 = vpop.f32.mrf.mxu1 }
 0x106   : > { %v4432_v48 = vadd.f32 %v3572_v51, %v628_v16  ;;  %v620_v35 = vadd.f32 %v619_v39, %v4339_v56  ;;  %v3575_v42 = vpop.f32.mrf.mxu0  ;;  %3778 = vmatmul.mubr.msk.bf16.gmra.mxu0 %vm298_vm2, %v4086_v3  ;;  %v2239_v51 = vpack.c.bf16 %v3256_v17, %v3255_v44 }
 0x107   : > { %v3541_v21 = vpop.f32.mrf.mxu1  ;;  %3744 = vmatmul.mubr.msk.bf16.gmra.mxu1 %vm298_vm2, %v2236_v23  ;;  %3781 = vmatprep.mubr.msk.bf16.mxu0 %vm298_vm2, %v4090_v6 }
 0x108   : > { %v4440_v36 = vadd.f32 %v881_v40, %v620_v35  ;;  %v641_v41 = vadd.f32 %v3541_v21, %v4343_v7  ;;  %v894_v60 = vpop.f32.mrf.mxu0  ;;  %3747 = vmatprep.mubr.msk.bf16.mxu1 %vm298_vm2, %v2237_v27  ;;  %v3257_v35 = vld [vmem:[%s3875_s26 + $0x109] sm:$0xff]  ;;  %v3259_v21 = vld [vmem:[%s3875_s26 + $0x121] sm:$0xff] }
 0x109   : > { %v632_v56 = vpop.f32.mrf.mxu1 }
 0x10a   : > { %v4448_v10 = vadd.f32 %v3575_v42, %v641_v41  ;;  %v633_v3 = vadd.f32 %v632_v56, %v4354_v58  ;;  %v3576_v28 = vpop.f32.mrf.mxu0  ;;  %v3258_v42 = vld [vmem:[%s3875_s26 + $0x111] sm:$0xff]  ;;  %v3260_v41 = vld [vmem:[%s3875_s26 + $0x129] sm:$0xff] }
 0x10b   : > { %v3542_v45 = vpop.f32.mrf.mxu1  ;;  %v2240_v56 = vpack.c.bf16 %v3258_v42, %v3257_v35  ;;  %v2241_v17 = vpack.c.bf16 %v3260_v41, %v3259_v21 }
 0x10c   : > { %v4451_v6 = vadd.f32 %v894_v60, %v633_v3  ;;  %v644_v7 = vadd.f32 %v3542_v45, %v4362_v62  ;;  %v897_v5 = vpop.f32.mrf.mxu0 }
 0x10d   : > { %v635_v18 = vpop.f32.mrf.mxu1 }
 0x10e   : > { %v4454_v23 = vadd.f32 %v3576_v28, %v644_v7  ;;  %v636_v16 = vadd.f32 %v635_v18, %v4368_v9  ;;  %v3579_v40 = vpop.f32.mrf.mxu0  ;;  %3782 = vmatmul.mubr.msk.bf16.gmra.mxu0 %vm298_vm2, %v4110_v25  ;;  %v3262_v18 = vld [vmem:[%s3875_s26 + $0x141] sm:$0xff] }
 0x10f   : > { %v3545_v58 = vpop.f32.mrf.mxu1  ;;  %3748 = vmatmul.mubr.msk.bf16.gmra.mxu1 %vm298_vm2, %v2238_v46  ;;  %3785 = vmatprep.mubr.msk.bf16.mxu0 %vm298_vm2, %v4114_v31 }
 0x110   : > { %v4462_v62 = vadd.f32 %v897_v5, %v636_v16  ;;  %v657_v27 = vadd.f32 %v3545_v58, %v4372_v15  ;;  %v910_v39 = vpop.f32.mrf.mxu0  ;;  %3751 = vmatprep.mubr.msk.bf16.mxu1 %vm298_vm2, %v2239_v51  ;;  %v3261_v51 = vld [vmem:[%s3875_s26 + $0x139] sm:$0xff]  ;;  %v3263_v16 = vld [vmem:[%s3875_s26 + $0x151] sm:$0xff] }
 0x111   : > { %v648_v9 = vpop.f32.mrf.mxu1 }
 0x112   : > { %v4470_v60 = vadd.f32 %v3579_v40, %v657_v27  ;;  %v649_v25 = vadd.f32 %v648_v9, %v4381_v24  ;;  %v3580_v53 = vpop.f32.mrf.mxu0  ;;  %v3264_v40 = vld [vmem:[%s3875_s26 + $0x159] sm:$0xff] }
 0x113   : > { %v3546_v1 = vpop.f32.mrf.mxu1  ;;  %v2243_v9 = vpack.c.bf16 %v3264_v40, %v3263_v16 }
 0x114   : > { %v4473_v31 = vadd.f32 %v910_v39, %v649_v25  ;;  %v660_v15 = vadd.f32 %v3546_v1, %v4387_v30  ;;  %v913_v44 = vpop.f32.mrf.mxu0  ;;  %v2242_v39 = vpack.c.bf16 %v3262_v18, %v3261_v51  ;;  %v3315_v1 = vld [vmem:[%s3875_s26 + $0x172] sm:$0xff] }
 0x115   : > { %v651_v3 = vpop.f32.mrf.mxu1 }
 0x116   : > { %v4476_v28 = vadd.f32 %v3580_v53, %v660_v15  ;;  %v652_v45 = vadd.f32 %v651_v3, %v4391_v38  ;;  %v3583_v46 = vpop.f32.mrf.mxu0  ;;  %3786 = vmatmul.mubr.msk.bf16.gmra.mxu0 %vm298_vm2, %v4134_v47 }
 0x117   : > { %v3549_v24 = vpop.f32.mrf.mxu1  ;;  %3752 = vmatmul.mubr.msk.bf16.gmra.mxu1 %vm298_vm2, %v2240_v56  ;;  %3789 = vmatprep.mubr.msk.bf16.mxu0 %vm298_vm2, %v4138_v57 }
 0x118   : > { %v4484_v30 = vadd.f32 %v913_v44, %v652_v45  ;;  %v673_v7 = vadd.f32 %v3549_v24, %v4303_v52  ;;  %v926_v5 = vpop.f32.mrf.mxu0  ;;  %3755 = vmatprep.mubr.msk.bf16.mxu1 %vm298_vm2, %v2241_v17  ;;  %v3266_v17 = vld [vmem:[%s3875_s26 + $0x171] sm:$0xff] }
 0x119   : > { %v664_v38 = vpop.f32.mrf.mxu1 }
 0x11a   : > { %v4492_v58 = vadd.f32 %v3583_v46, %v673_v7  ;;  %v665_v47 = vadd.f32 %v664_v38, %v4311_v54  ;;  %v3584_v27 = vpop.f32.mrf.mxu0 }
 0x11b   : > { %v3550_v57 = vpop.f32.mrf.mxu1 }
 0x11c   : > { %v4495_v35 = vadd.f32 %v926_v5, %v665_v47  ;;  %v676_v52 = vadd.f32 %v3550_v57, %v4313_v0  ;;  %v929_v42 = vpop.f32.mrf.mxu0  ;;  %v3314_v0 = vld [vmem:[%s3875_s26 + $0x16a] sm:$0xff]  ;;  %v3318_v47 = vld [vmem:[%s3875_s26 + $0x19a] sm:$0xff] }
 0x11d   : > { %v667_v21 = vpop.f32.mrf.mxu1 }
 0x11e   : > { %v4498_v41 = vadd.f32 %v3584_v27, %v676_v52  ;;  %v668_v25 = vadd.f32 %v667_v21, %v4317_v14  ;;  %v3587_v53 = vpop.f32.mrf.mxu0  ;;  %3790 = vmatmul.mubr.msk.bf16.gmra.mxu0 %vm298_vm2, %v4158_v11  ;;  %v3265_v14 = vld [vmem:[%s3875_s26 + $0x169] sm:$0xff]  ;;  %v3270_v52 = vld [vmem:[%s3875_s26 + $0x1a1] sm:$0xff] }
 0x11f   : > { %v3553_v54 = vpop.f32.mrf.mxu1  ;;  %3756 = vmatmul.mubr.msk.bf16.gmra.mxu1 %vm298_vm2, %v2242_v39  ;;  %3793 = vmatprep.mubr.msk.bf16.mxu0 %vm298_vm2, %v4162_v13  ;;  %v2538_v13 = vpack.c.bf16 %v3315_v1, %v3314_v0  ;;  %v2244_v7 = vpack.c.bf16 %v3266_v17, %v3265_v14  ;;  %v3319_v27 = vld [vmem:[%s3875_s26 + $0x1a2] sm:$0xff] }
 0x120   : > { %v4508_v56 = vadd.f32 %v929_v42, %v668_v25  ;;  %v689_v15 = vadd.f32 %v3553_v54, %v4323_v20  ;;  %v942_v44 = vpop.f32.mrf.mxu0  ;;  %3759 = vmatprep.mubr.msk.bf16.mxu1 %vm298_vm2, %v2243_v9 }
 0x121   : > { %v680_v3 = vpop.f32.mrf.mxu1 }
 0x122   : > { %v4514_v45 = vadd.f32 %v3587_v53, %v689_v15  ;;  %v681_v11 = vadd.f32 %v680_v3, %v4333_v34  ;;  %v3588_v46 = vpop.f32.mrf.mxu0  ;;  %v2540_v53 = vpack.c.bf16 %v3319_v27, %v3318_v47 }
 0x123   : > { %v3554_v24 = vpop.f32.mrf.mxu1 }
 0x124   : > { %v4517_v5 = vadd.f32 %v942_v44, %v681_v11  ;;  %v692_v20 = vadd.f32 %v3554_v24, %v4337_v50  ;;  %v945_v51 = vpop.f32.mrf.mxu0 }
 0x125   : > { %v683_v18 = vpop.f32.mrf.mxu1 }
 0x126   : > { %v4520_v38 = vadd.f32 %v3588_v46, %v692_v20  ;;  %v684_v16 = vadd.f32 %v683_v18, %v4341_v4  ;;  %v3591_v40 = vpop.f32.mrf.mxu0  ;;  %3794 = vmatmul.mubr.msk.bf16.gmra.mxu0 %vm298_vm2, %v2538_v13  ;;  %v3269_v4 = vld [vmem:[%s3875_s26 + $0x199] sm:$0xff] }
 0x127   : > { %v3557_v34 = vpop.f32.mrf.mxu1  ;;  %3760 = vmatmul.mubr.msk.bf16.gmra.mxu1 %vm298_vm2, %v2244_v7  ;;  %3797 = vmatprep.mubr.msk.bf16.mxu0 %vm298_vm2, %v4366_v8  ;;  %v2246_v54 = vpack.c.bf16 %v3270_v52, %v3269_v4 }
 0x128   : > { %v4529_v50 = vadd.f32 %v945_v51, %v684_v16  ;;  %v705_v57 = vadd.f32 %v3557_v34, %v4347_v26  ;;  %v958_v39 = vpop.f32.mrf.mxu0  ;;  %3763 = vmatprep.mubr.msk.bf16.mxu1 %vm298_vm2, %v4260_v29 }
 0x129   : > { %v696_v42 = vpop.f32.mrf.mxu1 }
 0x12a   : > { %v4536_v9 = vadd.f32 %v3591_v40, %v705_v57  ;;  %v697_v21 = vadd.f32 %v696_v42, %v4360_v61  ;;  %v3592_v25 = vpop.f32.mrf.mxu0 }
 0x12b   : > { %v3558_v8 = vpop.f32.mrf.mxu1 }
 0x12c   : > { %v4539_v0 = vadd.f32 %v958_v39, %v697_v21  ;;  %v708_v1 = vadd.f32 %v3558_v8, %v4364_v2  ;;  %v961_v26 = vpop.f32.mrf.mxu0 }
 0x12d   : > { %v699_v15 = vpop.f32.mrf.mxu1 }
 0x12e   : > { %v4542_v44 = vadd.f32 %v3592_v25, %v708_v1  ;;  %v700_v29 = vadd.f32 %v699_v15, %v4370_v12  ;;  %v3595_v14 = vpop.f32.mrf.mxu0  ;;  %3798 = vmatmul.mubr.msk.bf16.gmra.mxu0 %vm298_vm2, %v2540_v53 }
 0x12f   : > { %v3561_v17 = vpop.f32.mrf.mxu1  ;;  %3764 = vmatmul.mubr.msk.bf16.gmra.mxu1 %vm298_vm2, %v2246_v54 }
 0x130   : > { %v4547_v61 = vadd.f32 %v961_v26, %v700_v29  ;;  %v721_v3 = vadd.f32 %v3561_v17, %v4375_v22  ;;  %v974_v11 = vpop.f32.mrf.mxu0 }
 0x131   : > { %v712_v46 = vpop.f32.mrf.mxu1 }
 0x132   : > { %v4550_v13 = vadd.f32 %v3595_v14, %v721_v3  ;;  %v713_v2 = vadd.f32 %v712_v46, %v4385_v33  ;;  %v3596_v24 = vpop.f32.mrf.mxu0 }
 0x133   : > { %v3562_v7 = vpop.f32.mrf.mxu1 }
 0x134   : > { %v4553_v20 = vadd.f32 %v974_v11, %v713_v2  ;;  %v724_v12 = vadd.f32 %v3562_v7, %v4389_v37  ;;  %v977_v51 = vpop.f32.mrf.mxu0 }
 0x135   : > { %v715_v18 = vpop.f32.mrf.mxu1 }
 0x136   : > { %v4556_v16 = vadd.f32 %v3596_v24, %v724_v12  ;;  %v716_v40 = vadd.f32 %v715_v18, %v4393_v43  ;;  %v3635_v34 = vpop.f32.mrf.mxu0 }
 0x137   : > { %v3601_v22 = vpop.f32.mrf.mxu1 }
 0x138   : > { %v4559_v47 = vadd.f32 %v977_v51, %v716_v40  ;;  %v1286_v27 = vadd.f32 %v3601_v22, %v4405_v19  ;;  %v1451_v57 = vpop.f32.mrf.mxu0 }
 0x139   : > { %v1157_v33 = vpop.f32.mrf.mxu1 }
 0x13a   : > { %v4562_v39 = vadd.f32 %v3635_v34, %v1286_v27  ;;  %v1284_v4 = vadd.f32 %v1157_v33, %v4407_v32  ;;  %v3636_v52 = vpop.f32.mrf.mxu0 }
 0x13b   : > { %v3602_v37 = vpop.f32.mrf.mxu1 }
 0x13c   : > { %v4565_v42 = vadd.f32 %v1451_v57, %v1284_v4  ;;  %v1287_v21 = vadd.f32 %v3602_v37, %v4409_v59  ;;  %v1454_v25 = vpop.f32.mrf.mxu0 }
 0x13d   : > { %v1160_v43 = vpop.f32.mrf.mxu1 }
 0x13e   : > { %v4568_v53 = vadd.f32 %v3636_v52, %v1287_v21  ;;  %v1285_v8 = vadd.f32 %v1160_v43, %v4418_v63  ;;  %v3639_v54 = vpop.f32.mrf.mxu0 }
 0x13f   : > { %v3605_v19 = vpop.f32.mrf.mxu1 }
 0x140   : > { %v4571_v1 = vadd.f32 %v1454_v25, %v1285_v8  ;;  %v1290_v26 = vadd.f32 %v3605_v19, %v4426_v49  ;;  %v1467_v15 = vpop.f32.mrf.mxu0 }
 0x141   : > { %v1173_v32 = vpop.f32.mrf.mxu1 }
 0x142   : > { %v4574_v29 = vadd.f32 %v3639_v54, %v1290_v26  ;;  %v1288_v14 = vadd.f32 %v1173_v32, %v4429_v55  ;;  %v3640_v17 = vpop.f32.mrf.mxu0 }
 0x143   : > { %v3606_v59 = vpop.f32.mrf.mxu1 }
 0x144   : > { %v4577_v3 = vadd.f32 %v1467_v15, %v1288_v14  ;;  %v1291_v11 = vadd.f32 %v3606_v59, %v4432_v48  ;;  %v1470_v46 = vpop.f32.mrf.mxu0 }
 0x145   : > { %v1176_v63 = vpop.f32.mrf.mxu1 }
 0x146   : > { %v4580_v2 = vadd.f32 %v3640_v17, %v1291_v11  ;;  %v1289_v24 = vadd.f32 %v1176_v63, %v4440_v36  ;;  %v3643_v7 = vpop.f32.mrf.mxu0 }
 0x147   : > { %v3609_v49 = vpop.f32.mrf.mxu1 }
 0x148   : > { %v4583_v12 = vadd.f32 %v1470_v46, %v1289_v24  ;;  %v1294_v51 = vadd.f32 %v3609_v49, %v4448_v10  ;;  %v1483_v18 = vpop.f32.mrf.mxu0 }
 0x149   : > { %v1189_v55 = vpop.f32.mrf.mxu1 }
 0x14a   : > { %v4586_v40 = vadd.f32 %v3643_v7, %v1294_v51  ;;  %v1292_v34 = vadd.f32 %v1189_v55, %v4451_v6  ;;  %v3644_v22 = vpop.f32.mrf.mxu0 }
 0x14b   : > { %v3610_v48 = vpop.f32.mrf.mxu1 }
 0x14c   : > { %v4589_v27 = vadd.f32 %v1483_v18, %v1292_v34  ;;  %v1295_v57 = vadd.f32 %v3610_v48, %v4454_v23  ;;  %v1486_v33 = vpop.f32.mrf.mxu0 }
 0x14d   : > { %v1192_v36 = vpop.f32.mrf.mxu1 }
 0x14e   : > { %v4592_v4 = vadd.f32 %v3644_v22, %v1295_v57  ;;  %v1293_v52 = vadd.f32 %v1192_v36, %v4462_v62  ;;  %v3647_v37 = vpop.f32.mrf.mxu0 }
 0x14f   : > { %v3613_v10 = vpop.f32.mrf.mxu1 }
 0x150   : > { %v4595_v21 = vadd.f32 %v1486_v33, %v1293_v52  ;;  %v1298_v25 = vadd.f32 %v3613_v10, %v4470_v60  ;;  %v1499_v43 = vpop.f32.mrf.mxu0 }
 0x151   : > { %v1205_v6 = vpop.f32.mrf.mxu1 }
 0x152   : > { %v4598_v8 = vadd.f32 %v3647_v37, %v1298_v25  ;;  %v1296_v54 = vadd.f32 %v1205_v6, %v4473_v31  ;;  %v3648_v19 = vpop.f32.mrf.mxu0 }
 0x153   : > { %v3614_v23 = vpop.f32.mrf.mxu1 }
 0x154   : > { %v4601_v26 = vadd.f32 %v1499_v43, %v1296_v54  ;;  %v1299_v15 = vadd.f32 %v3614_v23, %v4476_v28  ;;  %v1502_v32 = vpop.f32.mrf.mxu0 }
 0x155   : > { %v1208_v62 = vpop.f32.mrf.mxu1 }
 0x156   : > { %v4604_v14 = vadd.f32 %v3648_v19, %v1299_v15  ;;  %v1297_v17 = vadd.f32 %v1208_v62, %v4484_v30  ;;  %v3651_v59 = vpop.f32.mrf.mxu0 }
 0x157   : > { %v3617_v60 = vpop.f32.mrf.mxu1 }
 0x158   : > { %v4607_v11 = vadd.f32 %v1502_v32, %v1297_v17  ;;  %v1302_v46 = vadd.f32 %v3617_v60, %v4492_v58  ;;  %v1515_v63 = vpop.f32.mrf.mxu0 }
 0x159   : > { %v1221_v31 = vpop.f32.mrf.mxu1 }
 0x15a   : > { %v4610_v24 = vadd.f32 %v3651_v59, %v1302_v46  ;;  %v1300_v7 = vadd.f32 %v1221_v31, %v4495_v35  ;;  %v3652_v49 = vpop.f32.mrf.mxu0 }
 0x15b   : > { %v3618_v28 = vpop.f32.mrf.mxu1 }
 0x15c   : > { %v4613_v51 = vadd.f32 %v1515_v63, %v1300_v7  ;;  %v1303_v18 = vadd.f32 %v3618_v28, %v4498_v41  ;;  %v1518_v55 = vpop.f32.mrf.mxu0 }
 0x15d   : > { %v1224_v30 = vpop.f32.mrf.mxu1 }
 0x15e   : > { %v4616_v34 = vadd.f32 %v3652_v49, %v1303_v18  ;;  %v1301_v22 = vadd.f32 %v1224_v30, %v4508_v56  ;;  %v3655_v48 = vpop.f32.mrf.mxu0 }
 0x15f   : > { %v3621_v58 = vpop.f32.mrf.mxu1 }
 0x160   : > { %5024 = vst [vmem:[#allocation2_spill] sm:$0xff] %v4616_v34  ;;  %v4619_v57 = vadd.f32 %v1518_v55, %v1301_v22  ;;  %v1306_v33 = vadd.f32 %v3621_v58, %v4514_v45  ;;  %v1531_v36 = vpop.f32.mrf.mxu0 }
 0x161   : > { %v1237_v35 = vpop.f32.mrf.mxu1 }
 0x162   : > { %5025 = vst [vmem:[#allocation3_spill] sm:$0xff] %v4619_v57  ;;  %v4622_v52 = vadd.f32 %v3655_v48, %v1306_v33  ;;  %v1304_v37 = vadd.f32 %v1237_v35, %v4517_v5  ;;  %v3656_v10 = vpop.f32.mrf.mxu0 }
 0x163   : > { %v3622_v41 = vpop.f32.mrf.mxu1 }
 0x164   : > { %5026 = vst [vmem:[#allocation4_spill] sm:$0xff] %v4622_v52  ;;  %v4625_v25 = vadd.f32 %v1531_v36, %v1304_v37  ;;  %v1307_v43 = vadd.f32 %v3622_v41, %v4520_v38  ;;  %v1534_v6 = vpop.f32.mrf.mxu0 }
 0x165   : > { %v1240_v56 = vpop.f32.mrf.mxu1 }
 0x166   : > { %5027 = vst [vmem:[#allocation5_spill] sm:$0xff] %v4625_v25  ;;  %v4628_v54 = vadd.f32 %v3656_v10, %v1307_v43  ;;  %v1305_v19 = vadd.f32 %v1240_v56, %v4529_v50  ;;  %v3659_v23 = vpop.f32.mrf.mxu0 }
 0x167   : > { %v3625_v45 = vpop.f32.mrf.mxu1 }
 0x168   : > { %5028 = vst [vmem:[#allocation6_spill] sm:$0xff] %v4628_v54  ;;  %v4631_v15 = vadd.f32 %v1534_v6, %v1305_v19  ;;  %v1310_v32 = vadd.f32 %v3625_v45, %v4536_v9  ;;  %v1547_v62 = vpop.f32.mrf.mxu0 }
 0x169   : > { %v1253_v5 = vpop.f32.mrf.mxu1 }
 0x16a   : > { %5029 = vst [vmem:[#allocation7_spill] sm:$0xff] %v4631_v15  ;;  %v4634_v17 = vadd.f32 %v3659_v23, %v1310_v32  ;;  %v1308_v59 = vadd.f32 %v1253_v5, %v4539_v0  ;;  %v3660_v60 = vpop.f32.mrf.mxu0 }
 0x16b   : > { %v3626_v38 = vpop.f32.mrf.mxu1 }
 0x16c   : > { %5030 = vst [vmem:[#allocation8_spill] sm:$0xff] %v4634_v17  ;;  %v4637_v46 = vadd.f32 %v1547_v62, %v1308_v59  ;;  %v1311_v63 = vadd.f32 %v3626_v38, %v4542_v44  ;;  %v1550_v31 = vpop.f32.mrf.mxu0 }
 0x16d   : > { %v1256_v50 = vpop.f32.mrf.mxu1 }
 0x16e   : > { %5031 = vst [vmem:[#allocation9_spill] sm:$0xff] %v4637_v46  ;;  %v4640_v7 = vadd.f32 %v3660_v60, %v1311_v63  ;;  %v1309_v49 = vadd.f32 %v1256_v50, %v4547_v61  ;;  %v3663_v28 = vpop.f32.mrf.mxu0 }
 0x16f   : > { %v3629_v9 = vpop.f32.mrf.mxu1 }
 0x170   : > { %5032 = vst [vmem:[#allocation10_spill] sm:$0xff] %v4640_v7  ;;  %v4643_v18 = vadd.f32 %v1550_v31, %v1309_v49  ;;  %v1314_v55 = vadd.f32 %v3629_v9, %v4550_v13  ;;  %v1563_v30 = vpop.f32.mrf.mxu0 }
 0x171   : > { %v1269_v0 = vpop.f32.mrf.mxu1 }
 0x172   : > { %5033 = vst [vmem:[#allocation11_spill] sm:$0xff] %v4643_v18  ;;  %v4646_v22 = vadd.f32 %v3663_v28, %v1314_v55  ;;  %v1312_v48 = vadd.f32 %v1269_v0, %v4553_v20  ;;  %v3664_v58 = vpop.f32.mrf.mxu0 }
 0x173   : > { %v3630_v44 = vpop.f32.mrf.mxu1 }
 0x174   : > { %5034 = vst [vmem:[#allocation12_spill] sm:$0xff] %v4646_v22  ;;  %v4649_v33 = vadd.f32 %v1563_v30, %v1312_v48  ;;  %v1315_v36 = vadd.f32 %v3630_v44, %v4556_v16  ;;  %v1566_v35 = vpop.f32.mrf.mxu0 }
 0x175   : > { %v1272_v61 = vpop.f32.mrf.mxu1 }
 0x176   : > { %5035 = vst [vmem:[#allocation13_spill] sm:$0xff] %v4649_v33  ;;  %v4652_v37 = vadd.f32 %v3664_v58, %v1315_v36  ;;  %v1313_v10 = vadd.f32 %v1272_v61, %v4559_v47  ;;  %v4655_v41 = vpop.f32.mrf.mxu0 }
 0x177   : > { %v3669_v13 = vpop.f32.mrf.mxu1 }
 0x178   : > { %5036 = vst [vmem:[#allocation14_spill] sm:$0xff] %v4652_v37  ;;  %v4657_v43 = vadd.f32 %v1566_v35, %v1313_v10  ;;  %v4659_v6 = vpop.f32.mrf.mxu0 }
 0x179   : > { %v1745_v20 = vpop.f32.mrf.mxu1 }
 0x17a   : > { %5037 = vst [vmem:[#allocation15_spill] sm:$0xff] %v4657_v43  ;;  %v4661_v56 = vpop.f32.mrf.mxu0 }
 0x17b   : > { %v3670_v19 = vpop.f32.mrf.mxu1 }
 0x17c   : > { %v4663_v23 = vpop.f32.mrf.mxu0 }
 0x17d   : > { %v4665_v16 = vpop.f32.mrf.mxu1 }
 0x17e   : > { %v4667_v45 = vpop.f32.mrf.mxu0 }
 0x17f   : > { %v4669_v32 = vpop.f32.mrf.mxu1 }
 0x180   : > { %v4671_v47 = vpop.f32.mrf.mxu0 }
 0x181   : > { %v4673_v62 = vpop.f32.mrf.mxu1 }
 0x182   : > { %v4675_v5 = vpop.f32.mrf.mxu0 }
 0x183   : > { %v4677_v59 = vpop.f32.mrf.mxu1 }
 0x184   : > { %v4679_v60 = vpop.f32.mrf.mxu0 }
 0x185   : > { %v4681_v38 = vpop.f32.mrf.mxu1 }
 0x186   : > { %v4683_v63 = vpop.f32.mrf.mxu0 }
 0x187   : > { %v4685_v31 = vpop.f32.mrf.mxu1 }
 0x188   : > { %v4687_v50 = vpop.f32.mrf.mxu0 }
 0x189   : > { %v4689_v49 = vpop.f32.mrf.mxu1 }
 0x18a   : > { %v4691_v28 = vpop.f32.mrf.mxu0 }
 0x18b   : > { %v4693_v9 = vpop.f32.mrf.mxu1 }
 0x18c   : > { %v4695_v55 = vpop.f32.mrf.mxu0 }
 0x18d   : > { %v4697_v30 = vpop.f32.mrf.mxu1 }
 0x18e   : > { %v4699_v0 = vpop.f32.mrf.mxu0 }
 0x18f   : > { %v4701_v48 = vpop.f32.mrf.mxu1 }
 0x190   : > { %v4703_v58 = vpop.f32.mrf.mxu0 }
 0x191   : > { %v4705_v44 = vpop.f32.mrf.mxu1 }
 0x192   : > { %v4707_v36 = vpop.f32.mrf.mxu0 }
 0x193   : > { %v4709_v35 = vpop.f32.mrf.mxu1 }
 0x194   : > { %v4711_v61 = vpop.f32.mrf.mxu0 }
 0x195   : > { %v4713_v10 = vpop.f32.mrf.mxu1 }
 0x196   : > { %v4715_v43 = vpop.f32.mrf.mxu0 }
 0x197   : > { %v4717_v37 = vpop.f32.mrf.mxu1 }
 0x198   : > { %v4719_v33 = vpop.f32.mrf.mxu0 }
 0x199   : > { %5038 = vst [vmem:[#allocation16_spill] sm:$0xff] %v4719_v33  ;;  %v4721_v22 = vpop.f32.mrf.mxu1 }
 0x19a   : > { %v4723_v18 = vpop.f32.mrf.mxu0 }
 0x19b   : > { %5039 = vst [vmem:[#allocation17_spill] sm:$0xff] %v4723_v18  ;;  %v4725_v7 = vpop.f32.mrf.mxu1 }
 0x19c   : > { %5040 = vst [vmem:[#allocation18_spill] sm:$0xff] %v4725_v7  ;;  %v4727_v46 = vpop.f32.mrf.mxu0 }
 0x19d   : > { %5041 = vst [vmem:[#allocation19_spill] sm:$0xff] %v4727_v46  ;;  %v4729_v17 = vpop.f32.mrf.mxu1 }
 0x19e   : > { %5042 = vst [vmem:[#allocation20_spill] sm:$0xff] %v4729_v17  ;;  %v4731_v15 = vpop.f32.mrf.mxu0 }
 0x19f   : > { %5043 = vst [vmem:[#allocation21_spill] sm:$0xff] %v4731_v15  ;;  %v4733_v54 = vpop.f32.mrf.mxu1 }
 0x1a0   : > { %5044 = vst [vmem:[#allocation22_spill] sm:$0xff] %v4733_v54  ;;  %v4735_v25 = vpop.f32.mrf.mxu0 }
 0x1a1   : > { %5045 = vst [vmem:[#allocation23_spill] sm:$0xff] %v4735_v25  ;;  %v4737_v52 = vpop.f32.mrf.mxu1 }
 0x1a2   : > { %5046 = vst [vmem:[#allocation24_spill] sm:$0xff] %v4737_v52  ;;  %v4739_v57 = vpop.f32.mrf.mxu0 }
 0x1a3   : > { %5047 = vst [vmem:[#allocation25_spill] sm:$0xff] %v4739_v57  ;;  %v4741_v33 = vpop.f32.mrf.mxu1 }
 0x1a4   : > { %5048 = vst [vmem:[#allocation26_spill] sm:$0xff] %v4741_v33  ;;  %v4743_v34 = vpop.f32.mrf.mxu0 }
 0x1a5   : > { %5049 = vst [vmem:[#allocation27_spill] sm:$0xff] %v4743_v34  ;;  %v4745_v18 = vpop.f32.mrf.mxu1 }
 0x1a6   : > { %5050 = vst [vmem:[#allocation28_spill] sm:$0xff] %v4745_v18  ;;  %v4747_v7 = vpop.f32.mrf.mxu0 }
 0x1a7   : > { %5051 = vst [vmem:[#allocation29_spill] sm:$0xff] %v4747_v7  ;;  %v4749_v46 = vpop.f32.mrf.mxu1 }
 0x1a8   : > { %5052 = vst [vmem:[#allocation30_spill] sm:$0xff] %v4749_v46  ;;  %v4751_v17 = vpop.f32.mrf.mxu0 }
 0x1a9   : > { %5053 = vst [vmem:[#allocation31_spill] sm:$0xff] %v4751_v17  ;;  %v4753_v15 = vpop.f32.mrf.mxu1  ;;  %v1874_v17 = vadd.f32 %v3669_v13, %v4562_v39  ;;  %v1873_v39 = vadd.f32 %v4665_v16, %v4571_v1  ;;  %v4799_v1 = vld [vmem:[%s5022_s3] ss:$0 sm:$0xff] }
 0x1aa   : > { %5054 = vst [vmem:[#allocation32_spill] sm:$0xff] %v4753_v15  ;;  %v4755_v54 = vpop.f32.mrf.mxu0 }
 0x1ab   : > { %5055 = vst [vmem:[#allocation33_spill] sm:$0xff] %v4755_v54  ;;  %v4757_v25 = vpop.f32.mrf.mxu1  ;;  %v1872_v54 = vadd.f32 %v1745_v20, %v4565_v42  ;;  %v4789_v42 = vld [vmem:[%s5021_s2] ss:$0 sm:$0xff] }
 0x1ac   : > { %5056 = vst [vmem:[#allocation34_spill] sm:$0xff] %v4757_v25  ;;  %v4759_v52 = vpop.f32.mrf.mxu0 }
 0x1ad   : > { %5057 = vst [vmem:[#allocation35_spill] sm:$0xff] %v4759_v52  ;;  %v4761_v57 = vpop.f32.mrf.mxu1 }
 0x1ae   : > { %5058 = vst [vmem:[#allocation36_spill] sm:$0xff] %v4761_v57  ;;  %v4763_v33 = vpop.f32.mrf.mxu0 }
 0x1af   : > { %5059 = vst [vmem:[#allocation37_spill] sm:$0xff] %v4763_v33  ;;  %v4765_v34 = vpop.f32.mrf.mxu1  ;;  %v2169_v33 = vadd.f32 %v4655_v41, %v1874_v17 }
 0x1b0   : > { %5060 = vst [vmem:[#allocation38_spill] sm:$0xff] %v4765_v34  ;;  %v4767_v18 = vpop.f32.mrf.mxu0  ;;  %v1875_v34 = vadd.f32 %v3670_v19, %v4568_v53 }
 0x1b1   : > { %5061 = vst [vmem:[#allocation39_spill] sm:$0xff] %v4767_v18  ;;  %v4769_v7 = vpop.f32.mrf.mxu1 }
 0x1b2   : > { %5062 = vst [vmem:[#allocation40_spill] sm:$0xff] %v4769_v7  ;;  %v4772_v46 = vpop.f32.mrf.mxu0  ;;  %v2167_v7 = vadd.f32 %v4659_v6, %v1872_v54  ;;  %v2170_v17 = vadd.f32 %v4661_v56, %v1875_v34  ;;  %v1876_v54 = vadd.f32 %v4673_v62, %v4577_v3 }
 0x1b3   : > { %5063 = vst [vmem:[#allocation41_spill] sm:$0xff] %v4772_v46  ;;  %v4774_v15 = vpop.f32.mrf.mxu1 }
 0x1b4   : > { %v4777_v25 = vpop.f32.mrf.mxu0 }
 0x1b5   : > { %5064 = vst [vmem:[#allocation42_spill] sm:$0xff] %v4777_v25  ;;  %v4779_v52 = vpop.f32.mrf.mxu1  ;;  %v1878_v25 = vadd.f32 %v4669_v32, %v4574_v29  ;;  %v1879_v29 = vadd.f32 %v4677_v59, %v4580_v2 }
 0x1b6   : > { %v3771_v57 = vpop.f32.mrf.mxu0 }
 0x1b7   : > { %v3737_v18 = vpop.f32.mrf.mxu1 }
 0x1b8   : > { %v2463_v13 = vadd.f32 %v3737_v18, %v2169_v33  ;;  %v2628_v46 = vpop.f32.mrf.mxu0  ;;  %v2168_v33 = vadd.f32 %v4663_v23, %v1873_v39  ;;  %v2171_v23 = vadd.f32 %v4671_v47, %v1876_v54  ;;  %v2174_v47 = vadd.f32 %v4675_v5, %v1879_v29 }
 0x1b9   : > { %v2334_v20 = vpop.f32.mrf.mxu1 }
 0x1ba   : > { %v2757_v41 = vadd.f32 %v3771_v57, %v2463_v13  ;;  %v2461_v53 = vadd.f32 %v2334_v20, %v2167_v7  ;;  %v3772_v19 = vpop.f32.mrf.mxu0  ;;  %v2173_v20 = vadd.f32 %v4667_v45, %v1878_v25 }
 0x1bb   : > { %v3738_v18 = vpop.f32.mrf.mxu1 }
 0x1bc   : > { %v2796_v34 = vmul.f32 %v4789_v42, %v2757_v41  ;;  %v2755_v57 = vadd.f32 %v2628_v46, %v2461_v53  ;;  %v2464_v7 = vadd.f32 %v3738_v18, %v2170_v17  ;;  %v2631_v6 = vpop.f32.mrf.mxu0  ;;  %v1877_v46 = vadd.f32 %v4681_v38, %v4583_v12 }
 0x1bd   : > { %v2337_v56 = vpop.f32.mrf.mxu1  ;;  %v1882_v12 = vadd.f32 %v4685_v31, %v4586_v40 }
 0x1be   : > { %v2835_v3 = vadd.f32 %v4799_v1, %v2796_v34  ;;  %v2794_v16 = vmul.f32 %v4789_v42, %v2755_v57  ;;  %v2758_v32 = vadd.f32 %v3772_v19, %v2464_v7  ;;  %v2462_v62 = vadd.f32 %v2337_v56, %v2168_v33  ;;  %v3775_v13 = vpop.f32.mrf.mxu0 }
 0x1bf   : > { %v3741_v2 = vpop.f32.mrf.mxu1  ;;  %v2172_v34 = vadd.f32 %v4679_v60, %v1877_v46  ;;  %v2177_v56 = vadd.f32 %v4683_v63, %v1882_v12  ;;  %v1881_v63 = vadd.f32 %v4697_v30, %v4595_v21  ;;  %v1886_v21 = vadd.f32 %v4701_v48, %v4598_v8 }
 0x1c0   : > { %v2867_v59 = vmax.f32 %v2835_v3, 0.0  ;;  %v2833_v39 = vadd.f32 %v4799_v1, %v2794_v16  ;;  %v2797_v17 = vmul.f32 %v4789_v42, %v2758_v32  ;;  %v2756_v25 = vadd.f32 %v2631_v6, %v2462_v62  ;;  %v2644_v45 = vpop.f32.mrf.mxu0 }
 0x1c1   : > { %v2467_v38 = vadd.f32 %v3741_v2, %v2173_v20  ;;  %v2350_v41 = vpop.f32.mrf.mxu1  ;;  %v1880_v3 = vadd.f32 %v4689_v49, %v4589_v27  ;;  %v1883_v16 = vadd.f32 %v4693_v9, %v4592_v4 }
 0x1c2   : > { %2900 = vst.msk [vmem:[%s4815_s21 + $0x10] sm:$0xff] %vm2897_vm3, %v2867_v59  ;;  %v2865_v53 = vmax.f32 %v2833_v39, 0.0  ;;  %v2836_v19 = vadd.f32 %v4799_v1, %v2797_v17  ;;  %v2795_v54 = vmul.f32 %v4789_v42, %v2756_v25  ;;  %v2465_v18 = vadd.f32 %v2350_v41, %v2171_v23  ;;  %v3776_v33 = vpop.f32.mrf.mxu0 }
 0x1c3   : > { %v2761_v57 = vadd.f32 %v3775_v13, %v2467_v38  ;;  %v3742_v7 = vpop.f32.mrf.mxu1  ;;  %v2175_v17 = vadd.f32 %v4687_v50, %v1880_v3  ;;  %v2178_v25 = vadd.f32 %v4691_v28, %v1883_v16  ;;  %v1884_v50 = vadd.f32 %v4705_v44, %v4601_v26 }
 0x1c4   : > { %2898 = vst.msk [vmem:[%s4815_s21] sm:$0xff] %vm2897_vm3, %v2865_v53  ;;  %v2868_v5 = vmax.f32 %v2836_v19, 0.0  ;;  %v2834_v40 = vadd.f32 %v4799_v1, %v2795_v54  ;;  %v2759_v31 = vadd.f32 %v2644_v45, %v2465_v18  ;;  %v2468_v6 = vadd.f32 %v3742_v7, %v2174_v47  ;;  %v2647_v29 = vpop.f32.mrf.mxu0 }
 0x1c5   : > { %v2800_v60 = vmul.f32 %v4789_v42, %v2761_v57  ;;  %v2353_v32 = vpop.f32.mrf.mxu1  ;;  %v2176_v19 = vadd.f32 %v4695_v55, %v1881_v63  ;;  %v2181_v57 = vadd.f32 %v4699_v0, %v1886_v21  ;;  %v5066_v21 = vld [vmem:[#allocation18_spill] sm:$0xff] }
 0x1c6   : > { %2901 = vst.msk [vmem:[%s4815_s21 + $0x18] sm:$0xff] %vm2897_vm3, %v2868_v5  ;;  %v2866_v62 = vmax.f32 %v2834_v40, 0.0  ;;  %v2798_v13 = vmul.f32 %v4789_v42, %v2759_v31  ;;  %v2762_v20 = vadd.f32 %v3776_v33, %v2468_v6  ;;  %v2466_v23 = vadd.f32 %v2353_v32, %v2172_v34  ;;  %v3779_v46 = vpop.f32.mrf.mxu0 }
 0x1c7   : > { %v2839_v2 = vadd.f32 %v4799_v1, %v2800_v60  ;;  %v3745_v27 = vpop.f32.mrf.mxu1  ;;  %v2179_v6 = vadd.f32 %v4703_v58, %v1884_v50  ;;  %v1890_v58 = vadd.f32 %v4717_v37, %v4610_v24  ;;  %v1888_v24 = vadd.f32 %v4721_v22, %v4613_v51 }
 0x1c8   : > { %2899 = vst.msk [vmem:[%s4815_s21 + $0x8] sm:$0xff] %vm2897_vm3, %v2866_v62  ;;  %v2837_v4 = vadd.f32 %v4799_v1, %v2798_v13  ;;  %v2801_v49 = vmul.f32 %v4789_v42, %v2762_v20  ;;  %v2760_v9 = vadd.f32 %v2647_v29, %v2466_v23  ;;  %v2471_v59 = vadd.f32 %v3745_v27, %v2177_v56  ;;  %v2660_v39 = vpop.f32.mrf.mxu0 }
 0x1c9   : > { %v2871_v30 = vmax.f32 %v2839_v2, 0.0  ;;  %v2366_v45 = vpop.f32.mrf.mxu1  ;;  %v1887_v29 = vadd.f32 %v4709_v35, %v4604_v14  ;;  %v1885_v56 = vadd.f32 %v4713_v10, %v4607_v11 }
 0x1ca   : > { %v2869_v47 = vmax.f32 %v2837_v4, 0.0  ;;  %v2840_v12 = vadd.f32 %v4799_v1, %v2801_v49  ;;  %v2799_v38 = vmul.f32 %v4789_v42, %v2760_v9  ;;  %v2765_v41 = vadd.f32 %v3779_v46, %v2471_v59  ;;  %v3780_v53 = vpop.f32.mrf.mxu0 }
 0x1cb   : > { %2904 = vst.msk [vmem:[%s4815_s21 + $0x30] sm:$0xff] %vm2897_vm3, %v2871_v30  ;;  %v2469_v28 = vadd.f32 %v2366_v45, %v2175_v17  ;;  %v3746_v54 = vpop.f32.mrf.mxu1  ;;  %v2182_v63 = vadd.f32 %v4707_v36, %v1887_v29  ;;  %v2180_v2 = vadd.f32 %v4711_v61, %v1885_v56  ;;  %v2185_v17 = vadd.f32 %v4715_v43, %v1890_v58 }
 0x1cc   : > { %2902 = vst.msk [vmem:[%s4815_s21 + $0x20] sm:$0xff] %vm2897_vm3, %v2869_v47  ;;  %v2872_v8 = vmax.f32 %v2840_v12, 0.0  ;;  %v2838_v48 = vadd.f32 %v4799_v1, %v2799_v38  ;;  %v2804_v18 = vmul.f32 %v4789_v42, %v2765_v41  ;;  %v2472_v33 = vadd.f32 %v3746_v54, %v2178_v25  ;;  %v2663_v34 = vpop.f32.mrf.mxu0  ;;  %v5065_v25 = vld [vmem:[#allocation2_spill] sm:$0xff]  ;;  %v5067_v38 = vld [vmem:[#allocation16_spill] sm:$0xff] }
 0x1cd   : > { %v2763_v55 = vadd.f32 %v2660_v39, %v2469_v28  ;;  %v2369_v7 = vpop.f32.mrf.mxu1  ;;  %v1891_v36 = vadd.f32 %v5066_v21, %v5065_v25  ;;  %v2183_v41 = vadd.f32 %v5067_v38, %v1888_v24  ;;  %v5080_v25 = vld [vmem:[#allocation7_spill] sm:$0xff]  ;;  %v5081_v21 = vld [vmem:[#allocation28_spill] sm:$0xff]  ;;  %v5082_v38 = vld [vmem:[#allocation25_spill] sm:$0xff] }
 0x1ce   : > { %2905 = vst.msk [vmem:[%s4815_s21 + $0x38] sm:$0xff] %vm2897_vm3, %v2872_v8  ;;  %v2870_v26 = vmax.f32 %v2838_v48, 0.0  ;;  %v2843_v44 = vadd.f32 %v4799_v1, %v2804_v18  ;;  %v2766_v5 = vadd.f32 %v3780_v53, %v2472_v33  ;;  %v2470_v40 = vadd.f32 %v2369_v7, %v2176_v19  ;;  %v3783_v31 = vpop.f32.mrf.mxu0  ;;  %v5068_v48 = vld [vmem:[#allocation17_spill] sm:$0xff]  ;;  %v5069_v33 = vld [vmem:[#allocation3_spill] sm:$0xff]  ;;  %v5072_v7 = vld [vmem:[#allocation22_spill] sm:$0xff] }
 0x1cf   : > { %v2802_v0 = vmul.f32 %v4789_v42, %v2763_v55  ;;  %v3749_v3 = vpop.f32.mrf.mxu1  ;;  %v2186_v18 = vadd.f32 %v5068_v48, %v1891_v36  ;;  %v5071_v55 = vld [vmem:[#allocation4_spill] sm:$0xff]  ;;  %v1893_v36 = vadd.f32 %v5081_v21, %v5080_v25  ;;  %v5083_v48 = vld [vmem:[#allocation27_spill] sm:$0xff]  ;;  %v5096_v21 = vld [vmem:[#allocation38_spill] sm:$0xff] }
 0x1d0   : > { %2903 = vst.msk [vmem:[%s4815_s21 + $0x28] sm:$0xff] %vm2897_vm3, %v2870_v26  ;;  %v2875_v16 = vmax.f32 %v2843_v44, 0.0  ;;  %v2805_v60 = vmul.f32 %v4789_v42, %v2766_v5  ;;  %v2764_v32 = vadd.f32 %v2663_v34, %v2470_v40  ;;  %v2475_v62 = vadd.f32 %v3749_v3, %v2181_v57  ;;  %v2676_v13 = vpop.f32.mrf.mxu0  ;;  %v5070_v34 = vld [vmem:[#allocation20_spill] sm:$0xff] }
 0x1d1   : > { %v2841_v20 = vadd.f32 %v4799_v1, %v2802_v0  ;;  %v2382_v14 = vpop.f32.mrf.mxu1  ;;  %v1889_v57 = vadd.f32 %v5070_v34, %v5069_v33  ;;  %v1894_v26 = vadd.f32 %v5072_v7, %v5071_v55  ;;  %v5073_v0 = vld [vmem:[#allocation5_spill] sm:$0xff]  ;;  %v5074_v3 = vld [vmem:[#allocation24_spill] sm:$0xff]  ;;  %v5085_v34 = vld [vmem:[#allocation30_spill] sm:$0xff] }
 0x1d2   : > { %2908 = vst.msk [vmem:[%s4815_s21 + $0x50] sm:$0xff] %vm2897_vm3, %v2875_v16  ;;  %v2844_v11 = vadd.f32 %v4799_v1, %v2805_v60  ;;  %v2803_v35 = vmul.f32 %v4789_v42, %v2764_v32  ;;  %v2769_v10 = vadd.f32 %v3783_v31, %v2475_v62  ;;  %v2473_v23 = vadd.f32 %v2382_v14, %v2179_v6  ;;  %v3784_v46 = vpop.f32.mrf.mxu0  ;;  %v5084_v33 = vld [vmem:[#allocation8_spill] sm:$0xff]  ;;  %v5086_v55 = vld [vmem:[#allocation9_spill] sm:$0xff] }
 0x1d3   : > { %v2873_v37 = vmax.f32 %v2841_v20, 0.0  ;;  %v3750_v27 = vpop.f32.mrf.mxu1  ;;  %v1892_v16 = vadd.f32 %v5074_v3, %v5073_v0  ;;  %v5087_v7 = vld [vmem:[#allocation32_spill] sm:$0xff]  ;;  %v5088_v0 = vld [vmem:[#allocation10_spill] sm:$0xff] }
 0x1d4   : > { %v2876_v4 = vmax.f32 %v2844_v11, 0.0  ;;  %v2842_v49 = vadd.f32 %v4799_v1, %v2803_v35  ;;  %v2808_v9 = vmul.f32 %v4789_v42, %v2769_v10  ;;  %v2767_v59 = vadd.f32 %v2676_v13, %v2473_v23  ;;  %v2679_v39 = vpop.f32.mrf.mxu0  ;;  %v5075_v11 = vld [vmem:[#allocation19_spill] sm:$0xff]  ;;  %v5076_v10 = vld [vmem:[#allocation21_spill] sm:$0xff]  ;;  %v5089_v3 = vld [vmem:[#allocation34_spill] sm:$0xff] }
 0x1d5   : > { %2906 = vst.msk [vmem:[%s4815_s21 + $0x40] sm:$0xff] %vm2897_vm3, %v2873_v37  ;;  %v2476_v61 = vadd.f32 %v3750_v27, %v2182_v63  ;;  %v2385_v30 = vpop.f32.mrf.mxu1  ;;  %v2184_v35 = vadd.f32 %v5075_v11, %v1889_v57  ;;  %v2189_v23 = vadd.f32 %v5076_v10, %v1894_v26  ;;  %v5078_v63 = vld [vmem:[#allocation26_spill] sm:$0xff]  ;;  %v1898_v57 = vadd.f32 %v5085_v34, %v5084_v33  ;;  %v5090_v11 = vld [vmem:[#allocation29_spill] sm:$0xff]  ;;  %v5091_v10 = vld [vmem:[#allocation31_spill] sm:$0xff] }
 0x1d6   : > { %2909 = vst.msk [vmem:[%s4815_s21 + $0x58] sm:$0xff] %vm2897_vm3, %v2876_v4  ;;  %v2874_v51 = vmax.f32 %v2842_v49, 0.0  ;;  %v2847_v22 = vadd.f32 %v4799_v1, %v2808_v9  ;;  %v2806_v45 = vmul.f32 %v4789_v42, %v2767_v59  ;;  %v2474_v47 = vadd.f32 %v2385_v30, %v2180_v2  ;;  %v3787_v12 = vpop.f32.mrf.mxu0  ;;  %v5095_v25 = vld [vmem:[#allocation12_spill] sm:$0xff]  ;;  %v5099_v33 = vld [vmem:[#allocation13_spill] sm:$0xff] }
 0x1d7   : > { %v2770_v43 = vadd.f32 %v3784_v46, %v2476_v61  ;;  %v3753_v53 = vpop.f32.mrf.mxu1  ;;  %v5077_v46 = vld [vmem:[#allocation6_spill] sm:$0xff]  ;;  %v1896_v26 = vadd.f32 %v5087_v7, %v5086_v55  ;;  %v5100_v34 = vld [vmem:[#allocation40_spill] sm:$0xff] }
 0x1d8   : > { %2907 = vst.msk [vmem:[%s4815_s21 + $0x48] sm:$0xff] %vm2897_vm3, %v2874_v51  ;;  %v2879_v19 = vmax.f32 %v2847_v22, 0.0  ;;  %v2845_v50 = vadd.f32 %v4799_v1, %v2806_v45  ;;  %v2768_v28 = vadd.f32 %v2679_v39, %v2474_v47  ;;  %v2479_v54 = vadd.f32 %v3753_v53, %v2185_v17  ;;  %v2692_v8 = vpop.f32.mrf.mxu0  ;;  %v5079_v39 = vld [vmem:[#allocation23_spill] sm:$0xff]  ;;  %v5101_v55 = vld [vmem:[#allocation14_spill] sm:$0xff] }
 0x1d9   : > { %v2809_v44 = vmul.f32 %v4789_v42, %v2770_v43  ;;  %v2398_v5 = vpop.f32.mrf.mxu1  ;;  %v1895_v2 = vadd.f32 %v5078_v63, %v5077_v46  ;;  %v2187_v17 = vadd.f32 %v5079_v39, %v1892_v16  ;;  %v1899_v16 = vadd.f32 %v5089_v3, %v5088_v0  ;;  %v5092_v46 = vld [vmem:[#allocation11_spill] sm:$0xff]  ;;  %v5093_v63 = vld [vmem:[#allocation36_spill] sm:$0xff]  ;;  %v5094_v39 = vld [vmem:[#allocation33_spill] sm:$0xff] }
 0x1da   : > { %2912 = vst.msk [vmem:[%s4815_s21 + $0x70] sm:$0xff] %vm2897_vm3, %v2879_v19  ;;  %v2877_v40 = vmax.f32 %v2845_v50, 0.0  ;;  %v2807_v31 = vmul.f32 %v4789_v42, %v2768_v28  ;;  %v2773_v6 = vadd.f32 %v3787_v12, %v2479_v54  ;;  %v2477_v29 = vadd.f32 %v2398_v5, %v2183_v41  ;;  %v3788_v56 = vpop.f32.mrf.mxu0 }
 0x1db   : > { %v2848_v60 = vadd.f32 %v4799_v1, %v2809_v44  ;;  %v3754_v32 = vpop.f32.mrf.mxu1  ;;  %v2190_v41 = vadd.f32 %v5082_v38, %v1895_v2  ;;  %v1897_v2 = vadd.f32 %v5093_v63, %v5092_v46  ;;  %v5097_v38 = vld [vmem:[#allocation35_spill] sm:$0xff]  ;;  %v1903_v7 = vadd.f32 %v4774_v15, %v5101_v55 }
 0x1dc   : > { %2910 = vst.msk [vmem:[%s4815_s21 + $0x60] sm:$0xff] %vm2897_vm3, %v2877_v40  ;;  %v2846_v62 = vadd.f32 %v4799_v1, %v2807_v31  ;;  %v2812_v13 = vmul.f32 %v4789_v42, %v2773_v6  ;;  %v2771_v58 = vadd.f32 %v2692_v8, %v2477_v29  ;;  %v2480_v20 = vadd.f32 %v3754_v32, %v2186_v18  ;;  %v2695_v14 = vpop.f32.mrf.mxu0 }
 0x1dd   : > { %v2880_v24 = vmax.f32 %v2848_v60, 0.0  ;;  %v2401_v37 = vpop.f32.mrf.mxu1  ;;  %v2188_v18 = vadd.f32 %v5083_v48, %v1893_v36  ;;  %v1902_v36 = vadd.f32 %v5096_v21, %v5095_v25  ;;  %v5098_v48 = vld [vmem:[#allocation37_spill] sm:$0xff] }
 0x1de   : > { %v2878_v27 = vmax.f32 %v2846_v62, 0.0  ;;  %v2851_v4 = vadd.f32 %v4799_v1, %v2812_v13  ;;  %v2810_v49 = vmul.f32 %v4789_v42, %v2771_v58  ;;  %v2774_v9 = vadd.f32 %v3788_v56, %v2480_v20  ;;  %v3791_v59 = vpop.f32.mrf.mxu0 }
 0x1df   : > { %2913 = vst.msk [vmem:[%s4815_s21 + $0x78] sm:$0xff] %vm2897_vm3, %v2880_v24  ;;  %v2478_v61 = vadd.f32 %v2401_v37, %v2184_v35  ;;  %v3757_v30 = vpop.f32.mrf.mxu1  ;;  %v2193_v35 = vadd.f32 %v5090_v11, %v1898_v57  ;;  %v1900_v57 = vadd.f32 %v5100_v34, %v5099_v33 }
 0x1e0   : > { %2911 = vst.msk [vmem:[%s4815_s21 + $0x68] sm:$0xff] %vm2897_vm3, %v2878_v27  ;;  %v2883_v51 = vmax.f32 %v2851_v4, 0.0  ;;  %v2849_v22 = vadd.f32 %v4799_v1, %v2810_v49  ;;  %v2813_v45 = vmul.f32 %v4789_v42, %v2774_v9  ;;  %v2483_v47 = vadd.f32 %v3757_v30, %v2189_v23  ;;  %v2708_v12 = vpop.f32.mrf.mxu0 }
 0x1e1   : > { %v2772_v43 = vadd.f32 %v2695_v14, %v2478_v61  ;;  %v2414_v53 = vpop.f32.mrf.mxu1  ;;  %v2191_v23 = vadd.f32 %v5091_v10, %v1896_v26 }
 0x1e2   : > { %2916 = vst.msk [vmem:[%s4815_s21 + $0x90] sm:$0xff] %vm2897_vm3, %v2883_v51  ;;  %v2881_v19 = vmax.f32 %v2849_v22, 0.0  ;;  %v2852_v50 = vadd.f32 %v4799_v1, %v2813_v45  ;;  %v2777_v28 = vadd.f32 %v3791_v59, %v2483_v47  ;;  %v2481_v54 = vadd.f32 %v2414_v53, %v2187_v17  ;;  %v3792_v8 = vpop.f32.mrf.mxu0 }
 0x1e3   : > { %v2811_v44 = vmul.f32 %v4789_v42, %v2772_v43  ;;  %v3758_v5 = vpop.f32.mrf.mxu1  ;;  %v2194_v17 = vadd.f32 %v5094_v39, %v1899_v16 }
 0x1e4   : > { %2914 = vst.msk [vmem:[%s4815_s21 + $0x80] sm:$0xff] %vm2897_vm3, %v2881_v19  ;;  %v2884_v40 = vmax.f32 %v2852_v50, 0.0  ;;  %v2816_v31 = vmul.f32 %v4789_v42, %v2777_v28  ;;  %v2775_v6 = vadd.f32 %v2708_v12, %v2481_v54  ;;  %v2484_v29 = vadd.f32 %v3758_v5, %v2190_v41  ;;  %v2711_v56 = vpop.f32.mrf.mxu0 }
 0x1e5   : > { %v2850_v60 = vadd.f32 %v4799_v1, %v2811_v44  ;;  %v2417_v32 = vpop.f32.mrf.mxu1  ;;  %v2192_v41 = vadd.f32 %v5097_v38, %v1897_v2  ;;  %v5105_v2 = vld [vmem:[#allocation42_spill] sm:$0xff] }
 0x1e6   : > { %2917 = vst.msk [vmem:[%s4815_s21 + $0x98] sm:$0xff] %vm2897_vm3, %v2884_v40  ;;  %v2855_v62 = vadd.f32 %v4799_v1, %v2816_v31  ;;  %v2814_v13 = vmul.f32 %v4789_v42, %v2775_v6  ;;  %v2778_v58 = vadd.f32 %v3792_v8, %v2484_v29  ;;  %v2482_v20 = vadd.f32 %v2417_v32, %v2188_v18  ;;  %v3795_v14 = vpop.f32.mrf.mxu0 }
 0x1e7   : > { %v2882_v24 = vmax.f32 %v2850_v60, 0.0  ;;  %v3761_v37 = vpop.f32.mrf.mxu1  ;;  %v2197_v18 = vadd.f32 %v5098_v48, %v1902_v36 }
 0x1e8   : > { %v2887_v27 = vmax.f32 %v2855_v62, 0.0  ;;  %v2853_v4 = vadd.f32 %v4799_v1, %v2814_v13  ;;  %v2817_v49 = vmul.f32 %v4789_v42, %v2778_v58  ;;  %v2776_v9 = vadd.f32 %v2711_v56, %v2482_v20  ;;  %v2724_v59 = vpop.f32.mrf.mxu0  ;;  %v5102_v56 = vld [vmem:[#allocation15_spill] sm:$0xff] }
 0x1e9   : > { %2915 = vst.msk [vmem:[%s4815_s21 + $0x88] sm:$0xff] %vm2897_vm3, %v2882_v24  ;;  %v2487_v61 = vadd.f32 %v3761_v37, %v2193_v35  ;;  %v2430_v30 = vpop.f32.mrf.mxu1  ;;  %v1901_v0 = vadd.f32 %v4779_v52, %v5102_v56  ;;  %v5103_v58 = vld [vmem:[#allocation39_spill] sm:$0xff] }
 0x1ea   : > { %2920 = vst.msk [vmem:[%s4815_s21 + $0xb0] sm:$0xff] %vm2897_vm3, %v2887_v27  ;;  %v2885_v51 = vmax.f32 %v2853_v4, 0.0  ;;  %v2856_v22 = vadd.f32 %v4799_v1, %v2817_v49  ;;  %v2815_v45 = vmul.f32 %v4789_v42, %v2776_v9  ;;  %v2485_v47 = vadd.f32 %v2430_v30, %v2191_v23  ;;  %v3796_v12 = vpop.f32.mrf.mxu0 }
 0x1eb   : > { %v2781_v43 = vadd.f32 %v3795_v14, %v2487_v61  ;;  %v3762_v53 = vpop.f32.mrf.mxu1  ;;  %v2195_v20 = vadd.f32 %v5103_v58, %v1900_v57  ;;  %v5104_v14 = vld [vmem:[#allocation41_spill] sm:$0xff]  ;;  %v2196_v24 = vadd.f32 %v5105_v2, %v1901_v0 }
 0x1ec   : > { %2918 = vst.msk [vmem:[%s4815_s21 + $0xa0] sm:$0xff] %vm2897_vm3, %v2885_v51  ;;  %v2888_v19 = vmax.f32 %v2856_v22, 0.0  ;;  %v2854_v50 = vadd.f32 %v4799_v1, %v2815_v45  ;;  %v2779_v28 = vadd.f32 %v2724_v59, %v2485_v47  ;;  %v2488_v54 = vadd.f32 %v3762_v53, %v2194_v17  ;;  %v2727_v8 = vpop.f32.mrf.mxu0 }
 0x1ed   : > { %v2820_v26 = vmul.f32 %v4789_v42, %v2781_v43  ;;  %v2433_v44 = vpop.f32.mrf.mxu1  ;;  %v2198_v11 = vadd.f32 %v5104_v14, %v1903_v7 }
 0x1ee   : > { %2921 = vst.msk [vmem:[%s4815_s21 + $0xb8] sm:$0xff] %vm2897_vm3, %v2888_v19  ;;  %v2886_v5 = vmax.f32 %v2854_v50, 0.0  ;;  %v2818_v40 = vmul.f32 %v4789_v42, %v2779_v28  ;;  %v2782_v31 = vadd.f32 %v3796_v12, %v2488_v54  ;;  %v2486_v6 = vadd.f32 %v2433_v44, %v2192_v41  ;;  %v3799_v29 = vpop.f32.mrf.mxu0 }
 0x1ef   : > { %v2859_v3 = vadd.f32 %v4799_v1, %v2820_v26  ;;  %v3765_v16 = vpop.f32.mrf.mxu1 }
 0x1f0   : > { %2919 = vst.msk [vmem:[%s4815_s21 + $0xa8] sm:$0xff] %vm2897_vm3, %v2886_v5  ;;  %v2857_v15 = vadd.f32 %v4799_v1, %v2818_v40  ;;  %v2821_v60 = vmul.f32 %v4789_v42, %v2782_v31  ;;  %v2780_v32 = vadd.f32 %v2727_v8, %v2486_v6  ;;  %v2491_v62 = vadd.f32 %v3765_v16, %v2197_v18  ;;  %v2740_v13 = vpop.f32.mrf.mxu0 }
 0x1f1   : > { %v2891_v35 = vmax.f32 %v2859_v3, 0.0  ;;  %v2446_v52 = vpop.f32.mrf.mxu1 }
 0x1f2   : > { %v2889_v10 = vmax.f32 %v2857_v15, 0.0  ;;  %v2860_v23 = vadd.f32 %v4799_v1, %v2821_v60  ;;  %v2819_v46 = vmul.f32 %v4789_v42, %v2780_v32  ;;  %v2785_v63 = vadd.f32 %v3799_v29, %v2491_v62  ;;  %v3800_v4 = vpop.f32.mrf.mxu0 }
 0x1f3   : > { %2924 = vst.msk [vmem:[%s4815_s21 + $0xd0] sm:$0xff] %vm2897_vm3, %v2891_v35  ;;  %v2489_v37 = vadd.f32 %v2446_v52, %v2195_v20  ;;  %v3766_v27 = vpop.f32.mrf.mxu1 }
 0x1f4   : > { %2922 = vst.msk [vmem:[%s4815_s21 + $0xc0] sm:$0xff] %vm2897_vm3, %v2889_v10  ;;  %v2892_v49 = vmax.f32 %v2860_v23, 0.0  ;;  %v2858_v9 = vadd.f32 %v4799_v1, %v2819_v46  ;;  %v2824_v59 = vmul.f32 %v4789_v42, %v2785_v63  ;;  %v2492_v39 = vadd.f32 %v3766_v27, %v2198_v11  ;;  %v2743_v22 = vpop.f32.mrf.mxu0 }
 0x1f5   : > { %v2783_v17 = vadd.f32 %v2740_v13, %v2489_v37  ;;  %v2449_v25 = vpop.f32.mrf.mxu1 }
 0x1f6   : > { %2925 = vst.msk [vmem:[%s4815_s21 + $0xd8] sm:$0xff] %vm2897_vm3, %v2892_v49  ;;  %v2890_v21 = vmax.f32 %v2858_v9, 0.0  ;;  %v2863_v36 = vadd.f32 %v4799_v1, %v2824_v59  ;;  %v2786_v61 = vadd.f32 %v3800_v4, %v2492_v39  ;;  %v2490_v30 = vadd.f32 %v2449_v25, %v2196_v24 }
 0x1f7   : > { %v2822_v51 = vmul.f32 %v4789_v42, %v2783_v17 }
 0x1f8   : > { %2923 = vst.msk [vmem:[%s4815_s21 + $0xc8] sm:$0xff] %vm2897_vm3, %v2890_v21  ;;  %v2895_v45 = vmax.f32 %v2863_v36, 0.0  ;;  %v2825_v47 = vmul.f32 %v4789_v42, %v2786_v61  ;;  %v2784_v12 = vadd.f32 %v2743_v22, %v2490_v30 }
 0x1f9   : > { %v2861_v38 = vadd.f32 %v4799_v1, %v2822_v51 }
 0x1fa   : > { %2928 = vst.msk [vmem:[%s4815_s21 + $0xf0] sm:$0xff] %vm2897_vm3, %v2895_v45  ;;  %v2864_v41 = vadd.f32 %v4799_v1, %v2825_v47  ;;  %v2823_v43 = vmul.f32 %v4789_v42, %v2784_v12 }
 0x1fb   : > { %v2893_v53 = vmax.f32 %v2861_v38, 0.0 }
 0x1fc   : > { %v2896_v19 = vmax.f32 %v2864_v41, 0.0  ;;  %v2862_v50 = vadd.f32 %v4799_v1, %v2823_v43 }
 0x1fd   : > { %2926 = vst.msk [vmem:[%s4815_s21 + $0xe0] sm:$0xff] %vm2897_vm3, %v2893_v53 }
 0x1fe   : > { %2929 = vst.msk [vmem:[%s4815_s21 + $0xf8] sm:$0xff] %vm2897_vm3, %v2896_v19  ;;  %v2894_v28 = vmax.f32 %v2862_v50, 0.0 }
 0x200   : > { %2927 = vst.msk [vmem:[%s4815_s21 + $0xe8] sm:$0xff] %vm2897_vm3, %v2894_v28 }
 0x201 PF: > { %s14_s15 = sadd.s32 1, %s3819_s15  }
 0x202   : > { %p11_p4 = scmp.ge.s32.totalorder %s14_s15, 4  }
 0x204   :  { %13 = sbr.rel (!%p11_p4) target bundleno = 1 (0x1), region = 76 }

// kernel: _lambda_.13
= control target key start
LH: loop header
LB: loop body
LE: loop exit
PB: predicated region body
PF: predicated region fallthrough
CT: control target
= control target key end

     0   :  { %s3903_s15 = smov 0   ;;  %s5072_s0 = inlined_call_operand.vmem [shape: f32[2,18,18,16], index: 0, kind: input, shape index: {}]   ;;  %s5073_s1 = inlined_call_operand.vmem [shape: bf16[9,16,32], index: 1, kind: input, shape index: {}]   ;;  %s5074_s2 = inlined_call_operand.vmem [shape: f32[1,32], index: 2, kind: input, shape index: {}]   ;;  %s5075_s3 = inlined_call_operand.vmem [shape: f32[1,32], index: 3, kind: input, shape index: {}]   ;;  %s5076_s4 = inlined_call_operand.vmem [shape: f32[2,16,16,32], index: 4, kind: output, shape index: {}]  }
   0x1 LB: > { %s3017_s16 = sadd.s32 4294967295, %s3876_s15   ;;  %p3021_p0 = scmp.ge.s32.totalorder %s3876_s15, 1  ;;  %s3876_s15 = sphi %s3903_s15, %s14_s15  }
   0x2   : > { %p162_p1 = scmp.lt.s32.totalorder %s3876_s15, 3 }
   0x4   : > { %p163_p2 = pnand %p3021_p0, %p162_p1 }
   0x6   : > { %166 = sbr.rel (%p163_p2) target bundleno = 513 (0x201), region = 36 }
   0xb   : > { %v3861_v0 = vld [vmem:[%s5073_s1 + $0x8] sm:$0xff]   ;;  %p188_p3 = scmp.lt.s32.totalorder %s3017_s16, 1  ;;  %v3862_v1 = vld [vmem:[%s5073_s1] sm:$0xff]   ;;  %v3863_v2 = vld [vmem:[%s5073_s1 + $0x10] sm:$0xff]   ;;  %vm306_vm0 = vcmask 130048   ;;  %vm2929_vm1 = vcmask 261120  }
   0xc   : > { %3850 = vmatprep.subr.bf16.mxu1 %v3861_v0  ;;  %3544 = vmatprep.subr.bf16.mxu0 %v3861_v0  ;;  %v3937_v10 = vld [vmem:[%s5073_s1 + $0x18] sm:$0xff]   ;;  %v3963_v22 = vld [vmem:[%s5073_s1 + $0x20] sm:$0xff]  }
   0xd   : > { %s5160_s16 = smov (!%p188_p3, %s3017_s16), 1  ;;  %3851 = vmatpush3.bf16.msra.mxu1 %v3861_v0  ;;  %3545 = vmatpush3.bf16.msra.mxu0 %v3861_v0 }
   0xe   : > { %s3852_s23 = smul.u32 432, %s5160_s16  ;;  %3578 = vmatprep.subr.bf16.mxu1 %v3862_v1  ;;  %3612 = vmatprep.subr.bf16.mxu0 %v3863_v2  ;;  %s3390_s19 = sshll.u32 %s5160_s16, 8 }
   0xf   : > { %s4868_s21 = scalar_lea.vmem %s5076_s4, %s3390_s19 }
  0x10   : > { %s3926_s26 = scalar_lea.vmem %s5072_s0, %s3852_s23 }
  0x11   : > { %v249_v3 = vld [vmem:[%s3926_s26 + $0x1] sm:$0xff]  ;;  %v250_v4 = vld [vmem:[%s3926_s26 + $0x9] sm:$0xff]  ;;  %v251_v8 = vld [vmem:[%s3926_s26 + $0x19] sm:$0xff] }
  0x12   : > { %v265_v5 = vld [vmem:[%s3926_s26 + $0xc1] sm:$0xff]  ;;  %v281_v6 = vpack.c.bf16 %v250_v4, %v249_v3  ;;  %v266_v7 = vld [vmem:[%s3926_s26 + $0xc9] sm:$0xff]  ;;  %v267_v13 = vld [vmem:[%s3926_s26 + $0xd9] sm:$0xff] }
  0x13   : > { %v252_v9 = vld [vmem:[%s3926_s26 + $0x21] sm:$0xff]  ;;  %v3939_v11 = vpack.c.bf16 %v266_v7, %v265_v5  ;;  %v253_v15 = vld [vmem:[%s3926_s26 + $0x31] sm:$0xff]  ;;  %v254_v17 = vld [vmem:[%s3926_s26 + $0x39] sm:$0xff] }
  0x14   : > { %v3941_v12 = vpack.c.bf16 %v252_v9, %v251_v8  ;;  %v268_v14 = vld [vmem:[%s3926_s26 + $0xe1] sm:$0xff]  ;;  %3546 = vmatprep.mubr.msk.bf16.mxu0 %vm306_vm0, %v281_v6  ;;  %v269_v18 = vld [vmem:[%s3926_s26 + $0xf1] sm:$0xff]  ;;  %v270_v19 = vld [vmem:[%s3926_s26 + $0xf9] sm:$0xff]  ;;  %v3956_v20 = vpack.c.bf16 %v254_v17, %v253_v15 }
  0x15   : > { %v3947_v16 = vpack.c.bf16 %v268_v14, %v267_v13  ;;  %3562 = vmatprep.mubr.msk.bf16.mxu1 %vm306_vm0, %v3939_v11  ;;  %v3958_v21 = vpack.c.bf16 %v270_v19, %v269_v18  ;;  %v255_v23 = vld [vmem:[%s3926_s26 + $0x49] sm:$0xff]  ;;  %v256_v24 = vld [vmem:[%s3926_s26 + $0x51] sm:$0xff]  ;;  %v257_v27 = vld [vmem:[%s3926_s26 + $0x61] sm:$0xff] }
  0x16   : > { %3547 = vmatmul.mubr.msk.bf16.vlgmr.msra.gmra.mxu0 %vm306_vm0, %v3941_v12  ;;  %v271_v25 = vld [vmem:[%s3926_s26 + $0x109] sm:$0xff]  ;;  %v272_v26 = vld [vmem:[%s3926_s26 + $0x111] sm:$0xff]  ;;  %v273_v29 = vld [vmem:[%s3926_s26 + $0x121] sm:$0xff]  ;;  %v3980_v31 = vpack.c.bf16 %v256_v24, %v255_v23 }
  0x17   : > { %3563 = vmatmul.mubr.msk.bf16.vlgmr.msra.gmra.mxu1 %vm306_vm0, %v3947_v16  ;;  %3613 = vmatpush3.bf16.msra.mxu0 %v3863_v2  ;;  %v258_v28 = vld [vmem:[%s3926_s26 + $0x69] sm:$0xff]  ;;  %v3983_v32 = vpack.c.bf16 %v272_v26, %v271_v25  ;;  %v259_v35 = vld [vmem:[%s3926_s26 + $0x79] sm:$0xff]  ;;  %v260_v36 = vld [vmem:[%s3926_s26 + $0x81] sm:$0xff] }
  0x18   : > { %3579 = vmatpush3.bf16.msra.mxu1 %v3862_v1  ;;  %3550 = vmatprep.mubr.msk.bf16.mxu0 %vm306_vm0, %v3956_v20  ;;  %v274_v30 = vld [vmem:[%s3926_s26 + $0x129] sm:$0xff]  ;;  %v3985_v33 = vpack.c.bf16 %v258_v28, %v257_v27  ;;  %v275_v37 = vld [vmem:[%s3926_s26 + $0x139] sm:$0xff]  ;;  %v276_v38 = vld [vmem:[%s3926_s26 + $0x141] sm:$0xff]  ;;  %v4005_v43 = vpack.c.bf16 %v260_v36, %v259_v35 }
  0x19   : > { %3566 = vmatprep.mubr.msk.bf16.mxu1 %vm306_vm0, %v3958_v21  ;;  %3646 = vmatprep.subr.bf16.mxu1 %v3937_v10  ;;  %v3987_v34 = vpack.c.bf16 %v274_v30, %v273_v29  ;;  %v261_v39 = vld [vmem:[%s3926_s26 + $0x91] sm:$0xff]  ;;  %v262_v40 = vld [vmem:[%s3926_s26 + $0x99] sm:$0xff]  ;;  %v4007_v44 = vpack.c.bf16 %v276_v38, %v275_v37  ;;  %v263_v47 = vld [vmem:[%s3926_s26 + $0xa9] sm:$0xff] }
  0x1a   : > { %3680 = vmatprep.subr.bf16.mxu0 %v3963_v22  ;;  %v277_v41 = vld [vmem:[%s3926_s26 + $0x151] sm:$0xff]  ;;  %v278_v42 = vld [vmem:[%s3926_s26 + $0x159] sm:$0xff]  ;;  %v4009_v45 = vpack.c.bf16 %v262_v40, %v261_v39  ;;  %v279_v49 = vld [vmem:[%s3926_s26 + $0x169] sm:$0xff] }
  0x1b   : > { %v4011_v46 = vpack.c.bf16 %v278_v42, %v277_v41  ;;  %v264_v48 = vld [vmem:[%s3926_s26 + $0xb1] sm:$0xff]  ;;  %v731_v51 = vld [vmem:[%s3926_s26 + $0x2] sm:$0xff]  ;;  %v733_v59 = vld [vmem:[%s3926_s26 + $0x1a] sm:$0xff] }
  0x1c   : > { %v280_v50 = vld [vmem:[%s3926_s26 + $0x171] sm:$0xff]  ;;  %v199_v53 = vld [vmem:[%s3926_s26] sm:$0xff]  ;;  %v200_v54 = vld [vmem:[%s3926_s26 + $0x8] sm:$0xff]  ;;  %v4029_v55 = vpack.c.bf16 %v264_v48, %v263_v47 }
  0x1d   : > { %v732_v52 = vld [vmem:[%s3926_s26 + $0xa] sm:$0xff]  ;;  %v4031_v56 = vpack.c.bf16 %v280_v50, %v279_v49  ;;  %v231_v58 = vpack.c.bf16 %v200_v54, %v199_v53  ;;  %v734_v60 = vld [vmem:[%s3926_s26 + $0x22] sm:$0xff]  ;;  %v201_v61 = vld [vmem:[%s3926_s26 + $0x18] sm:$0xff] }
  0x1e   : > { %3551 = vmatmul.mubr.msk.bf16.gmra.mxu0 %vm306_vm0, %v3980_v31  ;;  %v763_v57 = vpack.c.bf16 %v732_v52, %v731_v51  ;;  %v202_v62 = vld [vmem:[%s3926_s26 + $0x20] sm:$0xff]  ;;  %v203_v63 = vld [vmem:[%s3926_s26 + $0x30] sm:$0xff]  ;;  %v204_v0 = vld [vmem:[%s3926_s26 + $0x38] sm:$0xff]  ;;  %v4045_v1 = vpack.c.bf16 %v734_v60, %v733_v59 }
  0x1f   : > { %3567 = vmatmul.mubr.msk.bf16.gmra.mxu1 %vm306_vm0, %v3983_v32  ;;  %3554 = vmatprep.mubr.msk.bf16.mxu0 %vm306_vm0, %v3985_v33  ;;  %v735_v2 = vld [vmem:[%s3926_s26 + $0x32] sm:$0xff]  ;;  %v736_v3 = vld [vmem:[%s3926_s26 + $0x3a] sm:$0xff]  ;;  %v4049_v4 = vpack.c.bf16 %v202_v62, %v201_v61  ;;  %v4051_v5 = vpack.c.bf16 %v204_v0, %v203_v63  ;;  %v4058_v7 = vld [vmem:[%s5073_s1 + $0x28] sm:$0xff]  }
  0x20   : > { %3570 = vmatprep.mubr.msk.bf16.mxu1 %vm306_vm0, %v3987_v34  ;;  %v4053_v6 = vpack.c.bf16 %v736_v3, %v735_v2  ;;  %v4065_v8 = vld [vmem:[%s5073_s1 + $0x30] sm:$0xff]   ;;  %v205_v9 = vld [vmem:[%s3926_s26 + $0x48] sm:$0xff]  ;;  %v207_v19 = vld [vmem:[%s3926_s26 + $0x60] sm:$0xff] }
  0x21   : > { %v737_v13 = vld [vmem:[%s3926_s26 + $0x4a] sm:$0xff]  ;;  %v738_v14 = vld [vmem:[%s3926_s26 + $0x52] sm:$0xff]  ;;  %v739_v17 = vld [vmem:[%s3926_s26 + $0x62] sm:$0xff] }
  0x22   : > { %v206_v15 = vld [vmem:[%s3926_s26 + $0x50] sm:$0xff]  ;;  %v209_v26 = vld [vmem:[%s3926_s26 + $0x78] sm:$0xff]  ;;  %v742_v28 = vld [vmem:[%s3926_s26 + $0x82] sm:$0xff] }
  0x23   : > { %v740_v18 = vld [vmem:[%s3926_s26 + $0x6a] sm:$0xff]  ;;  %v4087_v23 = vpack.c.bf16 %v206_v15, %v205_v9  ;;  %v741_v27 = vld [vmem:[%s3926_s26 + $0x7a] sm:$0xff]  ;;  %v743_v30 = vld [vmem:[%s3926_s26 + $0x92] sm:$0xff] }
  0x24   : > { %v4089_v24 = vpack.c.bf16 %v740_v18, %v739_v17  ;;  %v210_v29 = vld [vmem:[%s3926_s26 + $0x80] sm:$0xff]  ;;  %v211_v36 = vld [vmem:[%s3926_s26 + $0x90] sm:$0xff]  ;;  %v212_v37 = vld [vmem:[%s3926_s26 + $0x98] sm:$0xff]  ;;  %v4109_v38 = vpack.c.bf16 %v742_v28, %v741_v27 }
  0x25   : > { %v744_v35 = vld [vmem:[%s3926_s26 + $0x9a] sm:$0xff]  ;;  %v4111_v39 = vpack.c.bf16 %v210_v29, %v209_v26  ;;  %v4115_v41 = vpack.c.bf16 %v212_v37, %v211_v36  ;;  %v213_v42 = vld [vmem:[%s3926_s26 + $0xa8] sm:$0xff]  ;;  %v746_v48 = vld [vmem:[%s3926_s26 + $0xb2] sm:$0xff] }
  0x26   : > { %3555 = vmatmul.mubr.msk.bf16.gmra.mxu0 %vm306_vm0, %v4005_v43  ;;  %v4113_v40 = vpack.c.bf16 %v744_v35, %v743_v30  ;;  %v745_v47 = vld [vmem:[%s3926_s26 + $0xaa] sm:$0xff]  ;;  %v747_v50 = vld [vmem:[%s3926_s26 + $0xc2] sm:$0xff]  ;;  %v217_v60 = vld [vmem:[%s3926_s26 + $0xd8] sm:$0xff] }
  0x27   : > { %3571 = vmatmul.mubr.msk.bf16.gmra.mxu1 %vm306_vm0, %v4007_v44  ;;  %3558 = vmatprep.mubr.msk.bf16.mxu0 %vm306_vm0, %v4009_v45  ;;  %v214_v49 = vld [vmem:[%s3926_s26 + $0xb0] sm:$0xff]  ;;  %v215_v52 = vld [vmem:[%s3926_s26 + $0xc0] sm:$0xff]  ;;  %v216_v53 = vld [vmem:[%s3926_s26 + $0xc8] sm:$0xff]  ;;  %v4133_v54 = vpack.c.bf16 %v746_v48, %v745_v47 }
  0x28   : > { %3574 = vmatprep.mubr.msk.bf16.mxu1 %vm306_vm0, %v4011_v46  ;;  %v748_v51 = vld [vmem:[%s3926_s26 + $0xca] sm:$0xff]  ;;  %v4139_v59 = vpack.c.bf16 %v216_v53, %v215_v52  ;;  %v749_v61 = vld [vmem:[%s3926_s26 + $0xda] sm:$0xff]  ;;  %v750_v62 = vld [vmem:[%s3926_s26 + $0xe2] sm:$0xff] }
  0x29   : > { %v218_v63 = vld [vmem:[%s3926_s26 + $0xe0] sm:$0xff]  ;;  %v751_v0 = vld [vmem:[%s3926_s26 + $0xf2] sm:$0xff]  ;;  %v221_v18 = vld [vmem:[%s3926_s26 + $0x108] sm:$0xff] }
  0x2a   : > { %v752_v2 = vld [vmem:[%s3926_s26 + $0xfa] sm:$0xff]  ;;  %v219_v3 = vld [vmem:[%s3926_s26 + $0xf0] sm:$0xff]  ;;  %v755_v27 = vld [vmem:[%s3926_s26 + $0x122] sm:$0xff] }
  0x2b   : > { %v220_v9 = vld [vmem:[%s3926_s26 + $0xf8] sm:$0xff]  ;;  %v4161_v15 = vpack.c.bf16 %v752_v2, %v751_v0  ;;  %v222_v26 = vld [vmem:[%s3926_s26 + $0x110] sm:$0xff]  ;;  %v223_v29 = vld [vmem:[%s3926_s26 + $0x120] sm:$0xff] }
  0x2c   : > { %v4163_v17 = vpack.c.bf16 %v220_v9, %v219_v3  ;;  %v756_v28 = vld [vmem:[%s3926_s26 + $0x12a] sm:$0xff]  ;;  %v4183_v36 = vpack.c.bf16 %v222_v26, %v221_v18  ;;  %v225_v47 = vld [vmem:[%s3926_s26 + $0x138] sm:$0xff] }
  0x2d   : > { %v224_v30 = vld [vmem:[%s3926_s26 + $0x128] sm:$0xff]  ;;  %v4185_v37 = vpack.c.bf16 %v756_v28, %v755_v27  ;;  %v757_v48 = vld [vmem:[%s3926_s26 + $0x13a] sm:$0xff]  ;;  %v227_v53 = vld [vmem:[%s3926_s26 + $0x150] sm:$0xff] }
  0x2e   : > { %3559 = vmatmul.mubr.msk.bf16.gmra.mxu0 %vm306_vm0, %v4029_v55  ;;  %v760_v52 = vld [vmem:[%s3926_s26 + $0x15a] sm:$0xff]  ;;  %v761_v2 = vld [vmem:[%s3926_s26 + $0x16a] sm:$0xff]  ;;  %v762_v3 = vld [vmem:[%s3926_s26 + $0x172] sm:$0xff] }
  0x2f   : > { %3575 = vmatmul.mubr.msk.bf16.gmra.mxu1 %vm306_vm0, %v4031_v56  ;;  %3614 = vmatprep.mubr.msk.bf16.mxu0 %vm306_vm0, %v763_v57  ;;  %v4135_v57 = vpack.c.bf16 %v214_v49, %v213_v42  ;;  %v4187_v42 = vpack.c.bf16 %v224_v30, %v223_v29  ;;  %v758_v49 = vld [vmem:[%s3926_s26 + $0x142] sm:$0xff]  ;;  %v230_v18 = vld [vmem:[%s3926_s26 + $0x170] sm:$0xff]  ;;  %v3868_v26 = vld [vmem:[%s5073_s1 + $0x38] sm:$0xff]  }
  0x30   : > { %3580 = vmatprep.mubr.msk.bf16.mxu1 %vm306_vm0, %v231_v58  ;;  %v4137_v58 = vpack.c.bf16 %v748_v51, %v747_v50  ;;  %v226_v50 = vld [vmem:[%s3926_s26 + $0x140] sm:$0xff]  ;;  %v759_v51 = vld [vmem:[%s3926_s26 + $0x152] sm:$0xff]  ;;  %v229_v9 = vld [vmem:[%s3926_s26 + $0x168] sm:$0xff] }
  0x31   : > { %v3869_v27 = vld [vmem:[%s5073_s1 + $0x40] sm:$0xff]  }
  0x32   : > { %v3264_v28 = vld [vmem:[%s3926_s26 + $0x1a0] sm:$0xff] }
  0x33   : > { %v3212_v30 = vld [vmem:[%s3926_s26 + $0x182] sm:$0xff] }
  0x36   : > { %3615 = vmatmul.mubr.msk.bf16.vlgmr.msra.gmra.mxu0 %vm306_vm0, %v4045_v1 }
  0x37   : > { %3581 = vmatmul.mubr.msk.bf16.vlgmr.msra.gmra.mxu1 %vm306_vm0, %v4049_v4  ;;  %3681 = vmatpush3.bf16.msra.mxu0 %v3963_v22  ;;  %v208_v22 = vld [vmem:[%s3926_s26 + $0x68] sm:$0xff] }
  0x38   : > { %3647 = vmatpush3.bf16.msra.mxu1 %v3937_v10  ;;  %3584 = vmatprep.mubr.msk.bf16.mxu1 %vm306_vm0, %v4051_v5  ;;  %v4084_v10 = vpack.c.bf16 %v738_v14, %v737_v13  ;;  %v4091_v25 = vpack.c.bf16 %v208_v22, %v207_v19  ;;  %v4157_v13 = vpack.c.bf16 %v750_v62, %v749_v61  ;;  %v753_v19 = vld [vmem:[%s3926_s26 + $0x10a] sm:$0xff]  ;;  %v754_v22 = vld [vmem:[%s3926_s26 + $0x112] sm:$0xff] }
  0x39   : > { %3618 = vmatprep.mubr.msk.bf16.mxu0 %vm306_vm0, %v4053_v6  ;;  %3714 = vmatprep.subr.bf16.mxu1 %v4058_v7  ;;  %v4159_v14 = vpack.c.bf16 %v218_v63, %v217_v60  ;;  %v4181_v35 = vpack.c.bf16 %v754_v22, %v753_v19  ;;  %v228_v60 = vld [vmem:[%s3926_s26 + $0x158] sm:$0xff]  ;;  %v4205_v61 = vpack.c.bf16 %v758_v49, %v757_v48 }
  0x3a   : > { %3748 = vmatprep.subr.bf16.mxu0 %v4065_v8  ;;  %v4207_v62 = vpack.c.bf16 %v226_v50, %v225_v47  ;;  %v4209_v63 = vpack.c.bf16 %v760_v52, %v759_v51  ;;  %v4211_v0 = vpack.c.bf16 %v228_v60, %v227_v53  ;;  %v4225_v19 = vpack.c.bf16 %v762_v3, %v761_v2 }
  0x3b   : > { %v4227_v22 = vpack.c.bf16 %v230_v18, %v229_v9 }
  0x3e   : > { %3619 = vmatmul.mubr.msk.bf16.gmra.mxu0 %vm306_vm0, %v4084_v10 }
  0x3f   : > { %3585 = vmatmul.mubr.msk.bf16.gmra.mxu1 %vm306_vm0, %v4087_v23  ;;  %3622 = vmatprep.mubr.msk.bf16.mxu0 %vm306_vm0, %v4089_v24 }
  0x40   : > { %3588 = vmatprep.mubr.msk.bf16.mxu1 %vm306_vm0, %v4091_v25 }
  0x46   : > { %3623 = vmatmul.mubr.msk.bf16.gmra.mxu0 %vm306_vm0, %v4109_v38 }
  0x47   : > { %3589 = vmatmul.mubr.msk.bf16.gmra.mxu1 %vm306_vm0, %v4111_v39  ;;  %3626 = vmatprep.mubr.msk.bf16.mxu0 %vm306_vm0, %v4113_v40 }
  0x48   : > { %3592 = vmatprep.mubr.msk.bf16.mxu1 %vm306_vm0, %v4115_v41 }
  0x4e   : > { %3627 = vmatmul.mubr.msk.bf16.gmra.mxu0 %vm306_vm0, %v4133_v54 }
  0x4f   : > { %3593 = vmatmul.mubr.msk.bf16.gmra.mxu1 %vm306_vm0, %v4135_v57  ;;  %3630 = vmatprep.mubr.msk.bf16.mxu0 %vm306_vm0, %v4137_v58 }
  0x50   : > { %3596 = vmatprep.mubr.msk.bf16.mxu1 %vm306_vm0, %v4139_v59 }
  0x56   : > { %3631 = vmatmul.mubr.msk.bf16.gmra.mxu0 %vm306_vm0, %v4157_v13 }
  0x57   : > { %3597 = vmatmul.mubr.msk.bf16.gmra.mxu1 %vm306_vm0, %v4159_v14  ;;  %3634 = vmatprep.mubr.msk.bf16.mxu0 %vm306_vm0, %v4161_v15 }
  0x58   : > { %3600 = vmatprep.mubr.msk.bf16.mxu1 %vm306_vm0, %v4163_v17 }
  0x5e   : > { %3635 = vmatmul.mubr.msk.bf16.gmra.mxu0 %vm306_vm0, %v4181_v35 }
  0x5f   : > { %3601 = vmatmul.mubr.msk.bf16.gmra.mxu1 %vm306_vm0, %v4183_v36  ;;  %3638 = vmatprep.mubr.msk.bf16.mxu0 %vm306_vm0, %v4185_v37 }
  0x60   : > { %3604 = vmatprep.mubr.msk.bf16.mxu1 %vm306_vm0, %v4187_v42 }
  0x66   : > { %3639 = vmatmul.mubr.msk.bf16.gmra.mxu0 %vm306_vm0, %v4205_v61 }
  0x67   : > { %3605 = vmatmul.mubr.msk.bf16.gmra.mxu1 %vm306_vm0, %v4207_v62  ;;  %3642 = vmatprep.mubr.msk.bf16.mxu0 %vm306_vm0, %v4209_v63 }
  0x68   : > { %3608 = vmatprep.mubr.msk.bf16.mxu1 %vm306_vm0, %v4211_v0 }
  0x6e   : > { %3643 = vmatmul.mubr.msk.bf16.gmra.mxu0 %vm306_vm0, %v4225_v19 }
  0x6f   : > { %3609 = vmatmul.mubr.msk.bf16.gmra.mxu1 %vm306_vm0, %v4227_v22  ;;  %3682 = vmatprep.mubr.msk.bf16.mxu0 %vm306_vm0, %v3941_v12  ;;  %v3162_v12 = vld [vmem:[%s3926_s26 + $0x189] sm:$0xff] }
  0x70   : > { %3648 = vmatprep.mubr.msk.bf16.mxu1 %vm306_vm0, %v4049_v4 }
  0x76   : > { %3683 = vmatmul.mubr.msk.bf16.vlgmr.msra.gmra.mxu0 %vm306_vm0, %v3956_v20 }
  0x77   : > { %3649 = vmatmul.mubr.msk.bf16.vlgmr.msra.gmra.mxu1 %vm306_vm0, %v4051_v5  ;;  %3749 = vmatpush3.bf16.msra.mxu0 %v4065_v8 }
  0x78   : > { %3715 = vmatpush3.bf16.msra.mxu1 %v4058_v7  ;;  %3652 = vmatprep.mubr.msk.bf16.mxu1 %vm306_vm0, %v4087_v23 }
  0x79   : > { %3686 = vmatprep.mubr.msk.bf16.mxu0 %vm306_vm0, %v3980_v31  ;;  %3782 = vmatprep.subr.bf16.mxu1 %v3868_v26 }
  0x7a   : > { %3816 = vmatprep.subr.bf16.mxu0 %v3869_v27 }
  0x7e   : > { %3687 = vmatmul.mubr.msk.bf16.gmra.mxu0 %vm306_vm0, %v3985_v33 }
  0x7f   : > { %3653 = vmatmul.mubr.msk.bf16.gmra.mxu1 %vm306_vm0, %v4091_v25  ;;  %3690 = vmatprep.mubr.msk.bf16.mxu0 %vm306_vm0, %v4005_v43 }
  0x80   : > { %3656 = vmatprep.mubr.msk.bf16.mxu1 %vm306_vm0, %v4111_v39 }
  0x86   : > { %3691 = vmatmul.mubr.msk.bf16.gmra.mxu0 %vm306_vm0, %v4009_v45 }
  0x87   : > { %3657 = vmatmul.mubr.msk.bf16.gmra.mxu1 %vm306_vm0, %v4115_v41  ;;  %3694 = vmatprep.mubr.msk.bf16.mxu0 %vm306_vm0, %v4029_v55 }
  0x88   : > { %3660 = vmatprep.mubr.msk.bf16.mxu1 %vm306_vm0, %v4135_v57 }
  0x8e   : > { %3695 = vmatmul.mubr.msk.bf16.gmra.mxu0 %vm306_vm0, %v3939_v11  ;;  %v3161_v11 = vld [vmem:[%s3926_s26 + $0x181] sm:$0xff] }
  0x8f   : > { %3661 = vmatmul.mubr.msk.bf16.gmra.mxu1 %vm306_vm0, %v4139_v59  ;;  %3698 = vmatprep.mubr.msk.bf16.mxu0 %vm306_vm0, %v3947_v16  ;;  %v3110_v16 = vld [vmem:[%s3926_s26 + $0x180] sm:$0xff] }
  0x90   : > { %3664 = vmatprep.mubr.msk.bf16.mxu1 %vm306_vm0, %v4159_v14 }
  0x96   : > { %3699 = vmatmul.mubr.msk.bf16.gmra.mxu0 %vm306_vm0, %v3958_v21  ;;  %v3111_v21 = vld [vmem:[%s3926_s26 + $0x188] sm:$0xff] }
  0x97   : > { %3665 = vmatmul.mubr.msk.bf16.gmra.mxu1 %vm306_vm0, %v4163_v17  ;;  %3702 = vmatprep.mubr.msk.bf16.mxu0 %vm306_vm0, %v3983_v32  ;;  %v4305_v32 = vpack.c.bf16 %v3162_v12, %v3161_v11  ;;  %v3292_v11 = vld [vmem:[%s3926_s26 + $0x91] sm:$0xff]  ;;  %v3293_v12 = vld [vmem:[%s3926_s26 + $0x99] sm:$0xff] }
  0x98   : > { %3668 = vmatprep.mubr.msk.bf16.mxu1 %vm306_vm0, %v4183_v36 }
  0x9e   : > { %3703 = vmatmul.mubr.msk.bf16.gmra.mxu0 %vm306_vm0, %v3987_v34  ;;  %v1077_v34 = vpack.c.bf16 %v3111_v21, %v3110_v16 }
  0x9f   : > { %3669 = vmatmul.mubr.msk.bf16.gmra.mxu1 %vm306_vm0, %v4187_v42  ;;  %3706 = vmatprep.mubr.msk.bf16.mxu0 %vm306_vm0, %v4007_v44 }
  0xa0   : > { %3672 = vmatprep.mubr.msk.bf16.mxu1 %vm306_vm0, %v4207_v62 }
  0xa6   : > { %3707 = vmatmul.mubr.msk.bf16.gmra.mxu0 %vm306_vm0, %v4011_v46 }
  0xa7   : > { %3673 = vmatmul.mubr.msk.bf16.gmra.mxu1 %vm306_vm0, %v4211_v0  ;;  %3710 = vmatprep.mubr.msk.bf16.mxu0 %vm306_vm0, %v4031_v56 }
  0xa8   : > { %3676 = vmatprep.mubr.msk.bf16.mxu1 %vm306_vm0, %v4227_v22 }
  0xae   : > { %3711 = vmatmul.mubr.msk.bf16.gmra.mxu0 %vm306_vm0, %v4305_v32 }
  0xaf   : > { %3677 = vmatmul.mubr.msk.bf16.gmra.mxu1 %vm306_vm0, %v1077_v34  ;;  %3750 = vmatprep.mubr.msk.bf16.mxu0 %vm306_vm0, %v4051_v5 }
  0xb0   : > { %3716 = vmatprep.mubr.msk.bf16.mxu1 %vm306_vm0, %v4045_v1 }
  0xb6   : > { %3751 = vmatmul.mubr.msk.bf16.vlgmr.msra.gmra.mxu0 %vm306_vm0, %v4087_v23 }
  0xb7   : > { %3717 = vmatmul.mubr.msk.bf16.vlgmr.msra.gmra.mxu1 %vm306_vm0, %v4053_v6  ;;  %3817 = vmatpush3.bf16.msra.mxu0 %v3869_v27 }
  0xb8   : > { %3783 = vmatpush3.bf16.msra.mxu1 %v3868_v26  ;;  %3720 = vmatprep.mubr.msk.bf16.mxu1 %vm306_vm0, %v4084_v10  ;;  %v3291_v26 = vld [vmem:[%s3926_s26 + $0x81] sm:$0xff] }
  0xb9   : > { %3754 = vmatprep.mubr.msk.bf16.mxu0 %vm306_vm0, %v4091_v25 }
  0xbe   : > { %3755 = vmatmul.mubr.msk.bf16.gmra.mxu0 %vm306_vm0, %v4111_v39 }
  0xbf   : > { %3721 = vmatmul.mubr.msk.bf16.gmra.mxu1 %vm306_vm0, %v4089_v24  ;;  %3758 = vmatprep.mubr.msk.bf16.mxu0 %vm306_vm0, %v4115_v41 }
  0xc0   : > { %3724 = vmatprep.mubr.msk.bf16.mxu1 %vm306_vm0, %v4109_v38 }
  0xc6   : > { %3759 = vmatmul.mubr.msk.bf16.gmra.mxu0 %vm306_vm0, %v4135_v57 }
  0xc7   : > { %3725 = vmatmul.mubr.msk.bf16.gmra.mxu1 %vm306_vm0, %v4113_v40  ;;  %3762 = vmatprep.mubr.msk.bf16.mxu0 %vm306_vm0, %v4139_v59 }
  0xc8   : > { %3728 = vmatprep.mubr.msk.bf16.mxu1 %vm306_vm0, %v4133_v54 }
  0xce   : > { %3763 = vmatmul.mubr.msk.bf16.gmra.mxu0 %vm306_vm0, %v4159_v14 }
  0xcf   : > { %3729 = vmatmul.mubr.msk.bf16.gmra.mxu1 %vm306_vm0, %v4137_v58  ;;  %3766 = vmatprep.mubr.msk.bf16.mxu0 %vm306_vm0, %v4163_v17  ;;  %v3263_v17 = vld [vmem:[%s3926_s26 + $0x198] sm:$0xff] }
  0xd0   : > { %3732 = vmatprep.mubr.msk.bf16.mxu1 %vm306_vm0, %v4157_v13  ;;  %v1972_v48 = vpack.c.bf16 %v3264_v28, %v3263_v17 }
  0xd6   : > { %v3548_v43 = vpop.f32.mrf.mxu0  ;;  %3767 = vmatmul.mubr.msk.bf16.gmra.mxu0 %vm306_vm0, %v4183_v36  ;;  %v3213_v36 = vld [vmem:[%s3926_s26 + $0x18a] sm:$0xff] }
  0xd7   : > { %v4348_v44 = vpop.f32.mrf.mxu1  ;;  %3733 = vmatmul.mubr.msk.bf16.gmra.mxu1 %vm306_vm0, %v4161_v15  ;;  %3770 = vmatprep.mubr.msk.bf16.mxu0 %vm306_vm0, %v4187_v42  ;;  %v4415_v50 = vpack.c.bf16 %v3213_v36, %v3212_v30 }
  0xd8   : > { %v4354_v45 = vpop.f32.mrf.mxu0  ;;  %3736 = vmatprep.mubr.msk.bf16.mxu1 %vm306_vm0, %v4181_v35 }
  0xd9   : > { %v4358_v46 = vpop.f32.mrf.mxu1 }
  0xda   : > { %v4360_v55 = vpop.f32.mrf.mxu0 }
  0xdb   : > { %v4362_v56 = vpop.f32.mrf.mxu1 }
  0xdc   : > { %v4364_v1 = vpop.f32.mrf.mxu0 }
  0xdd   : > { %v4366_v4 = vpop.f32.mrf.mxu1 }
  0xde   : > { %v4368_v5 = vpop.f32.mrf.mxu0  ;;  %3771 = vmatmul.mubr.msk.bf16.gmra.mxu0 %vm306_vm0, %v4207_v62 }
  0xdf   : > { %v4372_v7 = vpop.f32.mrf.mxu1  ;;  %3737 = vmatmul.mubr.msk.bf16.gmra.mxu1 %vm306_vm0, %v4185_v37  ;;  %3774 = vmatprep.mubr.msk.bf16.mxu0 %vm306_vm0, %v4211_v0 }
  0xe0   : > { %v4378_v8 = vpop.f32.mrf.mxu0  ;;  %3740 = vmatprep.mubr.msk.bf16.mxu1 %vm306_vm0, %v4205_v61 }
  0xe1   : > { %v4382_v23 = vpop.f32.mrf.mxu1 }
  0xe2   : > { %v4384_v25 = vpop.f32.mrf.mxu0 }
  0xe3   : > { %v4386_v39 = vpop.f32.mrf.mxu1 }
  0xe4   : > { %v4388_v41 = vpop.f32.mrf.mxu0 }
  0xe5   : > { %v4390_v57 = vpop.f32.mrf.mxu1 }
  0xe6   : > { %v4392_v59 = vpop.f32.mrf.mxu0  ;;  %3775 = vmatmul.mubr.msk.bf16.gmra.mxu0 %vm306_vm0, %v4227_v22  ;;  %v3290_v22 = vld [vmem:[%s3926_s26 + $0x79] sm:$0xff] }
  0xe7   : > { %v4396_v14 = vpop.f32.mrf.mxu1  ;;  %3741 = vmatmul.mubr.msk.bf16.gmra.mxu1 %vm306_vm0, %v4209_v63  ;;  %3778 = vmatprep.mubr.msk.bf16.mxu0 %vm306_vm0, %v1077_v34 }
  0xe8   : > { %v4403_v29 = vpop.f32.mrf.mxu0  ;;  %3744 = vmatprep.mubr.msk.bf16.mxu1 %vm306_vm0, %v4225_v19 }
  0xe9   : > { %v4409_v42 = vpop.f32.mrf.mxu1 }
  0xea   : > { %v4411_v47 = vpop.f32.mrf.mxu0 }
  0xeb   : > { %v4413_v49 = vpop.f32.mrf.mxu1 }
  0xec   : > { %v4417_v51 = vpop.f32.mrf.mxu0 }
  0xed   : > { %v4419_v52 = vpop.f32.mrf.mxu1 }
  0xee   : > { %v4421_v53 = vpop.f32.mrf.mxu0  ;;  %3779 = vmatmul.mubr.msk.bf16.gmra.mxu0 %vm306_vm0, %v1972_v48 }
  0xef   : > { %v4424_v60 = vpop.f32.mrf.mxu1  ;;  %3745 = vmatmul.mubr.msk.bf16.gmra.mxu1 %vm306_vm0, %v4415_v50  ;;  %3818 = vmatprep.mubr.msk.bf16.mxu0 %vm306_vm0, %v4053_v6 }
  0xf0   : > { %v4430_v62 = vpop.f32.mrf.mxu0  ;;  %3784 = vmatprep.mubr.msk.bf16.mxu1 %vm306_vm0, %v3956_v20 }
  0xf1   : > { %v4434_v63 = vpop.f32.mrf.mxu1 }
  0xf2   : > { %v4436_v0 = vpop.f32.mrf.mxu0 }
  0xf3   : > { %v4438_v2 = vpop.f32.mrf.mxu1 }
  0xf4   : > { %v4440_v3 = vpop.f32.mrf.mxu0 }
  0xf5   : > { %v4442_v9 = vpop.f32.mrf.mxu1 }
  0xf6   : > { %v3616_v6 = vpop.f32.mrf.mxu0  ;;  %3819 = vmatmul.mubr.msk.bf16.vlgmr.msra.gmra.mxu0 %vm306_vm0, %v4084_v10 }
  0xf7   : > { %v3582_v18 = vpop.f32.mrf.mxu1  ;;  %3785 = vmatmul.mubr.msk.bf16.vlgmr.msra.gmra.mxu1 %vm306_vm0, %v3980_v31  ;;  %3822 = vmatprep.mubr.msk.bf16.mxu0 %vm306_vm0, %v4089_v24  ;;  %v2258_v31 = vpack.c.bf16 %v3291_v26, %v3290_v22  ;;  %v3296_v22 = vld [vmem:[%s3926_s26 + $0xc1] sm:$0xff]  ;;  %v3297_v26 = vld [vmem:[%s3926_s26 + $0xc9] sm:$0xff] }
  0xf8   : > { %v613_v20 = vadd.f32 %v3582_v18, %v3548_v43  ;;  %v870_v19 = vpop.f32.mrf.mxu0  ;;  %3788 = vmatprep.mubr.msk.bf16.mxu1 %vm306_vm0, %v3985_v33  ;;  %v2259_v33 = vpack.c.bf16 %v3293_v12, %v3292_v11 }
  0xf9   : > { %v604_v27 = vpop.f32.mrf.mxu1 }
  0xfa   : > { %v4456_v16 = vadd.f32 %v3616_v6, %v613_v20  ;;  %v605_v10 = vadd.f32 %v604_v27, %v4354_v45  ;;  %v3617_v21 = vpop.f32.mrf.mxu0  ;;  %v3294_v20 = vld [vmem:[%s3926_s26 + $0xa9] sm:$0xff] }
  0xfb   : > { %v3583_v34 = vpop.f32.mrf.mxu1 }
  0xfc   : > { %v4459_v17 = vadd.f32 %v870_v19, %v605_v10  ;;  %v616_v24 = vadd.f32 %v3583_v34, %v4360_v55  ;;  %v873_v43 = vpop.f32.mrf.mxu0  ;;  %v3295_v19 = vld [vmem:[%s3926_s26 + $0xb1] sm:$0xff]  ;;  %v2261_v34 = vpack.c.bf16 %v3297_v26, %v3296_v22 }
  0xfd   : > { %v607_v28 = vpop.f32.mrf.mxu1  ;;  %v2260_v10 = vpack.c.bf16 %v3295_v19, %v3294_v20 }
  0xfe   : > { %v4462_v30 = vadd.f32 %v3617_v21, %v616_v24  ;;  %v608_v36 = vadd.f32 %v607_v28, %v4364_v1  ;;  %v3620_v48 = vpop.f32.mrf.mxu0  ;;  %3823 = vmatmul.mubr.msk.bf16.gmra.mxu0 %vm306_vm0, %v4109_v38 }
  0xff   : > { %v3586_v45 = vpop.f32.mrf.mxu1  ;;  %3789 = vmatmul.mubr.msk.bf16.gmra.mxu1 %vm306_vm0, %v2258_v31  ;;  %3826 = vmatprep.mubr.msk.bf16.mxu0 %vm306_vm0, %v4113_v40 }
 0x100   : > { %v4470_v55 = vadd.f32 %v873_v43, %v608_v36  ;;  %v629_v6 = vadd.f32 %v3586_v45, %v4368_v5  ;;  %v886_v18 = vpop.f32.mrf.mxu0  ;;  %3792 = vmatprep.mubr.msk.bf16.mxu1 %vm306_vm0, %v2259_v33  ;;  %v3299_v45 = vld [vmem:[%s3926_s26 + $0xe1] sm:$0xff] }
 0x101   : > { %v620_v1 = vpop.f32.mrf.mxu1 }
 0x102   : > { %v4478_v27 = vadd.f32 %v3620_v48, %v629_v6  ;;  %v621_v38 = vadd.f32 %v620_v1, %v4378_v8  ;;  %v3621_v11 = vpop.f32.mrf.mxu0  ;;  %v3298_v48 = vld [vmem:[%s3926_s26 + $0xd9] sm:$0xff]  ;;  %v3300_v6 = vld [vmem:[%s3926_s26 + $0xf1] sm:$0xff] }
 0x103   : > { %v3587_v12 = vpop.f32.mrf.mxu1  ;;  %v2262_v22 = vpack.c.bf16 %v3299_v45, %v3298_v48 }
 0x104   : > { %v4481_v40 = vadd.f32 %v886_v18, %v621_v38  ;;  %v632_v5 = vadd.f32 %v3587_v12, %v4384_v25  ;;  %v889_v21 = vpop.f32.mrf.mxu0  ;;  %v3301_v18 = vld [vmem:[%s3926_s26 + $0xf9] sm:$0xff] }
 0x105   : > { %v623_v31 = vpop.f32.mrf.mxu1  ;;  %v2263_v38 = vpack.c.bf16 %v3301_v18, %v3300_v6 }
 0x106   : > { %v4484_v24 = vadd.f32 %v3621_v11, %v632_v5  ;;  %v624_v43 = vadd.f32 %v623_v31, %v4388_v41  ;;  %v3624_v33 = vpop.f32.mrf.mxu0  ;;  %3827 = vmatmul.mubr.msk.bf16.gmra.mxu0 %vm306_vm0, %v4133_v54  ;;  %v3302_v31 = vld [vmem:[%s3926_s26 + $0x109] sm:$0xff] }
 0x107   : > { %v3590_v8 = vpop.f32.mrf.mxu1  ;;  %3793 = vmatmul.mubr.msk.bf16.gmra.mxu1 %vm306_vm0, %v2260_v10  ;;  %3830 = vmatprep.mubr.msk.bf16.mxu0 %vm306_vm0, %v4137_v58 }
 0x108   : > { %v4492_v25 = vadd.f32 %v889_v21, %v624_v43  ;;  %v645_v28 = vadd.f32 %v3590_v8, %v4392_v59  ;;  %v902_v36 = vpop.f32.mrf.mxu0  ;;  %3796 = vmatprep.mubr.msk.bf16.mxu1 %vm306_vm0, %v2261_v34  ;;  %v3303_v43 = vld [vmem:[%s3926_s26 + $0x111] sm:$0xff]  ;;  %v3305_v8 = vld [vmem:[%s3926_s26 + $0x129] sm:$0xff] }
 0x109   : > { %v636_v41 = vpop.f32.mrf.mxu1 }
 0x10a   : > { %v4500_v20 = vadd.f32 %v3624_v33, %v645_v28  ;;  %v637_v54 = vadd.f32 %v636_v41, %v4403_v29  ;;  %v3625_v19 = vpop.f32.mrf.mxu0  ;;  %v3304_v33 = vld [vmem:[%s3926_s26 + $0x121] sm:$0xff] }
 0x10b   : > { %v3591_v1 = vpop.f32.mrf.mxu1  ;;  %v2265_v6 = vpack.c.bf16 %v3305_v8, %v3304_v33 }
 0x10c   : > { %v4503_v58 = vadd.f32 %v902_v36, %v637_v54  ;;  %v648_v59 = vadd.f32 %v3591_v1, %v4411_v47  ;;  %v905_v26 = vpop.f32.mrf.mxu0 }
 0x10d   : > { %v639_v11 = vpop.f32.mrf.mxu1 }
 0x10e   : > { %v4506_v12 = vadd.f32 %v3625_v19, %v648_v59  ;;  %v640_v10 = vadd.f32 %v639_v11, %v4417_v51  ;;  %v3628_v5 = vpop.f32.mrf.mxu0  ;;  %3831 = vmatmul.mubr.msk.bf16.gmra.mxu0 %vm306_vm0, %v4157_v13  ;;  %v3360_v11 = vld [vmem:[%s3926_s26 + $0x15a] sm:$0xff] }
 0x10f   : > { %v3594_v29 = vpop.f32.mrf.mxu1  ;;  %3797 = vmatmul.mubr.msk.bf16.gmra.mxu1 %vm306_vm0, %v2262_v22  ;;  %3834 = vmatprep.mubr.msk.bf16.mxu0 %vm306_vm0, %v4161_v15  ;;  %v2264_v15 = vpack.c.bf16 %v3303_v43, %v3302_v31 }
 0x110   : > { %v4514_v47 = vadd.f32 %v905_v26, %v640_v10  ;;  %v661_v21 = vadd.f32 %v3594_v29, %v4421_v53  ;;  %v918_v34 = vpop.f32.mrf.mxu0  ;;  %3800 = vmatprep.mubr.msk.bf16.mxu1 %vm306_vm0, %v2263_v38  ;;  %v3359_v38 = vld [vmem:[%s3926_s26 + $0x152] sm:$0xff] }
 0x111   : > { %v652_v51 = vpop.f32.mrf.mxu1  ;;  %v2565_v43 = vpack.c.bf16 %v3360_v11, %v3359_v38 }
 0x112   : > { %v4522_v28 = vadd.f32 %v3628_v5, %v661_v21  ;;  %v653_v13 = vadd.f32 %v652_v51, %v4430_v62  ;;  %v3629_v36 = vpop.f32.mrf.mxu0  ;;  %v3308_v5 = vld [vmem:[%s3926_s26 + $0x151] sm:$0xff] }
 0x113   : > { %v3595_v48 = vpop.f32.mrf.mxu1 }
 0x114   : > { %v4525_v45 = vadd.f32 %v918_v34, %v653_v13  ;;  %v664_v53 = vadd.f32 %v3595_v48, %v4436_v0  ;;  %v921_v41 = vpop.f32.mrf.mxu0  ;;  %v3306_v0 = vld [vmem:[%s3926_s26 + $0x139] sm:$0xff] }
 0x115   : > { %v655_v18 = vpop.f32.mrf.mxu1 }
 0x116   : > { %v4528_v54 = vadd.f32 %v3629_v36, %v664_v53  ;;  %v656_v19 = vadd.f32 %v655_v18, %v4440_v3  ;;  %v3632_v62 = vpop.f32.mrf.mxu0  ;;  %3835 = vmatmul.mubr.msk.bf16.gmra.mxu0 %vm306_vm0, %v4181_v35  ;;  %v3307_v3 = vld [vmem:[%s3926_s26 + $0x141] sm:$0xff]  ;;  %v3309_v35 = vld [vmem:[%s3926_s26 + $0x159] sm:$0xff]  ;;  %v3361_v53 = vld [vmem:[%s3926_s26 + $0x16a] sm:$0xff] }
 0x117   : > { %v3598_v1 = vpop.f32.mrf.mxu1  ;;  %3801 = vmatmul.mubr.msk.bf16.gmra.mxu1 %vm306_vm0, %v2264_v15  ;;  %3838 = vmatprep.mubr.msk.bf16.mxu0 %vm306_vm0, %v4185_v37  ;;  %v2266_v31 = vpack.c.bf16 %v3307_v3, %v3306_v0  ;;  %v2267_v8 = vpack.c.bf16 %v3309_v35, %v3308_v5 }
 0x118   : > { %v4537_v22 = vadd.f32 %v921_v41, %v656_v19  ;;  %v677_v59 = vadd.f32 %v3598_v1, %v4348_v44  ;;  %v934_v26 = vpop.f32.mrf.mxu0  ;;  %3804 = vmatprep.mubr.msk.bf16.mxu1 %vm306_vm0, %v2265_v6  ;;  %v3310_v19 = vld [vmem:[%s3926_s26 + $0x169] sm:$0xff] }
 0x119   : > { %v668_v10 = vpop.f32.mrf.mxu1 }
 0x11a   : > { %v4546_v29 = vadd.f32 %v3632_v62, %v677_v59  ;;  %v669_v21 = vadd.f32 %v668_v10, %v4358_v46  ;;  %v3633_v34 = vpop.f32.mrf.mxu0 }
 0x11b   : > { %v3599_v37 = vpop.f32.mrf.mxu1 }
 0x11c   : > { %v4549_v44 = vadd.f32 %v934_v26, %v669_v21  ;;  %v680_v51 = vadd.f32 %v3599_v37, %v4362_v56  ;;  %v937_v33 = vpop.f32.mrf.mxu0  ;;  %v3362_v56 = vld [vmem:[%s3926_s26 + $0x172] sm:$0xff]  ;;  %v3366_v37 = vld [vmem:[%s3926_s26 + $0x1a2] sm:$0xff] }
 0x11d   : > { %v671_v13 = vpop.f32.mrf.mxu1  ;;  %v2566_v59 = vpack.c.bf16 %v3362_v56, %v3361_v53 }
 0x11e   : > { %v4552_v36 = vadd.f32 %v3633_v34, %v680_v51  ;;  %v672_v48 = vadd.f32 %v671_v13, %v4366_v4  ;;  %v3636_v46 = vpop.f32.mrf.mxu0  ;;  %3839 = vmatmul.mubr.msk.bf16.gmra.mxu0 %vm306_vm0, %v4205_v61  ;;  %v3311_v4 = vld [vmem:[%s3926_s26 + $0x171] sm:$0xff]  ;;  %v3365_v34 = vld [vmem:[%s3926_s26 + $0x19a] sm:$0xff] }
 0x11f   : > { %v3602_v15 = vpop.f32.mrf.mxu1  ;;  %3805 = vmatmul.mubr.msk.bf16.gmra.mxu1 %vm306_vm0, %v2266_v31  ;;  %3842 = vmatprep.mubr.msk.bf16.mxu0 %vm306_vm0, %v2565_v43  ;;  %v2268_v3 = vpack.c.bf16 %v3311_v4, %v3310_v19  ;;  %v3315_v51 = vld [vmem:[%s3926_s26 + $0x1a1] sm:$0xff] }
 0x120   : > { %v4561_v41 = vadd.f32 %v937_v33, %v672_v48  ;;  %v693_v6 = vadd.f32 %v3602_v15, %v4372_v7  ;;  %v950_v18 = vpop.f32.mrf.mxu0  ;;  %3808 = vmatprep.mubr.msk.bf16.mxu1 %vm306_vm0, %v2267_v8 }
 0x121   : > { %v684_v62 = vpop.f32.mrf.mxu1 }
 0x122   : > { %v4567_v1 = vadd.f32 %v3636_v46, %v693_v6  ;;  %v685_v61 = vadd.f32 %v684_v62, %v4382_v23  ;;  %v3637_v0 = vpop.f32.mrf.mxu0  ;;  %v2568_v46 = vpack.c.bf16 %v3366_v37, %v3365_v34 }
 0x123   : > { %v3603_v26 = vpop.f32.mrf.mxu1 }
 0x124   : > { %v4570_v38 = vadd.f32 %v950_v18, %v685_v61  ;;  %v696_v7 = vadd.f32 %v3603_v26, %v4386_v39  ;;  %v953_v11 = vpop.f32.mrf.mxu0 }
 0x125   : > { %v687_v10 = vpop.f32.mrf.mxu1 }
 0x126   : > { %v4573_v5 = vadd.f32 %v3637_v0, %v696_v7  ;;  %v688_v35 = vadd.f32 %v687_v10, %v4390_v57  ;;  %v3640_v21 = vpop.f32.mrf.mxu0  ;;  %3843 = vmatmul.mubr.msk.bf16.gmra.mxu0 %vm306_vm0, %v2566_v59  ;;  %v3314_v57 = vld [vmem:[%s3926_s26 + $0x199] sm:$0xff] }
 0x127   : > { %v3606_v23 = vpop.f32.mrf.mxu1  ;;  %3809 = vmatmul.mubr.msk.bf16.gmra.mxu1 %vm306_vm0, %v2268_v3  ;;  %3846 = vmatprep.mubr.msk.bf16.mxu0 %vm306_vm0, %v4415_v50  ;;  %v2270_v15 = vpack.c.bf16 %v3315_v51, %v3314_v57 }
 0x128   : > { %v4582_v39 = vadd.f32 %v953_v11, %v688_v35  ;;  %v709_v31 = vadd.f32 %v3606_v23, %v4396_v14  ;;  %v966_v43 = vpop.f32.mrf.mxu0  ;;  %3812 = vmatprep.mubr.msk.bf16.mxu1 %vm306_vm0, %v4305_v32 }
 0x129   : > { %v700_v33 = vpop.f32.mrf.mxu1 }
 0x12a   : > { %v4589_v8 = vadd.f32 %v3640_v21, %v709_v31  ;;  %v701_v13 = vadd.f32 %v700_v33, %v4409_v42  ;;  %v3641_v48 = vpop.f32.mrf.mxu0 }
 0x12b   : > { %v3607_v50 = vpop.f32.mrf.mxu1 }
 0x12c   : > { %v4592_v53 = vadd.f32 %v966_v43, %v701_v13  ;;  %v712_v56 = vadd.f32 %v3607_v50, %v4413_v49  ;;  %v969_v14 = vpop.f32.mrf.mxu0 }
 0x12d   : > { %v703_v6 = vpop.f32.mrf.mxu1 }
 0x12e   : > { %v4595_v18 = vadd.f32 %v3641_v48, %v712_v56  ;;  %v704_v32 = vadd.f32 %v703_v6, %v4419_v52  ;;  %v3644_v19 = vpop.f32.mrf.mxu0  ;;  %3847 = vmatmul.mubr.msk.bf16.gmra.mxu0 %vm306_vm0, %v2568_v46 }
 0x12f   : > { %v3610_v4 = vpop.f32.mrf.mxu1  ;;  %3813 = vmatmul.mubr.msk.bf16.gmra.mxu1 %vm306_vm0, %v2270_v15 }
 0x130   : > { %v4600_v42 = vadd.f32 %v969_v14, %v704_v32  ;;  %v725_v62 = vadd.f32 %v3610_v4, %v4424_v60  ;;  %v982_v61 = vpop.f32.mrf.mxu0 }
 0x131   : > { %v716_v0 = vpop.f32.mrf.mxu1 }
 0x132   : > { %v4603_v59 = vadd.f32 %v3644_v19, %v725_v62  ;;  %v717_v49 = vadd.f32 %v716_v0, %v4434_v63  ;;  %v3645_v26 = vpop.f32.mrf.mxu0 }
 0x133   : > { %v3611_v3 = vpop.f32.mrf.mxu1 }
 0x134   : > { %v4606_v7 = vadd.f32 %v982_v61, %v717_v49  ;;  %v728_v52 = vadd.f32 %v3611_v3, %v4438_v2  ;;  %v985_v11 = vpop.f32.mrf.mxu0 }
 0x135   : > { %v719_v10 = vpop.f32.mrf.mxu1 }
 0x136   : > { %v4609_v35 = vadd.f32 %v3645_v26, %v728_v52  ;;  %v720_v21 = vadd.f32 %v719_v10, %v4442_v9  ;;  %v3684_v23 = vpop.f32.mrf.mxu0 }
 0x137   : > { %v3650_v60 = vpop.f32.mrf.mxu1 }
 0x138   : > { %v4612_v34 = vadd.f32 %v985_v11, %v720_v21  ;;  %v1298_v37 = vadd.f32 %v3650_v60, %v4456_v16  ;;  %v1467_v31 = vpop.f32.mrf.mxu0 }
 0x139   : > { %v1169_v63 = vpop.f32.mrf.mxu1 }
 0x13a   : > { %v4615_v43 = vadd.f32 %v3684_v23, %v1298_v37  ;;  %v1296_v57 = vadd.f32 %v1169_v63, %v4459_v17  ;;  %v3685_v51 = vpop.f32.mrf.mxu0 }
 0x13b   : > { %v3651_v2 = vpop.f32.mrf.mxu1 }
 0x13c   : > { %v4618_v33 = vadd.f32 %v1467_v31, %v1296_v57  ;;  %v1299_v13 = vadd.f32 %v3651_v2, %v4462_v30  ;;  %v1470_v48 = vpop.f32.mrf.mxu0 }
 0x13d   : > { %v1172_v9 = vpop.f32.mrf.mxu1 }
 0x13e   : > { %v4621_v46 = vadd.f32 %v3685_v51, %v1299_v13  ;;  %v1297_v50 = vadd.f32 %v1172_v9, %v4470_v55  ;;  %v3688_v15 = vpop.f32.mrf.mxu0 }
 0x13f   : > { %v3654_v16 = vpop.f32.mrf.mxu1 }
 0x140   : > { %v4624_v56 = vadd.f32 %v1470_v48, %v1297_v50  ;;  %v1302_v14 = vadd.f32 %v3654_v16, %v4478_v27  ;;  %v1483_v6 = vpop.f32.mrf.mxu0 }
 0x141   : > { %v1185_v17 = vpop.f32.mrf.mxu1 }
 0x142   : > { %v4627_v32 = vadd.f32 %v3688_v15, %v1302_v14  ;;  %v1300_v19 = vadd.f32 %v1185_v17, %v4481_v40  ;;  %v3689_v4 = vpop.f32.mrf.mxu0 }
 0x143   : > { %v3655_v30 = vpop.f32.mrf.mxu1 }
 0x144   : > { %v4630_v62 = vadd.f32 %v1483_v6, %v1300_v19  ;;  %v1303_v61 = vadd.f32 %v3655_v30, %v4484_v24  ;;  %v1486_v0 = vpop.f32.mrf.mxu0 }
 0x145   : > { %v1188_v55 = vpop.f32.mrf.mxu1 }
 0x146   : > { %v4633_v49 = vadd.f32 %v3689_v4, %v1303_v61  ;;  %v1301_v26 = vadd.f32 %v1188_v55, %v4492_v25  ;;  %v3692_v3 = vpop.f32.mrf.mxu0 }
 0x147   : > { %v3658_v27 = vpop.f32.mrf.mxu1 }
 0x148   : > { %v4636_v52 = vadd.f32 %v1486_v0, %v1301_v26  ;;  %v1306_v11 = vadd.f32 %v3658_v27, %v4500_v20  ;;  %v1499_v10 = vpop.f32.mrf.mxu0 }
 0x149   : > { %v1201_v40 = vpop.f32.mrf.mxu1 }
 0x14a   : > { %v4639_v21 = vadd.f32 %v3692_v3, %v1306_v11  ;;  %v1304_v23 = vadd.f32 %v1201_v40, %v4503_v58  ;;  %v3693_v60 = vpop.f32.mrf.mxu0 }
 0x14b   : > { %v3659_v24 = vpop.f32.mrf.mxu1 }
 0x14c   : > { %v4642_v37 = vadd.f32 %v1499_v10, %v1304_v23  ;;  %v1307_v31 = vadd.f32 %v3659_v24, %v4506_v12  ;;  %v1502_v63 = vpop.f32.mrf.mxu0 }
 0x14d   : > { %v1204_v25 = vpop.f32.mrf.mxu1 }
 0x14e   : > { %v4645_v57 = vadd.f32 %v3693_v60, %v1307_v31  ;;  %v1305_v51 = vadd.f32 %v1204_v25, %v4514_v47  ;;  %v3696_v2 = vpop.f32.mrf.mxu0 }
 0x14f   : > { %v3662_v20 = vpop.f32.mrf.mxu1 }
 0x150   : > { %v4648_v13 = vadd.f32 %v1502_v63, %v1305_v51  ;;  %v1310_v48 = vadd.f32 %v3662_v20, %v4522_v28  ;;  %v1515_v9 = vpop.f32.mrf.mxu0 }
 0x151   : > { %v1217_v58 = vpop.f32.mrf.mxu1 }
 0x152   : > { %v4651_v50 = vadd.f32 %v3696_v2, %v1310_v48  ;;  %v1308_v15 = vadd.f32 %v1217_v58, %v4525_v45  ;;  %v3697_v16 = vpop.f32.mrf.mxu0 }
 0x153   : > { %v3663_v12 = vpop.f32.mrf.mxu1 }
 0x154   : > { %v4654_v14 = vadd.f32 %v1515_v9, %v1308_v15  ;;  %v1311_v6 = vadd.f32 %v3663_v12, %v4528_v54  ;;  %v1518_v17 = vpop.f32.mrf.mxu0 }
 0x155   : > { %v1220_v47 = vpop.f32.mrf.mxu1 }
 0x156   : > { %v4657_v19 = vadd.f32 %v3697_v16, %v1311_v6  ;;  %v1309_v4 = vadd.f32 %v1220_v47, %v4537_v22  ;;  %v3700_v30 = vpop.f32.mrf.mxu0 }
 0x157   : > { %v3666_v28 = vpop.f32.mrf.mxu1 }
 0x158   : > { %v4660_v61 = vadd.f32 %v1518_v17, %v1309_v4  ;;  %v1314_v0 = vadd.f32 %v3666_v28, %v4546_v29  ;;  %v1531_v55 = vpop.f32.mrf.mxu0 }
 0x159   : > { %v1233_v45 = vpop.f32.mrf.mxu1 }
 0x15a   : > { %v4663_v26 = vadd.f32 %v3700_v30, %v1314_v0  ;;  %v1312_v3 = vadd.f32 %v1233_v45, %v4549_v44  ;;  %v3701_v27 = vpop.f32.mrf.mxu0 }
 0x15b   : > { %v3667_v54 = vpop.f32.mrf.mxu1 }
 0x15c   : > { %v4666_v11 = vadd.f32 %v1531_v55, %v1312_v3  ;;  %v1315_v10 = vadd.f32 %v3667_v54, %v4552_v36  ;;  %v1534_v40 = vpop.f32.mrf.mxu0 }
 0x15d   : > { %v1236_v22 = vpop.f32.mrf.mxu1 }
 0x15e   : > { %v4669_v23 = vadd.f32 %v3701_v27, %v1315_v10  ;;  %v1313_v60 = vadd.f32 %v1236_v22, %v4561_v41  ;;  %v3704_v24 = vpop.f32.mrf.mxu0 }
 0x15f   : > { %v3670_v29 = vpop.f32.mrf.mxu1 }
 0x160   : > { %5077 = vst [vmem:[#allocation2_spill] sm:$0xff] %v4669_v23  ;;  %v4672_v31 = vadd.f32 %v1534_v40, %v1313_v60  ;;  %v1318_v63 = vadd.f32 %v3670_v29, %v4567_v1  ;;  %v1547_v25 = vpop.f32.mrf.mxu0 }
 0x161   : > { %v1249_v44 = vpop.f32.mrf.mxu1 }
 0x162   : > { %5078 = vst [vmem:[#allocation3_spill] sm:$0xff] %v4672_v31  ;;  %v4675_v51 = vadd.f32 %v3704_v24, %v1318_v63  ;;  %v1316_v2 = vadd.f32 %v1249_v44, %v4570_v38  ;;  %v3705_v20 = vpop.f32.mrf.mxu0 }
 0x163   : > { %v3671_v36 = vpop.f32.mrf.mxu1 }
 0x164   : > { %5079 = vst [vmem:[#allocation4_spill] sm:$0xff] %v4675_v51  ;;  %v4678_v48 = vadd.f32 %v1547_v25, %v1316_v2  ;;  %v1319_v9 = vadd.f32 %v3671_v36, %v4573_v5  ;;  %v1550_v58 = vpop.f32.mrf.mxu0 }
 0x165   : > { %v1252_v41 = vpop.f32.mrf.mxu1 }
 0x166   : > { %5080 = vst [vmem:[#allocation5_spill] sm:$0xff] %v4678_v48  ;;  %v4681_v15 = vadd.f32 %v3705_v20, %v1319_v9  ;;  %v1317_v16 = vadd.f32 %v1252_v41, %v4582_v39  ;;  %v3708_v12 = vpop.f32.mrf.mxu0 }
 0x167   : > { %v3674_v1 = vpop.f32.mrf.mxu1 }
 0x168   : > { %5081 = vst [vmem:[#allocation6_spill] sm:$0xff] %v4681_v15  ;;  %v4684_v6 = vadd.f32 %v1550_v58, %v1317_v16  ;;  %v1322_v17 = vadd.f32 %v3674_v1, %v4589_v8  ;;  %v1563_v47 = vpop.f32.mrf.mxu0 }
 0x169   : > { %v1265_v38 = vpop.f32.mrf.mxu1 }
 0x16a   : > { %5082 = vst [vmem:[#allocation7_spill] sm:$0xff] %v4684_v6  ;;  %v4687_v4 = vadd.f32 %v3708_v12, %v1322_v17  ;;  %v1320_v30 = vadd.f32 %v1265_v38, %v4592_v53  ;;  %v3709_v28 = vpop.f32.mrf.mxu0 }
 0x16b   : > { %v3675_v5 = vpop.f32.mrf.mxu1 }
 0x16c   : > { %5083 = vst [vmem:[#allocation8_spill] sm:$0xff] %v4687_v4  ;;  %v4690_v0 = vadd.f32 %v1563_v47, %v1320_v30  ;;  %v1323_v55 = vadd.f32 %v3675_v5, %v4595_v18  ;;  %v1566_v45 = vpop.f32.mrf.mxu0 }
 0x16d   : > { %v1268_v39 = vpop.f32.mrf.mxu1 }
 0x16e   : > { %5084 = vst [vmem:[#allocation9_spill] sm:$0xff] %v4690_v0  ;;  %v4693_v3 = vadd.f32 %v3709_v28, %v1323_v55  ;;  %v1321_v27 = vadd.f32 %v1268_v39, %v4600_v42  ;;  %v3712_v54 = vpop.f32.mrf.mxu0 }
 0x16f   : > { %v3678_v8 = vpop.f32.mrf.mxu1 }
 0x170   : > { %5085 = vst [vmem:[#allocation10_spill] sm:$0xff] %v4693_v3  ;;  %v4696_v10 = vadd.f32 %v1566_v45, %v1321_v27  ;;  %v1326_v40 = vadd.f32 %v3678_v8, %v4603_v59  ;;  %v1579_v22 = vpop.f32.mrf.mxu0 }
 0x171   : > { %v1281_v53 = vpop.f32.mrf.mxu1 }
 0x172   : > { %5086 = vst [vmem:[#allocation11_spill] sm:$0xff] %v4696_v10  ;;  %v4699_v60 = vadd.f32 %v3712_v54, %v1326_v40  ;;  %v1324_v24 = vadd.f32 %v1281_v53, %v4606_v7  ;;  %v3713_v29 = vpop.f32.mrf.mxu0 }
 0x173   : > { %v3679_v18 = vpop.f32.mrf.mxu1 }
 0x174   : > { %5087 = vst [vmem:[#allocation12_spill] sm:$0xff] %v4699_v60  ;;  %v4702_v63 = vadd.f32 %v1579_v22, %v1324_v24  ;;  %v1327_v25 = vadd.f32 %v3679_v18, %v4609_v35  ;;  %v1582_v44 = vpop.f32.mrf.mxu0 }
 0x175   : > { %v1284_v42 = vpop.f32.mrf.mxu1 }
 0x176   : > { %5088 = vst [vmem:[#allocation13_spill] sm:$0xff] %v4702_v63  ;;  %v4705_v2 = vadd.f32 %v3713_v29, %v1327_v25  ;;  %v1325_v20 = vadd.f32 %v1284_v42, %v4612_v34  ;;  %v4708_v36 = vpop.f32.mrf.mxu0 }
 0x177   : > { %v3718_v59 = vpop.f32.mrf.mxu1 }
 0x178   : > { %5089 = vst [vmem:[#allocation14_spill] sm:$0xff] %v4705_v2  ;;  %v4710_v9 = vadd.f32 %v1582_v44, %v1325_v20  ;;  %v4712_v58 = vpop.f32.mrf.mxu0 }
 0x179   : > { %v1765_v7 = vpop.f32.mrf.mxu1 }
 0x17a   : > { %5090 = vst [vmem:[#allocation15_spill] sm:$0xff] %v4710_v9  ;;  %v4714_v41 = vpop.f32.mrf.mxu0 }
 0x17b   : > { %v3719_v16 = vpop.f32.mrf.mxu1 }
 0x17c   : > { %v4716_v12 = vpop.f32.mrf.mxu0 }
 0x17d   : > { %v4718_v35 = vpop.f32.mrf.mxu1 }
 0x17e   : > { %v4720_v1 = vpop.f32.mrf.mxu0 }
 0x17f   : > { %v4722_v17 = vpop.f32.mrf.mxu1 }
 0x180   : > { %v4724_v34 = vpop.f32.mrf.mxu0 }
 0x181   : > { %v4726_v47 = vpop.f32.mrf.mxu1 }
 0x182   : > { %v4728_v38 = vpop.f32.mrf.mxu0 }
 0x183   : > { %v4730_v30 = vpop.f32.mrf.mxu1 }
 0x184   : > { %v4732_v28 = vpop.f32.mrf.mxu0 }
 0x185   : > { %v4734_v5 = vpop.f32.mrf.mxu1 }
 0x186   : > { %v4736_v55 = vpop.f32.mrf.mxu0 }
 0x187   : > { %v4738_v45 = vpop.f32.mrf.mxu1 }
 0x188   : > { %v4740_v39 = vpop.f32.mrf.mxu0 }
 0x189   : > { %v4742_v27 = vpop.f32.mrf.mxu1 }
 0x18a   : > { %v4744_v54 = vpop.f32.mrf.mxu0 }
 0x18b   : > { %v4746_v8 = vpop.f32.mrf.mxu1 }
 0x18c   : > { %v4748_v40 = vpop.f32.mrf.mxu0 }
 0x18d   : > { %v4750_v22 = vpop.f32.mrf.mxu1 }
 0x18e   : > { %v4752_v53 = vpop.f32.mrf.mxu0 }
 0x18f   : > { %v4754_v24 = vpop.f32.mrf.mxu1 }
 0x190   : > { %v4756_v29 = vpop.f32.mrf.mxu0 }
 0x191   : > { %v4758_v18 = vpop.f32.mrf.mxu1 }
 0x192   : > { %v4760_v25 = vpop.f32.mrf.mxu0 }
 0x193   : > { %v4762_v44 = vpop.f32.mrf.mxu1 }
 0x194   : > { %v4764_v42 = vpop.f32.mrf.mxu0 }
 0x195   : > { %v4766_v20 = vpop.f32.mrf.mxu1 }
 0x196   : > { %v4768_v9 = vpop.f32.mrf.mxu0 }
 0x197   : > { %v4770_v2 = vpop.f32.mrf.mxu1 }
 0x198   : > { %v4772_v63 = vpop.f32.mrf.mxu0 }
 0x199   : > { %5091 = vst [vmem:[#allocation16_spill] sm:$0xff] %v4772_v63  ;;  %v4774_v60 = vpop.f32.mrf.mxu1 }
 0x19a   : > { %v4776_v10 = vpop.f32.mrf.mxu0 }
 0x19b   : > { %5092 = vst [vmem:[#allocation17_spill] sm:$0xff] %v4776_v10  ;;  %v4778_v3 = vpop.f32.mrf.mxu1 }
 0x19c   : > { %5093 = vst [vmem:[#allocation18_spill] sm:$0xff] %v4778_v3  ;;  %v4780_v0 = vpop.f32.mrf.mxu0 }
 0x19d   : > { %5094 = vst [vmem:[#allocation19_spill] sm:$0xff] %v4780_v0  ;;  %v4782_v4 = vpop.f32.mrf.mxu1 }
 0x19e   : > { %5095 = vst [vmem:[#allocation20_spill] sm:$0xff] %v4782_v4  ;;  %v4784_v6 = vpop.f32.mrf.mxu0 }
 0x19f   : > { %5096 = vst [vmem:[#allocation21_spill] sm:$0xff] %v4784_v6  ;;  %v4786_v15 = vpop.f32.mrf.mxu1 }
 0x1a0   : > { %5097 = vst [vmem:[#allocation22_spill] sm:$0xff] %v4786_v15  ;;  %v4788_v48 = vpop.f32.mrf.mxu0 }
 0x1a1   : > { %5098 = vst [vmem:[#allocation23_spill] sm:$0xff] %v4788_v48  ;;  %v4790_v51 = vpop.f32.mrf.mxu1 }
 0x1a2   : > { %5099 = vst [vmem:[#allocation24_spill] sm:$0xff] %v4790_v51  ;;  %v4792_v31 = vpop.f32.mrf.mxu0 }
 0x1a3   : > { %5100 = vst [vmem:[#allocation25_spill] sm:$0xff] %v4792_v31  ;;  %v4794_v63 = vpop.f32.mrf.mxu1 }
 0x1a4   : > { %5101 = vst [vmem:[#allocation26_spill] sm:$0xff] %v4794_v63  ;;  %v4796_v23 = vpop.f32.mrf.mxu0 }
 0x1a5   : > { %5102 = vst [vmem:[#allocation27_spill] sm:$0xff] %v4796_v23  ;;  %v4798_v10 = vpop.f32.mrf.mxu1 }
 0x1a6   : > { %5103 = vst [vmem:[#allocation28_spill] sm:$0xff] %v4798_v10  ;;  %v4800_v3 = vpop.f32.mrf.mxu0 }
 0x1a7   : > { %5104 = vst [vmem:[#allocation29_spill] sm:$0xff] %v4800_v3  ;;  %v4802_v0 = vpop.f32.mrf.mxu1 }
 0x1a8   : > { %5105 = vst [vmem:[#allocation30_spill] sm:$0xff] %v4802_v0  ;;  %v4804_v4 = vpop.f32.mrf.mxu0 }
 0x1a9   : > { %5106 = vst [vmem:[#allocation31_spill] sm:$0xff] %v4804_v4  ;;  %v4806_v6 = vpop.f32.mrf.mxu1  ;;  %v1894_v4 = vadd.f32 %v3718_v59, %v4615_v43  ;;  %v1893_v43 = vadd.f32 %v4718_v35, %v4624_v56  ;;  %v4852_v56 = vld [vmem:[%s5075_s3] ss:$0 sm:$0xff] }
 0x1aa   : > { %5107 = vst [vmem:[#allocation32_spill] sm:$0xff] %v4806_v6  ;;  %v4808_v15 = vpop.f32.mrf.mxu0 }
 0x1ab   : > { %5108 = vst [vmem:[#allocation33_spill] sm:$0xff] %v4808_v15  ;;  %v4810_v48 = vpop.f32.mrf.mxu1  ;;  %v1892_v15 = vadd.f32 %v1765_v7, %v4618_v33  ;;  %v4842_v33 = vld [vmem:[%s5074_s2] ss:$0 sm:$0xff] }
 0x1ac   : > { %5109 = vst [vmem:[#allocation34_spill] sm:$0xff] %v4810_v48  ;;  %v4812_v51 = vpop.f32.mrf.mxu0 }
 0x1ad   : > { %5110 = vst [vmem:[#allocation35_spill] sm:$0xff] %v4812_v51  ;;  %v4814_v31 = vpop.f32.mrf.mxu1 }
 0x1ae   : > { %5111 = vst [vmem:[#allocation36_spill] sm:$0xff] %v4814_v31  ;;  %v4816_v63 = vpop.f32.mrf.mxu0 }
 0x1af   : > { %5112 = vst [vmem:[#allocation37_spill] sm:$0xff] %v4816_v63  ;;  %v4818_v23 = vpop.f32.mrf.mxu1  ;;  %v2193_v63 = vadd.f32 %v4708_v36, %v1894_v4 }
 0x1b0   : > { %5113 = vst [vmem:[#allocation38_spill] sm:$0xff] %v4818_v23  ;;  %v4820_v10 = vpop.f32.mrf.mxu0  ;;  %v1895_v23 = vadd.f32 %v3719_v16, %v4621_v46 }
 0x1b1   : > { %5114 = vst [vmem:[#allocation39_spill] sm:$0xff] %v4820_v10  ;;  %v4822_v3 = vpop.f32.mrf.mxu1 }
 0x1b2   : > { %5115 = vst [vmem:[#allocation40_spill] sm:$0xff] %v4822_v3  ;;  %v4825_v0 = vpop.f32.mrf.mxu0  ;;  %v2191_v3 = vadd.f32 %v4712_v58, %v1892_v15  ;;  %v2194_v4 = vadd.f32 %v4714_v41, %v1895_v23  ;;  %v1896_v15 = vadd.f32 %v4726_v47, %v4630_v62 }
 0x1b3   : > { %5116 = vst [vmem:[#allocation41_spill] sm:$0xff] %v4825_v0  ;;  %v4827_v6 = vpop.f32.mrf.mxu1 }
 0x1b4   : > { %v4830_v48 = vpop.f32.mrf.mxu0 }
 0x1b5   : > { %5117 = vst [vmem:[#allocation42_spill] sm:$0xff] %v4830_v48  ;;  %v4832_v51 = vpop.f32.mrf.mxu1  ;;  %v1898_v48 = vadd.f32 %v4722_v17, %v4627_v32  ;;  %v1899_v32 = vadd.f32 %v4730_v30, %v4633_v49 }
 0x1b6   : > { %v3820_v31 = vpop.f32.mrf.mxu0 }
 0x1b7   : > { %v3786_v10 = vpop.f32.mrf.mxu1 }
 0x1b8   : > { %v2491_v59 = vadd.f32 %v3786_v10, %v2193_v63  ;;  %v2660_v0 = vpop.f32.mrf.mxu0  ;;  %v2192_v63 = vadd.f32 %v4716_v12, %v1893_v43  ;;  %v2195_v12 = vadd.f32 %v4724_v34, %v1896_v15  ;;  %v2198_v34 = vadd.f32 %v4728_v38, %v1899_v32 }
 0x1b9   : > { %v2362_v7 = vpop.f32.mrf.mxu1 }
 0x1ba   : > { %v2789_v36 = vadd.f32 %v3820_v31, %v2491_v59  ;;  %v2489_v46 = vadd.f32 %v2362_v7, %v2191_v3  ;;  %v3821_v16 = vpop.f32.mrf.mxu0  ;;  %v2197_v7 = vadd.f32 %v4720_v1, %v1898_v48 }
 0x1bb   : > { %v3787_v10 = vpop.f32.mrf.mxu1 }
 0x1bc   : > { %v2828_v23 = vmul.f32 %v4842_v33, %v2789_v36  ;;  %v2787_v31 = vadd.f32 %v2660_v0, %v2489_v46  ;;  %v2492_v3 = vadd.f32 %v3787_v10, %v2194_v4  ;;  %v2663_v58 = vpop.f32.mrf.mxu0  ;;  %v1897_v0 = vadd.f32 %v4734_v5, %v4636_v52 }
 0x1bd   : > { %v2365_v41 = vpop.f32.mrf.mxu1  ;;  %v1902_v52 = vadd.f32 %v4738_v45, %v4639_v21 }
 0x1be   : > { %v2867_v62 = vadd.f32 %v4852_v56, %v2828_v23  ;;  %v2826_v35 = vmul.f32 %v4842_v33, %v2787_v31  ;;  %v2790_v17 = vadd.f32 %v3821_v16, %v2492_v3  ;;  %v2490_v47 = vadd.f32 %v2365_v41, %v2192_v63  ;;  %v3824_v59 = vpop.f32.mrf.mxu0 }
 0x1bf   : > { %v3790_v49 = vpop.f32.mrf.mxu1  ;;  %v2196_v23 = vadd.f32 %v4732_v28, %v1897_v0  ;;  %v2201_v41 = vadd.f32 %v4736_v55, %v1902_v52  ;;  %v1901_v55 = vadd.f32 %v4750_v22, %v4648_v13  ;;  %v1906_v13 = vadd.f32 %v4754_v24, %v4651_v50 }
 0x1c0   : > { %v2899_v30 = vmax.f32 %v2867_v62, 0.0  ;;  %v2865_v43 = vadd.f32 %v4852_v56, %v2826_v35  ;;  %v2829_v4 = vmul.f32 %v4842_v33, %v2790_v17  ;;  %v2788_v48 = vadd.f32 %v2663_v58, %v2490_v47  ;;  %v2676_v1 = vpop.f32.mrf.mxu0 }
 0x1c1   : > { %v2495_v5 = vadd.f32 %v3790_v49, %v2197_v7  ;;  %v2378_v36 = vpop.f32.mrf.mxu1  ;;  %v1900_v62 = vadd.f32 %v4742_v27, %v4642_v37  ;;  %v1903_v35 = vadd.f32 %v4746_v8, %v4645_v57 }
 0x1c2   : > { %2932 = vst.msk [vmem:[%s4868_s21 + $0x10] sm:$0xff] %vm2929_vm1, %v2899_v30  ;;  %v2897_v46 = vmax.f32 %v2865_v43, 0.0  ;;  %v2868_v16 = vadd.f32 %v4852_v56, %v2829_v4  ;;  %v2827_v15 = vmul.f32 %v4842_v33, %v2788_v48  ;;  %v2493_v10 = vadd.f32 %v2378_v36, %v2195_v12  ;;  %v3825_v63 = vpop.f32.mrf.mxu0 }
 0x1c3   : > { %v2793_v31 = vadd.f32 %v3824_v59, %v2495_v5  ;;  %v3791_v3 = vpop.f32.mrf.mxu1  ;;  %v2199_v4 = vadd.f32 %v4740_v39, %v1900_v62  ;;  %v2202_v48 = vadd.f32 %v4744_v54, %v1903_v35  ;;  %v1904_v39 = vadd.f32 %v4758_v18, %v4654_v14 }
 0x1c4   : > { %2930 = vst.msk [vmem:[%s4868_s21] sm:$0xff] %vm2929_vm1, %v2897_v46  ;;  %v2900_v38 = vmax.f32 %v2868_v16, 0.0  ;;  %v2866_v21 = vadd.f32 %v4852_v56, %v2827_v15  ;;  %v2791_v45 = vadd.f32 %v2676_v1, %v2493_v10  ;;  %v2496_v58 = vadd.f32 %v3791_v3, %v2198_v34  ;;  %v2679_v32 = vpop.f32.mrf.mxu0 }
 0x1c5   : > { %v2832_v28 = vmul.f32 %v4842_v33, %v2793_v31  ;;  %v2381_v17 = vpop.f32.mrf.mxu1  ;;  %v2200_v16 = vadd.f32 %v4748_v40, %v1901_v55  ;;  %v2205_v31 = vadd.f32 %v4752_v53, %v1906_v13  ;;  %v5119_v13 = vld [vmem:[#allocation18_spill] sm:$0xff] }
 0x1c6   : > { %2933 = vst.msk [vmem:[%s4868_s21 + $0x18] sm:$0xff] %vm2929_vm1, %v2900_v38  ;;  %v2898_v47 = vmax.f32 %v2866_v21, 0.0  ;;  %v2830_v59 = vmul.f32 %v4842_v33, %v2791_v45  ;;  %v2794_v7 = vadd.f32 %v3825_v63, %v2496_v58  ;;  %v2494_v12 = vadd.f32 %v2381_v17, %v2196_v23  ;;  %v3828_v0 = vpop.f32.mrf.mxu0 }
 0x1c7   : > { %v2871_v49 = vadd.f32 %v4852_v56, %v2832_v28  ;;  %v3794_v37 = vpop.f32.mrf.mxu1  ;;  %v2203_v58 = vadd.f32 %v4756_v29, %v1904_v39  ;;  %v1910_v29 = vadd.f32 %v4770_v2, %v4663_v26  ;;  %v1908_v26 = vadd.f32 %v4774_v60, %v4666_v11 }
 0x1c8   : > { %2931 = vst.msk [vmem:[%s4868_s21 + $0x8] sm:$0xff] %vm2929_vm1, %v2898_v47  ;;  %v2869_v57 = vadd.f32 %v4852_v56, %v2830_v59  ;;  %v2833_v27 = vmul.f32 %v4842_v33, %v2794_v7  ;;  %v2792_v8 = vadd.f32 %v2679_v32, %v2494_v12  ;;  %v2499_v30 = vadd.f32 %v3794_v37, %v2201_v41  ;;  %v2692_v43 = vpop.f32.mrf.mxu0 }
 0x1c9   : > { %v2903_v22 = vmax.f32 %v2871_v49, 0.0  ;;  %v2394_v1 = vpop.f32.mrf.mxu1  ;;  %v1907_v32 = vadd.f32 %v4762_v44, %v4657_v19  ;;  %v1905_v41 = vadd.f32 %v4766_v20, %v4660_v61 }
 0x1ca   : > { %v2901_v34 = vmax.f32 %v2869_v57, 0.0  ;;  %v2872_v52 = vadd.f32 %v4852_v56, %v2833_v27  ;;  %v2831_v5 = vmul.f32 %v4842_v33, %v2792_v8  ;;  %v2797_v36 = vadd.f32 %v3828_v0, %v2499_v30  ;;  %v3829_v46 = vpop.f32.mrf.mxu0 }
 0x1cb   : > { %2936 = vst.msk [vmem:[%s4868_s21 + $0x30] sm:$0xff] %vm2929_vm1, %v2903_v22  ;;  %v2497_v54 = vadd.f32 %v2394_v1, %v2199_v4  ;;  %v3795_v15 = vpop.f32.mrf.mxu1  ;;  %v2206_v55 = vadd.f32 %v4760_v25, %v1907_v32  ;;  %v2204_v49 = vadd.f32 %v4764_v42, %v1905_v41  ;;  %v2209_v4 = vadd.f32 %v4768_v9, %v1910_v29 }
 0x1cc   : > { %2934 = vst.msk [vmem:[%s4868_s21 + $0x20] sm:$0xff] %vm2929_vm1, %v2901_v34  ;;  %v2904_v50 = vmax.f32 %v2872_v52, 0.0  ;;  %v2870_v24 = vadd.f32 %v4852_v56, %v2831_v5  ;;  %v2836_v10 = vmul.f32 %v4842_v33, %v2797_v36  ;;  %v2500_v63 = vadd.f32 %v3795_v15, %v2202_v48  ;;  %v2695_v23 = vpop.f32.mrf.mxu0  ;;  %v5118_v48 = vld [vmem:[#allocation2_spill] sm:$0xff]  ;;  %v5120_v5 = vld [vmem:[#allocation16_spill] sm:$0xff] }
 0x1cd   : > { %v2795_v40 = vadd.f32 %v2692_v43, %v2497_v54  ;;  %v2397_v3 = vpop.f32.mrf.mxu1  ;;  %v1911_v25 = vadd.f32 %v5119_v13, %v5118_v48  ;;  %v2207_v36 = vadd.f32 %v5120_v5, %v1908_v26  ;;  %v5133_v48 = vld [vmem:[#allocation7_spill] sm:$0xff]  ;;  %v5134_v13 = vld [vmem:[#allocation28_spill] sm:$0xff]  ;;  %v5135_v5 = vld [vmem:[#allocation25_spill] sm:$0xff] }
 0x1ce   : > { %2937 = vst.msk [vmem:[%s4868_s21 + $0x38] sm:$0xff] %vm2929_vm1, %v2904_v50  ;;  %v2902_v14 = vmax.f32 %v2870_v24, 0.0  ;;  %v2875_v18 = vadd.f32 %v4852_v56, %v2836_v10  ;;  %v2798_v38 = vadd.f32 %v3829_v46, %v2500_v63  ;;  %v2498_v21 = vadd.f32 %v2397_v3, %v2200_v16  ;;  %v3832_v45 = vpop.f32.mrf.mxu0  ;;  %v5121_v24 = vld [vmem:[#allocation17_spill] sm:$0xff]  ;;  %v5122_v63 = vld [vmem:[#allocation3_spill] sm:$0xff]  ;;  %v5125_v3 = vld [vmem:[#allocation22_spill] sm:$0xff] }
 0x1cf   : > { %v2834_v53 = vmul.f32 %v4842_v33, %v2795_v40  ;;  %v3798_v62 = vpop.f32.mrf.mxu1  ;;  %v2210_v10 = vadd.f32 %v5121_v24, %v1911_v25  ;;  %v5124_v40 = vld [vmem:[#allocation4_spill] sm:$0xff]  ;;  %v1913_v25 = vadd.f32 %v5134_v13, %v5133_v48  ;;  %v5136_v24 = vld [vmem:[#allocation27_spill] sm:$0xff]  ;;  %v5149_v13 = vld [vmem:[#allocation38_spill] sm:$0xff] }
 0x1d0   : > { %2935 = vst.msk [vmem:[%s4868_s21 + $0x28] sm:$0xff] %vm2929_vm1, %v2902_v14  ;;  %v2907_v35 = vmax.f32 %v2875_v18, 0.0  ;;  %v2837_v28 = vmul.f32 %v4842_v33, %v2798_v38  ;;  %v2796_v17 = vadd.f32 %v2695_v23, %v2498_v21  ;;  %v2503_v47 = vadd.f32 %v3798_v62, %v2205_v31  ;;  %v2708_v59 = vpop.f32.mrf.mxu0  ;;  %v5123_v23 = vld [vmem:[#allocation20_spill] sm:$0xff] }
 0x1d1   : > { %v2873_v7 = vadd.f32 %v4852_v56, %v2834_v53  ;;  %v2410_v19 = vpop.f32.mrf.mxu1  ;;  %v1909_v31 = vadd.f32 %v5123_v23, %v5122_v63  ;;  %v1914_v14 = vadd.f32 %v5125_v3, %v5124_v40  ;;  %v5126_v53 = vld [vmem:[#allocation5_spill] sm:$0xff]  ;;  %v5127_v62 = vld [vmem:[#allocation24_spill] sm:$0xff]  ;;  %v5138_v23 = vld [vmem:[#allocation30_spill] sm:$0xff] }
 0x1d2   : > { %2940 = vst.msk [vmem:[%s4868_s21 + $0x50] sm:$0xff] %vm2929_vm1, %v2907_v35  ;;  %v2876_v61 = vadd.f32 %v4852_v56, %v2837_v28  ;;  %v2835_v44 = vmul.f32 %v4842_v33, %v2796_v17  ;;  %v2801_v20 = vadd.f32 %v3832_v45, %v2503_v47  ;;  %v2501_v12 = vadd.f32 %v2410_v19, %v2203_v58  ;;  %v3833_v0 = vpop.f32.mrf.mxu0  ;;  %v5137_v63 = vld [vmem:[#allocation8_spill] sm:$0xff]  ;;  %v5139_v40 = vld [vmem:[#allocation9_spill] sm:$0xff] }
 0x1d3   : > { %v2905_v2 = vmax.f32 %v2873_v7, 0.0  ;;  %v3799_v37 = vpop.f32.mrf.mxu1  ;;  %v1912_v35 = vadd.f32 %v5127_v62, %v5126_v53  ;;  %v5140_v3 = vld [vmem:[#allocation32_spill] sm:$0xff]  ;;  %v5141_v53 = vld [vmem:[#allocation10_spill] sm:$0xff] }
 0x1d4   : > { %v2908_v57 = vmax.f32 %v2876_v61, 0.0  ;;  %v2874_v27 = vadd.f32 %v4852_v56, %v2835_v44  ;;  %v2840_v8 = vmul.f32 %v4842_v33, %v2801_v20  ;;  %v2799_v30 = vadd.f32 %v2708_v59, %v2501_v12  ;;  %v2711_v43 = vpop.f32.mrf.mxu0  ;;  %v5128_v61 = vld [vmem:[#allocation19_spill] sm:$0xff]  ;;  %v5129_v20 = vld [vmem:[#allocation21_spill] sm:$0xff]  ;;  %v5142_v62 = vld [vmem:[#allocation34_spill] sm:$0xff] }
 0x1d5   : > { %2938 = vst.msk [vmem:[%s4868_s21 + $0x40] sm:$0xff] %vm2929_vm1, %v2905_v2  ;;  %v2504_v42 = vadd.f32 %v3799_v37, %v2206_v55  ;;  %v2413_v22 = vpop.f32.mrf.mxu1  ;;  %v2208_v44 = vadd.f32 %v5128_v61, %v1909_v31  ;;  %v2213_v12 = vadd.f32 %v5129_v20, %v1914_v14  ;;  %v5131_v55 = vld [vmem:[#allocation26_spill] sm:$0xff]  ;;  %v1918_v31 = vadd.f32 %v5138_v23, %v5137_v63  ;;  %v5143_v61 = vld [vmem:[#allocation29_spill] sm:$0xff]  ;;  %v5144_v20 = vld [vmem:[#allocation31_spill] sm:$0xff] }
 0x1d6   : > { %2941 = vst.msk [vmem:[%s4868_s21 + $0x58] sm:$0xff] %vm2929_vm1, %v2908_v57  ;;  %v2906_v11 = vmax.f32 %v2874_v27, 0.0  ;;  %v2879_v60 = vadd.f32 %v4852_v56, %v2840_v8  ;;  %v2838_v1 = vmul.f32 %v4842_v33, %v2799_v30  ;;  %v2502_v34 = vadd.f32 %v2413_v22, %v2204_v49  ;;  %v3836_v52 = vpop.f32.mrf.mxu0  ;;  %v5148_v48 = vld [vmem:[#allocation12_spill] sm:$0xff]  ;;  %v5152_v63 = vld [vmem:[#allocation13_spill] sm:$0xff] }
 0x1d7   : > { %v2802_v9 = vadd.f32 %v3833_v0, %v2504_v42  ;;  %v3802_v46 = vpop.f32.mrf.mxu1  ;;  %v5130_v0 = vld [vmem:[#allocation6_spill] sm:$0xff]  ;;  %v1916_v14 = vadd.f32 %v5140_v3, %v5139_v40  ;;  %v5153_v23 = vld [vmem:[#allocation40_spill] sm:$0xff] }
 0x1d8   : > { %2939 = vst.msk [vmem:[%s4868_s21 + $0x48] sm:$0xff] %vm2929_vm1, %v2906_v11  ;;  %v2911_v16 = vmax.f32 %v2879_v60, 0.0  ;;  %v2877_v39 = vadd.f32 %v4852_v56, %v2838_v1  ;;  %v2800_v54 = vadd.f32 %v2711_v43, %v2502_v34  ;;  %v2507_v15 = vadd.f32 %v3802_v46, %v2209_v4  ;;  %v2724_v50 = vpop.f32.mrf.mxu0  ;;  %v5132_v43 = vld [vmem:[#allocation23_spill] sm:$0xff]  ;;  %v5154_v40 = vld [vmem:[#allocation14_spill] sm:$0xff] }
 0x1d9   : > { %v2841_v18 = vmul.f32 %v4842_v33, %v2802_v9  ;;  %v2426_v38 = vpop.f32.mrf.mxu1  ;;  %v1915_v49 = vadd.f32 %v5131_v55, %v5130_v0  ;;  %v2211_v4 = vadd.f32 %v5132_v43, %v1912_v35  ;;  %v1919_v35 = vadd.f32 %v5142_v62, %v5141_v53  ;;  %v5145_v0 = vld [vmem:[#allocation11_spill] sm:$0xff]  ;;  %v5146_v55 = vld [vmem:[#allocation36_spill] sm:$0xff]  ;;  %v5147_v43 = vld [vmem:[#allocation33_spill] sm:$0xff] }
 0x1da   : > { %2944 = vst.msk [vmem:[%s4868_s21 + $0x70] sm:$0xff] %vm2929_vm1, %v2911_v16  ;;  %v2909_v21 = vmax.f32 %v2877_v39, 0.0  ;;  %v2839_v45 = vmul.f32 %v4842_v33, %v2800_v54  ;;  %v2805_v58 = vadd.f32 %v3836_v52, %v2507_v15  ;;  %v2505_v32 = vadd.f32 %v2426_v38, %v2207_v36  ;;  %v3837_v41 = vpop.f32.mrf.mxu0 }
 0x1db   : > { %v2880_v28 = vadd.f32 %v4852_v56, %v2841_v18  ;;  %v3803_v17 = vpop.f32.mrf.mxu1  ;;  %v2214_v36 = vadd.f32 %v5135_v5, %v1915_v49  ;;  %v1917_v49 = vadd.f32 %v5146_v55, %v5145_v0  ;;  %v5150_v5 = vld [vmem:[#allocation35_spill] sm:$0xff]  ;;  %v1923_v3 = vadd.f32 %v4827_v6, %v5154_v40 }
 0x1dc   : > { %2942 = vst.msk [vmem:[%s4868_s21 + $0x60] sm:$0xff] %vm2929_vm1, %v2909_v21  ;;  %v2878_v47 = vadd.f32 %v4852_v56, %v2839_v45  ;;  %v2844_v59 = vmul.f32 %v4842_v33, %v2805_v58  ;;  %v2803_v29 = vadd.f32 %v2724_v50, %v2505_v32  ;;  %v2508_v7 = vadd.f32 %v3803_v17, %v2210_v10  ;;  %v2727_v19 = vpop.f32.mrf.mxu0 }
 0x1dd   : > { %v2912_v26 = vmax.f32 %v2880_v28, 0.0  ;;  %v2429_v2 = vpop.f32.mrf.mxu1  ;;  %v2212_v10 = vadd.f32 %v5136_v24, %v1913_v25  ;;  %v1922_v25 = vadd.f32 %v5149_v13, %v5148_v48  ;;  %v5151_v24 = vld [vmem:[#allocation37_spill] sm:$0xff] }
 0x1de   : > { %v2910_v37 = vmax.f32 %v2878_v47, 0.0  ;;  %v2883_v57 = vadd.f32 %v4852_v56, %v2844_v59  ;;  %v2842_v27 = vmul.f32 %v4842_v33, %v2803_v29  ;;  %v2806_v8 = vadd.f32 %v3837_v41, %v2508_v7  ;;  %v3840_v30 = vpop.f32.mrf.mxu0 }
 0x1df   : > { %2945 = vst.msk [vmem:[%s4868_s21 + $0x78] sm:$0xff] %vm2929_vm1, %v2912_v26  ;;  %v2506_v42 = vadd.f32 %v2429_v2, %v2208_v44  ;;  %v3806_v22 = vpop.f32.mrf.mxu1  ;;  %v2217_v44 = vadd.f32 %v5143_v61, %v1918_v31  ;;  %v1920_v31 = vadd.f32 %v5153_v23, %v5152_v63 }
 0x1e0   : > { %2943 = vst.msk [vmem:[%s4868_s21 + $0x68] sm:$0xff] %vm2929_vm1, %v2910_v37  ;;  %v2915_v11 = vmax.f32 %v2883_v57, 0.0  ;;  %v2881_v60 = vadd.f32 %v4852_v56, %v2842_v27  ;;  %v2845_v1 = vmul.f32 %v4842_v33, %v2806_v8  ;;  %v2511_v34 = vadd.f32 %v3806_v22, %v2213_v12  ;;  %v2740_v52 = vpop.f32.mrf.mxu0 }
 0x1e1   : > { %v2804_v9 = vadd.f32 %v2727_v19, %v2506_v42  ;;  %v2442_v46 = vpop.f32.mrf.mxu1  ;;  %v2215_v12 = vadd.f32 %v5144_v20, %v1916_v14 }
 0x1e2   : > { %2948 = vst.msk [vmem:[%s4868_s21 + $0x90] sm:$0xff] %vm2929_vm1, %v2915_v11  ;;  %v2913_v16 = vmax.f32 %v2881_v60, 0.0  ;;  %v2884_v39 = vadd.f32 %v4852_v56, %v2845_v1  ;;  %v2809_v54 = vadd.f32 %v3840_v30, %v2511_v34  ;;  %v2509_v15 = vadd.f32 %v2442_v46, %v2211_v4  ;;  %v3841_v50 = vpop.f32.mrf.mxu0 }
 0x1e3   : > { %v2843_v18 = vmul.f32 %v4842_v33, %v2804_v9  ;;  %v3807_v38 = vpop.f32.mrf.mxu1  ;;  %v2218_v4 = vadd.f32 %v5147_v43, %v1919_v35 }
 0x1e4   : > { %2946 = vst.msk [vmem:[%s4868_s21 + $0x80] sm:$0xff] %vm2929_vm1, %v2913_v16  ;;  %v2916_v21 = vmax.f32 %v2884_v39, 0.0  ;;  %v2848_v45 = vmul.f32 %v4842_v33, %v2809_v54  ;;  %v2807_v58 = vadd.f32 %v2740_v52, %v2509_v15  ;;  %v2512_v32 = vadd.f32 %v3807_v38, %v2214_v36  ;;  %v2743_v41 = vpop.f32.mrf.mxu0 }
 0x1e5   : > { %v2882_v28 = vadd.f32 %v4852_v56, %v2843_v18  ;;  %v2445_v17 = vpop.f32.mrf.mxu1  ;;  %v2216_v36 = vadd.f32 %v5150_v5, %v1917_v49  ;;  %v5158_v49 = vld [vmem:[#allocation42_spill] sm:$0xff] }
 0x1e6   : > { %2949 = vst.msk [vmem:[%s4868_s21 + $0x98] sm:$0xff] %vm2929_vm1, %v2916_v21  ;;  %v2887_v47 = vadd.f32 %v4852_v56, %v2848_v45  ;;  %v2846_v59 = vmul.f32 %v4842_v33, %v2807_v58  ;;  %v2810_v29 = vadd.f32 %v3841_v50, %v2512_v32  ;;  %v2510_v7 = vadd.f32 %v2445_v17, %v2212_v10  ;;  %v3844_v19 = vpop.f32.mrf.mxu0 }
 0x1e7   : > { %v2914_v26 = vmax.f32 %v2882_v28, 0.0  ;;  %v3810_v2 = vpop.f32.mrf.mxu1  ;;  %v2221_v10 = vadd.f32 %v5151_v24, %v1922_v25 }
 0x1e8   : > { %v2919_v37 = vmax.f32 %v2887_v47, 0.0  ;;  %v2885_v57 = vadd.f32 %v4852_v56, %v2846_v59  ;;  %v2849_v27 = vmul.f32 %v4842_v33, %v2810_v29  ;;  %v2808_v8 = vadd.f32 %v2743_v41, %v2510_v7  ;;  %v2756_v30 = vpop.f32.mrf.mxu0  ;;  %v5155_v41 = vld [vmem:[#allocation15_spill] sm:$0xff] }
 0x1e9   : > { %2947 = vst.msk [vmem:[%s4868_s21 + $0x88] sm:$0xff] %vm2929_vm1, %v2914_v26  ;;  %v2515_v42 = vadd.f32 %v3810_v2, %v2217_v44  ;;  %v2458_v22 = vpop.f32.mrf.mxu1  ;;  %v1921_v53 = vadd.f32 %v4832_v51, %v5155_v41  ;;  %v5156_v29 = vld [vmem:[#allocation39_spill] sm:$0xff] }
 0x1ea   : > { %2952 = vst.msk [vmem:[%s4868_s21 + $0xb0] sm:$0xff] %vm2929_vm1, %v2919_v37  ;;  %v2917_v11 = vmax.f32 %v2885_v57, 0.0  ;;  %v2888_v60 = vadd.f32 %v4852_v56, %v2849_v27  ;;  %v2847_v1 = vmul.f32 %v4842_v33, %v2808_v8  ;;  %v2513_v34 = vadd.f32 %v2458_v22, %v2215_v12  ;;  %v3845_v52 = vpop.f32.mrf.mxu0 }
 0x1eb   : > { %v2813_v9 = vadd.f32 %v3844_v19, %v2515_v42  ;;  %v3811_v46 = vpop.f32.mrf.mxu1  ;;  %v2219_v7 = vadd.f32 %v5156_v29, %v1920_v31  ;;  %v5157_v19 = vld [vmem:[#allocation41_spill] sm:$0xff]  ;;  %v2220_v26 = vadd.f32 %v5158_v49, %v1921_v53 }
 0x1ec   : > { %2950 = vst.msk [vmem:[%s4868_s21 + $0xa0] sm:$0xff] %vm2929_vm1, %v2917_v11  ;;  %v2920_v16 = vmax.f32 %v2888_v60, 0.0  ;;  %v2886_v39 = vadd.f32 %v4852_v56, %v2847_v1  ;;  %v2811_v54 = vadd.f32 %v2756_v30, %v2513_v34  ;;  %v2516_v15 = vadd.f32 %v3811_v46, %v2218_v4  ;;  %v2759_v50 = vpop.f32.mrf.mxu0 }
 0x1ed   : > { %v2852_v14 = vmul.f32 %v4842_v33, %v2813_v9  ;;  %v2461_v18 = vpop.f32.mrf.mxu1  ;;  %v2222_v61 = vadd.f32 %v5157_v19, %v1923_v3 }
 0x1ee   : > { %2953 = vst.msk [vmem:[%s4868_s21 + $0xb8] sm:$0xff] %vm2929_vm1, %v2920_v16  ;;  %v2918_v38 = vmax.f32 %v2886_v39, 0.0  ;;  %v2850_v21 = vmul.f32 %v4842_v33, %v2811_v54  ;;  %v2814_v45 = vadd.f32 %v3845_v52, %v2516_v15  ;;  %v2514_v58 = vadd.f32 %v2461_v18, %v2216_v36  ;;  %v3848_v32 = vpop.f32.mrf.mxu0 }
 0x1ef   : > { %v2891_v62 = vadd.f32 %v4852_v56, %v2852_v14  ;;  %v3814_v35 = vpop.f32.mrf.mxu1 }
 0x1f0   : > { %2951 = vst.msk [vmem:[%s4868_s21 + $0xa8] sm:$0xff] %vm2929_vm1, %v2918_v38  ;;  %v2889_v6 = vadd.f32 %v4852_v56, %v2850_v21  ;;  %v2853_v28 = vmul.f32 %v4842_v33, %v2814_v45  ;;  %v2812_v17 = vadd.f32 %v2759_v50, %v2514_v58  ;;  %v2519_v47 = vadd.f32 %v3814_v35, %v2221_v10  ;;  %v2772_v59 = vpop.f32.mrf.mxu0 }
 0x1f1   : > { %v2923_v44 = vmax.f32 %v2891_v62, 0.0  ;;  %v2474_v51 = vpop.f32.mrf.mxu1 }
 0x1f2   : > { %v2921_v20 = vmax.f32 %v2889_v6, 0.0  ;;  %v2892_v12 = vadd.f32 %v4852_v56, %v2853_v28  ;;  %v2851_v0 = vmul.f32 %v4842_v33, %v2812_v17  ;;  %v2817_v55 = vadd.f32 %v3848_v32, %v2519_v47  ;;  %v3849_v57 = vpop.f32.mrf.mxu0 }
 0x1f3   : > { %2956 = vst.msk [vmem:[%s4868_s21 + $0xd0] sm:$0xff] %vm2929_vm1, %v2923_v44  ;;  %v2517_v2 = vadd.f32 %v2474_v51, %v2219_v7  ;;  %v3815_v37 = vpop.f32.mrf.mxu1 }
 0x1f4   : > { %2954 = vst.msk [vmem:[%s4868_s21 + $0xc0] sm:$0xff] %vm2929_vm1, %v2921_v20  ;;  %v2924_v27 = vmax.f32 %v2892_v12, 0.0  ;;  %v2890_v8 = vadd.f32 %v4852_v56, %v2851_v0  ;;  %v2856_v30 = vmul.f32 %v4842_v33, %v2817_v55  ;;  %v2520_v43 = vadd.f32 %v3815_v37, %v2222_v61  ;;  %v2775_v60 = vpop.f32.mrf.mxu0 }
 0x1f5   : > { %v2815_v4 = vadd.f32 %v2772_v59, %v2517_v2  ;;  %v2477_v48 = vpop.f32.mrf.mxu1 }
 0x1f6   : > { %2957 = vst.msk [vmem:[%s4868_s21 + $0xd8] sm:$0xff] %vm2929_vm1, %v2924_v27  ;;  %v2922_v13 = vmax.f32 %v2890_v8, 0.0  ;;  %v2895_v25 = vadd.f32 %v4852_v56, %v2856_v30  ;;  %v2818_v42 = vadd.f32 %v3849_v57, %v2520_v43  ;;  %v2518_v22 = vadd.f32 %v2477_v48, %v2220_v26 }
 0x1f7   : > { %v2854_v11 = vmul.f32 %v4842_v33, %v2815_v4 }
 0x1f8   : > { %2955 = vst.msk [vmem:[%s4868_s21 + $0xc8] sm:$0xff] %vm2929_vm1, %v2922_v13  ;;  %v2927_v1 = vmax.f32 %v2895_v25, 0.0  ;;  %v2857_v34 = vmul.f32 %v4842_v33, %v2818_v42  ;;  %v2816_v52 = vadd.f32 %v2775_v60, %v2518_v22 }
 0x1f9   : > { %v2893_v5 = vadd.f32 %v4852_v56, %v2854_v11 }
 0x1fa   : > { %2960 = vst.msk [vmem:[%s4868_s21 + $0xf0] sm:$0xff] %vm2929_vm1, %v2927_v1  ;;  %v2896_v36 = vadd.f32 %v4852_v56, %v2857_v34  ;;  %v2855_v9 = vmul.f32 %v4842_v33, %v2816_v52 }
 0x1fb   : > { %v2925_v46 = vmax.f32 %v2893_v5, 0.0 }
 0x1fc   : > { %v2928_v16 = vmax.f32 %v2896_v36, 0.0  ;;  %v2894_v39 = vadd.f32 %v4852_v56, %v2855_v9 }
 0x1fd   : > { %2958 = vst.msk [vmem:[%s4868_s21 + $0xe0] sm:$0xff] %vm2929_vm1, %v2925_v46 }
 0x1fe   : > { %2961 = vst.msk [vmem:[%s4868_s21 + $0xf8] sm:$0xff] %vm2929_vm1, %v2928_v16  ;;  %v2926_v54 = vmax.f32 %v2894_v39, 0.0 }
 0x200   : > { %2959 = vst.msk [vmem:[%s4868_s21 + $0xe8] sm:$0xff] %vm2929_vm1, %v2926_v54 }
 0x201 PF: > { %s14_s15 = sadd.s32 1, %s3876_s15  }
 0x202   : > { %p11_p4 = scmp.ge.s32.totalorder %s14_s15, 4  }
 0x204   :  { %13 = sbr.rel (!%p11_p4) target bundleno = 1 (0x1), region = 76 }

// kernel: _lambda_.12
= control target key start
LH: loop header
LB: loop body
LE: loop exit
PB: predicated region body
PF: predicated region fallthrough
CT: control target
= control target key end

     0   :  { %s4033_s18 = smov 0   ;;  %s5243_s0 = inlined_call_operand.vmem [shape: f32[2,18,18,16], index: 0, kind: input, shape index: {}]   ;;  %s5244_s1 = inlined_call_operand.vmem [shape: bf16[9,16,16], index: 1, kind: input, shape index: {}]   ;;  %s5245_s2 = inlined_call_operand.vmem [shape: f32[1,16], index: 2, kind: input, shape index: {}]   ;;  %s5246_s3 = inlined_call_operand.vmem [shape: f32[1,16], index: 3, kind: input, shape index: {}]   ;;  %s5247_s4 = inlined_call_operand.vmem [shape: f32[2,16,16,16], index: 4, kind: input, shape index: {}]   ;;  %s5248_s5 = inlined_call_operand.vmem [shape: f32[2,16,16,16], index: 5, kind: output, shape index: {}]  }
   0x1 LB: > { %s3139_s19 = sadd.s32 4294967295, %s4001_s18   ;;  %p3143_p0 = scmp.ge.s32.totalorder %s4001_s18, 1  ;;  %s4001_s18 = sphi %s4033_s18, %s15_s18  }
   0x2   : > { %p197_p1 = scmp.lt.s32.totalorder %s4001_s18, 3 }
   0x4   : > { %p198_p2 = pnand %p3143_p0, %p197_p1 }
   0x6   : > { %201 = sbr.rel (%p198_p2) target bundleno = 515 (0x203), region = 40 }
   0xb   : > { %v3986_v0 = vld [vmem:[%s5244_s1 + $0x8] sm:$0xff]   ;;  %p230_p3 = scmp.lt.s32.totalorder %s3139_s19, 1  ;;  %v3987_v1 = vld [vmem:[%s5244_s1] sm:$0xff]   ;;  %v3988_v2 = vld [vmem:[%s5244_s1 + $0x10] sm:$0xff]   ;;  %vm353_vm0 = vcmask 130048  }
   0xc   : > { %3975 = vmatprep.subr.bf16.mxu1 %v3986_v0  ;;  %3669 = vmatprep.subr.bf16.mxu0 %v3986_v0  ;;  %v4067_v10 = vld [vmem:[%s5244_s1 + $0x18] sm:$0xff]   ;;  %v4093_v22 = vld [vmem:[%s5244_s1 + $0x20] sm:$0xff]  }
   0xd   : > { %s5330_s19 = smov (!%p230_p3, %s3139_s19), 1  ;;  %3976 = vmatpush3.bf16.msra.mxu1 %v3986_v0  ;;  %3670 = vmatpush3.bf16.msra.mxu0 %v3986_v0 }
   0xe   : > { %s3977_s26 = smul.u32 432, %s5330_s19  ;;  %3703 = vmatprep.subr.bf16.mxu1 %v3987_v1  ;;  %3737 = vmatprep.subr.bf16.mxu0 %v3988_v2  ;;  %s3514_s17 = sshll.u32 %s5330_s19, 8 }
   0xf   : > { %s4981_s24 = scalar_lea.vmem %s5247_s4, %s3514_s17 }
  0x10   : > { %s4056_s29 = scalar_lea.vmem %s5243_s0, %s3977_s26 }
  0x11   : > { %v296_v3 = vld [vmem:[%s4056_s29 + $0x1] sm:$0xff]  ;;  %v297_v4 = vld [vmem:[%s4056_s29 + $0x9] sm:$0xff]  ;;  %v298_v8 = vld [vmem:[%s4056_s29 + $0x19] sm:$0xff] }
  0x12   : > { %v312_v5 = vld [vmem:[%s4056_s29 + $0xc1] sm:$0xff]  ;;  %v328_v6 = vpack.c.bf16 %v297_v4, %v296_v3  ;;  %v313_v7 = vld [vmem:[%s4056_s29 + $0xc9] sm:$0xff]  ;;  %v314_v13 = vld [vmem:[%s4056_s29 + $0xd9] sm:$0xff] }
  0x13   : > { %v299_v9 = vld [vmem:[%s4056_s29 + $0x21] sm:$0xff]  ;;  %v4069_v11 = vpack.c.bf16 %v313_v7, %v312_v5  ;;  %v300_v15 = vld [vmem:[%s4056_s29 + $0x31] sm:$0xff]  ;;  %v301_v17 = vld [vmem:[%s4056_s29 + $0x39] sm:$0xff] }
  0x14   : > { %v4071_v12 = vpack.c.bf16 %v299_v9, %v298_v8  ;;  %v315_v14 = vld [vmem:[%s4056_s29 + $0xe1] sm:$0xff]  ;;  %3671 = vmatprep.mubr.msk.bf16.mxu0 %vm353_vm0, %v328_v6  ;;  %v316_v18 = vld [vmem:[%s4056_s29 + $0xf1] sm:$0xff]  ;;  %v317_v19 = vld [vmem:[%s4056_s29 + $0xf9] sm:$0xff]  ;;  %v4086_v20 = vpack.c.bf16 %v301_v17, %v300_v15 }
  0x15   : > { %v4077_v16 = vpack.c.bf16 %v315_v14, %v314_v13  ;;  %3687 = vmatprep.mubr.msk.bf16.mxu1 %vm353_vm0, %v4069_v11  ;;  %v4088_v21 = vpack.c.bf16 %v317_v19, %v316_v18  ;;  %v302_v23 = vld [vmem:[%s4056_s29 + $0x49] sm:$0xff]  ;;  %v303_v24 = vld [vmem:[%s4056_s29 + $0x51] sm:$0xff]  ;;  %v304_v27 = vld [vmem:[%s4056_s29 + $0x61] sm:$0xff] }
  0x16   : > { %3672 = vmatmul.mubr.msk.bf16.vlgmr.msra.gmra.mxu0 %vm353_vm0, %v4071_v12  ;;  %v318_v25 = vld [vmem:[%s4056_s29 + $0x109] sm:$0xff]  ;;  %v319_v26 = vld [vmem:[%s4056_s29 + $0x111] sm:$0xff]  ;;  %v320_v29 = vld [vmem:[%s4056_s29 + $0x121] sm:$0xff]  ;;  %v4110_v31 = vpack.c.bf16 %v303_v24, %v302_v23 }
  0x17   : > { %3688 = vmatmul.mubr.msk.bf16.vlgmr.msra.gmra.mxu1 %vm353_vm0, %v4077_v16  ;;  %3738 = vmatpush3.bf16.msra.mxu0 %v3988_v2  ;;  %v305_v28 = vld [vmem:[%s4056_s29 + $0x69] sm:$0xff]  ;;  %v4113_v32 = vpack.c.bf16 %v319_v26, %v318_v25  ;;  %v306_v35 = vld [vmem:[%s4056_s29 + $0x79] sm:$0xff]  ;;  %v307_v36 = vld [vmem:[%s4056_s29 + $0x81] sm:$0xff] }
  0x18   : > { %3704 = vmatpush3.bf16.msra.mxu1 %v3987_v1  ;;  %3675 = vmatprep.mubr.msk.bf16.mxu0 %vm353_vm0, %v4086_v20  ;;  %v321_v30 = vld [vmem:[%s4056_s29 + $0x129] sm:$0xff]  ;;  %v4115_v33 = vpack.c.bf16 %v305_v28, %v304_v27  ;;  %v322_v37 = vld [vmem:[%s4056_s29 + $0x139] sm:$0xff]  ;;  %v323_v38 = vld [vmem:[%s4056_s29 + $0x141] sm:$0xff]  ;;  %v4135_v43 = vpack.c.bf16 %v307_v36, %v306_v35 }
  0x19   : > { %3691 = vmatprep.mubr.msk.bf16.mxu1 %vm353_vm0, %v4088_v21  ;;  %3771 = vmatprep.subr.bf16.mxu1 %v4067_v10  ;;  %v4117_v34 = vpack.c.bf16 %v321_v30, %v320_v29  ;;  %v308_v39 = vld [vmem:[%s4056_s29 + $0x91] sm:$0xff]  ;;  %v309_v40 = vld [vmem:[%s4056_s29 + $0x99] sm:$0xff]  ;;  %v4137_v44 = vpack.c.bf16 %v323_v38, %v322_v37  ;;  %v310_v47 = vld [vmem:[%s4056_s29 + $0xa9] sm:$0xff] }
  0x1a   : > { %3805 = vmatprep.subr.bf16.mxu0 %v4093_v22  ;;  %v324_v41 = vld [vmem:[%s4056_s29 + $0x151] sm:$0xff]  ;;  %v325_v42 = vld [vmem:[%s4056_s29 + $0x159] sm:$0xff]  ;;  %v4139_v45 = vpack.c.bf16 %v309_v40, %v308_v39  ;;  %v326_v49 = vld [vmem:[%s4056_s29 + $0x169] sm:$0xff] }
  0x1b   : > { %v4141_v46 = vpack.c.bf16 %v325_v42, %v324_v41  ;;  %v311_v48 = vld [vmem:[%s4056_s29 + $0xb1] sm:$0xff]  ;;  %v778_v51 = vld [vmem:[%s4056_s29 + $0x2] sm:$0xff]  ;;  %v780_v59 = vld [vmem:[%s4056_s29 + $0x1a] sm:$0xff] }
  0x1c   : > { %v327_v50 = vld [vmem:[%s4056_s29 + $0x171] sm:$0xff]  ;;  %v246_v53 = vld [vmem:[%s4056_s29] sm:$0xff]  ;;  %v247_v54 = vld [vmem:[%s4056_s29 + $0x8] sm:$0xff]  ;;  %v4159_v55 = vpack.c.bf16 %v311_v48, %v310_v47 }
  0x1d   : > { %v779_v52 = vld [vmem:[%s4056_s29 + $0xa] sm:$0xff]  ;;  %v4161_v56 = vpack.c.bf16 %v327_v50, %v326_v49  ;;  %v278_v58 = vpack.c.bf16 %v247_v54, %v246_v53  ;;  %v781_v60 = vld [vmem:[%s4056_s29 + $0x22] sm:$0xff]  ;;  %v248_v61 = vld [vmem:[%s4056_s29 + $0x18] sm:$0xff] }
  0x1e   : > { %3676 = vmatmul.mubr.msk.bf16.gmra.mxu0 %vm353_vm0, %v4110_v31  ;;  %v810_v57 = vpack.c.bf16 %v779_v52, %v778_v51  ;;  %v249_v62 = vld [vmem:[%s4056_s29 + $0x20] sm:$0xff]  ;;  %v250_v63 = vld [vmem:[%s4056_s29 + $0x30] sm:$0xff]  ;;  %v251_v0 = vld [vmem:[%s4056_s29 + $0x38] sm:$0xff]  ;;  %v4175_v1 = vpack.c.bf16 %v781_v60, %v780_v59 }
  0x1f   : > { %3692 = vmatmul.mubr.msk.bf16.gmra.mxu1 %vm353_vm0, %v4113_v32  ;;  %3679 = vmatprep.mubr.msk.bf16.mxu0 %vm353_vm0, %v4115_v33  ;;  %v782_v2 = vld [vmem:[%s4056_s29 + $0x32] sm:$0xff]  ;;  %v783_v3 = vld [vmem:[%s4056_s29 + $0x3a] sm:$0xff]  ;;  %v4179_v4 = vpack.c.bf16 %v249_v62, %v248_v61  ;;  %v4181_v5 = vpack.c.bf16 %v251_v0, %v250_v63  ;;  %v4188_v7 = vld [vmem:[%s5244_s1 + $0x28] sm:$0xff]  }
  0x20   : > { %3695 = vmatprep.mubr.msk.bf16.mxu1 %vm353_vm0, %v4117_v34  ;;  %v4183_v6 = vpack.c.bf16 %v783_v3, %v782_v2  ;;  %v4195_v8 = vld [vmem:[%s5244_s1 + $0x30] sm:$0xff]   ;;  %v252_v9 = vld [vmem:[%s4056_s29 + $0x48] sm:$0xff]  ;;  %v254_v19 = vld [vmem:[%s4056_s29 + $0x60] sm:$0xff] }
  0x21   : > { %v784_v13 = vld [vmem:[%s4056_s29 + $0x4a] sm:$0xff]  ;;  %v785_v14 = vld [vmem:[%s4056_s29 + $0x52] sm:$0xff]  ;;  %v786_v17 = vld [vmem:[%s4056_s29 + $0x62] sm:$0xff] }
  0x22   : > { %v253_v15 = vld [vmem:[%s4056_s29 + $0x50] sm:$0xff]  ;;  %v256_v26 = vld [vmem:[%s4056_s29 + $0x78] sm:$0xff]  ;;  %v789_v28 = vld [vmem:[%s4056_s29 + $0x82] sm:$0xff] }
  0x23   : > { %v787_v18 = vld [vmem:[%s4056_s29 + $0x6a] sm:$0xff]  ;;  %v4217_v23 = vpack.c.bf16 %v253_v15, %v252_v9  ;;  %v788_v27 = vld [vmem:[%s4056_s29 + $0x7a] sm:$0xff]  ;;  %v790_v30 = vld [vmem:[%s4056_s29 + $0x92] sm:$0xff] }
  0x24   : > { %v4219_v24 = vpack.c.bf16 %v787_v18, %v786_v17  ;;  %v257_v29 = vld [vmem:[%s4056_s29 + $0x80] sm:$0xff]  ;;  %v258_v36 = vld [vmem:[%s4056_s29 + $0x90] sm:$0xff]  ;;  %v259_v37 = vld [vmem:[%s4056_s29 + $0x98] sm:$0xff]  ;;  %v4239_v38 = vpack.c.bf16 %v789_v28, %v788_v27 }
  0x25   : > { %v791_v35 = vld [vmem:[%s4056_s29 + $0x9a] sm:$0xff]  ;;  %v4241_v39 = vpack.c.bf16 %v257_v29, %v256_v26  ;;  %v4245_v41 = vpack.c.bf16 %v259_v37, %v258_v36  ;;  %v260_v42 = vld [vmem:[%s4056_s29 + $0xa8] sm:$0xff]  ;;  %v793_v48 = vld [vmem:[%s4056_s29 + $0xb2] sm:$0xff] }
  0x26   : > { %3680 = vmatmul.mubr.msk.bf16.gmra.mxu0 %vm353_vm0, %v4135_v43  ;;  %v4243_v40 = vpack.c.bf16 %v791_v35, %v790_v30  ;;  %v792_v47 = vld [vmem:[%s4056_s29 + $0xaa] sm:$0xff]  ;;  %v794_v50 = vld [vmem:[%s4056_s29 + $0xc2] sm:$0xff]  ;;  %v264_v60 = vld [vmem:[%s4056_s29 + $0xd8] sm:$0xff] }
  0x27   : > { %3696 = vmatmul.mubr.msk.bf16.gmra.mxu1 %vm353_vm0, %v4137_v44  ;;  %3683 = vmatprep.mubr.msk.bf16.mxu0 %vm353_vm0, %v4139_v45  ;;  %v261_v49 = vld [vmem:[%s4056_s29 + $0xb0] sm:$0xff]  ;;  %v262_v52 = vld [vmem:[%s4056_s29 + $0xc0] sm:$0xff]  ;;  %v263_v53 = vld [vmem:[%s4056_s29 + $0xc8] sm:$0xff]  ;;  %v4263_v54 = vpack.c.bf16 %v793_v48, %v792_v47 }
  0x28   : > { %3699 = vmatprep.mubr.msk.bf16.mxu1 %vm353_vm0, %v4141_v46  ;;  %v795_v51 = vld [vmem:[%s4056_s29 + $0xca] sm:$0xff]  ;;  %v4269_v59 = vpack.c.bf16 %v263_v53, %v262_v52  ;;  %v796_v61 = vld [vmem:[%s4056_s29 + $0xda] sm:$0xff]  ;;  %v797_v62 = vld [vmem:[%s4056_s29 + $0xe2] sm:$0xff] }
  0x29   : > { %v265_v63 = vld [vmem:[%s4056_s29 + $0xe0] sm:$0xff]  ;;  %v798_v0 = vld [vmem:[%s4056_s29 + $0xf2] sm:$0xff]  ;;  %v268_v18 = vld [vmem:[%s4056_s29 + $0x108] sm:$0xff] }
  0x2a   : > { %v799_v2 = vld [vmem:[%s4056_s29 + $0xfa] sm:$0xff]  ;;  %v266_v3 = vld [vmem:[%s4056_s29 + $0xf0] sm:$0xff]  ;;  %v802_v27 = vld [vmem:[%s4056_s29 + $0x122] sm:$0xff] }
  0x2b   : > { %v267_v9 = vld [vmem:[%s4056_s29 + $0xf8] sm:$0xff]  ;;  %v4291_v15 = vpack.c.bf16 %v799_v2, %v798_v0  ;;  %v269_v26 = vld [vmem:[%s4056_s29 + $0x110] sm:$0xff]  ;;  %v270_v29 = vld [vmem:[%s4056_s29 + $0x120] sm:$0xff] }
  0x2c   : > { %v4293_v17 = vpack.c.bf16 %v267_v9, %v266_v3  ;;  %v803_v28 = vld [vmem:[%s4056_s29 + $0x12a] sm:$0xff]  ;;  %v4313_v36 = vpack.c.bf16 %v269_v26, %v268_v18  ;;  %v272_v47 = vld [vmem:[%s4056_s29 + $0x138] sm:$0xff] }
  0x2d   : > { %v271_v30 = vld [vmem:[%s4056_s29 + $0x128] sm:$0xff]  ;;  %v4315_v37 = vpack.c.bf16 %v803_v28, %v802_v27  ;;  %v804_v48 = vld [vmem:[%s4056_s29 + $0x13a] sm:$0xff]  ;;  %v274_v53 = vld [vmem:[%s4056_s29 + $0x150] sm:$0xff] }
  0x2e   : > { %3684 = vmatmul.mubr.msk.bf16.gmra.mxu0 %vm353_vm0, %v4159_v55  ;;  %v807_v52 = vld [vmem:[%s4056_s29 + $0x15a] sm:$0xff]  ;;  %v808_v2 = vld [vmem:[%s4056_s29 + $0x16a] sm:$0xff]  ;;  %v809_v3 = vld [vmem:[%s4056_s29 + $0x172] sm:$0xff] }
  0x2f   : > { %3700 = vmatmul.mubr.msk.bf16.gmra.mxu1 %vm353_vm0, %v4161_v56  ;;  %3739 = vmatprep.mubr.msk.bf16.mxu0 %vm353_vm0, %v810_v57  ;;  %v4265_v57 = vpack.c.bf16 %v261_v49, %v260_v42  ;;  %v4317_v42 = vpack.c.bf16 %v271_v30, %v270_v29  ;;  %v805_v49 = vld [vmem:[%s4056_s29 + $0x142] sm:$0xff]  ;;  %v277_v18 = vld [vmem:[%s4056_s29 + $0x170] sm:$0xff]  ;;  %v3993_v26 = vld [vmem:[%s5244_s1 + $0x38] sm:$0xff]  }
  0x30   : > { %3705 = vmatprep.mubr.msk.bf16.mxu1 %vm353_vm0, %v278_v58  ;;  %v4267_v58 = vpack.c.bf16 %v795_v51, %v794_v50  ;;  %v273_v50 = vld [vmem:[%s4056_s29 + $0x140] sm:$0xff]  ;;  %v806_v51 = vld [vmem:[%s4056_s29 + $0x152] sm:$0xff]  ;;  %v276_v9 = vld [vmem:[%s4056_s29 + $0x168] sm:$0xff] }
  0x31   : > { %v3994_v27 = vld [vmem:[%s5244_s1 + $0x40] sm:$0xff]  }
  0x32   : > { %v3388_v28 = vld [vmem:[%s4056_s29 + $0x1a0] sm:$0xff] }
  0x33   : > { %v3336_v30 = vld [vmem:[%s4056_s29 + $0x182] sm:$0xff] }
  0x36   : > { %3740 = vmatmul.mubr.msk.bf16.vlgmr.msra.gmra.mxu0 %vm353_vm0, %v4175_v1 }
  0x37   : > { %3706 = vmatmul.mubr.msk.bf16.vlgmr.msra.gmra.mxu1 %vm353_vm0, %v4179_v4  ;;  %3806 = vmatpush3.bf16.msra.mxu0 %v4093_v22  ;;  %v255_v22 = vld [vmem:[%s4056_s29 + $0x68] sm:$0xff] }
  0x38   : > { %3772 = vmatpush3.bf16.msra.mxu1 %v4067_v10  ;;  %3709 = vmatprep.mubr.msk.bf16.mxu1 %vm353_vm0, %v4181_v5  ;;  %v4214_v10 = vpack.c.bf16 %v785_v14, %v784_v13  ;;  %v4221_v25 = vpack.c.bf16 %v255_v22, %v254_v19  ;;  %v4287_v13 = vpack.c.bf16 %v797_v62, %v796_v61  ;;  %v800_v19 = vld [vmem:[%s4056_s29 + $0x10a] sm:$0xff]  ;;  %v801_v22 = vld [vmem:[%s4056_s29 + $0x112] sm:$0xff] }
  0x39   : > { %3743 = vmatprep.mubr.msk.bf16.mxu0 %vm353_vm0, %v4183_v6  ;;  %3839 = vmatprep.subr.bf16.mxu1 %v4188_v7  ;;  %v4289_v14 = vpack.c.bf16 %v265_v63, %v264_v60  ;;  %v4311_v35 = vpack.c.bf16 %v801_v22, %v800_v19  ;;  %v275_v60 = vld [vmem:[%s4056_s29 + $0x158] sm:$0xff]  ;;  %v4335_v61 = vpack.c.bf16 %v805_v49, %v804_v48 }
  0x3a   : > { %3873 = vmatprep.subr.bf16.mxu0 %v4195_v8  ;;  %v4337_v62 = vpack.c.bf16 %v273_v50, %v272_v47  ;;  %v4339_v63 = vpack.c.bf16 %v807_v52, %v806_v51  ;;  %v4341_v0 = vpack.c.bf16 %v275_v60, %v274_v53  ;;  %v4355_v19 = vpack.c.bf16 %v809_v3, %v808_v2 }
  0x3b   : > { %v4357_v22 = vpack.c.bf16 %v277_v18, %v276_v9 }
  0x3e   : > { %3744 = vmatmul.mubr.msk.bf16.gmra.mxu0 %vm353_vm0, %v4214_v10 }
  0x3f   : > { %3710 = vmatmul.mubr.msk.bf16.gmra.mxu1 %vm353_vm0, %v4217_v23  ;;  %3747 = vmatprep.mubr.msk.bf16.mxu0 %vm353_vm0, %v4219_v24 }
  0x40   : > { %3713 = vmatprep.mubr.msk.bf16.mxu1 %vm353_vm0, %v4221_v25 }
  0x46   : > { %3748 = vmatmul.mubr.msk.bf16.gmra.mxu0 %vm353_vm0, %v4239_v38 }
  0x47   : > { %3714 = vmatmul.mubr.msk.bf16.gmra.mxu1 %vm353_vm0, %v4241_v39  ;;  %3751 = vmatprep.mubr.msk.bf16.mxu0 %vm353_vm0, %v4243_v40 }
  0x48   : > { %3717 = vmatprep.mubr.msk.bf16.mxu1 %vm353_vm0, %v4245_v41 }
  0x4e   : > { %3752 = vmatmul.mubr.msk.bf16.gmra.mxu0 %vm353_vm0, %v4263_v54 }
  0x4f   : > { %3718 = vmatmul.mubr.msk.bf16.gmra.mxu1 %vm353_vm0, %v4265_v57  ;;  %3755 = vmatprep.mubr.msk.bf16.mxu0 %vm353_vm0, %v4267_v58 }
  0x50   : > { %3721 = vmatprep.mubr.msk.bf16.mxu1 %vm353_vm0, %v4269_v59 }
  0x56   : > { %3756 = vmatmul.mubr.msk.bf16.gmra.mxu0 %vm353_vm0, %v4287_v13 }
  0x57   : > { %3722 = vmatmul.mubr.msk.bf16.gmra.mxu1 %vm353_vm0, %v4289_v14  ;;  %3759 = vmatprep.mubr.msk.bf16.mxu0 %vm353_vm0, %v4291_v15 }
  0x58   : > { %3725 = vmatprep.mubr.msk.bf16.mxu1 %vm353_vm0, %v4293_v17 }
  0x5e   : > { %3760 = vmatmul.mubr.msk.bf16.gmra.mxu0 %vm353_vm0, %v4311_v35 }
  0x5f   : > { %3726 = vmatmul.mubr.msk.bf16.gmra.mxu1 %vm353_vm0, %v4313_v36  ;;  %3763 = vmatprep.mubr.msk.bf16.mxu0 %vm353_vm0, %v4315_v37 }
  0x60   : > { %3729 = vmatprep.mubr.msk.bf16.mxu1 %vm353_vm0, %v4317_v42 }
  0x66   : > { %3764 = vmatmul.mubr.msk.bf16.gmra.mxu0 %vm353_vm0, %v4335_v61 }
  0x67   : > { %3730 = vmatmul.mubr.msk.bf16.gmra.mxu1 %vm353_vm0, %v4337_v62  ;;  %3767 = vmatprep.mubr.msk.bf16.mxu0 %vm353_vm0, %v4339_v63 }
  0x68   : > { %3733 = vmatprep.mubr.msk.bf16.mxu1 %vm353_vm0, %v4341_v0 }
  0x6e   : > { %3768 = vmatmul.mubr.msk.bf16.gmra.mxu0 %vm353_vm0, %v4355_v19 }
  0x6f   : > { %3734 = vmatmul.mubr.msk.bf16.gmra.mxu1 %vm353_vm0, %v4357_v22  ;;  %3807 = vmatprep.mubr.msk.bf16.mxu0 %vm353_vm0, %v4071_v12  ;;  %v3286_v12 = vld [vmem:[%s4056_s29 + $0x189] sm:$0xff] }
  0x70   : > { %3773 = vmatprep.mubr.msk.bf16.mxu1 %vm353_vm0, %v4179_v4 }
  0x76   : > { %3808 = vmatmul.mubr.msk.bf16.vlgmr.msra.gmra.mxu0 %vm353_vm0, %v4086_v20 }
  0x77   : > { %3774 = vmatmul.mubr.msk.bf16.vlgmr.msra.gmra.mxu1 %vm353_vm0, %v4181_v5  ;;  %3874 = vmatpush3.bf16.msra.mxu0 %v4195_v8 }
  0x78   : > { %3840 = vmatpush3.bf16.msra.mxu1 %v4188_v7  ;;  %3777 = vmatprep.mubr.msk.bf16.mxu1 %vm353_vm0, %v4217_v23 }
  0x79   : > { %3811 = vmatprep.mubr.msk.bf16.mxu0 %vm353_vm0, %v4110_v31  ;;  %3907 = vmatprep.subr.bf16.mxu1 %v3993_v26 }
  0x7a   : > { %3941 = vmatprep.subr.bf16.mxu0 %v3994_v27 }
  0x7e   : > { %3812 = vmatmul.mubr.msk.bf16.gmra.mxu0 %vm353_vm0, %v4115_v33 }
  0x7f   : > { %3778 = vmatmul.mubr.msk.bf16.gmra.mxu1 %vm353_vm0, %v4221_v25  ;;  %3815 = vmatprep.mubr.msk.bf16.mxu0 %vm353_vm0, %v4135_v43 }
  0x80   : > { %3781 = vmatprep.mubr.msk.bf16.mxu1 %vm353_vm0, %v4241_v39 }
  0x86   : > { %3816 = vmatmul.mubr.msk.bf16.gmra.mxu0 %vm353_vm0, %v4139_v45 }
  0x87   : > { %3782 = vmatmul.mubr.msk.bf16.gmra.mxu1 %vm353_vm0, %v4245_v41  ;;  %3819 = vmatprep.mubr.msk.bf16.mxu0 %vm353_vm0, %v4159_v55 }
  0x88   : > { %3785 = vmatprep.mubr.msk.bf16.mxu1 %vm353_vm0, %v4265_v57 }
  0x8e   : > { %3820 = vmatmul.mubr.msk.bf16.gmra.mxu0 %vm353_vm0, %v4069_v11  ;;  %v3285_v11 = vld [vmem:[%s4056_s29 + $0x181] sm:$0xff] }
  0x8f   : > { %3786 = vmatmul.mubr.msk.bf16.gmra.mxu1 %vm353_vm0, %v4269_v59  ;;  %3823 = vmatprep.mubr.msk.bf16.mxu0 %vm353_vm0, %v4077_v16  ;;  %v3234_v16 = vld [vmem:[%s4056_s29 + $0x180] sm:$0xff] }
  0x90   : > { %3789 = vmatprep.mubr.msk.bf16.mxu1 %vm353_vm0, %v4289_v14 }
  0x96   : > { %3824 = vmatmul.mubr.msk.bf16.gmra.mxu0 %vm353_vm0, %v4088_v21  ;;  %v3235_v21 = vld [vmem:[%s4056_s29 + $0x188] sm:$0xff] }
  0x97   : > { %3790 = vmatmul.mubr.msk.bf16.gmra.mxu1 %vm353_vm0, %v4293_v17  ;;  %3827 = vmatprep.mubr.msk.bf16.mxu0 %vm353_vm0, %v4113_v32  ;;  %v4435_v32 = vpack.c.bf16 %v3286_v12, %v3285_v11  ;;  %v3416_v11 = vld [vmem:[%s4056_s29 + $0x91] sm:$0xff]  ;;  %v3417_v12 = vld [vmem:[%s4056_s29 + $0x99] sm:$0xff] }
  0x98   : > { %3793 = vmatprep.mubr.msk.bf16.mxu1 %vm353_vm0, %v4313_v36 }
  0x9e   : > { %3828 = vmatmul.mubr.msk.bf16.gmra.mxu0 %vm353_vm0, %v4117_v34  ;;  %v1124_v34 = vpack.c.bf16 %v3235_v21, %v3234_v16 }
  0x9f   : > { %3794 = vmatmul.mubr.msk.bf16.gmra.mxu1 %vm353_vm0, %v4317_v42  ;;  %3831 = vmatprep.mubr.msk.bf16.mxu0 %vm353_vm0, %v4137_v44 }
  0xa0   : > { %3797 = vmatprep.mubr.msk.bf16.mxu1 %vm353_vm0, %v4337_v62 }
  0xa6   : > { %3832 = vmatmul.mubr.msk.bf16.gmra.mxu0 %vm353_vm0, %v4141_v46 }
  0xa7   : > { %3798 = vmatmul.mubr.msk.bf16.gmra.mxu1 %vm353_vm0, %v4341_v0  ;;  %3835 = vmatprep.mubr.msk.bf16.mxu0 %vm353_vm0, %v4161_v56 }
  0xa8   : > { %3801 = vmatprep.mubr.msk.bf16.mxu1 %vm353_vm0, %v4357_v22 }
  0xae   : > { %3836 = vmatmul.mubr.msk.bf16.gmra.mxu0 %vm353_vm0, %v4435_v32 }
  0xaf   : > { %3802 = vmatmul.mubr.msk.bf16.gmra.mxu1 %vm353_vm0, %v1124_v34  ;;  %3875 = vmatprep.mubr.msk.bf16.mxu0 %vm353_vm0, %v4181_v5 }
  0xb0   : > { %3841 = vmatprep.mubr.msk.bf16.mxu1 %vm353_vm0, %v4175_v1 }
  0xb6   : > { %3876 = vmatmul.mubr.msk.bf16.vlgmr.msra.gmra.mxu0 %vm353_vm0, %v4217_v23 }
  0xb7   : > { %3842 = vmatmul.mubr.msk.bf16.vlgmr.msra.gmra.mxu1 %vm353_vm0, %v4183_v6  ;;  %3942 = vmatpush3.bf16.msra.mxu0 %v3994_v27 }
  0xb8   : > { %3908 = vmatpush3.bf16.msra.mxu1 %v3993_v26  ;;  %3845 = vmatprep.mubr.msk.bf16.mxu1 %vm353_vm0, %v4214_v10  ;;  %v3415_v26 = vld [vmem:[%s4056_s29 + $0x81] sm:$0xff] }
  0xb9   : > { %3879 = vmatprep.mubr.msk.bf16.mxu0 %vm353_vm0, %v4221_v25 }
  0xbe   : > { %3880 = vmatmul.mubr.msk.bf16.gmra.mxu0 %vm353_vm0, %v4241_v39 }
  0xbf   : > { %3846 = vmatmul.mubr.msk.bf16.gmra.mxu1 %vm353_vm0, %v4219_v24  ;;  %3883 = vmatprep.mubr.msk.bf16.mxu0 %vm353_vm0, %v4245_v41 }
  0xc0   : > { %3849 = vmatprep.mubr.msk.bf16.mxu1 %vm353_vm0, %v4239_v38 }
  0xc6   : > { %3884 = vmatmul.mubr.msk.bf16.gmra.mxu0 %vm353_vm0, %v4265_v57 }
  0xc7   : > { %3850 = vmatmul.mubr.msk.bf16.gmra.mxu1 %vm353_vm0, %v4243_v40  ;;  %3887 = vmatprep.mubr.msk.bf16.mxu0 %vm353_vm0, %v4269_v59 }
  0xc8   : > { %3853 = vmatprep.mubr.msk.bf16.mxu1 %vm353_vm0, %v4263_v54 }
  0xce   : > { %3888 = vmatmul.mubr.msk.bf16.gmra.mxu0 %vm353_vm0, %v4289_v14 }
  0xcf   : > { %3854 = vmatmul.mubr.msk.bf16.gmra.mxu1 %vm353_vm0, %v4267_v58  ;;  %3891 = vmatprep.mubr.msk.bf16.mxu0 %vm353_vm0, %v4293_v17  ;;  %v3387_v17 = vld [vmem:[%s4056_s29 + $0x198] sm:$0xff] }
  0xd0   : > { %3857 = vmatprep.mubr.msk.bf16.mxu1 %vm353_vm0, %v4287_v13  ;;  %v2019_v48 = vpack.c.bf16 %v3388_v28, %v3387_v17 }
  0xd6   : > { %v3673_v43 = vpop.f32.mrf.mxu0  ;;  %3892 = vmatmul.mubr.msk.bf16.gmra.mxu0 %vm353_vm0, %v4313_v36  ;;  %v3337_v36 = vld [vmem:[%s4056_s29 + $0x18a] sm:$0xff] }
  0xd7   : > { %v4478_v44 = vpop.f32.mrf.mxu1  ;;  %3858 = vmatmul.mubr.msk.bf16.gmra.mxu1 %vm353_vm0, %v4291_v15  ;;  %3895 = vmatprep.mubr.msk.bf16.mxu0 %vm353_vm0, %v4317_v42  ;;  %v4545_v50 = vpack.c.bf16 %v3337_v36, %v3336_v30 }
  0xd8   : > { %v4484_v45 = vpop.f32.mrf.mxu0  ;;  %3861 = vmatprep.mubr.msk.bf16.mxu1 %vm353_vm0, %v4311_v35 }
  0xd9   : > { %v4488_v46 = vpop.f32.mrf.mxu1 }
  0xda   : > { %v4490_v55 = vpop.f32.mrf.mxu0 }
  0xdb   : > { %v4492_v56 = vpop.f32.mrf.mxu1 }
  0xdc   : > { %v4494_v1 = vpop.f32.mrf.mxu0 }
  0xdd   : > { %v4496_v4 = vpop.f32.mrf.mxu1 }
  0xde   : > { %v4498_v5 = vpop.f32.mrf.mxu0  ;;  %3896 = vmatmul.mubr.msk.bf16.gmra.mxu0 %vm353_vm0, %v4337_v62 }
  0xdf   : > { %v4502_v7 = vpop.f32.mrf.mxu1  ;;  %3862 = vmatmul.mubr.msk.bf16.gmra.mxu1 %vm353_vm0, %v4315_v37  ;;  %3899 = vmatprep.mubr.msk.bf16.mxu0 %vm353_vm0, %v4341_v0 }
  0xe0   : > { %v4508_v8 = vpop.f32.mrf.mxu0  ;;  %3865 = vmatprep.mubr.msk.bf16.mxu1 %vm353_vm0, %v4335_v61 }
  0xe1   : > { %v4512_v23 = vpop.f32.mrf.mxu1 }
  0xe2   : > { %v4514_v25 = vpop.f32.mrf.mxu0 }
  0xe3   : > { %v4516_v39 = vpop.f32.mrf.mxu1 }
  0xe4   : > { %v4518_v41 = vpop.f32.mrf.mxu0 }
  0xe5   : > { %v4520_v57 = vpop.f32.mrf.mxu1 }
  0xe6   : > { %v4522_v59 = vpop.f32.mrf.mxu0  ;;  %3900 = vmatmul.mubr.msk.bf16.gmra.mxu0 %vm353_vm0, %v4357_v22  ;;  %v3414_v22 = vld [vmem:[%s4056_s29 + $0x79] sm:$0xff] }
  0xe7   : > { %v4526_v14 = vpop.f32.mrf.mxu1  ;;  %3866 = vmatmul.mubr.msk.bf16.gmra.mxu1 %vm353_vm0, %v4339_v63  ;;  %3903 = vmatprep.mubr.msk.bf16.mxu0 %vm353_vm0, %v1124_v34 }
  0xe8   : > { %v4533_v29 = vpop.f32.mrf.mxu0  ;;  %3869 = vmatprep.mubr.msk.bf16.mxu1 %vm353_vm0, %v4355_v19 }
  0xe9   : > { %v4539_v42 = vpop.f32.mrf.mxu1 }
  0xea   : > { %v4541_v47 = vpop.f32.mrf.mxu0 }
  0xeb   : > { %v4543_v49 = vpop.f32.mrf.mxu1 }
  0xec   : > { %v4547_v51 = vpop.f32.mrf.mxu0 }
  0xed   : > { %v4549_v52 = vpop.f32.mrf.mxu1 }
  0xee   : > { %v4551_v53 = vpop.f32.mrf.mxu0  ;;  %3904 = vmatmul.mubr.msk.bf16.gmra.mxu0 %vm353_vm0, %v2019_v48 }
  0xef   : > { %v4554_v60 = vpop.f32.mrf.mxu1  ;;  %3870 = vmatmul.mubr.msk.bf16.gmra.mxu1 %vm353_vm0, %v4545_v50  ;;  %3943 = vmatprep.mubr.msk.bf16.mxu0 %vm353_vm0, %v4183_v6 }
  0xf0   : > { %v4560_v62 = vpop.f32.mrf.mxu0  ;;  %3909 = vmatprep.mubr.msk.bf16.mxu1 %vm353_vm0, %v4086_v20 }
  0xf1   : > { %v4564_v63 = vpop.f32.mrf.mxu1 }
  0xf2   : > { %v4566_v0 = vpop.f32.mrf.mxu0 }
  0xf3   : > { %v4568_v2 = vpop.f32.mrf.mxu1 }
  0xf4   : > { %v4570_v3 = vpop.f32.mrf.mxu0 }
  0xf5   : > { %v4572_v9 = vpop.f32.mrf.mxu1 }
  0xf6   : > { %v3741_v6 = vpop.f32.mrf.mxu0  ;;  %3944 = vmatmul.mubr.msk.bf16.vlgmr.msra.gmra.mxu0 %vm353_vm0, %v4214_v10 }
  0xf7   : > { %v3707_v18 = vpop.f32.mrf.mxu1  ;;  %3910 = vmatmul.mubr.msk.bf16.vlgmr.msra.gmra.mxu1 %vm353_vm0, %v4110_v31  ;;  %3947 = vmatprep.mubr.msk.bf16.mxu0 %vm353_vm0, %v4219_v24  ;;  %v2305_v31 = vpack.c.bf16 %v3415_v26, %v3414_v22  ;;  %v3420_v22 = vld [vmem:[%s4056_s29 + $0xc1] sm:$0xff]  ;;  %v3421_v26 = vld [vmem:[%s4056_s29 + $0xc9] sm:$0xff] }
  0xf8   : > { %v660_v20 = vadd.f32 %v3707_v18, %v3673_v43  ;;  %v917_v19 = vpop.f32.mrf.mxu0  ;;  %3913 = vmatprep.mubr.msk.bf16.mxu1 %vm353_vm0, %v4115_v33  ;;  %v2306_v33 = vpack.c.bf16 %v3417_v12, %v3416_v11 }
  0xf9   : > { %v651_v27 = vpop.f32.mrf.mxu1 }
  0xfa   : > { %v4586_v16 = vadd.f32 %v3741_v6, %v660_v20  ;;  %v652_v10 = vadd.f32 %v651_v27, %v4484_v45  ;;  %v3742_v21 = vpop.f32.mrf.mxu0  ;;  %v3418_v20 = vld [vmem:[%s4056_s29 + $0xa9] sm:$0xff] }
  0xfb   : > { %v3708_v34 = vpop.f32.mrf.mxu1 }
  0xfc   : > { %v4589_v17 = vadd.f32 %v917_v19, %v652_v10  ;;  %v663_v24 = vadd.f32 %v3708_v34, %v4490_v55  ;;  %v920_v43 = vpop.f32.mrf.mxu0  ;;  %v3419_v19 = vld [vmem:[%s4056_s29 + $0xb1] sm:$0xff]  ;;  %v2308_v34 = vpack.c.bf16 %v3421_v26, %v3420_v22 }
  0xfd   : > { %v654_v28 = vpop.f32.mrf.mxu1  ;;  %v2307_v10 = vpack.c.bf16 %v3419_v19, %v3418_v20 }
  0xfe   : > { %v4592_v30 = vadd.f32 %v3742_v21, %v663_v24  ;;  %v655_v36 = vadd.f32 %v654_v28, %v4494_v1  ;;  %v3745_v48 = vpop.f32.mrf.mxu0  ;;  %3948 = vmatmul.mubr.msk.bf16.gmra.mxu0 %vm353_vm0, %v4239_v38 }
  0xff   : > { %v3711_v45 = vpop.f32.mrf.mxu1  ;;  %3914 = vmatmul.mubr.msk.bf16.gmra.mxu1 %vm353_vm0, %v2305_v31  ;;  %3951 = vmatprep.mubr.msk.bf16.mxu0 %vm353_vm0, %v4243_v40 }
 0x100   : > { %v4600_v55 = vadd.f32 %v920_v43, %v655_v36  ;;  %v676_v6 = vadd.f32 %v3711_v45, %v4498_v5  ;;  %v933_v18 = vpop.f32.mrf.mxu0  ;;  %3917 = vmatprep.mubr.msk.bf16.mxu1 %vm353_vm0, %v2306_v33  ;;  %v3423_v45 = vld [vmem:[%s4056_s29 + $0xe1] sm:$0xff] }
 0x101   : > { %v667_v1 = vpop.f32.mrf.mxu1 }
 0x102   : > { %v4608_v27 = vadd.f32 %v3745_v48, %v676_v6  ;;  %v668_v38 = vadd.f32 %v667_v1, %v4508_v8  ;;  %v3746_v11 = vpop.f32.mrf.mxu0  ;;  %v3422_v48 = vld [vmem:[%s4056_s29 + $0xd9] sm:$0xff]  ;;  %v3424_v6 = vld [vmem:[%s4056_s29 + $0xf1] sm:$0xff] }
 0x103   : > { %v3712_v12 = vpop.f32.mrf.mxu1  ;;  %v2309_v22 = vpack.c.bf16 %v3423_v45, %v3422_v48 }
 0x104   : > { %v4611_v40 = vadd.f32 %v933_v18, %v668_v38  ;;  %v679_v5 = vadd.f32 %v3712_v12, %v4514_v25  ;;  %v936_v21 = vpop.f32.mrf.mxu0  ;;  %v3425_v18 = vld [vmem:[%s4056_s29 + $0xf9] sm:$0xff] }
 0x105   : > { %v670_v31 = vpop.f32.mrf.mxu1  ;;  %v2310_v38 = vpack.c.bf16 %v3425_v18, %v3424_v6 }
 0x106   : > { %v4614_v24 = vadd.f32 %v3746_v11, %v679_v5  ;;  %v671_v43 = vadd.f32 %v670_v31, %v4518_v41  ;;  %v3749_v33 = vpop.f32.mrf.mxu0  ;;  %3952 = vmatmul.mubr.msk.bf16.gmra.mxu0 %vm353_vm0, %v4263_v54  ;;  %v3426_v31 = vld [vmem:[%s4056_s29 + $0x109] sm:$0xff] }
 0x107   : > { %v3715_v8 = vpop.f32.mrf.mxu1  ;;  %3918 = vmatmul.mubr.msk.bf16.gmra.mxu1 %vm353_vm0, %v2307_v10  ;;  %3955 = vmatprep.mubr.msk.bf16.mxu0 %vm353_vm0, %v4267_v58 }
 0x108   : > { %v4622_v25 = vadd.f32 %v936_v21, %v671_v43  ;;  %v692_v28 = vadd.f32 %v3715_v8, %v4522_v59  ;;  %v949_v36 = vpop.f32.mrf.mxu0  ;;  %3921 = vmatprep.mubr.msk.bf16.mxu1 %vm353_vm0, %v2308_v34  ;;  %v3427_v43 = vld [vmem:[%s4056_s29 + $0x111] sm:$0xff]  ;;  %v3429_v8 = vld [vmem:[%s4056_s29 + $0x129] sm:$0xff] }
 0x109   : > { %v683_v41 = vpop.f32.mrf.mxu1 }
 0x10a   : > { %v4630_v20 = vadd.f32 %v3749_v33, %v692_v28  ;;  %v684_v54 = vadd.f32 %v683_v41, %v4533_v29  ;;  %v3750_v19 = vpop.f32.mrf.mxu0  ;;  %v3428_v33 = vld [vmem:[%s4056_s29 + $0x121] sm:$0xff] }
 0x10b   : > { %v3716_v1 = vpop.f32.mrf.mxu1  ;;  %v2312_v6 = vpack.c.bf16 %v3429_v8, %v3428_v33 }
 0x10c   : > { %v4633_v58 = vadd.f32 %v949_v36, %v684_v54  ;;  %v695_v59 = vadd.f32 %v3716_v1, %v4541_v47  ;;  %v952_v26 = vpop.f32.mrf.mxu0 }
 0x10d   : > { %v686_v11 = vpop.f32.mrf.mxu1 }
 0x10e   : > { %v4636_v12 = vadd.f32 %v3750_v19, %v695_v59  ;;  %v687_v10 = vadd.f32 %v686_v11, %v4547_v51  ;;  %v3753_v5 = vpop.f32.mrf.mxu0  ;;  %3956 = vmatmul.mubr.msk.bf16.gmra.mxu0 %vm353_vm0, %v4287_v13  ;;  %v3484_v11 = vld [vmem:[%s4056_s29 + $0x15a] sm:$0xff] }
 0x10f   : > { %v3719_v29 = vpop.f32.mrf.mxu1  ;;  %3922 = vmatmul.mubr.msk.bf16.gmra.mxu1 %vm353_vm0, %v2309_v22  ;;  %3959 = vmatprep.mubr.msk.bf16.mxu0 %vm353_vm0, %v4291_v15  ;;  %v2311_v15 = vpack.c.bf16 %v3427_v43, %v3426_v31 }
 0x110   : > { %v4644_v47 = vadd.f32 %v952_v26, %v687_v10  ;;  %v708_v21 = vadd.f32 %v3719_v29, %v4551_v53  ;;  %v965_v34 = vpop.f32.mrf.mxu0  ;;  %3925 = vmatprep.mubr.msk.bf16.mxu1 %vm353_vm0, %v2310_v38  ;;  %v3483_v38 = vld [vmem:[%s4056_s29 + $0x152] sm:$0xff] }
 0x111   : > { %v699_v51 = vpop.f32.mrf.mxu1  ;;  %v2612_v43 = vpack.c.bf16 %v3484_v11, %v3483_v38 }
 0x112   : > { %v4652_v28 = vadd.f32 %v3753_v5, %v708_v21  ;;  %v700_v13 = vadd.f32 %v699_v51, %v4560_v62  ;;  %v3754_v36 = vpop.f32.mrf.mxu0  ;;  %v3432_v5 = vld [vmem:[%s4056_s29 + $0x151] sm:$0xff] }
 0x113   : > { %v3720_v48 = vpop.f32.mrf.mxu1 }
 0x114   : > { %v4655_v45 = vadd.f32 %v965_v34, %v700_v13  ;;  %v711_v53 = vadd.f32 %v3720_v48, %v4566_v0  ;;  %v968_v41 = vpop.f32.mrf.mxu0  ;;  %v3430_v0 = vld [vmem:[%s4056_s29 + $0x139] sm:$0xff] }
 0x115   : > { %v702_v18 = vpop.f32.mrf.mxu1 }
 0x116   : > { %v4658_v54 = vadd.f32 %v3754_v36, %v711_v53  ;;  %v703_v19 = vadd.f32 %v702_v18, %v4570_v3  ;;  %v3757_v62 = vpop.f32.mrf.mxu0  ;;  %3960 = vmatmul.mubr.msk.bf16.gmra.mxu0 %vm353_vm0, %v4311_v35  ;;  %v3431_v3 = vld [vmem:[%s4056_s29 + $0x141] sm:$0xff]  ;;  %v3433_v35 = vld [vmem:[%s4056_s29 + $0x159] sm:$0xff]  ;;  %v3485_v53 = vld [vmem:[%s4056_s29 + $0x16a] sm:$0xff] }
 0x117   : > { %v3723_v1 = vpop.f32.mrf.mxu1  ;;  %3926 = vmatmul.mubr.msk.bf16.gmra.mxu1 %vm353_vm0, %v2311_v15  ;;  %3963 = vmatprep.mubr.msk.bf16.mxu0 %vm353_vm0, %v4315_v37  ;;  %v2313_v31 = vpack.c.bf16 %v3431_v3, %v3430_v0  ;;  %v2314_v8 = vpack.c.bf16 %v3433_v35, %v3432_v5 }
 0x118   : > { %v4667_v22 = vadd.f32 %v968_v41, %v703_v19  ;;  %v724_v59 = vadd.f32 %v3723_v1, %v4478_v44  ;;  %v981_v26 = vpop.f32.mrf.mxu0  ;;  %3929 = vmatprep.mubr.msk.bf16.mxu1 %vm353_vm0, %v2312_v6  ;;  %v3434_v19 = vld [vmem:[%s4056_s29 + $0x169] sm:$0xff] }
 0x119   : > { %v715_v10 = vpop.f32.mrf.mxu1 }
 0x11a   : > { %v4676_v29 = vadd.f32 %v3757_v62, %v724_v59  ;;  %v716_v21 = vadd.f32 %v715_v10, %v4488_v46  ;;  %v3758_v34 = vpop.f32.mrf.mxu0 }
 0x11b   : > { %v3724_v37 = vpop.f32.mrf.mxu1 }
 0x11c   : > { %v4679_v44 = vadd.f32 %v981_v26, %v716_v21  ;;  %v727_v51 = vadd.f32 %v3724_v37, %v4492_v56  ;;  %v984_v33 = vpop.f32.mrf.mxu0  ;;  %v3486_v56 = vld [vmem:[%s4056_s29 + $0x172] sm:$0xff]  ;;  %v3490_v37 = vld [vmem:[%s4056_s29 + $0x1a2] sm:$0xff] }
 0x11d   : > { %v718_v13 = vpop.f32.mrf.mxu1  ;;  %v2613_v59 = vpack.c.bf16 %v3486_v56, %v3485_v53 }
 0x11e   : > { %v4682_v36 = vadd.f32 %v3758_v34, %v727_v51  ;;  %v719_v48 = vadd.f32 %v718_v13, %v4496_v4  ;;  %v3761_v46 = vpop.f32.mrf.mxu0  ;;  %3964 = vmatmul.mubr.msk.bf16.gmra.mxu0 %vm353_vm0, %v4335_v61  ;;  %v3435_v4 = vld [vmem:[%s4056_s29 + $0x171] sm:$0xff]  ;;  %v3489_v34 = vld [vmem:[%s4056_s29 + $0x19a] sm:$0xff] }
 0x11f   : > { %v3727_v15 = vpop.f32.mrf.mxu1  ;;  %3930 = vmatmul.mubr.msk.bf16.gmra.mxu1 %vm353_vm0, %v2313_v31  ;;  %3967 = vmatprep.mubr.msk.bf16.mxu0 %vm353_vm0, %v2612_v43  ;;  %v2315_v3 = vpack.c.bf16 %v3435_v4, %v3434_v19  ;;  %v3439_v51 = vld [vmem:[%s4056_s29 + $0x1a1] sm:$0xff] }
 0x120   : > { %v4691_v41 = vadd.f32 %v984_v33, %v719_v48  ;;  %v740_v6 = vadd.f32 %v3727_v15, %v4502_v7  ;;  %v997_v18 = vpop.f32.mrf.mxu0  ;;  %3933 = vmatprep.mubr.msk.bf16.mxu1 %vm353_vm0, %v2314_v8 }
 0x121   : > { %v731_v62 = vpop.f32.mrf.mxu1 }
 0x122   : > { %v4697_v1 = vadd.f32 %v3761_v46, %v740_v6  ;;  %v732_v61 = vadd.f32 %v731_v62, %v4512_v23  ;;  %v3762_v0 = vpop.f32.mrf.mxu0  ;;  %v2615_v46 = vpack.c.bf16 %v3490_v37, %v3489_v34 }
 0x123   : > { %v3728_v26 = vpop.f32.mrf.mxu1 }
 0x124   : > { %v4700_v38 = vadd.f32 %v997_v18, %v732_v61  ;;  %v743_v7 = vadd.f32 %v3728_v26, %v4516_v39  ;;  %v1000_v11 = vpop.f32.mrf.mxu0 }
 0x125   : > { %v734_v10 = vpop.f32.mrf.mxu1 }
 0x126   : > { %v4703_v5 = vadd.f32 %v3762_v0, %v743_v7  ;;  %v735_v35 = vadd.f32 %v734_v10, %v4520_v57  ;;  %v3765_v21 = vpop.f32.mrf.mxu0  ;;  %3968 = vmatmul.mubr.msk.bf16.gmra.mxu0 %vm353_vm0, %v2613_v59  ;;  %v3438_v57 = vld [vmem:[%s4056_s29 + $0x199] sm:$0xff]  ;;  %s5014_s29 = scalar_lea.vmem %s5248_s5, %s3514_s17 }
 0x127   : > { %v3731_v23 = vpop.f32.mrf.mxu1  ;;  %3934 = vmatmul.mubr.msk.bf16.gmra.mxu1 %vm353_vm0, %v2315_v3  ;;  %3971 = vmatprep.mubr.msk.bf16.mxu0 %vm353_vm0, %v4545_v50  ;;  %v2317_v15 = vpack.c.bf16 %v3439_v51, %v3438_v57 }
 0x128   : > { %v4712_v39 = vadd.f32 %v1000_v11, %v735_v35  ;;  %v756_v31 = vadd.f32 %v3731_v23, %v4526_v14  ;;  %v1013_v43 = vpop.f32.mrf.mxu0  ;;  %3937 = vmatprep.mubr.msk.bf16.mxu1 %vm353_vm0, %v4435_v32 }
 0x129   : > { %v747_v33 = vpop.f32.mrf.mxu1 }
 0x12a   : > { %v4719_v8 = vadd.f32 %v3765_v21, %v756_v31  ;;  %v748_v13 = vadd.f32 %v747_v33, %v4539_v42  ;;  %v3766_v48 = vpop.f32.mrf.mxu0 }
 0x12b   : > { %v3732_v50 = vpop.f32.mrf.mxu1 }
 0x12c   : > { %v4722_v53 = vadd.f32 %v1013_v43, %v748_v13  ;;  %v759_v56 = vadd.f32 %v3732_v50, %v4543_v49  ;;  %v1016_v14 = vpop.f32.mrf.mxu0 }
 0x12d   : > { %v750_v6 = vpop.f32.mrf.mxu1 }
 0x12e   : > { %v4725_v18 = vadd.f32 %v3766_v48, %v759_v56  ;;  %v751_v32 = vadd.f32 %v750_v6, %v4549_v52  ;;  %v3769_v19 = vpop.f32.mrf.mxu0  ;;  %3972 = vmatmul.mubr.msk.bf16.gmra.mxu0 %vm353_vm0, %v2615_v46 }
 0x12f   : > { %v3735_v4 = vpop.f32.mrf.mxu1  ;;  %3938 = vmatmul.mubr.msk.bf16.gmra.mxu1 %vm353_vm0, %v2317_v15 }
 0x130   : > { %v4730_v42 = vadd.f32 %v1016_v14, %v751_v32  ;;  %v772_v62 = vadd.f32 %v3735_v4, %v4554_v60  ;;  %v1029_v61 = vpop.f32.mrf.mxu0 }
 0x131   : > { %v763_v0 = vpop.f32.mrf.mxu1 }
 0x132   : > { %v4733_v59 = vadd.f32 %v3769_v19, %v772_v62  ;;  %v764_v49 = vadd.f32 %v763_v0, %v4564_v63  ;;  %v3770_v26 = vpop.f32.mrf.mxu0 }
 0x133   : > { %v3736_v3 = vpop.f32.mrf.mxu1 }
 0x134   : > { %v4736_v7 = vadd.f32 %v1029_v61, %v764_v49  ;;  %v775_v52 = vadd.f32 %v3736_v3, %v4568_v2  ;;  %v1032_v11 = vpop.f32.mrf.mxu0 }
 0x135   : > { %v766_v10 = vpop.f32.mrf.mxu1 }
 0x136   : > { %v4739_v35 = vadd.f32 %v3770_v26, %v775_v52  ;;  %v767_v21 = vadd.f32 %v766_v10, %v4572_v9  ;;  %v3809_v23 = vpop.f32.mrf.mxu0 }
 0x137   : > { %v3775_v60 = vpop.f32.mrf.mxu1 }
 0x138   : > { %v4742_v34 = vadd.f32 %v1032_v11, %v767_v21  ;;  %v1345_v37 = vadd.f32 %v3775_v60, %v4586_v16  ;;  %v1514_v31 = vpop.f32.mrf.mxu0 }
 0x139   : > { %v1216_v63 = vpop.f32.mrf.mxu1 }
 0x13a   : > { %v4745_v43 = vadd.f32 %v3809_v23, %v1345_v37  ;;  %v1343_v57 = vadd.f32 %v1216_v63, %v4589_v17  ;;  %v3810_v51 = vpop.f32.mrf.mxu0 }
 0x13b   : > { %v3776_v2 = vpop.f32.mrf.mxu1 }
 0x13c   : > { %v4748_v33 = vadd.f32 %v1514_v31, %v1343_v57  ;;  %v1346_v13 = vadd.f32 %v3776_v2, %v4592_v30  ;;  %v1517_v48 = vpop.f32.mrf.mxu0 }
 0x13d   : > { %v1219_v9 = vpop.f32.mrf.mxu1 }
 0x13e   : > { %v4751_v46 = vadd.f32 %v3810_v51, %v1346_v13  ;;  %v1344_v50 = vadd.f32 %v1219_v9, %v4600_v55  ;;  %v3813_v15 = vpop.f32.mrf.mxu0 }
 0x13f   : > { %v3779_v16 = vpop.f32.mrf.mxu1 }
 0x140   : > { %v4754_v56 = vadd.f32 %v1517_v48, %v1344_v50  ;;  %v1349_v14 = vadd.f32 %v3779_v16, %v4608_v27  ;;  %v1530_v6 = vpop.f32.mrf.mxu0 }
 0x141   : > { %v1232_v17 = vpop.f32.mrf.mxu1 }
 0x142   : > { %v4757_v32 = vadd.f32 %v3813_v15, %v1349_v14  ;;  %v1347_v19 = vadd.f32 %v1232_v17, %v4611_v40  ;;  %v3814_v4 = vpop.f32.mrf.mxu0 }
 0x143   : > { %v3780_v30 = vpop.f32.mrf.mxu1 }
 0x144   : > { %v4760_v62 = vadd.f32 %v1530_v6, %v1347_v19  ;;  %v1350_v61 = vadd.f32 %v3780_v30, %v4614_v24  ;;  %v1533_v0 = vpop.f32.mrf.mxu0 }
 0x145   : > { %v1235_v55 = vpop.f32.mrf.mxu1 }
 0x146   : > { %v4763_v49 = vadd.f32 %v3814_v4, %v1350_v61  ;;  %v1348_v26 = vadd.f32 %v1235_v55, %v4622_v25  ;;  %v3817_v3 = vpop.f32.mrf.mxu0 }
 0x147   : > { %v3783_v27 = vpop.f32.mrf.mxu1 }
 0x148   : > { %v4766_v52 = vadd.f32 %v1533_v0, %v1348_v26  ;;  %v1353_v11 = vadd.f32 %v3783_v27, %v4630_v20  ;;  %v1546_v10 = vpop.f32.mrf.mxu0 }
 0x149   : > { %v1248_v40 = vpop.f32.mrf.mxu1 }
 0x14a   : > { %v4769_v21 = vadd.f32 %v3817_v3, %v1353_v11  ;;  %v1351_v23 = vadd.f32 %v1248_v40, %v4633_v58  ;;  %v3818_v60 = vpop.f32.mrf.mxu0 }
 0x14b   : > { %v3784_v24 = vpop.f32.mrf.mxu1 }
 0x14c   : > { %v4772_v37 = vadd.f32 %v1546_v10, %v1351_v23  ;;  %v1354_v31 = vadd.f32 %v3784_v24, %v4636_v12  ;;  %v1549_v63 = vpop.f32.mrf.mxu0 }
 0x14d   : > { %v1251_v25 = vpop.f32.mrf.mxu1 }
 0x14e   : > { %v4775_v57 = vadd.f32 %v3818_v60, %v1354_v31  ;;  %v1352_v51 = vadd.f32 %v1251_v25, %v4644_v47  ;;  %v3821_v2 = vpop.f32.mrf.mxu0 }
 0x14f   : > { %v3787_v20 = vpop.f32.mrf.mxu1 }
 0x150   : > { %v4778_v13 = vadd.f32 %v1549_v63, %v1352_v51  ;;  %v1357_v48 = vadd.f32 %v3787_v20, %v4652_v28  ;;  %v1562_v9 = vpop.f32.mrf.mxu0 }
 0x151   : > { %v1264_v58 = vpop.f32.mrf.mxu1 }
 0x152   : > { %v4781_v50 = vadd.f32 %v3821_v2, %v1357_v48  ;;  %v1355_v15 = vadd.f32 %v1264_v58, %v4655_v45  ;;  %v3822_v16 = vpop.f32.mrf.mxu0 }
 0x153   : > { %v3788_v12 = vpop.f32.mrf.mxu1 }
 0x154   : > { %v4784_v14 = vadd.f32 %v1562_v9, %v1355_v15  ;;  %v1358_v6 = vadd.f32 %v3788_v12, %v4658_v54  ;;  %v1565_v17 = vpop.f32.mrf.mxu0 }
 0x155   : > { %v1267_v47 = vpop.f32.mrf.mxu1 }
 0x156   : > { %v4787_v19 = vadd.f32 %v3822_v16, %v1358_v6  ;;  %v1356_v4 = vadd.f32 %v1267_v47, %v4667_v22  ;;  %v3825_v30 = vpop.f32.mrf.mxu0 }
 0x157   : > { %v3791_v28 = vpop.f32.mrf.mxu1 }
 0x158   : > { %v4790_v61 = vadd.f32 %v1565_v17, %v1356_v4  ;;  %v1361_v0 = vadd.f32 %v3791_v28, %v4676_v29  ;;  %v1578_v55 = vpop.f32.mrf.mxu0 }
 0x159   : > { %v1280_v45 = vpop.f32.mrf.mxu1 }
 0x15a   : > { %v4793_v26 = vadd.f32 %v3825_v30, %v1361_v0  ;;  %v1359_v3 = vadd.f32 %v1280_v45, %v4679_v44  ;;  %v3826_v27 = vpop.f32.mrf.mxu0 }
 0x15b   : > { %v3792_v54 = vpop.f32.mrf.mxu1 }
 0x15c   : > { %v4796_v11 = vadd.f32 %v1578_v55, %v1359_v3  ;;  %v1362_v10 = vadd.f32 %v3792_v54, %v4682_v36  ;;  %v1581_v40 = vpop.f32.mrf.mxu0 }
 0x15d   : > { %v1283_v22 = vpop.f32.mrf.mxu1 }
 0x15e   : > { %v4799_v23 = vadd.f32 %v3826_v27, %v1362_v10  ;;  %v1360_v60 = vadd.f32 %v1283_v22, %v4691_v41  ;;  %v3829_v24 = vpop.f32.mrf.mxu0 }
 0x15f   : > { %v3795_v29 = vpop.f32.mrf.mxu1 }
 0x160   : > { %5249 = vst [vmem:[#allocation2_spill] sm:$0xff] %v4799_v23  ;;  %v4802_v31 = vadd.f32 %v1581_v40, %v1360_v60  ;;  %v1365_v63 = vadd.f32 %v3795_v29, %v4697_v1  ;;  %v1594_v25 = vpop.f32.mrf.mxu0 }
 0x161   : > { %v1296_v44 = vpop.f32.mrf.mxu1 }
 0x162   : > { %5250 = vst [vmem:[#allocation3_spill] sm:$0xff] %v4802_v31  ;;  %v4805_v51 = vadd.f32 %v3829_v24, %v1365_v63  ;;  %v1363_v2 = vadd.f32 %v1296_v44, %v4700_v38  ;;  %v3830_v20 = vpop.f32.mrf.mxu0 }
 0x163   : > { %v3796_v36 = vpop.f32.mrf.mxu1 }
 0x164   : > { %5251 = vst [vmem:[#allocation4_spill] sm:$0xff] %v4805_v51  ;;  %v4808_v48 = vadd.f32 %v1594_v25, %v1363_v2  ;;  %v1366_v9 = vadd.f32 %v3796_v36, %v4703_v5  ;;  %v1597_v58 = vpop.f32.mrf.mxu0 }
 0x165   : > { %v1299_v41 = vpop.f32.mrf.mxu1 }
 0x166   : > { %5252 = vst [vmem:[#allocation5_spill] sm:$0xff] %v4808_v48  ;;  %v4811_v15 = vadd.f32 %v3830_v20, %v1366_v9  ;;  %v1364_v16 = vadd.f32 %v1299_v41, %v4712_v39  ;;  %v3833_v12 = vpop.f32.mrf.mxu0 }
 0x167   : > { %v3799_v1 = vpop.f32.mrf.mxu1 }
 0x168   : > { %5253 = vst [vmem:[#allocation6_spill] sm:$0xff] %v4811_v15  ;;  %v4814_v6 = vadd.f32 %v1597_v58, %v1364_v16  ;;  %v1369_v17 = vadd.f32 %v3799_v1, %v4719_v8  ;;  %v1610_v47 = vpop.f32.mrf.mxu0 }
 0x169   : > { %v1312_v38 = vpop.f32.mrf.mxu1 }
 0x16a   : > { %5254 = vst [vmem:[#allocation7_spill] sm:$0xff] %v4814_v6  ;;  %v4817_v4 = vadd.f32 %v3833_v12, %v1369_v17  ;;  %v1367_v30 = vadd.f32 %v1312_v38, %v4722_v53  ;;  %v3834_v28 = vpop.f32.mrf.mxu0 }
 0x16b   : > { %v3800_v5 = vpop.f32.mrf.mxu1 }
 0x16c   : > { %5255 = vst [vmem:[#allocation8_spill] sm:$0xff] %v4817_v4  ;;  %v4820_v0 = vadd.f32 %v1610_v47, %v1367_v30  ;;  %v1370_v55 = vadd.f32 %v3800_v5, %v4725_v18  ;;  %v1613_v45 = vpop.f32.mrf.mxu0 }
 0x16d   : > { %v1315_v39 = vpop.f32.mrf.mxu1 }
 0x16e   : > { %5256 = vst [vmem:[#allocation9_spill] sm:$0xff] %v4820_v0  ;;  %v4823_v3 = vadd.f32 %v3834_v28, %v1370_v55  ;;  %v1368_v27 = vadd.f32 %v1315_v39, %v4730_v42  ;;  %v3837_v54 = vpop.f32.mrf.mxu0 }
 0x16f   : > { %v3803_v8 = vpop.f32.mrf.mxu1 }
 0x170   : > { %5257 = vst [vmem:[#allocation10_spill] sm:$0xff] %v4823_v3  ;;  %v4826_v10 = vadd.f32 %v1613_v45, %v1368_v27  ;;  %v1373_v40 = vadd.f32 %v3803_v8, %v4733_v59  ;;  %v1626_v22 = vpop.f32.mrf.mxu0 }
 0x171   : > { %v1328_v53 = vpop.f32.mrf.mxu1 }
 0x172   : > { %5258 = vst [vmem:[#allocation11_spill] sm:$0xff] %v4826_v10  ;;  %v4829_v60 = vadd.f32 %v3837_v54, %v1373_v40  ;;  %v1371_v24 = vadd.f32 %v1328_v53, %v4736_v7  ;;  %v3838_v29 = vpop.f32.mrf.mxu0 }
 0x173   : > { %v3804_v18 = vpop.f32.mrf.mxu1 }
 0x174   : > { %5259 = vst [vmem:[#allocation12_spill] sm:$0xff] %v4829_v60  ;;  %v4832_v63 = vadd.f32 %v1626_v22, %v1371_v24  ;;  %v1374_v25 = vadd.f32 %v3804_v18, %v4739_v35  ;;  %v1629_v44 = vpop.f32.mrf.mxu0 }
 0x175   : > { %v1331_v42 = vpop.f32.mrf.mxu1 }
 0x176   : > { %5260 = vst [vmem:[#allocation13_spill] sm:$0xff] %v4832_v63  ;;  %v4835_v2 = vadd.f32 %v3838_v29, %v1374_v25  ;;  %v1372_v20 = vadd.f32 %v1331_v42, %v4742_v34  ;;  %v4838_v36 = vpop.f32.mrf.mxu0 }
 0x177   : > { %v3843_v59 = vpop.f32.mrf.mxu1 }
 0x178   : > { %5261 = vst [vmem:[#allocation14_spill] sm:$0xff] %v4835_v2  ;;  %v4840_v9 = vadd.f32 %v1629_v44, %v1372_v20  ;;  %v4842_v58 = vpop.f32.mrf.mxu0 }
 0x179   : > { %v1812_v7 = vpop.f32.mrf.mxu1 }
 0x17a   : > { %5262 = vst [vmem:[#allocation15_spill] sm:$0xff] %v4840_v9  ;;  %v4844_v41 = vpop.f32.mrf.mxu0 }
 0x17b   : > { %v3844_v16 = vpop.f32.mrf.mxu1 }
 0x17c   : > { %v4846_v12 = vpop.f32.mrf.mxu0 }
 0x17d   : > { %v4848_v35 = vpop.f32.mrf.mxu1 }
 0x17e   : > { %v4850_v1 = vpop.f32.mrf.mxu0 }
 0x17f   : > { %v4852_v17 = vpop.f32.mrf.mxu1 }
 0x180   : > { %v4854_v34 = vpop.f32.mrf.mxu0 }
 0x181   : > { %v4856_v47 = vpop.f32.mrf.mxu1 }
 0x182   : > { %v4858_v38 = vpop.f32.mrf.mxu0 }
 0x183   : > { %v4860_v30 = vpop.f32.mrf.mxu1 }
 0x184   : > { %v4862_v28 = vpop.f32.mrf.mxu0 }
 0x185   : > { %v4864_v5 = vpop.f32.mrf.mxu1 }
 0x186   : > { %v4866_v55 = vpop.f32.mrf.mxu0 }
 0x187   : > { %v4868_v45 = vpop.f32.mrf.mxu1 }
 0x188   : > { %v4870_v39 = vpop.f32.mrf.mxu0 }
 0x189   : > { %v4872_v27 = vpop.f32.mrf.mxu1 }
 0x18a   : > { %v4874_v54 = vpop.f32.mrf.mxu0 }
 0x18b   : > { %v4876_v8 = vpop.f32.mrf.mxu1 }
 0x18c   : > { %v4878_v40 = vpop.f32.mrf.mxu0 }
 0x18d   : > { %v4880_v22 = vpop.f32.mrf.mxu1 }
 0x18e   : > { %v4882_v53 = vpop.f32.mrf.mxu0 }
 0x18f   : > { %v4884_v24 = vpop.f32.mrf.mxu1 }
 0x190   : > { %v4886_v29 = vpop.f32.mrf.mxu0 }
 0x191   : > { %v4888_v18 = vpop.f32.mrf.mxu1 }
 0x192   : > { %v4890_v25 = vpop.f32.mrf.mxu0 }
 0x193   : > { %v4892_v44 = vpop.f32.mrf.mxu1 }
 0x194   : > { %v4894_v42 = vpop.f32.mrf.mxu0 }
 0x195   : > { %v4896_v20 = vpop.f32.mrf.mxu1 }
 0x196   : > { %v4898_v9 = vpop.f32.mrf.mxu0 }
 0x197   : > { %v4900_v2 = vpop.f32.mrf.mxu1 }
 0x198   : > { %v4902_v63 = vpop.f32.mrf.mxu0 }
 0x199   : > { %5263 = vst [vmem:[#allocation16_spill] sm:$0xff] %v4902_v63  ;;  %v4904_v60 = vpop.f32.mrf.mxu1 }
 0x19a   : > { %v4906_v10 = vpop.f32.mrf.mxu0 }
 0x19b   : > { %5264 = vst [vmem:[#allocation17_spill] sm:$0xff] %v4906_v10  ;;  %v4908_v3 = vpop.f32.mrf.mxu1 }
 0x19c   : > { %5265 = vst [vmem:[#allocation18_spill] sm:$0xff] %v4908_v3  ;;  %v4910_v0 = vpop.f32.mrf.mxu0 }
 0x19d   : > { %5266 = vst [vmem:[#allocation19_spill] sm:$0xff] %v4910_v0  ;;  %v4912_v4 = vpop.f32.mrf.mxu1 }
 0x19e   : > { %5267 = vst [vmem:[#allocation20_spill] sm:$0xff] %v4912_v4  ;;  %v4914_v6 = vpop.f32.mrf.mxu0 }
 0x19f   : > { %5268 = vst [vmem:[#allocation21_spill] sm:$0xff] %v4914_v6  ;;  %v4916_v15 = vpop.f32.mrf.mxu1 }
 0x1a0   : > { %5269 = vst [vmem:[#allocation22_spill] sm:$0xff] %v4916_v15  ;;  %v4918_v48 = vpop.f32.mrf.mxu0 }
 0x1a1   : > { %5270 = vst [vmem:[#allocation23_spill] sm:$0xff] %v4918_v48  ;;  %v4920_v51 = vpop.f32.mrf.mxu1 }
 0x1a2   : > { %5271 = vst [vmem:[#allocation24_spill] sm:$0xff] %v4920_v51  ;;  %v4922_v31 = vpop.f32.mrf.mxu0 }
 0x1a3   : > { %5272 = vst [vmem:[#allocation25_spill] sm:$0xff] %v4922_v31  ;;  %v4924_v63 = vpop.f32.mrf.mxu1 }
 0x1a4   : > { %5273 = vst [vmem:[#allocation26_spill] sm:$0xff] %v4924_v63  ;;  %v4926_v23 = vpop.f32.mrf.mxu0 }
 0x1a5   : > { %5274 = vst [vmem:[#allocation27_spill] sm:$0xff] %v4926_v23  ;;  %v4928_v10 = vpop.f32.mrf.mxu1 }
 0x1a6   : > { %5275 = vst [vmem:[#allocation28_spill] sm:$0xff] %v4928_v10  ;;  %v4930_v3 = vpop.f32.mrf.mxu0 }
 0x1a7   : > { %5276 = vst [vmem:[#allocation29_spill] sm:$0xff] %v4930_v3  ;;  %v4932_v0 = vpop.f32.mrf.mxu1 }
 0x1a8   : > { %5277 = vst [vmem:[#allocation30_spill] sm:$0xff] %v4932_v0  ;;  %v4934_v4 = vpop.f32.mrf.mxu0 }
 0x1a9   : > { %5278 = vst [vmem:[#allocation31_spill] sm:$0xff] %v4934_v4  ;;  %v4936_v6 = vpop.f32.mrf.mxu1  ;;  %v1941_v4 = vadd.f32 %v3843_v59, %v4745_v43  ;;  %v1940_v59 = vadd.f32 %v4848_v35, %v4754_v56 }
 0x1aa   : > { %5279 = vst [vmem:[#allocation32_spill] sm:$0xff] %v4936_v6  ;;  %v4938_v15 = vpop.f32.mrf.mxu0 }
 0x1ab   : > { %5280 = vst [vmem:[#allocation33_spill] sm:$0xff] %v4938_v15  ;;  %v4940_v48 = vpop.f32.mrf.mxu1 }
 0x1ac   : > { %5281 = vst [vmem:[#allocation34_spill] sm:$0xff] %v4940_v48  ;;  %v4942_v51 = vpop.f32.mrf.mxu0 }
 0x1ad   : > { %5282 = vst [vmem:[#allocation35_spill] sm:$0xff] %v4942_v51  ;;  %v4944_v31 = vpop.f32.mrf.mxu1  ;;  %v1939_v51 = vadd.f32 %v1812_v7, %v4748_v33  ;;  %v4973_v33 = vld [vmem:[%s5245_s2] ss:$0 sm:$0xff] }
 0x1ae   : > { %5283 = vst [vmem:[#allocation36_spill] sm:$0xff] %v4944_v31  ;;  %v4946_v23 = vpop.f32.mrf.mxu0 }
 0x1af   : > { %5284 = vst [vmem:[#allocation37_spill] sm:$0xff] %v4946_v23  ;;  %v4948_v10 = vpop.f32.mrf.mxu1  ;;  %v2240_v23 = vadd.f32 %v4838_v36, %v1941_v4  ;;  %v2238_v43 = vadd.f32 %v4842_v58, %v1939_v51 }
 0x1b0   : > { %5285 = vst [vmem:[#allocation38_spill] sm:$0xff] %v4948_v10  ;;  %v4950_v3 = vpop.f32.mrf.mxu0  ;;  %v1942_v10 = vadd.f32 %v3844_v16, %v4751_v46 }
 0x1b1   : > { %5286 = vst [vmem:[#allocation39_spill] sm:$0xff] %v4950_v3  ;;  %v4952_v0 = vpop.f32.mrf.mxu1 }
 0x1b2   : > { %v4955_v6 = vpop.f32.mrf.mxu0  ;;  %v2241_v4 = vadd.f32 %v4844_v41, %v1942_v10  ;;  %v2239_v10 = vadd.f32 %v4846_v12, %v1940_v59 }
 0x1b3   : > { %5287 = vst [vmem:[#allocation40_spill] sm:$0xff] %v4955_v6  ;;  %v4957_v15 = vpop.f32.mrf.mxu1 }
 0x1b4   : > { %5288 = vst [vmem:[#allocation41_spill] sm:$0xff] %v4957_v15  ;;  %v4960_v48 = vpop.f32.mrf.mxu0 }
 0x1b5   : > { %v4962_v31 = vpop.f32.mrf.mxu1 }
 0x1b6   : > { %v3945_v3 = vpop.f32.mrf.mxu0 }
 0x1b7   : > { %v3911_v63 = vpop.f32.mrf.mxu1 }
 0x1b8   : > { %v2538_v6 = vadd.f32 %v3911_v63, %v2240_v23  ;;  %v2707_v15 = vpop.f32.mrf.mxu0  ;;  %v1945_v23 = vadd.f32 %v4852_v17, %v4757_v32  ;;  %v4988_v63 = vld [vmem:[%s5246_s3] ss:$0 sm:$0xff]  ;;  %v1946_v32 = vadd.f32 %v4860_v30, %v4763_v49 }
 0x1b9   : > { %v2409_v7 = vpop.f32.mrf.mxu1 }
 0x1ba   : > { %v2836_v46 = vadd.f32 %v3945_v3, %v2538_v6  ;;  %v2536_v51 = vadd.f32 %v2409_v7, %v2238_v43  ;;  %v3946_v56 = vpop.f32.mrf.mxu0  ;;  %v1943_v6 = vadd.f32 %v4856_v47, %v4760_v62  ;;  %v2946_v3 = vld [vmem:[%s4981_s24 + $0x10] sm:$0xff]  ;;  %v2944_v62 = vld [vmem:[%s4981_s24] sm:$0xff] }
 0x1bb   : > { %v3912_v36 = vpop.f32.mrf.mxu1 }
 0x1bc   : > { %v2875_v58 = vmul.f32 %v4973_v33, %v2836_v46  ;;  %v2834_v41 = vadd.f32 %v2707_v15, %v2536_v51  ;;  %v2539_v16 = vadd.f32 %v3912_v36, %v2241_v4  ;;  %v2710_v35 = vpop.f32.mrf.mxu0  ;;  %v2244_v15 = vadd.f32 %v4850_v1, %v1945_v23 }
 0x1bd   : > { %v2412_v17 = vpop.f32.mrf.mxu1  ;;  %v1944_v4 = vadd.f32 %v4864_v5, %v4766_v52  ;;  %v1949_v1 = vadd.f32 %v4868_v45, %v4769_v21  ;;  %v2947_v52 = vld [vmem:[%s4981_s24 + $0x18] sm:$0xff]  ;;  %v1947_v21 = vadd.f32 %v4872_v27, %v4772_v37  ;;  %v2945_v45 = vld [vmem:[%s4981_s24 + $0x8] sm:$0xff] }
 0x1be   : > { %v2914_v43 = vadd.f32 %v4988_v63, %v2875_v58  ;;  %v2873_v7 = vmul.f32 %v4973_v33, %v2834_v41  ;;  %v2837_v12 = vadd.f32 %v3946_v56, %v2539_v16  ;;  %v2537_v59 = vadd.f32 %v2412_v17, %v2239_v10  ;;  %v3949_v46 = vpop.f32.mrf.mxu0 }
 0x1bf   : > { %v3915_v47 = vpop.f32.mrf.mxu1  ;;  %v2242_v56 = vadd.f32 %v4854_v34, %v1943_v6  ;;  %v2245_v10 = vadd.f32 %v4858_v38, %v1946_v32  ;;  %v2243_v6 = vadd.f32 %v4862_v28, %v1944_v4  ;;  %v1950_v28 = vadd.f32 %v4876_v8, %v4775_v57 }
 0x1c0   : > { %v2978_v51 = vadd.f32 %v2946_v3, %v2914_v43  ;;  %v2912_v49 = vadd.f32 %v4988_v63, %v2873_v7  ;;  %v2876_v30 = vmul.f32 %v4973_v33, %v2837_v12  ;;  %v2835_v36 = vadd.f32 %v2710_v35, %v2537_v59  ;;  %v2723_v58 = vpop.f32.mrf.mxu0 }
 0x1c1   : > { %v2542_v5 = vadd.f32 %v3915_v47, %v2244_v15  ;;  %v2425_v23 = vpop.f32.mrf.mxu1  ;;  %v1948_v57 = vadd.f32 %v4880_v22, %v4778_v13  ;;  %v1953_v13 = vadd.f32 %v4884_v24, %v4781_v50  ;;  %v1951_v50 = vadd.f32 %v4888_v18, %v4784_v14  ;;  %v2954_v18 = vld [vmem:[%s4981_s24 + $0x50] sm:$0xff] }
 0x1c2   : > { %v3010_v41 = vmax.f32 %v2978_v51, 0.0  ;;  %v2976_v16 = vadd.f32 %v2944_v62, %v2912_v49  ;;  %v2915_v35 = vadd.f32 %v4988_v63, %v2876_v30  ;;  %v2874_v34 = vmul.f32 %v4973_v33, %v2835_v36  ;;  %v3950_v38 = vpop.f32.mrf.mxu0  ;;  %v2950_v51 = vld [vmem:[%s4981_s24 + $0x30] sm:$0xff] }
 0x1c3   : > { %v2840_v32 = vadd.f32 %v3949_v46, %v2542_v5  ;;  %v2540_v3 = vadd.f32 %v2425_v23, %v2242_v56  ;;  %v3916_v17 = vpop.f32.mrf.mxu1  ;;  %v2248_v62 = vadd.f32 %v4866_v55, %v1949_v1  ;;  %v2246_v56 = vadd.f32 %v4870_v39, %v1947_v21  ;;  %v2948_v1 = vld [vmem:[%s4981_s24 + $0x20] sm:$0xff] }
 0x1c4   : > { %3042 = vst.msk [vmem:[%s5014_s29 + $0x10] sm:$0xff] %vm353_vm0, %v3010_v41  ;;  %v3008_v43 = vmax.f32 %v2976_v16, 0.0  ;;  %v2979_v7 = vadd.f32 %v2947_v52, %v2915_v35  ;;  %v2913_v12 = vadd.f32 %v4988_v63, %v2874_v34  ;;  %v2543_v59 = vadd.f32 %v3916_v17, %v2245_v10  ;;  %v2726_v15 = vpop.f32.mrf.mxu0  ;;  %v2951_v35 = vld [vmem:[%s4981_s24 + $0x38] sm:$0xff]  ;;  %v2949_v17 = vld [vmem:[%s4981_s24 + $0x28] sm:$0xff] }
 0x1c5   : > { %v2879_v37 = vmul.f32 %v4973_v33, %v2840_v32  ;;  %v2838_v27 = vadd.f32 %v2723_v58, %v2540_v3  ;;  %v2428_v46 = vpop.f32.mrf.mxu1  ;;  %v2249_v39 = vadd.f32 %v4874_v54, %v1950_v28  ;;  %v2247_v54 = vadd.f32 %v4878_v40, %v1948_v57 }
 0x1c6   : > { %3040 = vst.msk [vmem:[%s5014_s29] sm:$0xff] %vm353_vm0, %v3008_v43  ;;  %v3011_v4 = vmax.f32 %v2979_v7, 0.0  ;;  %v2977_v47 = vadd.f32 %v2945_v45, %v2913_v12  ;;  %v2841_v49 = vadd.f32 %v3950_v38, %v2543_v59  ;;  %v2541_v30 = vadd.f32 %v2428_v46, %v2243_v6  ;;  %v3953_v36 = vpop.f32.mrf.mxu0 }
 0x1c7   : > { %v2918_v55 = vadd.f32 %v4988_v63, %v2879_v37  ;;  %v2877_v8 = vmul.f32 %v4973_v33, %v2838_v27  ;;  %v3919_v58 = vpop.f32.mrf.mxu1  ;;  %v2252_v28 = vadd.f32 %v4882_v53, %v1953_v13  ;;  %v1954_v40 = vadd.f32 %v4892_v44, %v4787_v19  ;;  %v2952_v19 = vld [vmem:[%s4981_s24 + $0x40] sm:$0xff] }
 0x1c8   : > { %3043 = vst.msk [vmem:[%s5014_s29 + $0x18] sm:$0xff] %vm353_vm0, %v3011_v4  ;;  %v3009_v10 = vmax.f32 %v2977_v47, 0.0  ;;  %v2880_v52 = vmul.f32 %v4973_v33, %v2841_v49  ;;  %v2839_v5 = vadd.f32 %v2726_v15, %v2541_v30  ;;  %v2546_v23 = vadd.f32 %v3919_v58, %v2248_v62  ;;  %v2739_v41 = vpop.f32.mrf.mxu0 }
 0x1c9   : > { %v2982_v22 = vadd.f32 %v2950_v51, %v2918_v55  ;;  %v2916_v16 = vadd.f32 %v4988_v63, %v2877_v8  ;;  %v2441_v34 = vpop.f32.mrf.mxu1  ;;  %v2250_v30 = vadd.f32 %v4886_v29, %v1951_v50  ;;  %v1952_v53 = vadd.f32 %v4896_v20, %v4790_v61  ;;  %v5290_v50 = vld [vmem:[#allocation18_spill] sm:$0xff] }
 0x1ca   : > { %3041 = vst.msk [vmem:[%s5014_s29 + $0x8] sm:$0xff] %vm353_vm0, %v3009_v10  ;;  %v2919_v38 = vadd.f32 %v4988_v63, %v2880_v52  ;;  %v2878_v6 = vmul.f32 %v4973_v33, %v2839_v5  ;;  %v2844_v21 = vadd.f32 %v3953_v36, %v2546_v23  ;;  %v2544_v45 = vadd.f32 %v2441_v34, %v2246_v56  ;;  %v3954_v32 = vpop.f32.mrf.mxu0 }
 0x1cb   : > { %v3014_v24 = vmax.f32 %v2982_v22, 0.0  ;;  %v2980_v3 = vadd.f32 %v2948_v1, %v2916_v16  ;;  %v3920_v43 = vpop.f32.mrf.mxu1  ;;  %v2253_v29 = vadd.f32 %v4890_v25, %v1954_v40  ;;  %v1957_v61 = vadd.f32 %v4900_v2, %v4793_v26  ;;  %v5293_v40 = vld [vmem:[#allocation20_spill] sm:$0xff] }
 0x1cc   : > { %v2983_v7 = vadd.f32 %v2951_v35, %v2919_v38  ;;  %v2917_v12 = vadd.f32 %v4988_v63, %v2878_v6  ;;  %v2883_v59 = vmul.f32 %v4973_v33, %v2844_v21  ;;  %v2842_v15 = vadd.f32 %v2739_v41, %v2544_v45  ;;  %v2742_v62 = vpop.f32.mrf.mxu0  ;;  %v2955_v41 = vld [vmem:[%s4981_s24 + $0x58] sm:$0xff]  ;;  %v2953_v38 = vld [vmem:[%s4981_s24 + $0x48] sm:$0xff] }
 0x1cd   : > { %3046 = vst.msk [vmem:[%s5014_s29 + $0x30] sm:$0xff] %vm353_vm0, %v3014_v24  ;;  %v3012_v14 = vmax.f32 %v2980_v3, 0.0  ;;  %v2547_v37 = vadd.f32 %v3920_v43, %v2249_v39  ;;  %v2444_v27 = vpop.f32.mrf.mxu1  ;;  %v2251_v16 = vadd.f32 %v4894_v42, %v1952_v53  ;;  %v1955_v26 = vadd.f32 %v4904_v60, %v4796_v11  ;;  %v2958_v3 = vld [vmem:[%s4981_s24 + $0x70] sm:$0xff]  ;;  %v5294_v53 = vld [vmem:[#allocation17_spill] sm:$0xff] }
 0x1ce   : > { %v3015_v46 = vmax.f32 %v2983_v7, 0.0  ;;  %v2981_v4 = vadd.f32 %v2949_v17, %v2917_v12  ;;  %v2922_v47 = vadd.f32 %v4988_v63, %v2883_v59  ;;  %v2881_v51 = vmul.f32 %v4973_v33, %v2842_v15  ;;  %v3957_v49 = vpop.f32.mrf.mxu0 }
 0x1cf   : > { %3044 = vst.msk [vmem:[%s5014_s29 + $0x20] sm:$0xff] %vm353_vm0, %v3012_v14  ;;  %v2845_v44 = vadd.f32 %v3954_v32, %v2547_v37  ;;  %v2545_v36 = vadd.f32 %v2444_v27, %v2247_v54  ;;  %v3923_v56 = vpop.f32.mrf.mxu1  ;;  %v2256_v42 = vadd.f32 %v4898_v9, %v1957_v61  ;;  %v5289_v54 = vld [vmem:[#allocation2_spill] sm:$0xff]  ;;  %v5291_v9 = vld [vmem:[#allocation16_spill] sm:$0xff] }
 0x1d0   : > { %3047 = vst.msk [vmem:[%s5014_s29 + $0x38] sm:$0xff] %vm353_vm0, %v3015_v46  ;;  %v3013_v57 = vmax.f32 %v2981_v4, 0.0  ;;  %v2986_v55 = vadd.f32 %v2954_v18, %v2922_v47  ;;  %v2920_v8 = vadd.f32 %v4988_v63, %v2881_v51  ;;  %v2550_v58 = vadd.f32 %v3923_v56, %v2252_v28  ;;  %v2755_v10 = vpop.f32.mrf.mxu0  ;;  %v5292_v28 = vld [vmem:[#allocation3_spill] sm:$0xff]  ;;  %v2956_v27 = vld [vmem:[%s4981_s24 + $0x60] sm:$0xff] }
 0x1d1   : > { %v2884_v20 = vmul.f32 %v4973_v33, %v2845_v44  ;;  %v2843_v1 = vadd.f32 %v2742_v62, %v2545_v36  ;;  %v2457_v52 = vpop.f32.mrf.mxu1  ;;  %v1958_v11 = vadd.f32 %v5290_v50, %v5289_v54  ;;  %v2254_v62 = vadd.f32 %v5291_v9, %v1955_v26  ;;  %v5295_v44 = vld [vmem:[#allocation4_spill] sm:$0xff]  ;;  %v5296_v36 = vld [vmem:[#allocation22_spill] sm:$0xff] }
 0x1d2   : > { %3045 = vst.msk [vmem:[%s5014_s29 + $0x28] sm:$0xff] %vm353_vm0, %v3013_v57  ;;  %v3018_v5 = vmax.f32 %v2986_v55, 0.0  ;;  %v2984_v23 = vadd.f32 %v2952_v19, %v2920_v8  ;;  %v2848_v39 = vadd.f32 %v3957_v49, %v2550_v58  ;;  %v2548_v13 = vadd.f32 %v2457_v52, %v2250_v30  ;;  %v3958_v22 = vpop.f32.mrf.mxu0  ;;  %v2959_v55 = vld [vmem:[%s4981_s24 + $0x78] sm:$0xff]  ;;  %v5297_v52 = vld [vmem:[#allocation19_spill] sm:$0xff]  ;;  %v5305_v9 = vld [vmem:[#allocation28_spill] sm:$0xff] }
 0x1d3   : > { %v2923_v2 = vadd.f32 %v4988_v63, %v2884_v20  ;;  %v2882_v25 = vmul.f32 %v4973_v33, %v2843_v1  ;;  %v3924_v35 = vpop.f32.mrf.mxu1  ;;  %v1956_v14 = vadd.f32 %v5293_v40, %v5292_v28  ;;  %v2257_v19 = vadd.f32 %v5294_v53, %v1958_v11  ;;  %v5308_v53 = vld [vmem:[#allocation30_spill] sm:$0xff] }
 0x1d4   : > { %3050 = vst.msk [vmem:[%s5014_s29 + $0x50] sm:$0xff] %vm353_vm0, %v3018_v5  ;;  %v3016_v34 = vmax.f32 %v2984_v23, 0.0  ;;  %v2887_v6 = vmul.f32 %v4973_v33, %v2848_v39  ;;  %v2846_v21 = vadd.f32 %v2755_v10, %v2548_v13  ;;  %v2551_v45 = vadd.f32 %v3924_v35, %v2253_v29  ;;  %v2758_v32 = vpop.f32.mrf.mxu0  ;;  %v5298_v23 = vld [vmem:[#allocation5_spill] sm:$0xff]  ;;  %v2957_v13 = vld [vmem:[%s4981_s24 + $0x68] sm:$0xff] }
 0x1d5   : > { %v2987_v60 = vadd.f32 %v2955_v41, %v2923_v2  ;;  %v2921_v24 = vadd.f32 %v4988_v63, %v2882_v25  ;;  %v2460_v17 = vpop.f32.mrf.mxu1  ;;  %v1961_v56 = vadd.f32 %v5296_v36, %v5295_v44  ;;  %v2255_v5 = vadd.f32 %v5297_v52, %v1956_v14  ;;  %v5299_v41 = vld [vmem:[#allocation24_spill] sm:$0xff] }
 0x1d6   : > { %3048 = vst.msk [vmem:[%s5014_s29 + $0x40] sm:$0xff] %vm353_vm0, %v3016_v34  ;;  %v2926_v43 = vadd.f32 %v4988_v63, %v2887_v6  ;;  %v2885_v7 = vmul.f32 %v4973_v33, %v2846_v21  ;;  %v2849_v12 = vadd.f32 %v3958_v22, %v2551_v45  ;;  %v2549_v59 = vadd.f32 %v2460_v17, %v2251_v16  ;;  %v3961_v15 = vpop.f32.mrf.mxu0  ;;  %v5300_v6 = vld [vmem:[#allocation21_spill] sm:$0xff]  ;;  %v5301_v45 = vld [vmem:[#allocation6_spill] sm:$0xff]  ;;  %v5311_v52 = vld [vmem:[#allocation32_spill] sm:$0xff] }
 0x1d7   : > { %v3019_v18 = vmax.f32 %v2987_v60, 0.0  ;;  %v2985_v37 = vadd.f32 %v2953_v38, %v2921_v24  ;;  %v3927_v46 = vpop.f32.mrf.mxu1  ;;  %v1959_v39 = vadd.f32 %v5299_v41, %v5298_v23  ;;  %v2260_v21 = vadd.f32 %v5300_v6, %v1961_v56  ;;  %v2963_v56 = vld [vmem:[%s4981_s24 + $0x98] sm:$0xff]  ;;  %v5314_v6 = vld [vmem:[#allocation34_spill] sm:$0xff] }
 0x1d8   : > { %v2990_v4 = vadd.f32 %v2958_v3, %v2926_v43  ;;  %v2924_v47 = vadd.f32 %v4988_v63, %v2885_v7  ;;  %v2888_v51 = vmul.f32 %v4973_v33, %v2849_v12  ;;  %v2847_v49 = vadd.f32 %v2758_v32, %v2549_v59  ;;  %v2771_v30 = vpop.f32.mrf.mxu0  ;;  %v5302_v32 = vld [vmem:[#allocation26_spill] sm:$0xff]  ;;  %v2962_v3 = vld [vmem:[%s4981_s24 + $0x90] sm:$0xff]  ;;  %v5303_v12 = vld [vmem:[#allocation23_spill] sm:$0xff] }
 0x1d9   : > { %3051 = vst.msk [vmem:[%s5014_s29 + $0x58] sm:$0xff] %vm353_vm0, %v3019_v18  ;;  %v3017_v57 = vmax.f32 %v2985_v37, 0.0  ;;  %v2554_v8 = vadd.f32 %v3927_v46, %v2256_v42  ;;  %v2473_v58 = vpop.f32.mrf.mxu1  ;;  %v1962_v42 = vadd.f32 %v5302_v32, %v5301_v45  ;;  %v2258_v59 = vadd.f32 %v5303_v12, %v1959_v39  ;;  %v2960_v37 = vld [vmem:[%s4981_s24 + $0x80] sm:$0xff]  ;;  %v2961_v39 = vld [vmem:[%s4981_s24 + $0x88] sm:$0xff]  ;;  %v2966_v32 = vld [vmem:[%s4981_s24 + $0xb0] sm:$0xff] }
 0x1da   : > { %v3022_v10 = vmax.f32 %v2990_v4, 0.0  ;;  %v2988_v29 = vadd.f32 %v2956_v27, %v2924_v47  ;;  %v2927_v61 = vadd.f32 %v4988_v63, %v2888_v51  ;;  %v2886_v20 = vmul.f32 %v4973_v33, %v2847_v49  ;;  %v3962_v1 = vpop.f32.mrf.mxu0  ;;  %v5306_v51 = vld [vmem:[#allocation25_spill] sm:$0xff]  ;;  %v5317_v12 = vld [vmem:[#allocation36_spill] sm:$0xff] }
 0x1db   : > { %3049 = vst.msk [vmem:[%s5014_s29 + $0x48] sm:$0xff] %vm353_vm0, %v3017_v57  ;;  %v2852_v22 = vadd.f32 %v3961_v15, %v2554_v8  ;;  %v2552_v16 = vadd.f32 %v2473_v58, %v2254_v62  ;;  %v3928_v26 = vpop.f32.mrf.mxu1  ;;  %v5304_v15 = vld [vmem:[#allocation7_spill] sm:$0xff]  ;;  %v2261_v49 = vadd.f32 %v5306_v51, %v1962_v42 }
 0x1dc   : > { %3054 = vst.msk [vmem:[%s5014_s29 + $0x70] sm:$0xff] %vm353_vm0, %v3022_v10  ;;  %v3020_v2 = vmax.f32 %v2988_v29, 0.0  ;;  %v2991_v25 = vadd.f32 %v2959_v55, %v2927_v61  ;;  %v2925_v35 = vadd.f32 %v4988_v63, %v2886_v20  ;;  %v2555_v34 = vadd.f32 %v3928_v26, %v2257_v19  ;;  %v2774_v38 = vpop.f32.mrf.mxu0  ;;  %v5309_v61 = vld [vmem:[#allocation27_spill] sm:$0xff] }
 0x1dd   : > { %v2891_v54 = vmul.f32 %v4973_v33, %v2852_v22  ;;  %v2850_v50 = vadd.f32 %v2771_v30, %v2552_v16  ;;  %v2476_v11 = vpop.f32.mrf.mxu1  ;;  %v1960_v62 = vadd.f32 %v5305_v9, %v5304_v15  ;;  %v5307_v30 = vld [vmem:[#allocation8_spill] sm:$0xff]  ;;  %v2964_v15 = vld [vmem:[%s4981_s24 + $0xa0] sm:$0xff] }
 0x1de   : > { %3052 = vst.msk [vmem:[%s5014_s29 + $0x60] sm:$0xff] %vm353_vm0, %v3020_v2  ;;  %v3023_v60 = vmax.f32 %v2991_v25, 0.0  ;;  %v2989_v24 = vadd.f32 %v2957_v13, %v2925_v35  ;;  %v2853_v17 = vadd.f32 %v3962_v1, %v2555_v34  ;;  %v2553_v43 = vadd.f32 %v2476_v11, %v2255_v5  ;;  %v3965_v7 = vpop.f32.mrf.mxu0  ;;  %v5310_v1 = vld [vmem:[#allocation9_spill] sm:$0xff] }
 0x1df   : > { %v2930_v28 = vadd.f32 %v4988_v63, %v2891_v54  ;;  %v2889_v40 = vmul.f32 %v4973_v33, %v2850_v50  ;;  %v3931_v14 = vpop.f32.mrf.mxu1  ;;  %v1965_v19 = vadd.f32 %v5308_v53, %v5307_v30  ;;  %v2259_v20 = vadd.f32 %v5309_v61, %v1960_v62  ;;  %v5312_v35 = vld [vmem:[#allocation29_spill] sm:$0xff] }
 0x1e0   : > { %3055 = vst.msk [vmem:[%s5014_s29 + $0x78] sm:$0xff] %vm353_vm0, %v3023_v60  ;;  %v3021_v18 = vmax.f32 %v2989_v24, 0.0  ;;  %v2892_v27 = vmul.f32 %v4973_v33, %v2853_v17  ;;  %v2851_v46 = vadd.f32 %v2774_v38, %v2553_v43  ;;  %v2558_v4 = vadd.f32 %v3931_v14, %v2260_v21  ;;  %v2787_v47 = vpop.f32.mrf.mxu0  ;;  %v5313_v38 = vld [vmem:[#allocation10_spill] sm:$0xff]  ;;  %v5315_v17 = vld [vmem:[#allocation31_spill] sm:$0xff] }
 0x1e1   : > { %v2994_v44 = vadd.f32 %v2962_v3, %v2930_v28  ;;  %v2928_v36 = vadd.f32 %v4988_v63, %v2889_v40  ;;  %v2489_v57 = vpop.f32.mrf.mxu1  ;;  %v1963_v5 = vadd.f32 %v5311_v52, %v5310_v1  ;;  %v2264_v34 = vadd.f32 %v5312_v35, %v1965_v19  ;;  %v2967_v19 = vld [vmem:[%s4981_s24 + $0xb8] sm:$0xff]  ;;  %v2965_v52 = vld [vmem:[%s4981_s24 + $0xa8] sm:$0xff] }
 0x1e2   : > { %3053 = vst.msk [vmem:[%s5014_s29 + $0x68] sm:$0xff] %vm353_vm0, %v3021_v18  ;;  %v2931_v55 = vadd.f32 %v4988_v63, %v2892_v27  ;;  %v2890_v8 = vmul.f32 %v4973_v33, %v2851_v46  ;;  %v2856_v58 = vadd.f32 %v3965_v7, %v2558_v4  ;;  %v2556_v10 = vadd.f32 %v2489_v57, %v2258_v59  ;;  %v3966_v29 = vpop.f32.mrf.mxu0  ;;  %v5316_v7 = vld [vmem:[#allocation11_spill] sm:$0xff]  ;;  %v5318_v46 = vld [vmem:[#allocation33_spill] sm:$0xff] }
 0x1e3   : > { %v3026_v23 = vmax.f32 %v2994_v44, 0.0  ;;  %v2992_v41 = vadd.f32 %v2960_v37, %v2928_v36  ;;  %v3932_v13 = vpop.f32.mrf.mxu1  ;;  %v1966_v21 = vadd.f32 %v5314_v6, %v5313_v38  ;;  %v2262_v43 = vadd.f32 %v5315_v17, %v1963_v5  ;;  %v5319_v57 = vld [vmem:[#allocation35_spill] sm:$0xff] }
 0x1e4   : > { %v2995_v22 = vadd.f32 %v2963_v56, %v2931_v55  ;;  %v2929_v16 = vadd.f32 %v4988_v63, %v2890_v8  ;;  %v2895_v26 = vmul.f32 %v4973_v33, %v2856_v58  ;;  %v2854_v2 = vadd.f32 %v2787_v47, %v2556_v10  ;;  %v2790_v25 = vpop.f32.mrf.mxu0  ;;  %v5320_v8 = vld [vmem:[#allocation12_spill] sm:$0xff]  ;;  %v5321_v58 = vld [vmem:[#allocation38_spill] sm:$0xff] }
 0x1e5   : > { %3058 = vst.msk [vmem:[%s5014_s29 + $0x90] sm:$0xff] %vm353_vm0, %v3026_v23  ;;  %v3024_v45 = vmax.f32 %v2992_v41, 0.0  ;;  %v2559_v42 = vadd.f32 %v3932_v13, %v2261_v49  ;;  %v2492_v54 = vpop.f32.mrf.mxu1  ;;  %v1964_v59 = vadd.f32 %v5317_v12, %v5316_v7  ;;  %v2265_v4 = vadd.f32 %v5318_v46, %v1966_v21  ;;  %v5322_v13 = vld [vmem:[#allocation13_spill] sm:$0xff] }
 0x1e6   : > { %v3027_v50 = vmax.f32 %v2995_v22, 0.0  ;;  %v2993_v11 = vadd.f32 %v2961_v39, %v2929_v16  ;;  %v2934_v60 = vadd.f32 %v4988_v63, %v2895_v26  ;;  %v2893_v24 = vmul.f32 %v4973_v33, %v2854_v2  ;;  %v3969_v3 = vpop.f32.mrf.mxu0  ;;  %v5323_v16 = vld [vmem:[#allocation14_spill] sm:$0xff]  ;;  %v5324_v26 = vld [vmem:[#allocation41_spill] sm:$0xff] }
 0x1e7   : > { %3056 = vst.msk [vmem:[%s5014_s29 + $0x80] sm:$0xff] %vm353_vm0, %v3024_v45  ;;  %v2857_v9 = vadd.f32 %v3966_v29, %v2559_v42  ;;  %v2557_v62 = vadd.f32 %v2492_v54, %v2259_v20  ;;  %v3935_v28 = vpop.f32.mrf.mxu1  ;;  %v2263_v55 = vadd.f32 %v5319_v57, %v1964_v59  ;;  %v1969_v10 = vadd.f32 %v5321_v58, %v5320_v8 }
 0x1e8   : > { %3059 = vst.msk [vmem:[%s5014_s29 + $0x98] sm:$0xff] %vm353_vm0, %v3027_v50  ;;  %v3025_v40 = vmax.f32 %v2993_v11, 0.0  ;;  %v2998_v14 = vadd.f32 %v2966_v32, %v2934_v60  ;;  %v2932_v18 = vadd.f32 %v4988_v63, %v2893_v24  ;;  %v2562_v37 = vadd.f32 %v3935_v28, %v2264_v34  ;;  %v2803_v27 = vpop.f32.mrf.mxu0  ;;  %v2970_v34 = vld [vmem:[%s4981_s24 + $0xd0] sm:$0xff]  ;;  %v5326_v50 = vld [vmem:[#allocation15_spill] sm:$0xff] }
 0x1e9   : > { %v2896_v47 = vmul.f32 %v4973_v33, %v2857_v9  ;;  %v2855_v51 = vadd.f32 %v2790_v25, %v2557_v62  ;;  %v2505_v49 = vpop.f32.mrf.mxu1  ;;  %v1967_v22 = vadd.f32 %v4952_v0, %v5322_v13  ;;  %v1970_v2 = vadd.f32 %v5324_v26, %v5323_v16  ;;  %v5325_v0 = vld [vmem:[#allocation37_spill] sm:$0xff]  ;;  %v5327_v9 = vld [vmem:[#allocation39_spill] sm:$0xff]  ;;  %v5328_v28 = vld [vmem:[#allocation40_spill] sm:$0xff] }
 0x1ea   : > { %3057 = vst.msk [vmem:[%s5014_s29 + $0x88] sm:$0xff] %vm353_vm0, %v3025_v40  ;;  %v3030_v30 = vmax.f32 %v2998_v14, 0.0  ;;  %v2996_v53 = vadd.f32 %v2964_v15, %v2932_v18  ;;  %v2860_v44 = vadd.f32 %v3969_v3, %v2562_v37  ;;  %v2560_v36 = vadd.f32 %v2505_v49, %v2262_v43  ;;  %v3970_v56 = vpop.f32.mrf.mxu0  ;;  %v2968_v3 = vld [vmem:[%s4981_s24 + $0xc0] sm:$0xff]  ;;  %v2971_v14 = vld [vmem:[%s4981_s24 + $0xd8] sm:$0xff]  ;;  %v2969_v49 = vld [vmem:[%s4981_s24 + $0xc8] sm:$0xff] }
 0x1eb   : > { %v2935_v29 = vadd.f32 %v4988_v63, %v2896_v47  ;;  %v2894_v61 = vmul.f32 %v4973_v33, %v2855_v51  ;;  %v3936_v20 = vpop.f32.mrf.mxu1  ;;  %v2268_v54 = vadd.f32 %v5325_v0, %v1969_v10  ;;  %v1968_v11 = vadd.f32 %v4962_v31, %v5326_v50 }
 0x1ec   : > { %3062 = vst.msk [vmem:[%s5014_s29 + $0xb0] sm:$0xff] %vm353_vm0, %v3030_v30  ;;  %v3028_v1 = vmax.f32 %v2996_v53, 0.0  ;;  %v2899_v5 = vmul.f32 %v4973_v33, %v2860_v44  ;;  %v2858_v23 = vadd.f32 %v2803_v27, %v2560_v36  ;;  %v2563_v41 = vadd.f32 %v3936_v20, %v2265_v4  ;;  %v2806_v39 = vpop.f32.mrf.mxu0 }
 0x1ed   : > { %v2999_v25 = vadd.f32 %v2967_v19, %v2935_v29  ;;  %v2933_v35 = vadd.f32 %v4988_v63, %v2894_v61  ;;  %v2508_v38 = vpop.f32.mrf.mxu1  ;;  %v2266_v62 = vadd.f32 %v5327_v9, %v1967_v22  ;;  %v2269_v40 = vadd.f32 %v5328_v28, %v1970_v2  ;;  %v2974_v61 = vld [vmem:[%s4981_s24 + $0xf0] sm:$0xff]  ;;  %v2975_v2 = vld [vmem:[%s4981_s24 + $0xf8] sm:$0xff] }
 0x1ee   : > { %3060 = vst.msk [vmem:[%s5014_s29 + $0xa0] sm:$0xff] %vm353_vm0, %v3028_v1  ;;  %v2938_v6 = vadd.f32 %v4988_v63, %v2899_v5  ;;  %v2897_v21 = vmul.f32 %v4973_v33, %v2858_v23  ;;  %v2861_v45 = vadd.f32 %v3970_v56, %v2563_v41  ;;  %v2561_v32 = vadd.f32 %v2508_v38, %v2263_v55  ;;  %v3973_v42 = vpop.f32.mrf.mxu0 }
 0x1ef   : > { %v3031_v60 = vmax.f32 %v2999_v25, 0.0  ;;  %v2997_v24 = vadd.f32 %v2965_v52, %v2933_v35  ;;  %v3939_v17 = vpop.f32.mrf.mxu1  ;;  %v2267_v51 = vadd.f32 %v4960_v48, %v1968_v11 }
 0x1f0   : > { %v3002_v43 = vadd.f32 %v2970_v34, %v2938_v6  ;;  %v2936_v7 = vadd.f32 %v4988_v63, %v2897_v21  ;;  %v2900_v12 = vmul.f32 %v4973_v33, %v2861_v45  ;;  %v2859_v59 = vadd.f32 %v2806_v39, %v2561_v32  ;;  %v2819_v15 = vpop.f32.mrf.mxu0  ;;  %v2972_v39 = vld [vmem:[%s4981_s24 + $0xe0] sm:$0xff]  ;;  %v2973_v6 = vld [vmem:[%s4981_s24 + $0xe8] sm:$0xff] }
 0x1f1   : > { %3063 = vst.msk [vmem:[%s5014_s29 + $0xb8] sm:$0xff] %vm353_vm0, %v3031_v60  ;;  %v3029_v31 = vmax.f32 %v2997_v24, 0.0  ;;  %v2566_v18 = vadd.f32 %v3939_v17, %v2268_v54  ;;  %v2521_v37 = vpop.f32.mrf.mxu1 }
 0x1f2   : > { %v3034_v27 = vmax.f32 %v3002_v43, 0.0  ;;  %v3000_v46 = vadd.f32 %v2968_v3, %v2936_v7  ;;  %v2939_v4 = vadd.f32 %v4988_v63, %v2900_v12  ;;  %v2898_v47 = vmul.f32 %v4973_v33, %v2859_v59  ;;  %v3974_v44 = vpop.f32.mrf.mxu0 }
 0x1f3   : > { %3061 = vst.msk [vmem:[%s5014_s29 + $0xa8] sm:$0xff] %vm353_vm0, %v3029_v31  ;;  %v2864_v30 = vadd.f32 %v3973_v42, %v2566_v18  ;;  %v2564_v53 = vadd.f32 %v2521_v37, %v2266_v62  ;;  %v3940_v19 = vpop.f32.mrf.mxu1 }
 0x1f4   : > { %3066 = vst.msk [vmem:[%s5014_s29 + $0xd0] sm:$0xff] %vm353_vm0, %v3034_v27  ;;  %v3032_v36 = vmax.f32 %v3000_v46, 0.0  ;;  %v3003_v56 = vadd.f32 %v2971_v14, %v2939_v4  ;;  %v2937_v57 = vadd.f32 %v4988_v63, %v2898_v47  ;;  %v2567_v55 = vadd.f32 %v3940_v19, %v2269_v40  ;;  %v2822_v23 = vpop.f32.mrf.mxu0 }
 0x1f5   : > { %v2903_v8 = vmul.f32 %v4973_v33, %v2864_v30  ;;  %v2862_v48 = vadd.f32 %v2819_v15, %v2564_v53  ;;  %v2524_v58 = vpop.f32.mrf.mxu1 }
 0x1f6   : > { %3064 = vst.msk [vmem:[%s5014_s29 + $0xc0] sm:$0xff] %vm353_vm0, %v3032_v36  ;;  %v3035_v10 = vmax.f32 %v3003_v56, 0.0  ;;  %v3001_v29 = vadd.f32 %v2969_v49, %v2937_v57  ;;  %v2865_v20 = vadd.f32 %v3974_v44, %v2567_v55  ;;  %v2565_v1 = vadd.f32 %v2524_v58, %v2267_v51 }
 0x1f7   : > { %v2942_v52 = vadd.f32 %v4988_v63, %v2903_v8  ;;  %v2901_v5 = vmul.f32 %v4973_v33, %v2862_v48 }
 0x1f8   : > { %3067 = vst.msk [vmem:[%s5014_s29 + $0xd8] sm:$0xff] %vm353_vm0, %v3035_v10  ;;  %v3033_v41 = vmax.f32 %v3001_v29, 0.0  ;;  %v2904_v13 = vmul.f32 %v4973_v33, %v2865_v20  ;;  %v2863_v22 = vadd.f32 %v2822_v23, %v2565_v1 }
 0x1f9   : > { %v3006_v16 = vadd.f32 %v2974_v61, %v2942_v52  ;;  %v2940_v26 = vadd.f32 %v4988_v63, %v2901_v5 }
 0x1fa   : > { %3065 = vst.msk [vmem:[%s5014_s29 + $0xc8] sm:$0xff] %vm353_vm0, %v3033_v41  ;;  %v2943_v25 = vadd.f32 %v4988_v63, %v2904_v13  ;;  %v2902_v35 = vmul.f32 %v4973_v33, %v2863_v22 }
 0x1fb   : > { %v3038_v34 = vmax.f32 %v3006_v16, 0.0  ;;  %v3004_v38 = vadd.f32 %v2972_v39, %v2940_v26 }
 0x1fc   : > { %v3007_v21 = vadd.f32 %v2975_v2, %v2943_v25  ;;  %v2941_v45 = vadd.f32 %v4988_v63, %v2902_v35 }
 0x1fd   : > { %3070 = vst.msk [vmem:[%s5014_s29 + $0xf0] sm:$0xff] %vm353_vm0, %v3038_v34  ;;  %v3036_v32 = vmax.f32 %v3004_v38, 0.0 }
 0x1fe   : > { %v3039_v42 = vmax.f32 %v3007_v21, 0.0  ;;  %v3005_v0 = vadd.f32 %v2973_v6, %v2941_v45 }
 0x1ff   : > { %3068 = vst.msk [vmem:[%s5014_s29 + $0xe0] sm:$0xff] %vm353_vm0, %v3036_v32 }
 0x200   : > { %3071 = vst.msk [vmem:[%s5014_s29 + $0xf8] sm:$0xff] %vm353_vm0, %v3039_v42  ;;  %v3037_v54 = vmax.f32 %v3005_v0, 0.0 }
 0x202   : > { %3069 = vst.msk [vmem:[%s5014_s29 + $0xe8] sm:$0xff] %vm353_vm0, %v3037_v54 }
 0x203 PF: > { %s15_s18 = sadd.s32 1, %s4001_s18  }
 0x204   : > { %p12_p4 = scmp.ge.s32.totalorder %s15_s18, 4  }
 0x206   :  { %14 = sbr.rel (!%p12_p4) target bundleno = 1 (0x1), region = 83 }

// kernel: _lambda_.11
= control target key start
LH: loop header
LB: loop body
LE: loop exit
PB: predicated region body
PF: predicated region fallthrough
CT: control target
= control target key end

     0   :  { %s3902_s15 = smov 0   ;;  %s5071_s0 = inlined_call_operand.vmem [shape: f32[2,18,18,16], index: 0, kind: input, shape index: {}]   ;;  %s5072_s1 = inlined_call_operand.vmem [shape: bf16[9,16,16], index: 1, kind: input, shape index: {}]   ;;  %s5073_s2 = inlined_call_operand.vmem [shape: f32[1,16], index: 2, kind: input, shape index: {}]   ;;  %s5074_s3 = inlined_call_operand.vmem [shape: f32[1,16], index: 3, kind: input, shape index: {}]   ;;  %s5075_s4 = inlined_call_operand.vmem [shape: f32[2,16,16,16], index: 4, kind: output, shape index: {}]  }
   0x1 LB: > { %s3016_s16 = sadd.s32 4294967295, %s3875_s15   ;;  %p3020_p0 = scmp.ge.s32.totalorder %s3875_s15, 1  ;;  %s3875_s15 = sphi %s3902_s15, %s14_s15  }
   0x2   : > { %p162_p1 = scmp.lt.s32.totalorder %s3875_s15, 3 }
   0x4   : > { %p163_p2 = pnand %p3020_p0, %p162_p1 }
   0x6   : > { %166 = sbr.rel (%p163_p2) target bundleno = 513 (0x201), region = 36 }
   0xb   : > { %v3860_v0 = vld [vmem:[%s5072_s1 + $0x8] sm:$0xff]   ;;  %p188_p3 = scmp.lt.s32.totalorder %s3016_s16, 1  ;;  %v3861_v1 = vld [vmem:[%s5072_s1] sm:$0xff]   ;;  %v3862_v2 = vld [vmem:[%s5072_s1 + $0x10] sm:$0xff]   ;;  %vm306_vm0 = vcmask 130048  }
   0xc   : > { %3849 = vmatprep.subr.bf16.mxu1 %v3860_v0  ;;  %3543 = vmatprep.subr.bf16.mxu0 %v3860_v0  ;;  %v3936_v10 = vld [vmem:[%s5072_s1 + $0x18] sm:$0xff]   ;;  %v3962_v22 = vld [vmem:[%s5072_s1 + $0x20] sm:$0xff]  }
   0xd   : > { %s5159_s16 = smov (!%p188_p3, %s3016_s16), 1  ;;  %3850 = vmatpush3.bf16.msra.mxu1 %v3860_v0  ;;  %3544 = vmatpush3.bf16.msra.mxu0 %v3860_v0 }
   0xe   : > { %s3851_s23 = smul.u32 432, %s5159_s16  ;;  %3577 = vmatprep.subr.bf16.mxu1 %v3861_v1  ;;  %3611 = vmatprep.subr.bf16.mxu0 %v3862_v2  ;;  %s3389_s19 = sshll.u32 %s5159_s16, 8 }
   0xf   : > { %s4867_s21 = scalar_lea.vmem %s5075_s4, %s3389_s19 }
  0x10   : > { %s3925_s26 = scalar_lea.vmem %s5071_s0, %s3851_s23 }
  0x11   : > { %v249_v3 = vld [vmem:[%s3925_s26 + $0x1] sm:$0xff]  ;;  %v250_v4 = vld [vmem:[%s3925_s26 + $0x9] sm:$0xff]  ;;  %v251_v8 = vld [vmem:[%s3925_s26 + $0x19] sm:$0xff] }
  0x12   : > { %v265_v5 = vld [vmem:[%s3925_s26 + $0xc1] sm:$0xff]  ;;  %v281_v6 = vpack.c.bf16 %v250_v4, %v249_v3  ;;  %v266_v7 = vld [vmem:[%s3925_s26 + $0xc9] sm:$0xff]  ;;  %v267_v13 = vld [vmem:[%s3925_s26 + $0xd9] sm:$0xff] }
  0x13   : > { %v252_v9 = vld [vmem:[%s3925_s26 + $0x21] sm:$0xff]  ;;  %v3938_v11 = vpack.c.bf16 %v266_v7, %v265_v5  ;;  %v253_v15 = vld [vmem:[%s3925_s26 + $0x31] sm:$0xff]  ;;  %v254_v17 = vld [vmem:[%s3925_s26 + $0x39] sm:$0xff] }
  0x14   : > { %v3940_v12 = vpack.c.bf16 %v252_v9, %v251_v8  ;;  %v268_v14 = vld [vmem:[%s3925_s26 + $0xe1] sm:$0xff]  ;;  %3545 = vmatprep.mubr.msk.bf16.mxu0 %vm306_vm0, %v281_v6  ;;  %v269_v18 = vld [vmem:[%s3925_s26 + $0xf1] sm:$0xff]  ;;  %v270_v19 = vld [vmem:[%s3925_s26 + $0xf9] sm:$0xff]  ;;  %v3955_v20 = vpack.c.bf16 %v254_v17, %v253_v15 }
  0x15   : > { %v3946_v16 = vpack.c.bf16 %v268_v14, %v267_v13  ;;  %3561 = vmatprep.mubr.msk.bf16.mxu1 %vm306_vm0, %v3938_v11  ;;  %v3957_v21 = vpack.c.bf16 %v270_v19, %v269_v18  ;;  %v255_v23 = vld [vmem:[%s3925_s26 + $0x49] sm:$0xff]  ;;  %v256_v24 = vld [vmem:[%s3925_s26 + $0x51] sm:$0xff]  ;;  %v257_v27 = vld [vmem:[%s3925_s26 + $0x61] sm:$0xff] }
  0x16   : > { %3546 = vmatmul.mubr.msk.bf16.vlgmr.msra.gmra.mxu0 %vm306_vm0, %v3940_v12  ;;  %v271_v25 = vld [vmem:[%s3925_s26 + $0x109] sm:$0xff]  ;;  %v272_v26 = vld [vmem:[%s3925_s26 + $0x111] sm:$0xff]  ;;  %v273_v29 = vld [vmem:[%s3925_s26 + $0x121] sm:$0xff]  ;;  %v3979_v31 = vpack.c.bf16 %v256_v24, %v255_v23 }
  0x17   : > { %3562 = vmatmul.mubr.msk.bf16.vlgmr.msra.gmra.mxu1 %vm306_vm0, %v3946_v16  ;;  %3612 = vmatpush3.bf16.msra.mxu0 %v3862_v2  ;;  %v258_v28 = vld [vmem:[%s3925_s26 + $0x69] sm:$0xff]  ;;  %v3982_v32 = vpack.c.bf16 %v272_v26, %v271_v25  ;;  %v259_v35 = vld [vmem:[%s3925_s26 + $0x79] sm:$0xff]  ;;  %v260_v36 = vld [vmem:[%s3925_s26 + $0x81] sm:$0xff] }
  0x18   : > { %3578 = vmatpush3.bf16.msra.mxu1 %v3861_v1  ;;  %3549 = vmatprep.mubr.msk.bf16.mxu0 %vm306_vm0, %v3955_v20  ;;  %v274_v30 = vld [vmem:[%s3925_s26 + $0x129] sm:$0xff]  ;;  %v3984_v33 = vpack.c.bf16 %v258_v28, %v257_v27  ;;  %v275_v37 = vld [vmem:[%s3925_s26 + $0x139] sm:$0xff]  ;;  %v276_v38 = vld [vmem:[%s3925_s26 + $0x141] sm:$0xff]  ;;  %v4004_v43 = vpack.c.bf16 %v260_v36, %v259_v35 }
  0x19   : > { %3565 = vmatprep.mubr.msk.bf16.mxu1 %vm306_vm0, %v3957_v21  ;;  %3645 = vmatprep.subr.bf16.mxu1 %v3936_v10  ;;  %v3986_v34 = vpack.c.bf16 %v274_v30, %v273_v29  ;;  %v261_v39 = vld [vmem:[%s3925_s26 + $0x91] sm:$0xff]  ;;  %v262_v40 = vld [vmem:[%s3925_s26 + $0x99] sm:$0xff]  ;;  %v4006_v44 = vpack.c.bf16 %v276_v38, %v275_v37  ;;  %v263_v47 = vld [vmem:[%s3925_s26 + $0xa9] sm:$0xff] }
  0x1a   : > { %3679 = vmatprep.subr.bf16.mxu0 %v3962_v22  ;;  %v277_v41 = vld [vmem:[%s3925_s26 + $0x151] sm:$0xff]  ;;  %v278_v42 = vld [vmem:[%s3925_s26 + $0x159] sm:$0xff]  ;;  %v4008_v45 = vpack.c.bf16 %v262_v40, %v261_v39  ;;  %v279_v49 = vld [vmem:[%s3925_s26 + $0x169] sm:$0xff] }
  0x1b   : > { %v4010_v46 = vpack.c.bf16 %v278_v42, %v277_v41  ;;  %v264_v48 = vld [vmem:[%s3925_s26 + $0xb1] sm:$0xff]  ;;  %v731_v51 = vld [vmem:[%s3925_s26 + $0x2] sm:$0xff]  ;;  %v733_v59 = vld [vmem:[%s3925_s26 + $0x1a] sm:$0xff] }
  0x1c   : > { %v280_v50 = vld [vmem:[%s3925_s26 + $0x171] sm:$0xff]  ;;  %v199_v53 = vld [vmem:[%s3925_s26] sm:$0xff]  ;;  %v200_v54 = vld [vmem:[%s3925_s26 + $0x8] sm:$0xff]  ;;  %v4028_v55 = vpack.c.bf16 %v264_v48, %v263_v47 }
  0x1d   : > { %v732_v52 = vld [vmem:[%s3925_s26 + $0xa] sm:$0xff]  ;;  %v4030_v56 = vpack.c.bf16 %v280_v50, %v279_v49  ;;  %v231_v58 = vpack.c.bf16 %v200_v54, %v199_v53  ;;  %v734_v60 = vld [vmem:[%s3925_s26 + $0x22] sm:$0xff]  ;;  %v201_v61 = vld [vmem:[%s3925_s26 + $0x18] sm:$0xff] }
  0x1e   : > { %3550 = vmatmul.mubr.msk.bf16.gmra.mxu0 %vm306_vm0, %v3979_v31  ;;  %v763_v57 = vpack.c.bf16 %v732_v52, %v731_v51  ;;  %v202_v62 = vld [vmem:[%s3925_s26 + $0x20] sm:$0xff]  ;;  %v203_v63 = vld [vmem:[%s3925_s26 + $0x30] sm:$0xff]  ;;  %v204_v0 = vld [vmem:[%s3925_s26 + $0x38] sm:$0xff]  ;;  %v4044_v1 = vpack.c.bf16 %v734_v60, %v733_v59 }
  0x1f   : > { %3566 = vmatmul.mubr.msk.bf16.gmra.mxu1 %vm306_vm0, %v3982_v32  ;;  %3553 = vmatprep.mubr.msk.bf16.mxu0 %vm306_vm0, %v3984_v33  ;;  %v735_v2 = vld [vmem:[%s3925_s26 + $0x32] sm:$0xff]  ;;  %v736_v3 = vld [vmem:[%s3925_s26 + $0x3a] sm:$0xff]  ;;  %v4048_v4 = vpack.c.bf16 %v202_v62, %v201_v61  ;;  %v4050_v5 = vpack.c.bf16 %v204_v0, %v203_v63  ;;  %v4057_v7 = vld [vmem:[%s5072_s1 + $0x28] sm:$0xff]  }
  0x20   : > { %3569 = vmatprep.mubr.msk.bf16.mxu1 %vm306_vm0, %v3986_v34  ;;  %v4052_v6 = vpack.c.bf16 %v736_v3, %v735_v2  ;;  %v4064_v8 = vld [vmem:[%s5072_s1 + $0x30] sm:$0xff]   ;;  %v205_v9 = vld [vmem:[%s3925_s26 + $0x48] sm:$0xff]  ;;  %v207_v19 = vld [vmem:[%s3925_s26 + $0x60] sm:$0xff] }
  0x21   : > { %v737_v13 = vld [vmem:[%s3925_s26 + $0x4a] sm:$0xff]  ;;  %v738_v14 = vld [vmem:[%s3925_s26 + $0x52] sm:$0xff]  ;;  %v739_v17 = vld [vmem:[%s3925_s26 + $0x62] sm:$0xff] }
  0x22   : > { %v206_v15 = vld [vmem:[%s3925_s26 + $0x50] sm:$0xff]  ;;  %v209_v26 = vld [vmem:[%s3925_s26 + $0x78] sm:$0xff]  ;;  %v742_v28 = vld [vmem:[%s3925_s26 + $0x82] sm:$0xff] }
  0x23   : > { %v740_v18 = vld [vmem:[%s3925_s26 + $0x6a] sm:$0xff]  ;;  %v4086_v23 = vpack.c.bf16 %v206_v15, %v205_v9  ;;  %v741_v27 = vld [vmem:[%s3925_s26 + $0x7a] sm:$0xff]  ;;  %v743_v30 = vld [vmem:[%s3925_s26 + $0x92] sm:$0xff] }
  0x24   : > { %v4088_v24 = vpack.c.bf16 %v740_v18, %v739_v17  ;;  %v210_v29 = vld [vmem:[%s3925_s26 + $0x80] sm:$0xff]  ;;  %v211_v36 = vld [vmem:[%s3925_s26 + $0x90] sm:$0xff]  ;;  %v212_v37 = vld [vmem:[%s3925_s26 + $0x98] sm:$0xff]  ;;  %v4108_v38 = vpack.c.bf16 %v742_v28, %v741_v27 }
  0x25   : > { %v744_v35 = vld [vmem:[%s3925_s26 + $0x9a] sm:$0xff]  ;;  %v4110_v39 = vpack.c.bf16 %v210_v29, %v209_v26  ;;  %v4114_v41 = vpack.c.bf16 %v212_v37, %v211_v36  ;;  %v213_v42 = vld [vmem:[%s3925_s26 + $0xa8] sm:$0xff]  ;;  %v746_v48 = vld [vmem:[%s3925_s26 + $0xb2] sm:$0xff] }
  0x26   : > { %3554 = vmatmul.mubr.msk.bf16.gmra.mxu0 %vm306_vm0, %v4004_v43  ;;  %v4112_v40 = vpack.c.bf16 %v744_v35, %v743_v30  ;;  %v745_v47 = vld [vmem:[%s3925_s26 + $0xaa] sm:$0xff]  ;;  %v747_v50 = vld [vmem:[%s3925_s26 + $0xc2] sm:$0xff]  ;;  %v217_v60 = vld [vmem:[%s3925_s26 + $0xd8] sm:$0xff] }
  0x27   : > { %3570 = vmatmul.mubr.msk.bf16.gmra.mxu1 %vm306_vm0, %v4006_v44  ;;  %3557 = vmatprep.mubr.msk.bf16.mxu0 %vm306_vm0, %v4008_v45  ;;  %v214_v49 = vld [vmem:[%s3925_s26 + $0xb0] sm:$0xff]  ;;  %v215_v52 = vld [vmem:[%s3925_s26 + $0xc0] sm:$0xff]  ;;  %v216_v53 = vld [vmem:[%s3925_s26 + $0xc8] sm:$0xff]  ;;  %v4132_v54 = vpack.c.bf16 %v746_v48, %v745_v47 }
  0x28   : > { %3573 = vmatprep.mubr.msk.bf16.mxu1 %vm306_vm0, %v4010_v46  ;;  %v748_v51 = vld [vmem:[%s3925_s26 + $0xca] sm:$0xff]  ;;  %v4138_v59 = vpack.c.bf16 %v216_v53, %v215_v52  ;;  %v749_v61 = vld [vmem:[%s3925_s26 + $0xda] sm:$0xff]  ;;  %v750_v62 = vld [vmem:[%s3925_s26 + $0xe2] sm:$0xff] }
  0x29   : > { %v218_v63 = vld [vmem:[%s3925_s26 + $0xe0] sm:$0xff]  ;;  %v751_v0 = vld [vmem:[%s3925_s26 + $0xf2] sm:$0xff]  ;;  %v221_v18 = vld [vmem:[%s3925_s26 + $0x108] sm:$0xff] }
  0x2a   : > { %v752_v2 = vld [vmem:[%s3925_s26 + $0xfa] sm:$0xff]  ;;  %v219_v3 = vld [vmem:[%s3925_s26 + $0xf0] sm:$0xff]  ;;  %v755_v27 = vld [vmem:[%s3925_s26 + $0x122] sm:$0xff] }
  0x2b   : > { %v220_v9 = vld [vmem:[%s3925_s26 + $0xf8] sm:$0xff]  ;;  %v4160_v15 = vpack.c.bf16 %v752_v2, %v751_v0  ;;  %v222_v26 = vld [vmem:[%s3925_s26 + $0x110] sm:$0xff]  ;;  %v223_v29 = vld [vmem:[%s3925_s26 + $0x120] sm:$0xff] }
  0x2c   : > { %v4162_v17 = vpack.c.bf16 %v220_v9, %v219_v3  ;;  %v756_v28 = vld [vmem:[%s3925_s26 + $0x12a] sm:$0xff]  ;;  %v4182_v36 = vpack.c.bf16 %v222_v26, %v221_v18  ;;  %v225_v47 = vld [vmem:[%s3925_s26 + $0x138] sm:$0xff] }
  0x2d   : > { %v224_v30 = vld [vmem:[%s3925_s26 + $0x128] sm:$0xff]  ;;  %v4184_v37 = vpack.c.bf16 %v756_v28, %v755_v27  ;;  %v757_v48 = vld [vmem:[%s3925_s26 + $0x13a] sm:$0xff]  ;;  %v227_v53 = vld [vmem:[%s3925_s26 + $0x150] sm:$0xff] }
  0x2e   : > { %3558 = vmatmul.mubr.msk.bf16.gmra.mxu0 %vm306_vm0, %v4028_v55  ;;  %v760_v52 = vld [vmem:[%s3925_s26 + $0x15a] sm:$0xff]  ;;  %v761_v2 = vld [vmem:[%s3925_s26 + $0x16a] sm:$0xff]  ;;  %v762_v3 = vld [vmem:[%s3925_s26 + $0x172] sm:$0xff] }
  0x2f   : > { %3574 = vmatmul.mubr.msk.bf16.gmra.mxu1 %vm306_vm0, %v4030_v56  ;;  %3613 = vmatprep.mubr.msk.bf16.mxu0 %vm306_vm0, %v763_v57  ;;  %v4134_v57 = vpack.c.bf16 %v214_v49, %v213_v42  ;;  %v4186_v42 = vpack.c.bf16 %v224_v30, %v223_v29  ;;  %v758_v49 = vld [vmem:[%s3925_s26 + $0x142] sm:$0xff]  ;;  %v230_v18 = vld [vmem:[%s3925_s26 + $0x170] sm:$0xff]  ;;  %v3867_v26 = vld [vmem:[%s5072_s1 + $0x38] sm:$0xff]  }
  0x30   : > { %3579 = vmatprep.mubr.msk.bf16.mxu1 %vm306_vm0, %v231_v58  ;;  %v4136_v58 = vpack.c.bf16 %v748_v51, %v747_v50  ;;  %v226_v50 = vld [vmem:[%s3925_s26 + $0x140] sm:$0xff]  ;;  %v759_v51 = vld [vmem:[%s3925_s26 + $0x152] sm:$0xff]  ;;  %v229_v9 = vld [vmem:[%s3925_s26 + $0x168] sm:$0xff] }
  0x31   : > { %v3868_v27 = vld [vmem:[%s5072_s1 + $0x40] sm:$0xff]  }
  0x32   : > { %v3263_v28 = vld [vmem:[%s3925_s26 + $0x1a0] sm:$0xff] }
  0x33   : > { %v3211_v30 = vld [vmem:[%s3925_s26 + $0x182] sm:$0xff] }
  0x36   : > { %3614 = vmatmul.mubr.msk.bf16.vlgmr.msra.gmra.mxu0 %vm306_vm0, %v4044_v1 }
  0x37   : > { %3580 = vmatmul.mubr.msk.bf16.vlgmr.msra.gmra.mxu1 %vm306_vm0, %v4048_v4  ;;  %3680 = vmatpush3.bf16.msra.mxu0 %v3962_v22  ;;  %v208_v22 = vld [vmem:[%s3925_s26 + $0x68] sm:$0xff] }
  0x38   : > { %3646 = vmatpush3.bf16.msra.mxu1 %v3936_v10  ;;  %3583 = vmatprep.mubr.msk.bf16.mxu1 %vm306_vm0, %v4050_v5  ;;  %v4083_v10 = vpack.c.bf16 %v738_v14, %v737_v13  ;;  %v4090_v25 = vpack.c.bf16 %v208_v22, %v207_v19  ;;  %v4156_v13 = vpack.c.bf16 %v750_v62, %v749_v61  ;;  %v753_v19 = vld [vmem:[%s3925_s26 + $0x10a] sm:$0xff]  ;;  %v754_v22 = vld [vmem:[%s3925_s26 + $0x112] sm:$0xff] }
  0x39   : > { %3617 = vmatprep.mubr.msk.bf16.mxu0 %vm306_vm0, %v4052_v6  ;;  %3713 = vmatprep.subr.bf16.mxu1 %v4057_v7  ;;  %v4158_v14 = vpack.c.bf16 %v218_v63, %v217_v60  ;;  %v4180_v35 = vpack.c.bf16 %v754_v22, %v753_v19  ;;  %v228_v60 = vld [vmem:[%s3925_s26 + $0x158] sm:$0xff]  ;;  %v4204_v61 = vpack.c.bf16 %v758_v49, %v757_v48 }
  0x3a   : > { %3747 = vmatprep.subr.bf16.mxu0 %v4064_v8  ;;  %v4206_v62 = vpack.c.bf16 %v226_v50, %v225_v47  ;;  %v4208_v63 = vpack.c.bf16 %v760_v52, %v759_v51  ;;  %v4210_v0 = vpack.c.bf16 %v228_v60, %v227_v53  ;;  %v4224_v19 = vpack.c.bf16 %v762_v3, %v761_v2 }
  0x3b   : > { %v4226_v22 = vpack.c.bf16 %v230_v18, %v229_v9 }
  0x3e   : > { %3618 = vmatmul.mubr.msk.bf16.gmra.mxu0 %vm306_vm0, %v4083_v10 }
  0x3f   : > { %3584 = vmatmul.mubr.msk.bf16.gmra.mxu1 %vm306_vm0, %v4086_v23  ;;  %3621 = vmatprep.mubr.msk.bf16.mxu0 %vm306_vm0, %v4088_v24 }
  0x40   : > { %3587 = vmatprep.mubr.msk.bf16.mxu1 %vm306_vm0, %v4090_v25 }
  0x46   : > { %3622 = vmatmul.mubr.msk.bf16.gmra.mxu0 %vm306_vm0, %v4108_v38 }
  0x47   : > { %3588 = vmatmul.mubr.msk.bf16.gmra.mxu1 %vm306_vm0, %v4110_v39  ;;  %3625 = vmatprep.mubr.msk.bf16.mxu0 %vm306_vm0, %v4112_v40 }
  0x48   : > { %3591 = vmatprep.mubr.msk.bf16.mxu1 %vm306_vm0, %v4114_v41 }
  0x4e   : > { %3626 = vmatmul.mubr.msk.bf16.gmra.mxu0 %vm306_vm0, %v4132_v54 }
  0x4f   : > { %3592 = vmatmul.mubr.msk.bf16.gmra.mxu1 %vm306_vm0, %v4134_v57  ;;  %3629 = vmatprep.mubr.msk.bf16.mxu0 %vm306_vm0, %v4136_v58 }
  0x50   : > { %3595 = vmatprep.mubr.msk.bf16.mxu1 %vm306_vm0, %v4138_v59 }
  0x56   : > { %3630 = vmatmul.mubr.msk.bf16.gmra.mxu0 %vm306_vm0, %v4156_v13 }
  0x57   : > { %3596 = vmatmul.mubr.msk.bf16.gmra.mxu1 %vm306_vm0, %v4158_v14  ;;  %3633 = vmatprep.mubr.msk.bf16.mxu0 %vm306_vm0, %v4160_v15 }
  0x58   : > { %3599 = vmatprep.mubr.msk.bf16.mxu1 %vm306_vm0, %v4162_v17 }
  0x5e   : > { %3634 = vmatmul.mubr.msk.bf16.gmra.mxu0 %vm306_vm0, %v4180_v35 }
  0x5f   : > { %3600 = vmatmul.mubr.msk.bf16.gmra.mxu1 %vm306_vm0, %v4182_v36  ;;  %3637 = vmatprep.mubr.msk.bf16.mxu0 %vm306_vm0, %v4184_v37 }
  0x60   : > { %3603 = vmatprep.mubr.msk.bf16.mxu1 %vm306_vm0, %v4186_v42 }
  0x66   : > { %3638 = vmatmul.mubr.msk.bf16.gmra.mxu0 %vm306_vm0, %v4204_v61 }
  0x67   : > { %3604 = vmatmul.mubr.msk.bf16.gmra.mxu1 %vm306_vm0, %v4206_v62  ;;  %3641 = vmatprep.mubr.msk.bf16.mxu0 %vm306_vm0, %v4208_v63 }
  0x68   : > { %3607 = vmatprep.mubr.msk.bf16.mxu1 %vm306_vm0, %v4210_v0 }
  0x6e   : > { %3642 = vmatmul.mubr.msk.bf16.gmra.mxu0 %vm306_vm0, %v4224_v19 }
  0x6f   : > { %3608 = vmatmul.mubr.msk.bf16.gmra.mxu1 %vm306_vm0, %v4226_v22  ;;  %3681 = vmatprep.mubr.msk.bf16.mxu0 %vm306_vm0, %v3940_v12  ;;  %v3161_v12 = vld [vmem:[%s3925_s26 + $0x189] sm:$0xff] }
  0x70   : > { %3647 = vmatprep.mubr.msk.bf16.mxu1 %vm306_vm0, %v4048_v4 }
  0x76   : > { %3682 = vmatmul.mubr.msk.bf16.vlgmr.msra.gmra.mxu0 %vm306_vm0, %v3955_v20 }
  0x77   : > { %3648 = vmatmul.mubr.msk.bf16.vlgmr.msra.gmra.mxu1 %vm306_vm0, %v4050_v5  ;;  %3748 = vmatpush3.bf16.msra.mxu0 %v4064_v8 }
  0x78   : > { %3714 = vmatpush3.bf16.msra.mxu1 %v4057_v7  ;;  %3651 = vmatprep.mubr.msk.bf16.mxu1 %vm306_vm0, %v4086_v23 }
  0x79   : > { %3685 = vmatprep.mubr.msk.bf16.mxu0 %vm306_vm0, %v3979_v31  ;;  %3781 = vmatprep.subr.bf16.mxu1 %v3867_v26 }
  0x7a   : > { %3815 = vmatprep.subr.bf16.mxu0 %v3868_v27 }
  0x7e   : > { %3686 = vmatmul.mubr.msk.bf16.gmra.mxu0 %vm306_vm0, %v3984_v33 }
  0x7f   : > { %3652 = vmatmul.mubr.msk.bf16.gmra.mxu1 %vm306_vm0, %v4090_v25  ;;  %3689 = vmatprep.mubr.msk.bf16.mxu0 %vm306_vm0, %v4004_v43 }
  0x80   : > { %3655 = vmatprep.mubr.msk.bf16.mxu1 %vm306_vm0, %v4110_v39 }
  0x86   : > { %3690 = vmatmul.mubr.msk.bf16.gmra.mxu0 %vm306_vm0, %v4008_v45 }
  0x87   : > { %3656 = vmatmul.mubr.msk.bf16.gmra.mxu1 %vm306_vm0, %v4114_v41  ;;  %3693 = vmatprep.mubr.msk.bf16.mxu0 %vm306_vm0, %v4028_v55 }
  0x88   : > { %3659 = vmatprep.mubr.msk.bf16.mxu1 %vm306_vm0, %v4134_v57 }
  0x8e   : > { %3694 = vmatmul.mubr.msk.bf16.gmra.mxu0 %vm306_vm0, %v3938_v11  ;;  %v3160_v11 = vld [vmem:[%s3925_s26 + $0x181] sm:$0xff] }
  0x8f   : > { %3660 = vmatmul.mubr.msk.bf16.gmra.mxu1 %vm306_vm0, %v4138_v59  ;;  %3697 = vmatprep.mubr.msk.bf16.mxu0 %vm306_vm0, %v3946_v16  ;;  %v3109_v16 = vld [vmem:[%s3925_s26 + $0x180] sm:$0xff] }
  0x90   : > { %3663 = vmatprep.mubr.msk.bf16.mxu1 %vm306_vm0, %v4158_v14 }
  0x96   : > { %3698 = vmatmul.mubr.msk.bf16.gmra.mxu0 %vm306_vm0, %v3957_v21  ;;  %v3110_v21 = vld [vmem:[%s3925_s26 + $0x188] sm:$0xff] }
  0x97   : > { %3664 = vmatmul.mubr.msk.bf16.gmra.mxu1 %vm306_vm0, %v4162_v17  ;;  %3701 = vmatprep.mubr.msk.bf16.mxu0 %vm306_vm0, %v3982_v32  ;;  %v4304_v32 = vpack.c.bf16 %v3161_v12, %v3160_v11  ;;  %v3291_v11 = vld [vmem:[%s3925_s26 + $0x91] sm:$0xff]  ;;  %v3292_v12 = vld [vmem:[%s3925_s26 + $0x99] sm:$0xff] }
  0x98   : > { %3667 = vmatprep.mubr.msk.bf16.mxu1 %vm306_vm0, %v4182_v36 }
  0x9e   : > { %3702 = vmatmul.mubr.msk.bf16.gmra.mxu0 %vm306_vm0, %v3986_v34  ;;  %v1077_v34 = vpack.c.bf16 %v3110_v21, %v3109_v16 }
  0x9f   : > { %3668 = vmatmul.mubr.msk.bf16.gmra.mxu1 %vm306_vm0, %v4186_v42  ;;  %3705 = vmatprep.mubr.msk.bf16.mxu0 %vm306_vm0, %v4006_v44 }
  0xa0   : > { %3671 = vmatprep.mubr.msk.bf16.mxu1 %vm306_vm0, %v4206_v62 }
  0xa6   : > { %3706 = vmatmul.mubr.msk.bf16.gmra.mxu0 %vm306_vm0, %v4010_v46 }
  0xa7   : > { %3672 = vmatmul.mubr.msk.bf16.gmra.mxu1 %vm306_vm0, %v4210_v0  ;;  %3709 = vmatprep.mubr.msk.bf16.mxu0 %vm306_vm0, %v4030_v56 }
  0xa8   : > { %3675 = vmatprep.mubr.msk.bf16.mxu1 %vm306_vm0, %v4226_v22 }
  0xae   : > { %3710 = vmatmul.mubr.msk.bf16.gmra.mxu0 %vm306_vm0, %v4304_v32 }
  0xaf   : > { %3676 = vmatmul.mubr.msk.bf16.gmra.mxu1 %vm306_vm0, %v1077_v34  ;;  %3749 = vmatprep.mubr.msk.bf16.mxu0 %vm306_vm0, %v4050_v5 }
  0xb0   : > { %3715 = vmatprep.mubr.msk.bf16.mxu1 %vm306_vm0, %v4044_v1 }
  0xb6   : > { %3750 = vmatmul.mubr.msk.bf16.vlgmr.msra.gmra.mxu0 %vm306_vm0, %v4086_v23 }
  0xb7   : > { %3716 = vmatmul.mubr.msk.bf16.vlgmr.msra.gmra.mxu1 %vm306_vm0, %v4052_v6  ;;  %3816 = vmatpush3.bf16.msra.mxu0 %v3868_v27 }
  0xb8   : > { %3782 = vmatpush3.bf16.msra.mxu1 %v3867_v26  ;;  %3719 = vmatprep.mubr.msk.bf16.mxu1 %vm306_vm0, %v4083_v10  ;;  %v3290_v26 = vld [vmem:[%s3925_s26 + $0x81] sm:$0xff] }
  0xb9   : > { %3753 = vmatprep.mubr.msk.bf16.mxu0 %vm306_vm0, %v4090_v25 }
  0xbe   : > { %3754 = vmatmul.mubr.msk.bf16.gmra.mxu0 %vm306_vm0, %v4110_v39 }
  0xbf   : > { %3720 = vmatmul.mubr.msk.bf16.gmra.mxu1 %vm306_vm0, %v4088_v24  ;;  %3757 = vmatprep.mubr.msk.bf16.mxu0 %vm306_vm0, %v4114_v41 }
  0xc0   : > { %3723 = vmatprep.mubr.msk.bf16.mxu1 %vm306_vm0, %v4108_v38 }
  0xc6   : > { %3758 = vmatmul.mubr.msk.bf16.gmra.mxu0 %vm306_vm0, %v4134_v57 }
  0xc7   : > { %3724 = vmatmul.mubr.msk.bf16.gmra.mxu1 %vm306_vm0, %v4112_v40  ;;  %3761 = vmatprep.mubr.msk.bf16.mxu0 %vm306_vm0, %v4138_v59 }
  0xc8   : > { %3727 = vmatprep.mubr.msk.bf16.mxu1 %vm306_vm0, %v4132_v54 }
  0xce   : > { %3762 = vmatmul.mubr.msk.bf16.gmra.mxu0 %vm306_vm0, %v4158_v14 }
  0xcf   : > { %3728 = vmatmul.mubr.msk.bf16.gmra.mxu1 %vm306_vm0, %v4136_v58  ;;  %3765 = vmatprep.mubr.msk.bf16.mxu0 %vm306_vm0, %v4162_v17  ;;  %v3262_v17 = vld [vmem:[%s3925_s26 + $0x198] sm:$0xff] }
  0xd0   : > { %3731 = vmatprep.mubr.msk.bf16.mxu1 %vm306_vm0, %v4156_v13  ;;  %v1972_v48 = vpack.c.bf16 %v3263_v28, %v3262_v17 }
  0xd6   : > { %v3547_v43 = vpop.f32.mrf.mxu0  ;;  %3766 = vmatmul.mubr.msk.bf16.gmra.mxu0 %vm306_vm0, %v4182_v36  ;;  %v3212_v36 = vld [vmem:[%s3925_s26 + $0x18a] sm:$0xff] }
  0xd7   : > { %v4347_v44 = vpop.f32.mrf.mxu1  ;;  %3732 = vmatmul.mubr.msk.bf16.gmra.mxu1 %vm306_vm0, %v4160_v15  ;;  %3769 = vmatprep.mubr.msk.bf16.mxu0 %vm306_vm0, %v4186_v42  ;;  %v4414_v50 = vpack.c.bf16 %v3212_v36, %v3211_v30 }
  0xd8   : > { %v4353_v45 = vpop.f32.mrf.mxu0  ;;  %3735 = vmatprep.mubr.msk.bf16.mxu1 %vm306_vm0, %v4180_v35 }
  0xd9   : > { %v4357_v46 = vpop.f32.mrf.mxu1 }
  0xda   : > { %v4359_v55 = vpop.f32.mrf.mxu0 }
  0xdb   : > { %v4361_v56 = vpop.f32.mrf.mxu1 }
  0xdc   : > { %v4363_v1 = vpop.f32.mrf.mxu0 }
  0xdd   : > { %v4365_v4 = vpop.f32.mrf.mxu1 }
  0xde   : > { %v4367_v5 = vpop.f32.mrf.mxu0  ;;  %3770 = vmatmul.mubr.msk.bf16.gmra.mxu0 %vm306_vm0, %v4206_v62 }
  0xdf   : > { %v4371_v7 = vpop.f32.mrf.mxu1  ;;  %3736 = vmatmul.mubr.msk.bf16.gmra.mxu1 %vm306_vm0, %v4184_v37  ;;  %3773 = vmatprep.mubr.msk.bf16.mxu0 %vm306_vm0, %v4210_v0 }
  0xe0   : > { %v4377_v8 = vpop.f32.mrf.mxu0  ;;  %3739 = vmatprep.mubr.msk.bf16.mxu1 %vm306_vm0, %v4204_v61 }
  0xe1   : > { %v4381_v23 = vpop.f32.mrf.mxu1 }
  0xe2   : > { %v4383_v25 = vpop.f32.mrf.mxu0 }
  0xe3   : > { %v4385_v39 = vpop.f32.mrf.mxu1 }
  0xe4   : > { %v4387_v41 = vpop.f32.mrf.mxu0 }
  0xe5   : > { %v4389_v57 = vpop.f32.mrf.mxu1 }
  0xe6   : > { %v4391_v59 = vpop.f32.mrf.mxu0  ;;  %3774 = vmatmul.mubr.msk.bf16.gmra.mxu0 %vm306_vm0, %v4226_v22  ;;  %v3289_v22 = vld [vmem:[%s3925_s26 + $0x79] sm:$0xff] }
  0xe7   : > { %v4395_v14 = vpop.f32.mrf.mxu1  ;;  %3740 = vmatmul.mubr.msk.bf16.gmra.mxu1 %vm306_vm0, %v4208_v63  ;;  %3777 = vmatprep.mubr.msk.bf16.mxu0 %vm306_vm0, %v1077_v34 }
  0xe8   : > { %v4402_v29 = vpop.f32.mrf.mxu0  ;;  %3743 = vmatprep.mubr.msk.bf16.mxu1 %vm306_vm0, %v4224_v19 }
  0xe9   : > { %v4408_v42 = vpop.f32.mrf.mxu1 }
  0xea   : > { %v4410_v47 = vpop.f32.mrf.mxu0 }
  0xeb   : > { %v4412_v49 = vpop.f32.mrf.mxu1 }
  0xec   : > { %v4416_v51 = vpop.f32.mrf.mxu0 }
  0xed   : > { %v4418_v52 = vpop.f32.mrf.mxu1 }
  0xee   : > { %v4420_v53 = vpop.f32.mrf.mxu0  ;;  %3778 = vmatmul.mubr.msk.bf16.gmra.mxu0 %vm306_vm0, %v1972_v48 }
  0xef   : > { %v4423_v60 = vpop.f32.mrf.mxu1  ;;  %3744 = vmatmul.mubr.msk.bf16.gmra.mxu1 %vm306_vm0, %v4414_v50  ;;  %3817 = vmatprep.mubr.msk.bf16.mxu0 %vm306_vm0, %v4052_v6 }
  0xf0   : > { %v4429_v62 = vpop.f32.mrf.mxu0  ;;  %3783 = vmatprep.mubr.msk.bf16.mxu1 %vm306_vm0, %v3955_v20 }
  0xf1   : > { %v4433_v63 = vpop.f32.mrf.mxu1 }
  0xf2   : > { %v4435_v0 = vpop.f32.mrf.mxu0 }
  0xf3   : > { %v4437_v2 = vpop.f32.mrf.mxu1 }
  0xf4   : > { %v4439_v3 = vpop.f32.mrf.mxu0 }
  0xf5   : > { %v4441_v9 = vpop.f32.mrf.mxu1 }
  0xf6   : > { %v3615_v6 = vpop.f32.mrf.mxu0  ;;  %3818 = vmatmul.mubr.msk.bf16.vlgmr.msra.gmra.mxu0 %vm306_vm0, %v4083_v10 }
  0xf7   : > { %v3581_v18 = vpop.f32.mrf.mxu1  ;;  %3784 = vmatmul.mubr.msk.bf16.vlgmr.msra.gmra.mxu1 %vm306_vm0, %v3979_v31  ;;  %3821 = vmatprep.mubr.msk.bf16.mxu0 %vm306_vm0, %v4088_v24  ;;  %v2258_v31 = vpack.c.bf16 %v3290_v26, %v3289_v22  ;;  %v3295_v22 = vld [vmem:[%s3925_s26 + $0xc1] sm:$0xff]  ;;  %v3296_v26 = vld [vmem:[%s3925_s26 + $0xc9] sm:$0xff] }
  0xf8   : > { %v613_v20 = vadd.f32 %v3581_v18, %v3547_v43  ;;  %v870_v19 = vpop.f32.mrf.mxu0  ;;  %3787 = vmatprep.mubr.msk.bf16.mxu1 %vm306_vm0, %v3984_v33  ;;  %v2259_v33 = vpack.c.bf16 %v3292_v12, %v3291_v11 }
  0xf9   : > { %v604_v27 = vpop.f32.mrf.mxu1 }
  0xfa   : > { %v4455_v16 = vadd.f32 %v3615_v6, %v613_v20  ;;  %v605_v10 = vadd.f32 %v604_v27, %v4353_v45  ;;  %v3616_v21 = vpop.f32.mrf.mxu0  ;;  %v3293_v20 = vld [vmem:[%s3925_s26 + $0xa9] sm:$0xff] }
  0xfb   : > { %v3582_v34 = vpop.f32.mrf.mxu1 }
  0xfc   : > { %v4458_v17 = vadd.f32 %v870_v19, %v605_v10  ;;  %v616_v24 = vadd.f32 %v3582_v34, %v4359_v55  ;;  %v873_v43 = vpop.f32.mrf.mxu0  ;;  %v3294_v19 = vld [vmem:[%s3925_s26 + $0xb1] sm:$0xff]  ;;  %v2261_v34 = vpack.c.bf16 %v3296_v26, %v3295_v22 }
  0xfd   : > { %v607_v28 = vpop.f32.mrf.mxu1  ;;  %v2260_v10 = vpack.c.bf16 %v3294_v19, %v3293_v20 }
  0xfe   : > { %v4461_v30 = vadd.f32 %v3616_v21, %v616_v24  ;;  %v608_v36 = vadd.f32 %v607_v28, %v4363_v1  ;;  %v3619_v48 = vpop.f32.mrf.mxu0  ;;  %3822 = vmatmul.mubr.msk.bf16.gmra.mxu0 %vm306_vm0, %v4108_v38 }
  0xff   : > { %v3585_v45 = vpop.f32.mrf.mxu1  ;;  %3788 = vmatmul.mubr.msk.bf16.gmra.mxu1 %vm306_vm0, %v2258_v31  ;;  %3825 = vmatprep.mubr.msk.bf16.mxu0 %vm306_vm0, %v4112_v40 }
 0x100   : > { %v4469_v55 = vadd.f32 %v873_v43, %v608_v36  ;;  %v629_v6 = vadd.f32 %v3585_v45, %v4367_v5  ;;  %v886_v18 = vpop.f32.mrf.mxu0  ;;  %3791 = vmatprep.mubr.msk.bf16.mxu1 %vm306_vm0, %v2259_v33  ;;  %v3298_v45 = vld [vmem:[%s3925_s26 + $0xe1] sm:$0xff] }
 0x101   : > { %v620_v1 = vpop.f32.mrf.mxu1 }
 0x102   : > { %v4477_v27 = vadd.f32 %v3619_v48, %v629_v6  ;;  %v621_v38 = vadd.f32 %v620_v1, %v4377_v8  ;;  %v3620_v11 = vpop.f32.mrf.mxu0  ;;  %v3297_v48 = vld [vmem:[%s3925_s26 + $0xd9] sm:$0xff]  ;;  %v3299_v6 = vld [vmem:[%s3925_s26 + $0xf1] sm:$0xff] }
 0x103   : > { %v3586_v12 = vpop.f32.mrf.mxu1  ;;  %v2262_v22 = vpack.c.bf16 %v3298_v45, %v3297_v48 }
 0x104   : > { %v4480_v40 = vadd.f32 %v886_v18, %v621_v38  ;;  %v632_v5 = vadd.f32 %v3586_v12, %v4383_v25  ;;  %v889_v21 = vpop.f32.mrf.mxu0  ;;  %v3300_v18 = vld [vmem:[%s3925_s26 + $0xf9] sm:$0xff] }
 0x105   : > { %v623_v31 = vpop.f32.mrf.mxu1  ;;  %v2263_v38 = vpack.c.bf16 %v3300_v18, %v3299_v6 }
 0x106   : > { %v4483_v24 = vadd.f32 %v3620_v11, %v632_v5  ;;  %v624_v43 = vadd.f32 %v623_v31, %v4387_v41  ;;  %v3623_v33 = vpop.f32.mrf.mxu0  ;;  %3826 = vmatmul.mubr.msk.bf16.gmra.mxu0 %vm306_vm0, %v4132_v54  ;;  %v3301_v31 = vld [vmem:[%s3925_s26 + $0x109] sm:$0xff] }
 0x107   : > { %v3589_v8 = vpop.f32.mrf.mxu1  ;;  %3792 = vmatmul.mubr.msk.bf16.gmra.mxu1 %vm306_vm0, %v2260_v10  ;;  %3829 = vmatprep.mubr.msk.bf16.mxu0 %vm306_vm0, %v4136_v58 }
 0x108   : > { %v4491_v25 = vadd.f32 %v889_v21, %v624_v43  ;;  %v645_v28 = vadd.f32 %v3589_v8, %v4391_v59  ;;  %v902_v36 = vpop.f32.mrf.mxu0  ;;  %3795 = vmatprep.mubr.msk.bf16.mxu1 %vm306_vm0, %v2261_v34  ;;  %v3302_v43 = vld [vmem:[%s3925_s26 + $0x111] sm:$0xff]  ;;  %v3304_v8 = vld [vmem:[%s3925_s26 + $0x129] sm:$0xff] }
 0x109   : > { %v636_v41 = vpop.f32.mrf.mxu1 }
 0x10a   : > { %v4499_v20 = vadd.f32 %v3623_v33, %v645_v28  ;;  %v637_v54 = vadd.f32 %v636_v41, %v4402_v29  ;;  %v3624_v19 = vpop.f32.mrf.mxu0  ;;  %v3303_v33 = vld [vmem:[%s3925_s26 + $0x121] sm:$0xff] }
 0x10b   : > { %v3590_v1 = vpop.f32.mrf.mxu1  ;;  %v2265_v6 = vpack.c.bf16 %v3304_v8, %v3303_v33 }
 0x10c   : > { %v4502_v58 = vadd.f32 %v902_v36, %v637_v54  ;;  %v648_v59 = vadd.f32 %v3590_v1, %v4410_v47  ;;  %v905_v26 = vpop.f32.mrf.mxu0 }
 0x10d   : > { %v639_v11 = vpop.f32.mrf.mxu1 }
 0x10e   : > { %v4505_v12 = vadd.f32 %v3624_v19, %v648_v59  ;;  %v640_v10 = vadd.f32 %v639_v11, %v4416_v51  ;;  %v3627_v5 = vpop.f32.mrf.mxu0  ;;  %3830 = vmatmul.mubr.msk.bf16.gmra.mxu0 %vm306_vm0, %v4156_v13  ;;  %v3359_v11 = vld [vmem:[%s3925_s26 + $0x15a] sm:$0xff] }
 0x10f   : > { %v3593_v29 = vpop.f32.mrf.mxu1  ;;  %3796 = vmatmul.mubr.msk.bf16.gmra.mxu1 %vm306_vm0, %v2262_v22  ;;  %3833 = vmatprep.mubr.msk.bf16.mxu0 %vm306_vm0, %v4160_v15  ;;  %v2264_v15 = vpack.c.bf16 %v3302_v43, %v3301_v31 }
 0x110   : > { %v4513_v47 = vadd.f32 %v905_v26, %v640_v10  ;;  %v661_v21 = vadd.f32 %v3593_v29, %v4420_v53  ;;  %v918_v34 = vpop.f32.mrf.mxu0  ;;  %3799 = vmatprep.mubr.msk.bf16.mxu1 %vm306_vm0, %v2263_v38  ;;  %v3358_v38 = vld [vmem:[%s3925_s26 + $0x152] sm:$0xff] }
 0x111   : > { %v652_v51 = vpop.f32.mrf.mxu1  ;;  %v2565_v43 = vpack.c.bf16 %v3359_v11, %v3358_v38 }
 0x112   : > { %v4521_v28 = vadd.f32 %v3627_v5, %v661_v21  ;;  %v653_v13 = vadd.f32 %v652_v51, %v4429_v62  ;;  %v3628_v36 = vpop.f32.mrf.mxu0  ;;  %v3307_v5 = vld [vmem:[%s3925_s26 + $0x151] sm:$0xff] }
 0x113   : > { %v3594_v48 = vpop.f32.mrf.mxu1 }
 0x114   : > { %v4524_v45 = vadd.f32 %v918_v34, %v653_v13  ;;  %v664_v53 = vadd.f32 %v3594_v48, %v4435_v0  ;;  %v921_v41 = vpop.f32.mrf.mxu0  ;;  %v3305_v0 = vld [vmem:[%s3925_s26 + $0x139] sm:$0xff] }
 0x115   : > { %v655_v18 = vpop.f32.mrf.mxu1 }
 0x116   : > { %v4527_v54 = vadd.f32 %v3628_v36, %v664_v53  ;;  %v656_v19 = vadd.f32 %v655_v18, %v4439_v3  ;;  %v3631_v62 = vpop.f32.mrf.mxu0  ;;  %3834 = vmatmul.mubr.msk.bf16.gmra.mxu0 %vm306_vm0, %v4180_v35  ;;  %v3306_v3 = vld [vmem:[%s3925_s26 + $0x141] sm:$0xff]  ;;  %v3308_v35 = vld [vmem:[%s3925_s26 + $0x159] sm:$0xff]  ;;  %v3360_v53 = vld [vmem:[%s3925_s26 + $0x16a] sm:$0xff] }
 0x117   : > { %v3597_v1 = vpop.f32.mrf.mxu1  ;;  %3800 = vmatmul.mubr.msk.bf16.gmra.mxu1 %vm306_vm0, %v2264_v15  ;;  %3837 = vmatprep.mubr.msk.bf16.mxu0 %vm306_vm0, %v4184_v37  ;;  %v2266_v31 = vpack.c.bf16 %v3306_v3, %v3305_v0  ;;  %v2267_v8 = vpack.c.bf16 %v3308_v35, %v3307_v5 }
 0x118   : > { %v4536_v22 = vadd.f32 %v921_v41, %v656_v19  ;;  %v677_v59 = vadd.f32 %v3597_v1, %v4347_v44  ;;  %v934_v26 = vpop.f32.mrf.mxu0  ;;  %3803 = vmatprep.mubr.msk.bf16.mxu1 %vm306_vm0, %v2265_v6  ;;  %v3309_v19 = vld [vmem:[%s3925_s26 + $0x169] sm:$0xff] }
 0x119   : > { %v668_v10 = vpop.f32.mrf.mxu1 }
 0x11a   : > { %v4545_v29 = vadd.f32 %v3631_v62, %v677_v59  ;;  %v669_v21 = vadd.f32 %v668_v10, %v4357_v46  ;;  %v3632_v34 = vpop.f32.mrf.mxu0 }
 0x11b   : > { %v3598_v37 = vpop.f32.mrf.mxu1 }
 0x11c   : > { %v4548_v44 = vadd.f32 %v934_v26, %v669_v21  ;;  %v680_v51 = vadd.f32 %v3598_v37, %v4361_v56  ;;  %v937_v33 = vpop.f32.mrf.mxu0  ;;  %v3361_v56 = vld [vmem:[%s3925_s26 + $0x172] sm:$0xff]  ;;  %v3365_v37 = vld [vmem:[%s3925_s26 + $0x1a2] sm:$0xff] }
 0x11d   : > { %v671_v13 = vpop.f32.mrf.mxu1  ;;  %v2566_v59 = vpack.c.bf16 %v3361_v56, %v3360_v53 }
 0x11e   : > { %v4551_v36 = vadd.f32 %v3632_v34, %v680_v51  ;;  %v672_v48 = vadd.f32 %v671_v13, %v4365_v4  ;;  %v3635_v46 = vpop.f32.mrf.mxu0  ;;  %3838 = vmatmul.mubr.msk.bf16.gmra.mxu0 %vm306_vm0, %v4204_v61  ;;  %v3310_v4 = vld [vmem:[%s3925_s26 + $0x171] sm:$0xff]  ;;  %v3364_v34 = vld [vmem:[%s3925_s26 + $0x19a] sm:$0xff] }
 0x11f   : > { %v3601_v15 = vpop.f32.mrf.mxu1  ;;  %3804 = vmatmul.mubr.msk.bf16.gmra.mxu1 %vm306_vm0, %v2266_v31  ;;  %3841 = vmatprep.mubr.msk.bf16.mxu0 %vm306_vm0, %v2565_v43  ;;  %v2268_v3 = vpack.c.bf16 %v3310_v4, %v3309_v19  ;;  %v3314_v51 = vld [vmem:[%s3925_s26 + $0x1a1] sm:$0xff] }
 0x120   : > { %v4560_v41 = vadd.f32 %v937_v33, %v672_v48  ;;  %v693_v6 = vadd.f32 %v3601_v15, %v4371_v7  ;;  %v950_v18 = vpop.f32.mrf.mxu0  ;;  %3807 = vmatprep.mubr.msk.bf16.mxu1 %vm306_vm0, %v2267_v8 }
 0x121   : > { %v684_v62 = vpop.f32.mrf.mxu1 }
 0x122   : > { %v4566_v1 = vadd.f32 %v3635_v46, %v693_v6  ;;  %v685_v61 = vadd.f32 %v684_v62, %v4381_v23  ;;  %v3636_v0 = vpop.f32.mrf.mxu0  ;;  %v2568_v46 = vpack.c.bf16 %v3365_v37, %v3364_v34 }
 0x123   : > { %v3602_v26 = vpop.f32.mrf.mxu1 }
 0x124   : > { %v4569_v38 = vadd.f32 %v950_v18, %v685_v61  ;;  %v696_v7 = vadd.f32 %v3602_v26, %v4385_v39  ;;  %v953_v11 = vpop.f32.mrf.mxu0 }
 0x125   : > { %v687_v10 = vpop.f32.mrf.mxu1 }
 0x126   : > { %v4572_v5 = vadd.f32 %v3636_v0, %v696_v7  ;;  %v688_v35 = vadd.f32 %v687_v10, %v4389_v57  ;;  %v3639_v21 = vpop.f32.mrf.mxu0  ;;  %3842 = vmatmul.mubr.msk.bf16.gmra.mxu0 %vm306_vm0, %v2566_v59  ;;  %v3313_v57 = vld [vmem:[%s3925_s26 + $0x199] sm:$0xff] }
 0x127   : > { %v3605_v23 = vpop.f32.mrf.mxu1  ;;  %3808 = vmatmul.mubr.msk.bf16.gmra.mxu1 %vm306_vm0, %v2268_v3  ;;  %3845 = vmatprep.mubr.msk.bf16.mxu0 %vm306_vm0, %v4414_v50  ;;  %v2270_v15 = vpack.c.bf16 %v3314_v51, %v3313_v57 }
 0x128   : > { %v4581_v39 = vadd.f32 %v953_v11, %v688_v35  ;;  %v709_v31 = vadd.f32 %v3605_v23, %v4395_v14  ;;  %v966_v43 = vpop.f32.mrf.mxu0  ;;  %3811 = vmatprep.mubr.msk.bf16.mxu1 %vm306_vm0, %v4304_v32 }
 0x129   : > { %v700_v33 = vpop.f32.mrf.mxu1 }
 0x12a   : > { %v4588_v8 = vadd.f32 %v3639_v21, %v709_v31  ;;  %v701_v13 = vadd.f32 %v700_v33, %v4408_v42  ;;  %v3640_v48 = vpop.f32.mrf.mxu0 }
 0x12b   : > { %v3606_v50 = vpop.f32.mrf.mxu1 }
 0x12c   : > { %v4591_v53 = vadd.f32 %v966_v43, %v701_v13  ;;  %v712_v56 = vadd.f32 %v3606_v50, %v4412_v49  ;;  %v969_v14 = vpop.f32.mrf.mxu0 }
 0x12d   : > { %v703_v6 = vpop.f32.mrf.mxu1 }
 0x12e   : > { %v4594_v18 = vadd.f32 %v3640_v48, %v712_v56  ;;  %v704_v32 = vadd.f32 %v703_v6, %v4418_v52  ;;  %v3643_v19 = vpop.f32.mrf.mxu0  ;;  %3846 = vmatmul.mubr.msk.bf16.gmra.mxu0 %vm306_vm0, %v2568_v46 }
 0x12f   : > { %v3609_v4 = vpop.f32.mrf.mxu1  ;;  %3812 = vmatmul.mubr.msk.bf16.gmra.mxu1 %vm306_vm0, %v2270_v15 }
 0x130   : > { %v4599_v42 = vadd.f32 %v969_v14, %v704_v32  ;;  %v725_v62 = vadd.f32 %v3609_v4, %v4423_v60  ;;  %v982_v61 = vpop.f32.mrf.mxu0 }
 0x131   : > { %v716_v0 = vpop.f32.mrf.mxu1 }
 0x132   : > { %v4602_v59 = vadd.f32 %v3643_v19, %v725_v62  ;;  %v717_v49 = vadd.f32 %v716_v0, %v4433_v63  ;;  %v3644_v26 = vpop.f32.mrf.mxu0 }
 0x133   : > { %v3610_v3 = vpop.f32.mrf.mxu1 }
 0x134   : > { %v4605_v7 = vadd.f32 %v982_v61, %v717_v49  ;;  %v728_v52 = vadd.f32 %v3610_v3, %v4437_v2  ;;  %v985_v11 = vpop.f32.mrf.mxu0 }
 0x135   : > { %v719_v10 = vpop.f32.mrf.mxu1 }
 0x136   : > { %v4608_v35 = vadd.f32 %v3644_v26, %v728_v52  ;;  %v720_v21 = vadd.f32 %v719_v10, %v4441_v9  ;;  %v3683_v23 = vpop.f32.mrf.mxu0 }
 0x137   : > { %v3649_v60 = vpop.f32.mrf.mxu1 }
 0x138   : > { %v4611_v34 = vadd.f32 %v985_v11, %v720_v21  ;;  %v1298_v37 = vadd.f32 %v3649_v60, %v4455_v16  ;;  %v1467_v31 = vpop.f32.mrf.mxu0 }
 0x139   : > { %v1169_v63 = vpop.f32.mrf.mxu1 }
 0x13a   : > { %v4614_v43 = vadd.f32 %v3683_v23, %v1298_v37  ;;  %v1296_v57 = vadd.f32 %v1169_v63, %v4458_v17  ;;  %v3684_v51 = vpop.f32.mrf.mxu0 }
 0x13b   : > { %v3650_v2 = vpop.f32.mrf.mxu1 }
 0x13c   : > { %v4617_v33 = vadd.f32 %v1467_v31, %v1296_v57  ;;  %v1299_v13 = vadd.f32 %v3650_v2, %v4461_v30  ;;  %v1470_v48 = vpop.f32.mrf.mxu0 }
 0x13d   : > { %v1172_v9 = vpop.f32.mrf.mxu1 }
 0x13e   : > { %v4620_v46 = vadd.f32 %v3684_v51, %v1299_v13  ;;  %v1297_v50 = vadd.f32 %v1172_v9, %v4469_v55  ;;  %v3687_v15 = vpop.f32.mrf.mxu0 }
 0x13f   : > { %v3653_v16 = vpop.f32.mrf.mxu1 }
 0x140   : > { %v4623_v56 = vadd.f32 %v1470_v48, %v1297_v50  ;;  %v1302_v14 = vadd.f32 %v3653_v16, %v4477_v27  ;;  %v1483_v6 = vpop.f32.mrf.mxu0 }
 0x141   : > { %v1185_v17 = vpop.f32.mrf.mxu1 }
 0x142   : > { %v4626_v32 = vadd.f32 %v3687_v15, %v1302_v14  ;;  %v1300_v19 = vadd.f32 %v1185_v17, %v4480_v40  ;;  %v3688_v4 = vpop.f32.mrf.mxu0 }
 0x143   : > { %v3654_v30 = vpop.f32.mrf.mxu1 }
 0x144   : > { %v4629_v62 = vadd.f32 %v1483_v6, %v1300_v19  ;;  %v1303_v61 = vadd.f32 %v3654_v30, %v4483_v24  ;;  %v1486_v0 = vpop.f32.mrf.mxu0 }
 0x145   : > { %v1188_v55 = vpop.f32.mrf.mxu1 }
 0x146   : > { %v4632_v49 = vadd.f32 %v3688_v4, %v1303_v61  ;;  %v1301_v26 = vadd.f32 %v1188_v55, %v4491_v25  ;;  %v3691_v3 = vpop.f32.mrf.mxu0 }
 0x147   : > { %v3657_v27 = vpop.f32.mrf.mxu1 }
 0x148   : > { %v4635_v52 = vadd.f32 %v1486_v0, %v1301_v26  ;;  %v1306_v11 = vadd.f32 %v3657_v27, %v4499_v20  ;;  %v1499_v10 = vpop.f32.mrf.mxu0 }
 0x149   : > { %v1201_v40 = vpop.f32.mrf.mxu1 }
 0x14a   : > { %v4638_v21 = vadd.f32 %v3691_v3, %v1306_v11  ;;  %v1304_v23 = vadd.f32 %v1201_v40, %v4502_v58  ;;  %v3692_v60 = vpop.f32.mrf.mxu0 }
 0x14b   : > { %v3658_v24 = vpop.f32.mrf.mxu1 }
 0x14c   : > { %v4641_v37 = vadd.f32 %v1499_v10, %v1304_v23  ;;  %v1307_v31 = vadd.f32 %v3658_v24, %v4505_v12  ;;  %v1502_v63 = vpop.f32.mrf.mxu0 }
 0x14d   : > { %v1204_v25 = vpop.f32.mrf.mxu1 }
 0x14e   : > { %v4644_v57 = vadd.f32 %v3692_v60, %v1307_v31  ;;  %v1305_v51 = vadd.f32 %v1204_v25, %v4513_v47  ;;  %v3695_v2 = vpop.f32.mrf.mxu0 }
 0x14f   : > { %v3661_v20 = vpop.f32.mrf.mxu1 }
 0x150   : > { %v4647_v13 = vadd.f32 %v1502_v63, %v1305_v51  ;;  %v1310_v48 = vadd.f32 %v3661_v20, %v4521_v28  ;;  %v1515_v9 = vpop.f32.mrf.mxu0 }
 0x151   : > { %v1217_v58 = vpop.f32.mrf.mxu1 }
 0x152   : > { %v4650_v50 = vadd.f32 %v3695_v2, %v1310_v48  ;;  %v1308_v15 = vadd.f32 %v1217_v58, %v4524_v45  ;;  %v3696_v16 = vpop.f32.mrf.mxu0 }
 0x153   : > { %v3662_v12 = vpop.f32.mrf.mxu1 }
 0x154   : > { %v4653_v14 = vadd.f32 %v1515_v9, %v1308_v15  ;;  %v1311_v6 = vadd.f32 %v3662_v12, %v4527_v54  ;;  %v1518_v17 = vpop.f32.mrf.mxu0 }
 0x155   : > { %v1220_v47 = vpop.f32.mrf.mxu1 }
 0x156   : > { %v4656_v19 = vadd.f32 %v3696_v16, %v1311_v6  ;;  %v1309_v4 = vadd.f32 %v1220_v47, %v4536_v22  ;;  %v3699_v30 = vpop.f32.mrf.mxu0 }
 0x157   : > { %v3665_v28 = vpop.f32.mrf.mxu1 }
 0x158   : > { %v4659_v61 = vadd.f32 %v1518_v17, %v1309_v4  ;;  %v1314_v0 = vadd.f32 %v3665_v28, %v4545_v29  ;;  %v1531_v55 = vpop.f32.mrf.mxu0 }
 0x159   : > { %v1233_v45 = vpop.f32.mrf.mxu1 }
 0x15a   : > { %v4662_v26 = vadd.f32 %v3699_v30, %v1314_v0  ;;  %v1312_v3 = vadd.f32 %v1233_v45, %v4548_v44  ;;  %v3700_v27 = vpop.f32.mrf.mxu0 }
 0x15b   : > { %v3666_v54 = vpop.f32.mrf.mxu1 }
 0x15c   : > { %v4665_v11 = vadd.f32 %v1531_v55, %v1312_v3  ;;  %v1315_v10 = vadd.f32 %v3666_v54, %v4551_v36  ;;  %v1534_v40 = vpop.f32.mrf.mxu0 }
 0x15d   : > { %v1236_v22 = vpop.f32.mrf.mxu1 }
 0x15e   : > { %v4668_v23 = vadd.f32 %v3700_v27, %v1315_v10  ;;  %v1313_v60 = vadd.f32 %v1236_v22, %v4560_v41  ;;  %v3703_v24 = vpop.f32.mrf.mxu0 }
 0x15f   : > { %v3669_v29 = vpop.f32.mrf.mxu1 }
 0x160   : > { %5076 = vst [vmem:[#allocation2_spill] sm:$0xff] %v4668_v23  ;;  %v4671_v31 = vadd.f32 %v1534_v40, %v1313_v60  ;;  %v1318_v63 = vadd.f32 %v3669_v29, %v4566_v1  ;;  %v1547_v25 = vpop.f32.mrf.mxu0 }
 0x161   : > { %v1249_v44 = vpop.f32.mrf.mxu1 }
 0x162   : > { %5077 = vst [vmem:[#allocation3_spill] sm:$0xff] %v4671_v31  ;;  %v4674_v51 = vadd.f32 %v3703_v24, %v1318_v63  ;;  %v1316_v2 = vadd.f32 %v1249_v44, %v4569_v38  ;;  %v3704_v20 = vpop.f32.mrf.mxu0 }
 0x163   : > { %v3670_v36 = vpop.f32.mrf.mxu1 }
 0x164   : > { %5078 = vst [vmem:[#allocation4_spill] sm:$0xff] %v4674_v51  ;;  %v4677_v48 = vadd.f32 %v1547_v25, %v1316_v2  ;;  %v1319_v9 = vadd.f32 %v3670_v36, %v4572_v5  ;;  %v1550_v58 = vpop.f32.mrf.mxu0 }
 0x165   : > { %v1252_v41 = vpop.f32.mrf.mxu1 }
 0x166   : > { %5079 = vst [vmem:[#allocation5_spill] sm:$0xff] %v4677_v48  ;;  %v4680_v15 = vadd.f32 %v3704_v20, %v1319_v9  ;;  %v1317_v16 = vadd.f32 %v1252_v41, %v4581_v39  ;;  %v3707_v12 = vpop.f32.mrf.mxu0 }
 0x167   : > { %v3673_v1 = vpop.f32.mrf.mxu1 }
 0x168   : > { %5080 = vst [vmem:[#allocation6_spill] sm:$0xff] %v4680_v15  ;;  %v4683_v6 = vadd.f32 %v1550_v58, %v1317_v16  ;;  %v1322_v17 = vadd.f32 %v3673_v1, %v4588_v8  ;;  %v1563_v47 = vpop.f32.mrf.mxu0 }
 0x169   : > { %v1265_v38 = vpop.f32.mrf.mxu1 }
 0x16a   : > { %5081 = vst [vmem:[#allocation7_spill] sm:$0xff] %v4683_v6  ;;  %v4686_v4 = vadd.f32 %v3707_v12, %v1322_v17  ;;  %v1320_v30 = vadd.f32 %v1265_v38, %v4591_v53  ;;  %v3708_v28 = vpop.f32.mrf.mxu0 }
 0x16b   : > { %v3674_v5 = vpop.f32.mrf.mxu1 }
 0x16c   : > { %5082 = vst [vmem:[#allocation8_spill] sm:$0xff] %v4686_v4  ;;  %v4689_v0 = vadd.f32 %v1563_v47, %v1320_v30  ;;  %v1323_v55 = vadd.f32 %v3674_v5, %v4594_v18  ;;  %v1566_v45 = vpop.f32.mrf.mxu0 }
 0x16d   : > { %v1268_v39 = vpop.f32.mrf.mxu1 }
 0x16e   : > { %5083 = vst [vmem:[#allocation9_spill] sm:$0xff] %v4689_v0  ;;  %v4692_v3 = vadd.f32 %v3708_v28, %v1323_v55  ;;  %v1321_v27 = vadd.f32 %v1268_v39, %v4599_v42  ;;  %v3711_v54 = vpop.f32.mrf.mxu0 }
 0x16f   : > { %v3677_v8 = vpop.f32.mrf.mxu1 }
 0x170   : > { %5084 = vst [vmem:[#allocation10_spill] sm:$0xff] %v4692_v3  ;;  %v4695_v10 = vadd.f32 %v1566_v45, %v1321_v27  ;;  %v1326_v40 = vadd.f32 %v3677_v8, %v4602_v59  ;;  %v1579_v22 = vpop.f32.mrf.mxu0 }
 0x171   : > { %v1281_v53 = vpop.f32.mrf.mxu1 }
 0x172   : > { %5085 = vst [vmem:[#allocation11_spill] sm:$0xff] %v4695_v10  ;;  %v4698_v60 = vadd.f32 %v3711_v54, %v1326_v40  ;;  %v1324_v24 = vadd.f32 %v1281_v53, %v4605_v7  ;;  %v3712_v29 = vpop.f32.mrf.mxu0 }
 0x173   : > { %v3678_v18 = vpop.f32.mrf.mxu1 }
 0x174   : > { %5086 = vst [vmem:[#allocation12_spill] sm:$0xff] %v4698_v60  ;;  %v4701_v63 = vadd.f32 %v1579_v22, %v1324_v24  ;;  %v1327_v25 = vadd.f32 %v3678_v18, %v4608_v35  ;;  %v1582_v44 = vpop.f32.mrf.mxu0 }
 0x175   : > { %v1284_v42 = vpop.f32.mrf.mxu1 }
 0x176   : > { %5087 = vst [vmem:[#allocation13_spill] sm:$0xff] %v4701_v63  ;;  %v4704_v2 = vadd.f32 %v3712_v29, %v1327_v25  ;;  %v1325_v20 = vadd.f32 %v1284_v42, %v4611_v34  ;;  %v4707_v36 = vpop.f32.mrf.mxu0 }
 0x177   : > { %v3717_v59 = vpop.f32.mrf.mxu1 }
 0x178   : > { %5088 = vst [vmem:[#allocation14_spill] sm:$0xff] %v4704_v2  ;;  %v4709_v9 = vadd.f32 %v1582_v44, %v1325_v20  ;;  %v4711_v58 = vpop.f32.mrf.mxu0 }
 0x179   : > { %v1765_v7 = vpop.f32.mrf.mxu1 }
 0x17a   : > { %5089 = vst [vmem:[#allocation15_spill] sm:$0xff] %v4709_v9  ;;  %v4713_v41 = vpop.f32.mrf.mxu0 }
 0x17b   : > { %v3718_v16 = vpop.f32.mrf.mxu1 }
 0x17c   : > { %v4715_v12 = vpop.f32.mrf.mxu0 }
 0x17d   : > { %v4717_v35 = vpop.f32.mrf.mxu1 }
 0x17e   : > { %v4719_v1 = vpop.f32.mrf.mxu0 }
 0x17f   : > { %v4721_v17 = vpop.f32.mrf.mxu1 }
 0x180   : > { %v4723_v34 = vpop.f32.mrf.mxu0 }
 0x181   : > { %v4725_v47 = vpop.f32.mrf.mxu1 }
 0x182   : > { %v4727_v38 = vpop.f32.mrf.mxu0 }
 0x183   : > { %v4729_v30 = vpop.f32.mrf.mxu1 }
 0x184   : > { %v4731_v28 = vpop.f32.mrf.mxu0 }
 0x185   : > { %v4733_v5 = vpop.f32.mrf.mxu1 }
 0x186   : > { %v4735_v55 = vpop.f32.mrf.mxu0 }
 0x187   : > { %v4737_v45 = vpop.f32.mrf.mxu1 }
 0x188   : > { %v4739_v39 = vpop.f32.mrf.mxu0 }
 0x189   : > { %v4741_v27 = vpop.f32.mrf.mxu1 }
 0x18a   : > { %v4743_v54 = vpop.f32.mrf.mxu0 }
 0x18b   : > { %v4745_v8 = vpop.f32.mrf.mxu1 }
 0x18c   : > { %v4747_v40 = vpop.f32.mrf.mxu0 }
 0x18d   : > { %v4749_v22 = vpop.f32.mrf.mxu1 }
 0x18e   : > { %v4751_v53 = vpop.f32.mrf.mxu0 }
 0x18f   : > { %v4753_v24 = vpop.f32.mrf.mxu1 }
 0x190   : > { %v4755_v29 = vpop.f32.mrf.mxu0 }
 0x191   : > { %v4757_v18 = vpop.f32.mrf.mxu1 }
 0x192   : > { %v4759_v25 = vpop.f32.mrf.mxu0 }
 0x193   : > { %v4761_v44 = vpop.f32.mrf.mxu1 }
 0x194   : > { %v4763_v42 = vpop.f32.mrf.mxu0 }
 0x195   : > { %v4765_v20 = vpop.f32.mrf.mxu1 }
 0x196   : > { %v4767_v9 = vpop.f32.mrf.mxu0 }
 0x197   : > { %v4769_v2 = vpop.f32.mrf.mxu1 }
 0x198   : > { %v4771_v63 = vpop.f32.mrf.mxu0 }
 0x199   : > { %5090 = vst [vmem:[#allocation16_spill] sm:$0xff] %v4771_v63  ;;  %v4773_v60 = vpop.f32.mrf.mxu1 }
 0x19a   : > { %v4775_v10 = vpop.f32.mrf.mxu0 }
 0x19b   : > { %5091 = vst [vmem:[#allocation17_spill] sm:$0xff] %v4775_v10  ;;  %v4777_v3 = vpop.f32.mrf.mxu1 }
 0x19c   : > { %5092 = vst [vmem:[#allocation18_spill] sm:$0xff] %v4777_v3  ;;  %v4779_v0 = vpop.f32.mrf.mxu0 }
 0x19d   : > { %5093 = vst [vmem:[#allocation19_spill] sm:$0xff] %v4779_v0  ;;  %v4781_v4 = vpop.f32.mrf.mxu1 }
 0x19e   : > { %5094 = vst [vmem:[#allocation20_spill] sm:$0xff] %v4781_v4  ;;  %v4783_v6 = vpop.f32.mrf.mxu0 }
 0x19f   : > { %5095 = vst [vmem:[#allocation21_spill] sm:$0xff] %v4783_v6  ;;  %v4785_v15 = vpop.f32.mrf.mxu1 }
 0x1a0   : > { %5096 = vst [vmem:[#allocation22_spill] sm:$0xff] %v4785_v15  ;;  %v4787_v48 = vpop.f32.mrf.mxu0 }
 0x1a1   : > { %5097 = vst [vmem:[#allocation23_spill] sm:$0xff] %v4787_v48  ;;  %v4789_v51 = vpop.f32.mrf.mxu1 }
 0x1a2   : > { %5098 = vst [vmem:[#allocation24_spill] sm:$0xff] %v4789_v51  ;;  %v4791_v31 = vpop.f32.mrf.mxu0 }
 0x1a3   : > { %5099 = vst [vmem:[#allocation25_spill] sm:$0xff] %v4791_v31  ;;  %v4793_v63 = vpop.f32.mrf.mxu1 }
 0x1a4   : > { %5100 = vst [vmem:[#allocation26_spill] sm:$0xff] %v4793_v63  ;;  %v4795_v23 = vpop.f32.mrf.mxu0 }
 0x1a5   : > { %5101 = vst [vmem:[#allocation27_spill] sm:$0xff] %v4795_v23  ;;  %v4797_v10 = vpop.f32.mrf.mxu1 }
 0x1a6   : > { %5102 = vst [vmem:[#allocation28_spill] sm:$0xff] %v4797_v10  ;;  %v4799_v3 = vpop.f32.mrf.mxu0 }
 0x1a7   : > { %5103 = vst [vmem:[#allocation29_spill] sm:$0xff] %v4799_v3  ;;  %v4801_v0 = vpop.f32.mrf.mxu1 }
 0x1a8   : > { %5104 = vst [vmem:[#allocation30_spill] sm:$0xff] %v4801_v0  ;;  %v4803_v4 = vpop.f32.mrf.mxu0 }
 0x1a9   : > { %5105 = vst [vmem:[#allocation31_spill] sm:$0xff] %v4803_v4  ;;  %v4805_v6 = vpop.f32.mrf.mxu1  ;;  %v1894_v4 = vadd.f32 %v3717_v59, %v4614_v43  ;;  %v1893_v43 = vadd.f32 %v4717_v35, %v4623_v56  ;;  %v4851_v56 = vld [vmem:[%s5074_s3] ss:$0 sm:$0xff] }
 0x1aa   : > { %5106 = vst [vmem:[#allocation32_spill] sm:$0xff] %v4805_v6  ;;  %v4807_v15 = vpop.f32.mrf.mxu0 }
 0x1ab   : > { %5107 = vst [vmem:[#allocation33_spill] sm:$0xff] %v4807_v15  ;;  %v4809_v48 = vpop.f32.mrf.mxu1  ;;  %v1892_v15 = vadd.f32 %v1765_v7, %v4617_v33  ;;  %v4841_v33 = vld [vmem:[%s5073_s2] ss:$0 sm:$0xff] }
 0x1ac   : > { %5108 = vst [vmem:[#allocation34_spill] sm:$0xff] %v4809_v48  ;;  %v4811_v51 = vpop.f32.mrf.mxu0 }
 0x1ad   : > { %5109 = vst [vmem:[#allocation35_spill] sm:$0xff] %v4811_v51  ;;  %v4813_v31 = vpop.f32.mrf.mxu1 }
 0x1ae   : > { %5110 = vst [vmem:[#allocation36_spill] sm:$0xff] %v4813_v31  ;;  %v4815_v63 = vpop.f32.mrf.mxu0 }
 0x1af   : > { %5111 = vst [vmem:[#allocation37_spill] sm:$0xff] %v4815_v63  ;;  %v4817_v23 = vpop.f32.mrf.mxu1  ;;  %v2193_v63 = vadd.f32 %v4707_v36, %v1894_v4 }
 0x1b0   : > { %5112 = vst [vmem:[#allocation38_spill] sm:$0xff] %v4817_v23  ;;  %v4819_v10 = vpop.f32.mrf.mxu0  ;;  %v1895_v23 = vadd.f32 %v3718_v16, %v4620_v46 }
 0x1b1   : > { %5113 = vst [vmem:[#allocation39_spill] sm:$0xff] %v4819_v10  ;;  %v4821_v3 = vpop.f32.mrf.mxu1 }
 0x1b2   : > { %5114 = vst [vmem:[#allocation40_spill] sm:$0xff] %v4821_v3  ;;  %v4824_v0 = vpop.f32.mrf.mxu0  ;;  %v2191_v3 = vadd.f32 %v4711_v58, %v1892_v15  ;;  %v2194_v4 = vadd.f32 %v4713_v41, %v1895_v23  ;;  %v1896_v15 = vadd.f32 %v4725_v47, %v4629_v62 }
 0x1b3   : > { %5115 = vst [vmem:[#allocation41_spill] sm:$0xff] %v4824_v0  ;;  %v4826_v6 = vpop.f32.mrf.mxu1 }
 0x1b4   : > { %v4829_v48 = vpop.f32.mrf.mxu0 }
 0x1b5   : > { %5116 = vst [vmem:[#allocation42_spill] sm:$0xff] %v4829_v48  ;;  %v4831_v51 = vpop.f32.mrf.mxu1  ;;  %v1898_v48 = vadd.f32 %v4721_v17, %v4626_v32  ;;  %v1899_v32 = vadd.f32 %v4729_v30, %v4632_v49 }
 0x1b6   : > { %v3819_v31 = vpop.f32.mrf.mxu0 }
 0x1b7   : > { %v3785_v10 = vpop.f32.mrf.mxu1 }
 0x1b8   : > { %v2491_v59 = vadd.f32 %v3785_v10, %v2193_v63  ;;  %v2660_v0 = vpop.f32.mrf.mxu0  ;;  %v2192_v63 = vadd.f32 %v4715_v12, %v1893_v43  ;;  %v2195_v12 = vadd.f32 %v4723_v34, %v1896_v15 }
 0x1b9   : > { %v2362_v7 = vpop.f32.mrf.mxu1 }
 0x1ba   : > { %v2789_v36 = vadd.f32 %v3819_v31, %v2491_v59  ;;  %v2489_v46 = vadd.f32 %v2362_v7, %v2191_v3  ;;  %v3820_v16 = vpop.f32.mrf.mxu0  ;;  %v2197_v7 = vadd.f32 %v4719_v1, %v1898_v48  ;;  %v2198_v1 = vadd.f32 %v4727_v38, %v1899_v32 }
 0x1bb   : > { %v3786_v10 = vpop.f32.mrf.mxu1 }
 0x1bc   : > { %v2828_v23 = vmul.f32 %v4841_v33, %v2789_v36  ;;  %v2787_v31 = vadd.f32 %v2660_v0, %v2489_v46  ;;  %v2492_v3 = vadd.f32 %v3786_v10, %v2194_v4  ;;  %v2663_v58 = vpop.f32.mrf.mxu0  ;;  %v1897_v0 = vadd.f32 %v4733_v5, %v4635_v52 }
 0x1bd   : > { %v2365_v41 = vpop.f32.mrf.mxu1  ;;  %v1902_v52 = vadd.f32 %v4737_v45, %v4638_v21 }
 0x1be   : > { %v2867_v62 = vadd.f32 %v4851_v56, %v2828_v23  ;;  %v2826_v35 = vmul.f32 %v4841_v33, %v2787_v31  ;;  %v2790_v17 = vadd.f32 %v3820_v16, %v2492_v3  ;;  %v2490_v47 = vadd.f32 %v2365_v41, %v2192_v63  ;;  %v3823_v59 = vpop.f32.mrf.mxu0 }
 0x1bf   : > { %v3789_v49 = vpop.f32.mrf.mxu1  ;;  %v2196_v23 = vadd.f32 %v4731_v28, %v1897_v0  ;;  %v2201_v41 = vadd.f32 %v4735_v55, %v1902_v52  ;;  %v1901_v55 = vadd.f32 %v4749_v22, %v4647_v13  ;;  %v1906_v13 = vadd.f32 %v4753_v24, %v4650_v50 }
 0x1c0   : > { %v2899_v30 = vmax.f32 %v2867_v62, 0.0  ;;  %v2865_v43 = vadd.f32 %v4851_v56, %v2826_v35  ;;  %v2829_v4 = vmul.f32 %v4841_v33, %v2790_v17  ;;  %v2788_v36 = vadd.f32 %v2663_v58, %v2490_v47  ;;  %v2676_v48 = vpop.f32.mrf.mxu0 }
 0x1c1   : > { %v2495_v34 = vadd.f32 %v3789_v49, %v2197_v7  ;;  %v2378_v5 = vpop.f32.mrf.mxu1  ;;  %v1900_v62 = vadd.f32 %v4741_v27, %v4641_v37  ;;  %v1903_v35 = vadd.f32 %v4745_v8, %v4644_v57 }
 0x1c2   : > { %2931 = vst.msk [vmem:[%s4867_s21 + $0x10] sm:$0xff] %vm306_vm0, %v2899_v30  ;;  %v2897_v46 = vmax.f32 %v2865_v43, 0.0  ;;  %v2868_v16 = vadd.f32 %v4851_v56, %v2829_v4  ;;  %v2827_v15 = vmul.f32 %v4841_v33, %v2788_v36  ;;  %v2493_v10 = vadd.f32 %v2378_v5, %v2195_v12  ;;  %v3824_v63 = vpop.f32.mrf.mxu0 }
 0x1c3   : > { %v2793_v31 = vadd.f32 %v3823_v59, %v2495_v34  ;;  %v3790_v3 = vpop.f32.mrf.mxu1  ;;  %v2199_v4 = vadd.f32 %v4739_v39, %v1900_v62  ;;  %v2202_v36 = vadd.f32 %v4743_v54, %v1903_v35  ;;  %v1904_v39 = vadd.f32 %v4757_v18, %v4653_v14 }
 0x1c4   : > { %2929 = vst.msk [vmem:[%s4867_s21] sm:$0xff] %vm306_vm0, %v2897_v46  ;;  %v2900_v38 = vmax.f32 %v2868_v16, 0.0  ;;  %v2866_v21 = vadd.f32 %v4851_v56, %v2827_v15  ;;  %v2791_v45 = vadd.f32 %v2676_v48, %v2493_v10  ;;  %v2496_v58 = vadd.f32 %v3790_v3, %v2198_v1  ;;  %v2679_v32 = vpop.f32.mrf.mxu0 }
 0x1c5   : > { %v2832_v28 = vmul.f32 %v4841_v33, %v2793_v31  ;;  %v2381_v17 = vpop.f32.mrf.mxu1  ;;  %v2200_v16 = vadd.f32 %v4747_v40, %v1901_v55  ;;  %v2205_v31 = vadd.f32 %v4751_v53, %v1906_v13  ;;  %v5118_v13 = vld [vmem:[#allocation18_spill] sm:$0xff] }
 0x1c6   : > { %2932 = vst.msk [vmem:[%s4867_s21 + $0x18] sm:$0xff] %vm306_vm0, %v2900_v38  ;;  %v2898_v47 = vmax.f32 %v2866_v21, 0.0  ;;  %v2830_v59 = vmul.f32 %v4841_v33, %v2791_v45  ;;  %v2794_v7 = vadd.f32 %v3824_v63, %v2496_v58  ;;  %v2494_v12 = vadd.f32 %v2381_v17, %v2196_v23  ;;  %v3827_v0 = vpop.f32.mrf.mxu0 }
 0x1c7   : > { %v2871_v49 = vadd.f32 %v4851_v56, %v2832_v28  ;;  %v3793_v37 = vpop.f32.mrf.mxu1  ;;  %v2203_v58 = vadd.f32 %v4755_v29, %v1904_v39  ;;  %v1910_v29 = vadd.f32 %v4769_v2, %v4662_v26  ;;  %v1908_v26 = vadd.f32 %v4773_v60, %v4665_v11 }
 0x1c8   : > { %2930 = vst.msk [vmem:[%s4867_s21 + $0x8] sm:$0xff] %vm306_vm0, %v2898_v47  ;;  %v2869_v57 = vadd.f32 %v4851_v56, %v2830_v59  ;;  %v2833_v27 = vmul.f32 %v4841_v33, %v2794_v7  ;;  %v2792_v8 = vadd.f32 %v2679_v32, %v2494_v12  ;;  %v2499_v30 = vadd.f32 %v3793_v37, %v2201_v41  ;;  %v2692_v43 = vpop.f32.mrf.mxu0 }
 0x1c9   : > { %v2903_v22 = vmax.f32 %v2871_v49, 0.0  ;;  %v2394_v48 = vpop.f32.mrf.mxu1  ;;  %v1907_v32 = vadd.f32 %v4761_v44, %v4656_v19  ;;  %v1905_v41 = vadd.f32 %v4765_v20, %v4659_v61 }
 0x1ca   : > { %v2901_v1 = vmax.f32 %v2869_v57, 0.0  ;;  %v2872_v52 = vadd.f32 %v4851_v56, %v2833_v27  ;;  %v2831_v34 = vmul.f32 %v4841_v33, %v2792_v8  ;;  %v2797_v5 = vadd.f32 %v3827_v0, %v2499_v30  ;;  %v3828_v46 = vpop.f32.mrf.mxu0 }
 0x1cb   : > { %2935 = vst.msk [vmem:[%s4867_s21 + $0x30] sm:$0xff] %vm306_vm0, %v2903_v22  ;;  %v2497_v54 = vadd.f32 %v2394_v48, %v2199_v4  ;;  %v3794_v15 = vpop.f32.mrf.mxu1  ;;  %v2206_v55 = vadd.f32 %v4759_v25, %v1907_v32  ;;  %v2204_v49 = vadd.f32 %v4763_v42, %v1905_v41  ;;  %v2209_v4 = vadd.f32 %v4767_v9, %v1910_v29 }
 0x1cc   : > { %2933 = vst.msk [vmem:[%s4867_s21 + $0x20] sm:$0xff] %vm306_vm0, %v2901_v1  ;;  %v2904_v50 = vmax.f32 %v2872_v52, 0.0  ;;  %v2870_v24 = vadd.f32 %v4851_v56, %v2831_v34  ;;  %v2836_v10 = vmul.f32 %v4841_v33, %v2797_v5  ;;  %v2500_v63 = vadd.f32 %v3794_v15, %v2202_v36  ;;  %v2695_v23 = vpop.f32.mrf.mxu0  ;;  %v5117_v36 = vld [vmem:[#allocation2_spill] sm:$0xff]  ;;  %v5119_v34 = vld [vmem:[#allocation16_spill] sm:$0xff] }
 0x1cd   : > { %v2795_v40 = vadd.f32 %v2692_v43, %v2497_v54  ;;  %v2397_v3 = vpop.f32.mrf.mxu1  ;;  %v1911_v25 = vadd.f32 %v5118_v13, %v5117_v36  ;;  %v2207_v5 = vadd.f32 %v5119_v34, %v1908_v26  ;;  %v5132_v36 = vld [vmem:[#allocation7_spill] sm:$0xff]  ;;  %v5133_v13 = vld [vmem:[#allocation28_spill] sm:$0xff]  ;;  %v5134_v34 = vld [vmem:[#allocation25_spill] sm:$0xff] }
 0x1ce   : > { %2936 = vst.msk [vmem:[%s4867_s21 + $0x38] sm:$0xff] %vm306_vm0, %v2904_v50  ;;  %v2902_v14 = vmax.f32 %v2870_v24, 0.0  ;;  %v2875_v18 = vadd.f32 %v4851_v56, %v2836_v10  ;;  %v2798_v38 = vadd.f32 %v3828_v46, %v2500_v63  ;;  %v2498_v21 = vadd.f32 %v2397_v3, %v2200_v16  ;;  %v3831_v45 = vpop.f32.mrf.mxu0  ;;  %v5120_v24 = vld [vmem:[#allocation17_spill] sm:$0xff]  ;;  %v5121_v63 = vld [vmem:[#allocation3_spill] sm:$0xff]  ;;  %v5124_v3 = vld [vmem:[#allocation22_spill] sm:$0xff] }
 0x1cf   : > { %v2834_v53 = vmul.f32 %v4841_v33, %v2795_v40  ;;  %v3797_v62 = vpop.f32.mrf.mxu1  ;;  %v2210_v10 = vadd.f32 %v5120_v24, %v1911_v25  ;;  %v5123_v40 = vld [vmem:[#allocation4_spill] sm:$0xff]  ;;  %v1913_v25 = vadd.f32 %v5133_v13, %v5132_v36  ;;  %v5135_v24 = vld [vmem:[#allocation27_spill] sm:$0xff]  ;;  %v5148_v13 = vld [vmem:[#allocation38_spill] sm:$0xff] }
 0x1d0   : > { %2934 = vst.msk [vmem:[%s4867_s21 + $0x28] sm:$0xff] %vm306_vm0, %v2902_v14  ;;  %v2907_v35 = vmax.f32 %v2875_v18, 0.0  ;;  %v2837_v28 = vmul.f32 %v4841_v33, %v2798_v38  ;;  %v2796_v17 = vadd.f32 %v2695_v23, %v2498_v21  ;;  %v2503_v47 = vadd.f32 %v3797_v62, %v2205_v31  ;;  %v2708_v59 = vpop.f32.mrf.mxu0  ;;  %v5122_v23 = vld [vmem:[#allocation20_spill] sm:$0xff] }
 0x1d1   : > { %v2873_v7 = vadd.f32 %v4851_v56, %v2834_v53  ;;  %v2410_v19 = vpop.f32.mrf.mxu1  ;;  %v1909_v31 = vadd.f32 %v5122_v23, %v5121_v63  ;;  %v1914_v14 = vadd.f32 %v5124_v3, %v5123_v40  ;;  %v5125_v53 = vld [vmem:[#allocation5_spill] sm:$0xff]  ;;  %v5126_v62 = vld [vmem:[#allocation24_spill] sm:$0xff]  ;;  %v5137_v23 = vld [vmem:[#allocation30_spill] sm:$0xff] }
 0x1d2   : > { %2939 = vst.msk [vmem:[%s4867_s21 + $0x50] sm:$0xff] %vm306_vm0, %v2907_v35  ;;  %v2876_v61 = vadd.f32 %v4851_v56, %v2837_v28  ;;  %v2835_v44 = vmul.f32 %v4841_v33, %v2796_v17  ;;  %v2801_v20 = vadd.f32 %v3831_v45, %v2503_v47  ;;  %v2501_v12 = vadd.f32 %v2410_v19, %v2203_v58  ;;  %v3832_v0 = vpop.f32.mrf.mxu0  ;;  %v5136_v63 = vld [vmem:[#allocation8_spill] sm:$0xff]  ;;  %v5138_v40 = vld [vmem:[#allocation9_spill] sm:$0xff] }
 0x1d3   : > { %v2905_v2 = vmax.f32 %v2873_v7, 0.0  ;;  %v3798_v37 = vpop.f32.mrf.mxu1  ;;  %v1912_v35 = vadd.f32 %v5126_v62, %v5125_v53  ;;  %v5139_v3 = vld [vmem:[#allocation32_spill] sm:$0xff]  ;;  %v5140_v53 = vld [vmem:[#allocation10_spill] sm:$0xff] }
 0x1d4   : > { %v2908_v57 = vmax.f32 %v2876_v61, 0.0  ;;  %v2874_v27 = vadd.f32 %v4851_v56, %v2835_v44  ;;  %v2840_v8 = vmul.f32 %v4841_v33, %v2801_v20  ;;  %v2799_v30 = vadd.f32 %v2708_v59, %v2501_v12  ;;  %v2711_v43 = vpop.f32.mrf.mxu0  ;;  %v5127_v61 = vld [vmem:[#allocation19_spill] sm:$0xff]  ;;  %v5128_v20 = vld [vmem:[#allocation21_spill] sm:$0xff]  ;;  %v5141_v62 = vld [vmem:[#allocation34_spill] sm:$0xff] }
 0x1d5   : > { %2937 = vst.msk [vmem:[%s4867_s21 + $0x40] sm:$0xff] %vm306_vm0, %v2905_v2  ;;  %v2504_v42 = vadd.f32 %v3798_v37, %v2206_v55  ;;  %v2413_v22 = vpop.f32.mrf.mxu1  ;;  %v2208_v44 = vadd.f32 %v5127_v61, %v1909_v31  ;;  %v2213_v12 = vadd.f32 %v5128_v20, %v1914_v14  ;;  %v5130_v55 = vld [vmem:[#allocation26_spill] sm:$0xff]  ;;  %v1918_v31 = vadd.f32 %v5137_v23, %v5136_v63  ;;  %v5142_v61 = vld [vmem:[#allocation29_spill] sm:$0xff]  ;;  %v5143_v20 = vld [vmem:[#allocation31_spill] sm:$0xff] }
 0x1d6   : > { %2940 = vst.msk [vmem:[%s4867_s21 + $0x58] sm:$0xff] %vm306_vm0, %v2908_v57  ;;  %v2906_v11 = vmax.f32 %v2874_v27, 0.0  ;;  %v2879_v60 = vadd.f32 %v4851_v56, %v2840_v8  ;;  %v2838_v48 = vmul.f32 %v4841_v33, %v2799_v30  ;;  %v2502_v1 = vadd.f32 %v2413_v22, %v2204_v49  ;;  %v3835_v52 = vpop.f32.mrf.mxu0  ;;  %v5147_v36 = vld [vmem:[#allocation12_spill] sm:$0xff]  ;;  %v5151_v63 = vld [vmem:[#allocation13_spill] sm:$0xff] }
 0x1d7   : > { %v2802_v9 = vadd.f32 %v3832_v0, %v2504_v42  ;;  %v3801_v46 = vpop.f32.mrf.mxu1  ;;  %v5129_v0 = vld [vmem:[#allocation6_spill] sm:$0xff]  ;;  %v1916_v14 = vadd.f32 %v5139_v3, %v5138_v40  ;;  %v5152_v23 = vld [vmem:[#allocation40_spill] sm:$0xff] }
 0x1d8   : > { %2938 = vst.msk [vmem:[%s4867_s21 + $0x48] sm:$0xff] %vm306_vm0, %v2906_v11  ;;  %v2911_v16 = vmax.f32 %v2879_v60, 0.0  ;;  %v2877_v39 = vadd.f32 %v4851_v56, %v2838_v48  ;;  %v2800_v54 = vadd.f32 %v2711_v43, %v2502_v1  ;;  %v2507_v15 = vadd.f32 %v3801_v46, %v2209_v4  ;;  %v2724_v50 = vpop.f32.mrf.mxu0  ;;  %v5131_v43 = vld [vmem:[#allocation23_spill] sm:$0xff]  ;;  %v5153_v40 = vld [vmem:[#allocation14_spill] sm:$0xff] }
 0x1d9   : > { %v2841_v18 = vmul.f32 %v4841_v33, %v2802_v9  ;;  %v2426_v38 = vpop.f32.mrf.mxu1  ;;  %v1915_v49 = vadd.f32 %v5130_v55, %v5129_v0  ;;  %v2211_v4 = vadd.f32 %v5131_v43, %v1912_v35  ;;  %v1919_v35 = vadd.f32 %v5141_v62, %v5140_v53  ;;  %v5144_v0 = vld [vmem:[#allocation11_spill] sm:$0xff]  ;;  %v5145_v55 = vld [vmem:[#allocation36_spill] sm:$0xff]  ;;  %v5146_v43 = vld [vmem:[#allocation33_spill] sm:$0xff] }
 0x1da   : > { %2943 = vst.msk [vmem:[%s4867_s21 + $0x70] sm:$0xff] %vm306_vm0, %v2911_v16  ;;  %v2909_v21 = vmax.f32 %v2877_v39, 0.0  ;;  %v2839_v45 = vmul.f32 %v4841_v33, %v2800_v54  ;;  %v2805_v58 = vadd.f32 %v3835_v52, %v2507_v15  ;;  %v2505_v32 = vadd.f32 %v2426_v38, %v2207_v5  ;;  %v3836_v41 = vpop.f32.mrf.mxu0 }
 0x1db   : > { %v2880_v28 = vadd.f32 %v4851_v56, %v2841_v18  ;;  %v3802_v17 = vpop.f32.mrf.mxu1  ;;  %v2214_v5 = vadd.f32 %v5134_v34, %v1915_v49  ;;  %v1917_v49 = vadd.f32 %v5145_v55, %v5144_v0  ;;  %v5149_v34 = vld [vmem:[#allocation35_spill] sm:$0xff]  ;;  %v1923_v3 = vadd.f32 %v4826_v6, %v5153_v40 }
 0x1dc   : > { %2941 = vst.msk [vmem:[%s4867_s21 + $0x60] sm:$0xff] %vm306_vm0, %v2909_v21  ;;  %v2878_v47 = vadd.f32 %v4851_v56, %v2839_v45  ;;  %v2844_v59 = vmul.f32 %v4841_v33, %v2805_v58  ;;  %v2803_v29 = vadd.f32 %v2724_v50, %v2505_v32  ;;  %v2508_v7 = vadd.f32 %v3802_v17, %v2210_v10  ;;  %v2727_v19 = vpop.f32.mrf.mxu0 }
 0x1dd   : > { %v2912_v26 = vmax.f32 %v2880_v28, 0.0  ;;  %v2429_v2 = vpop.f32.mrf.mxu1  ;;  %v2212_v10 = vadd.f32 %v5135_v24, %v1913_v25  ;;  %v1922_v25 = vadd.f32 %v5148_v13, %v5147_v36  ;;  %v5150_v24 = vld [vmem:[#allocation37_spill] sm:$0xff] }
 0x1de   : > { %v2910_v37 = vmax.f32 %v2878_v47, 0.0  ;;  %v2883_v57 = vadd.f32 %v4851_v56, %v2844_v59  ;;  %v2842_v27 = vmul.f32 %v4841_v33, %v2803_v29  ;;  %v2806_v8 = vadd.f32 %v3836_v41, %v2508_v7  ;;  %v3839_v30 = vpop.f32.mrf.mxu0 }
 0x1df   : > { %2944 = vst.msk [vmem:[%s4867_s21 + $0x78] sm:$0xff] %vm306_vm0, %v2912_v26  ;;  %v2506_v42 = vadd.f32 %v2429_v2, %v2208_v44  ;;  %v3805_v22 = vpop.f32.mrf.mxu1  ;;  %v2217_v44 = vadd.f32 %v5142_v61, %v1918_v31  ;;  %v1920_v31 = vadd.f32 %v5152_v23, %v5151_v63 }
 0x1e0   : > { %2942 = vst.msk [vmem:[%s4867_s21 + $0x68] sm:$0xff] %vm306_vm0, %v2910_v37  ;;  %v2915_v11 = vmax.f32 %v2883_v57, 0.0  ;;  %v2881_v60 = vadd.f32 %v4851_v56, %v2842_v27  ;;  %v2845_v48 = vmul.f32 %v4841_v33, %v2806_v8  ;;  %v2511_v1 = vadd.f32 %v3805_v22, %v2213_v12  ;;  %v2740_v52 = vpop.f32.mrf.mxu0 }
 0x1e1   : > { %v2804_v9 = vadd.f32 %v2727_v19, %v2506_v42  ;;  %v2442_v46 = vpop.f32.mrf.mxu1  ;;  %v2215_v12 = vadd.f32 %v5143_v20, %v1916_v14 }
 0x1e2   : > { %2947 = vst.msk [vmem:[%s4867_s21 + $0x90] sm:$0xff] %vm306_vm0, %v2915_v11  ;;  %v2913_v16 = vmax.f32 %v2881_v60, 0.0  ;;  %v2884_v39 = vadd.f32 %v4851_v56, %v2845_v48  ;;  %v2809_v54 = vadd.f32 %v3839_v30, %v2511_v1  ;;  %v2509_v15 = vadd.f32 %v2442_v46, %v2211_v4  ;;  %v3840_v50 = vpop.f32.mrf.mxu0 }
 0x1e3   : > { %v2843_v18 = vmul.f32 %v4841_v33, %v2804_v9  ;;  %v3806_v38 = vpop.f32.mrf.mxu1  ;;  %v2218_v4 = vadd.f32 %v5146_v43, %v1919_v35 }
 0x1e4   : > { %2945 = vst.msk [vmem:[%s4867_s21 + $0x80] sm:$0xff] %vm306_vm0, %v2913_v16  ;;  %v2916_v21 = vmax.f32 %v2884_v39, 0.0  ;;  %v2848_v45 = vmul.f32 %v4841_v33, %v2809_v54  ;;  %v2807_v58 = vadd.f32 %v2740_v52, %v2509_v15  ;;  %v2512_v32 = vadd.f32 %v3806_v38, %v2214_v5  ;;  %v2743_v41 = vpop.f32.mrf.mxu0 }
 0x1e5   : > { %v2882_v28 = vadd.f32 %v4851_v56, %v2843_v18  ;;  %v2445_v17 = vpop.f32.mrf.mxu1  ;;  %v2216_v5 = vadd.f32 %v5149_v34, %v1917_v49  ;;  %v5157_v49 = vld [vmem:[#allocation42_spill] sm:$0xff] }
 0x1e6   : > { %2948 = vst.msk [vmem:[%s4867_s21 + $0x98] sm:$0xff] %vm306_vm0, %v2916_v21  ;;  %v2887_v47 = vadd.f32 %v4851_v56, %v2848_v45  ;;  %v2846_v59 = vmul.f32 %v4841_v33, %v2807_v58  ;;  %v2810_v29 = vadd.f32 %v3840_v50, %v2512_v32  ;;  %v2510_v7 = vadd.f32 %v2445_v17, %v2212_v10  ;;  %v3843_v19 = vpop.f32.mrf.mxu0 }
 0x1e7   : > { %v2914_v26 = vmax.f32 %v2882_v28, 0.0  ;;  %v3809_v2 = vpop.f32.mrf.mxu1  ;;  %v2221_v10 = vadd.f32 %v5150_v24, %v1922_v25 }
 0x1e8   : > { %v2919_v37 = vmax.f32 %v2887_v47, 0.0  ;;  %v2885_v57 = vadd.f32 %v4851_v56, %v2846_v59  ;;  %v2849_v27 = vmul.f32 %v4841_v33, %v2810_v29  ;;  %v2808_v8 = vadd.f32 %v2743_v41, %v2510_v7  ;;  %v2756_v30 = vpop.f32.mrf.mxu0  ;;  %v5154_v41 = vld [vmem:[#allocation15_spill] sm:$0xff] }
 0x1e9   : > { %2946 = vst.msk [vmem:[%s4867_s21 + $0x88] sm:$0xff] %vm306_vm0, %v2914_v26  ;;  %v2515_v42 = vadd.f32 %v3809_v2, %v2217_v44  ;;  %v2458_v22 = vpop.f32.mrf.mxu1  ;;  %v1921_v53 = vadd.f32 %v4831_v51, %v5154_v41  ;;  %v5155_v29 = vld [vmem:[#allocation39_spill] sm:$0xff] }
 0x1ea   : > { %2951 = vst.msk [vmem:[%s4867_s21 + $0xb0] sm:$0xff] %vm306_vm0, %v2919_v37  ;;  %v2917_v11 = vmax.f32 %v2885_v57, 0.0  ;;  %v2888_v60 = vadd.f32 %v4851_v56, %v2849_v27  ;;  %v2847_v48 = vmul.f32 %v4841_v33, %v2808_v8  ;;  %v2513_v1 = vadd.f32 %v2458_v22, %v2215_v12  ;;  %v3844_v52 = vpop.f32.mrf.mxu0 }
 0x1eb   : > { %v2813_v9 = vadd.f32 %v3843_v19, %v2515_v42  ;;  %v3810_v46 = vpop.f32.mrf.mxu1  ;;  %v2219_v7 = vadd.f32 %v5155_v29, %v1920_v31  ;;  %v5156_v19 = vld [vmem:[#allocation41_spill] sm:$0xff]  ;;  %v2220_v26 = vadd.f32 %v5157_v49, %v1921_v53 }
 0x1ec   : > { %2949 = vst.msk [vmem:[%s4867_s21 + $0xa0] sm:$0xff] %vm306_vm0, %v2917_v11  ;;  %v2920_v16 = vmax.f32 %v2888_v60, 0.0  ;;  %v2886_v39 = vadd.f32 %v4851_v56, %v2847_v48  ;;  %v2811_v54 = vadd.f32 %v2756_v30, %v2513_v1  ;;  %v2516_v15 = vadd.f32 %v3810_v46, %v2218_v4  ;;  %v2759_v50 = vpop.f32.mrf.mxu0 }
 0x1ed   : > { %v2852_v14 = vmul.f32 %v4841_v33, %v2813_v9  ;;  %v2461_v18 = vpop.f32.mrf.mxu1  ;;  %v2222_v61 = vadd.f32 %v5156_v19, %v1923_v3 }
 0x1ee   : > { %2952 = vst.msk [vmem:[%s4867_s21 + $0xb8] sm:$0xff] %vm306_vm0, %v2920_v16  ;;  %v2918_v38 = vmax.f32 %v2886_v39, 0.0  ;;  %v2850_v21 = vmul.f32 %v4841_v33, %v2811_v54  ;;  %v2814_v45 = vadd.f32 %v3844_v52, %v2516_v15  ;;  %v2514_v58 = vadd.f32 %v2461_v18, %v2216_v5  ;;  %v3847_v32 = vpop.f32.mrf.mxu0 }
 0x1ef   : > { %v2891_v62 = vadd.f32 %v4851_v56, %v2852_v14  ;;  %v3813_v35 = vpop.f32.mrf.mxu1 }
 0x1f0   : > { %2950 = vst.msk [vmem:[%s4867_s21 + $0xa8] sm:$0xff] %vm306_vm0, %v2918_v38  ;;  %v2889_v6 = vadd.f32 %v4851_v56, %v2850_v21  ;;  %v2853_v28 = vmul.f32 %v4841_v33, %v2814_v45  ;;  %v2812_v17 = vadd.f32 %v2759_v50, %v2514_v58  ;;  %v2519_v47 = vadd.f32 %v3813_v35, %v2221_v10  ;;  %v2772_v59 = vpop.f32.mrf.mxu0 }
 0x1f1   : > { %v2923_v44 = vmax.f32 %v2891_v62, 0.0  ;;  %v2474_v51 = vpop.f32.mrf.mxu1 }
 0x1f2   : > { %v2921_v20 = vmax.f32 %v2889_v6, 0.0  ;;  %v2892_v12 = vadd.f32 %v4851_v56, %v2853_v28  ;;  %v2851_v0 = vmul.f32 %v4841_v33, %v2812_v17  ;;  %v2817_v55 = vadd.f32 %v3847_v32, %v2519_v47  ;;  %v3848_v57 = vpop.f32.mrf.mxu0 }
 0x1f3   : > { %2955 = vst.msk [vmem:[%s4867_s21 + $0xd0] sm:$0xff] %vm306_vm0, %v2923_v44  ;;  %v2517_v2 = vadd.f32 %v2474_v51, %v2219_v7  ;;  %v3814_v37 = vpop.f32.mrf.mxu1 }
 0x1f4   : > { %2953 = vst.msk [vmem:[%s4867_s21 + $0xc0] sm:$0xff] %vm306_vm0, %v2921_v20  ;;  %v2924_v27 = vmax.f32 %v2892_v12, 0.0  ;;  %v2890_v8 = vadd.f32 %v4851_v56, %v2851_v0  ;;  %v2856_v30 = vmul.f32 %v4841_v33, %v2817_v55  ;;  %v2520_v43 = vadd.f32 %v3814_v37, %v2222_v61  ;;  %v2775_v60 = vpop.f32.mrf.mxu0 }
 0x1f5   : > { %v2815_v4 = vadd.f32 %v2772_v59, %v2517_v2  ;;  %v2477_v36 = vpop.f32.mrf.mxu1 }
 0x1f6   : > { %2956 = vst.msk [vmem:[%s4867_s21 + $0xd8] sm:$0xff] %vm306_vm0, %v2924_v27  ;;  %v2922_v13 = vmax.f32 %v2890_v8, 0.0  ;;  %v2895_v25 = vadd.f32 %v4851_v56, %v2856_v30  ;;  %v2818_v42 = vadd.f32 %v3848_v57, %v2520_v43  ;;  %v2518_v22 = vadd.f32 %v2477_v36, %v2220_v26 }
 0x1f7   : > { %v2854_v11 = vmul.f32 %v4841_v33, %v2815_v4 }
 0x1f8   : > { %2954 = vst.msk [vmem:[%s4867_s21 + $0xc8] sm:$0xff] %vm306_vm0, %v2922_v13  ;;  %v2927_v48 = vmax.f32 %v2895_v25, 0.0  ;;  %v2857_v1 = vmul.f32 %v4841_v33, %v2818_v42  ;;  %v2816_v52 = vadd.f32 %v2775_v60, %v2518_v22 }
 0x1f9   : > { %v2893_v34 = vadd.f32 %v4851_v56, %v2854_v11 }
 0x1fa   : > { %2959 = vst.msk [vmem:[%s4867_s21 + $0xf0] sm:$0xff] %vm306_vm0, %v2927_v48  ;;  %v2896_v5 = vadd.f32 %v4851_v56, %v2857_v1  ;;  %v2855_v9 = vmul.f32 %v4841_v33, %v2816_v52 }
 0x1fb   : > { %v2925_v46 = vmax.f32 %v2893_v34, 0.0 }
 0x1fc   : > { %v2928_v16 = vmax.f32 %v2896_v5, 0.0  ;;  %v2894_v39 = vadd.f32 %v4851_v56, %v2855_v9 }
 0x1fd   : > { %2957 = vst.msk [vmem:[%s4867_s21 + $0xe0] sm:$0xff] %vm306_vm0, %v2925_v46 }
 0x1fe   : > { %2960 = vst.msk [vmem:[%s4867_s21 + $0xf8] sm:$0xff] %vm306_vm0, %v2928_v16  ;;  %v2926_v54 = vmax.f32 %v2894_v39, 0.0 }
 0x200   : > { %2958 = vst.msk [vmem:[%s4867_s21 + $0xe8] sm:$0xff] %vm306_vm0, %v2926_v54 }
 0x201 PF: > { %s14_s15 = sadd.s32 1, %s3875_s15  }
 0x202   : > { %p11_p4 = scmp.ge.s32.totalorder %s14_s15, 4  }
 0x204   :  { %13 = sbr.rel (!%p11_p4) target bundleno = 1 (0x1), region = 76 }

// kernel: _lambda_.14
= control target key start
LH: loop header
LB: loop body
LE: loop exit
PB: predicated region body
PF: predicated region fallthrough
CT: control target
= control target key end

     0   :  { %vm50_vm0 = vcmask 130048   ;;  %vm218_vm1 = vcmask 261120   ;;  %s452_s1 = inlined_call_operand.vmem [shape: bf16[16,32], index: 1, kind: input, shape index: {}]   ;;  %s453_s0 = inlined_call_operand.vmem [shape: f32[128,16], index: 0, kind: input, shape index: {}]   ;;  %s454_s2 = inlined_call_operand.vmem [shape: f32[1,32], index: 2, kind: input, shape index: {}]   ;;  %s455_s3 = inlined_call_operand.vmem [shape: f32[1,32], index: 3, kind: input, shape index: {}]   ;;  %s456_s4 = inlined_call_operand.vmem [shape: f32[128,32], index: 4, kind: output, shape index: {}]  }
   0x1   :  { %v279_v0 = vld [vmem:[%s452_s1] sm:$0xff]   ;;  %v19_v2 = vld [vmem:[%s453_s0 + $0x8] sm:$0xff]  ;;  %v20_v6 = vld [vmem:[%s453_s0 + $0x10] sm:$0xff] }
   0x2   :  { %v18_v1 = vld [vmem:[%s453_s0] sm:$0xff]  ;;  %259 = vmatprep.subr.bf16.mxu0 %v279_v0  ;;  %277 = vmatprep.subr.bf16.mxu1 %v279_v0  ;;  %v27_v5 = vld [vmem:[%s453_s0 + $0x48] sm:$0xff]  ;;  %v21_v7 = vld [vmem:[%s453_s0 + $0x18] sm:$0xff] }
   0x3   :  { %v26_v3 = vld [vmem:[%s453_s0 + $0x40] sm:$0xff]  ;;  %v34_v4 = vpack.c.bf16 %v19_v2, %v18_v1  ;;  %260 = vmatpush3.bf16.msra.mxu0 %v279_v0  ;;  %278 = vmatpush3.bf16.msra.mxu1 %v279_v0  ;;  %v35_v9 = vpack.c.bf16 %v21_v7, %v20_v6  ;;  %v28_v10 = vld [vmem:[%s453_s0 + $0x50] sm:$0xff]  ;;  %v29_v11 = vld [vmem:[%s453_s0 + $0x58] sm:$0xff] }
   0x4   :  { %v38_v8 = vpack.c.bf16 %v27_v5, %v26_v3  ;;  %v22_v12 = vld [vmem:[%s453_s0 + $0x20] sm:$0xff]  ;;  %v39_v13 = vpack.c.bf16 %v29_v11, %v28_v10  ;;  %v23_v14 = vld [vmem:[%s453_s0 + $0x28] sm:$0xff]  ;;  %v24_v19 = vld [vmem:[%s453_s0 + $0x30] sm:$0xff] }
   0x5   :  { %261 = vmatprep.mubr.msk.bf16.mxu0 %vm50_vm0, %v34_v4  ;;  %v30_v15 = vld [vmem:[%s453_s0 + $0x60] sm:$0xff]  ;;  %v31_v16 = vld [vmem:[%s453_s0 + $0x68] sm:$0xff]  ;;  %v36_v17 = vpack.c.bf16 %v23_v14, %v22_v12  ;;  %v25_v20 = vld [vmem:[%s453_s0 + $0x38] sm:$0xff] }
   0x6   :  { %269 = vmatprep.mubr.msk.bf16.mxu1 %vm50_vm0, %v38_v8  ;;  %v40_v18 = vpack.c.bf16 %v31_v16, %v30_v15  ;;  %262 = vmatmul.mubr.msk.bf16.vlgmr.msra.gmra.mxu0 %vm50_vm0, %v35_v9  ;;  %v32_v21 = vld [vmem:[%s453_s0 + $0x70] sm:$0xff]  ;;  %v33_v22 = vld [vmem:[%s453_s0 + $0x78] sm:$0xff]  ;;  %v37_v23 = vpack.c.bf16 %v25_v20, %v24_v19  ;;  %v248_v25 = vld [vmem:[%s454_s2] ss:$0 sm:$0xff] }
   0x7   :  { %270 = vmatmul.mubr.msk.bf16.vlgmr.msra.gmra.mxu1 %vm50_vm0, %v39_v13  ;;  %265 = vmatprep.mubr.msk.bf16.mxu0 %vm50_vm0, %v36_v17  ;;  %v41_v24 = vpack.c.bf16 %v33_v22, %v32_v21  ;;  %v370_v27 = vld [vmem:[%s455_s3] ss:$0 sm:$0xff] }
   0x8   :  { %273 = vmatprep.mubr.msk.bf16.mxu1 %vm50_vm0, %v40_v18 }
   0xe   :  { %266 = vmatmul.mubr.msk.bf16.gmra.mxu0 %vm50_vm0, %v37_v23 }
   0xf   :  { %274 = vmatmul.mubr.msk.bf16.gmra.mxu1 %vm50_vm0, %v41_v24 }
  0xc6   :  { %v263_v26 = vpop.f32.mrf.mxu0 }
  0xc7   :  { %v271_v28 = vpop.f32.mrf.mxu1  ;;  %v181_v29 = vmul.f32 %v263_v26, %v248_v25 }
  0xc8   :  { %v189_v30 = vmul.f32 %v271_v28, %v248_v25  ;;  %v109_v31 = vpop.f32.mrf.mxu0 }
  0xc9   :  { %v141_v32 = vpop.f32.mrf.mxu1  ;;  %v204_v33 = vadd.f32 %v370_v27, %v181_v29  ;;  %v179_v35 = vmul.f32 %v248_v25, %v109_v31 }
  0xca   :  { %v212_v34 = vadd.f32 %v370_v27, %v189_v30  ;;  %v187_v36 = vmul.f32 %v248_v25, %v141_v32  ;;  %v264_v37 = vpop.f32.mrf.mxu0 }
  0xcb   :  { %v272_v38 = vpop.f32.mrf.mxu1  ;;  %221 = vst.msk [vmem:[%s456_s4 + $0x10] sm:$0xff] %vm218_vm1, %v204_v33  ;;  %v202_v39 = vadd.f32 %v370_v27, %v179_v35  ;;  %v182_v41 = vmul.f32 %v264_v37, %v248_v25 }
  0xcc   :  { %229 = vst.msk [vmem:[%s456_s4 + $0x50] sm:$0xff] %vm218_vm1, %v212_v34  ;;  %v210_v40 = vadd.f32 %v370_v27, %v187_v36  ;;  %v190_v42 = vmul.f32 %v272_v38, %v248_v25  ;;  %v112_v43 = vpop.f32.mrf.mxu0 }
  0xcd   :  { %v144_v44 = vpop.f32.mrf.mxu1  ;;  %219 = vst.msk [vmem:[%s456_s4] sm:$0xff] %vm218_vm1, %v202_v39  ;;  %v205_v45 = vadd.f32 %v370_v27, %v182_v41  ;;  %v180_v47 = vmul.f32 %v248_v25, %v112_v43 }
  0xce   :  { %227 = vst.msk [vmem:[%s456_s4 + $0x40] sm:$0xff] %vm218_vm1, %v210_v40  ;;  %v213_v46 = vadd.f32 %v370_v27, %v190_v42  ;;  %v188_v48 = vmul.f32 %v248_v25, %v144_v44  ;;  %v267_v49 = vpop.f32.mrf.mxu0 }
  0xcf   :  { %v275_v50 = vpop.f32.mrf.mxu1  ;;  %222 = vst.msk [vmem:[%s456_s4 + $0x18] sm:$0xff] %vm218_vm1, %v205_v45  ;;  %v203_v51 = vadd.f32 %v370_v27, %v180_v47  ;;  %v185_v53 = vmul.f32 %v267_v49, %v248_v25 }
  0xd0   :  { %230 = vst.msk [vmem:[%s456_s4 + $0x58] sm:$0xff] %vm218_vm1, %v213_v46  ;;  %v211_v52 = vadd.f32 %v370_v27, %v188_v48  ;;  %v193_v54 = vmul.f32 %v275_v50, %v248_v25  ;;  %v125_v55 = vpop.f32.mrf.mxu0 }
  0xd1   :  { %v157_v56 = vpop.f32.mrf.mxu1  ;;  %220 = vst.msk [vmem:[%s456_s4 + $0x8] sm:$0xff] %vm218_vm1, %v203_v51  ;;  %v208_v57 = vadd.f32 %v370_v27, %v185_v53  ;;  %v183_v59 = vmul.f32 %v248_v25, %v125_v55 }
  0xd2   :  { %228 = vst.msk [vmem:[%s456_s4 + $0x48] sm:$0xff] %vm218_vm1, %v211_v52  ;;  %v216_v58 = vadd.f32 %v370_v27, %v193_v54  ;;  %v191_v60 = vmul.f32 %v248_v25, %v157_v56  ;;  %v268_v61 = vpop.f32.mrf.mxu0 }
  0xd3   :  { %v276_v62 = vpop.f32.mrf.mxu1  ;;  %225 = vst.msk [vmem:[%s456_s4 + $0x30] sm:$0xff] %vm218_vm1, %v208_v57  ;;  %v206_v63 = vadd.f32 %v370_v27, %v183_v59  ;;  %v186_v1 = vmul.f32 %v268_v61, %v248_v25 }
  0xd4   :  { %233 = vst.msk [vmem:[%s456_s4 + $0x70] sm:$0xff] %vm218_vm1, %v216_v58  ;;  %v214_v0 = vadd.f32 %v370_v27, %v191_v60  ;;  %v194_v2 = vmul.f32 %v276_v62, %v248_v25  ;;  %v128_v3 = vpop.f32.mrf.mxu0 }
  0xd5   :  { %v160_v4 = vpop.f32.mrf.mxu1  ;;  %223 = vst.msk [vmem:[%s456_s4 + $0x20] sm:$0xff] %vm218_vm1, %v206_v63  ;;  %v209_v5 = vadd.f32 %v370_v27, %v186_v1  ;;  %v184_v7 = vmul.f32 %v248_v25, %v128_v3 }
  0xd6   :  { %231 = vst.msk [vmem:[%s456_s4 + $0x60] sm:$0xff] %vm218_vm1, %v214_v0  ;;  %v217_v6 = vadd.f32 %v370_v27, %v194_v2  ;;  %v192_v8 = vmul.f32 %v248_v25, %v160_v4 }
  0xd7   :  { %226 = vst.msk [vmem:[%s456_s4 + $0x38] sm:$0xff] %vm218_vm1, %v209_v5  ;;  %v207_v9 = vadd.f32 %v370_v27, %v184_v7 }
  0xd8   :  { %234 = vst.msk [vmem:[%s456_s4 + $0x78] sm:$0xff] %vm218_vm1, %v217_v6  ;;  %v215_v10 = vadd.f32 %v370_v27, %v192_v8 }
  0xd9   :  { %224 = vst.msk [vmem:[%s456_s4 + $0x28] sm:$0xff] %vm218_vm1, %v207_v9 }
  0xda   :  { %232 = vst.msk [vmem:[%s456_s4 + $0x68] sm:$0xff] %vm218_vm1, %v215_v10 }

// kernel: _lambda_.16
= control target key start
LH: loop header
LB: loop body
LE: loop exit
PB: predicated region body
PF: predicated region fallthrough
CT: control target
= control target key end

     0   :  { %s1686_s15 = smov 0   ;;  %s1971_s0 = inlined_call_operand.vmem [shape: f32[2,10,10,32], index: 0, kind: input, shape index: {}]   ;;  %s1972_s1 = inlined_call_operand.vmem [shape: bf16[9,32,64], index: 1, kind: input, shape index: {}]   ;;  %s1973_s2 = inlined_call_operand.vmem [shape: f32[1,64], index: 2, kind: input, shape index: {}]   ;;  %s1974_s3 = inlined_call_operand.vmem [shape: f32[1,64], index: 3, kind: input, shape index: {}]   ;;  %s1975_s4 = inlined_call_operand.vmem [shape: f32[2,8,8,64], index: 4, kind: output, shape index: {}]  }
   0x1 LB: > { %s1313_s16 = sadd.s32 4294967295, %s1659_s15   ;;  %p1317_p0 = scmp.ge.s32.totalorder %s1659_s15, 1  ;;  %s1659_s15 = sphi %s1686_s15, %s14_s15  }
   0x2   : > { %p162_p1 = scmp.lt.s32.totalorder %s1659_s15, 3 }
   0x4   : > { %p163_p2 = pnand %p1317_p0, %p162_p1 }
   0x5   : > { %p188_p3 = scmp.lt.s32.totalorder (!%p163_p2), %s1313_s16, 1 }
   0x6   : > { %166 = sbr.rel (%p163_p2) target bundleno = 295 (0x127), region = 36 }
   0xb   : > { %v1635_v0 = vld [vmem:[%s1972_s1 + $0x18] sm:$0xff]   ;;  %v1636_v1 = vld [vmem:[%s1972_s1 + $0x10] sm:$0xff]   ;;  %s1977_s16 = smov (!%p188_p3, %s1313_s16), 1  ;;  %v1637_v2 = vld [vmem:[%s1972_s1 + $0x8] sm:$0xff]   ;;  %vm244_vm0 = vcmask 261120   ;;  %vm1249_vm1 = vcmask 523264  }
   0xc   : > { %1514 = vmatprep.subr.bf16.mxu0 %v1635_v0  ;;  %1622 = vmatprep.subr.bf16.mxu1 %v1635_v0  ;;  %s1626_s23 = smul.u32 160, %s1977_s16  ;;  %v1638_v3 = vld [vmem:[%s1972_s1 + $0x28] sm:$0xff]   ;;  %v1640_v7 = vld [vmem:[%s1972_s1 + $0x20] sm:$0xff]   ;;  %v1641_v29 = vld [vmem:[%s1972_s1 + $0x38] sm:$0xff]   ;;  %s1459_s11 = sshll.u32 %s1977_s16, 6 }
   0xd   : > { %1515 = vmatpush3.bf16.msra.mxu0 %v1635_v0  ;;  %1624 = vmatpush3.bf16.msra.mxu1 %v1635_v0  ;;  %v1639_v12 = vld [vmem:[%s1972_s1] sm:$0xff]   ;;  %v1642_v28 = vld [vmem:[%s1972_s1 + $0x48] sm:$0xff]   ;;  %v1643_v38 = vld [vmem:[%s1972_s1 + $0x30] sm:$0xff]   ;;  %s1936_s13 = scalar_lea.vmem %s1975_s4, %s1459_s11 }
   0xe   : > { %1516 = vmatprep.subr.bf16.mxu0 %v1636_v1  ;;  %1623 = vmatprep.subr.bf16.mxu1 %v1636_v1  ;;  %s1712_s28 = scalar_lea.vmem %s1971_s0, %s1626_s23  ;;  %v1644_v41 = vld [vmem:[%s1972_s1 + $0x40] sm:$0xff]   ;;  %v1646_v44 = vld [vmem:[%s1972_s1 + $0x68] sm:$0xff]   ;;  %v1645_v45 = vld [vmem:[%s1972_s1 + $0x58] sm:$0xff]  }
   0xf   : > { %v215_v4 = vld [vmem:[%s1712_s28 + $0x1] sm:$0xff]  ;;  %v1716_v5 = vld [vmem:[%s1712_s28 + $0x11] sm:$0xff] }
  0x10   : > { %v1719_v6 = vld [vmem:[%s1712_s28 + $0x41] sm:$0xff]  ;;  %v223_v8 = vpack.c.bf16 %v1716_v5, %v215_v4  ;;  %v1726_v9 = vld [vmem:[%s1712_s28 + $0x51] sm:$0xff] }
  0x11   : > { %1517 = vmatpush3.bf16.msra.mxu0 %v1636_v1  ;;  %1625 = vmatpush3.bf16.msra.mxu1 %v1636_v1  ;;  %v1729_v10 = vld [vmem:[%s1712_s28 + $0x21] sm:$0xff]  ;;  %v1732_v11 = vld [vmem:[%s1712_s28 + $0x31] sm:$0xff]  ;;  %v1739_v13 = vpack.c.bf16 %v1726_v9, %v1719_v6 }
  0x12   : > { %1526 = vmatprep.subr.bf16.mxu1 %v1637_v2  ;;  %1538 = vmatprep.subr.bf16.mxu0 %v1638_v3  ;;  %v1743_v14 = vpack.c.bf16 %v1732_v11, %v1729_v10  ;;  %v1746_v15 = vld [vmem:[%s1712_s28 + $0x61] sm:$0xff]  ;;  %v1749_v16 = vld [vmem:[%s1712_s28 + $0x71] sm:$0xff]  ;;  %v648_v48 = vpack.c.bf16 %v1729_v10, %v1716_v5  ;;  %v649_v50 = vpack.c.bf16 %v1719_v6, %v1732_v11 }
  0x13   : > { %v199_v17 = vld [vmem:[%s1712_s28] sm:$0xff]  ;;  %1518 = vmatprep.mubr.msk.bf16.mxu0 %vm244_vm0, %v223_v8  ;;  %v1755_v18 = vpack.c.bf16 %v1749_v16, %v1746_v15  ;;  %v200_v19 = vld [vmem:[%s1712_s28 + $0x10] sm:$0xff]  ;;  %1522 = vmatprep.mubr.msk.bf16.mxu1 %vm244_vm0, %v1739_v13  ;;  %v650_v53 = vpack.c.bf16 %v1746_v15, %v1726_v9  ;;  %v1650_v58 = vld [vmem:[%s1972_s1 + $0x88] sm:$0xff]  }
  0x14   : > { %v411_v20 = vld [vmem:[%s1712_s28 + $0x2] sm:$0xff]  ;;  %v1760_v21 = vld [vmem:[%s1712_s28 + $0x12] sm:$0xff]  ;;  %1519 = vmatmul.mubr.msk.bf16.vlgmr.msra.gmra.mxu0 %vm244_vm0, %v1743_v14  ;;  %v207_v22 = vpack.c.bf16 %v200_v19, %v199_v17 }
  0x15   : > { %v419_v23 = vpack.c.bf16 %v1760_v21, %v411_v20  ;;  %v1768_v24 = vld [vmem:[%s1712_s28 + $0x22] sm:$0xff]  ;;  %1523 = vmatmul.mubr.msk.bf16.vlgmr.msra.gmra.mxu1 %vm244_vm0, %v1755_v18  ;;  %1539 = vmatpush3.bf16.msra.mxu0 %v1638_v3  ;;  %v1773_v25 = vld [vmem:[%s1712_s28 + $0x32] sm:$0xff] }
  0x16   : > { %1527 = vmatpush3.bf16.msra.mxu1 %v1637_v2  ;;  %1540 = vmatprep.subr.bf16.mxu0 %v1640_v7  ;;  %v201_v26 = vld [vmem:[%s1712_s28 + $0x20] sm:$0xff]  ;;  %v202_v27 = vld [vmem:[%s1712_s28 + $0x30] sm:$0xff]  ;;  %v1789_v32 = vpack.c.bf16 %v1773_v25, %v1768_v24  ;;  %v1649_v59 = vld [vmem:[%s1972_s1 + $0x78] sm:$0xff]   ;;  %v762_v62 = vpack.c.bf16 %v1768_v24, %v1760_v21 }
  0x17   : > { %1528 = vmatprep.subr.bf16.mxu1 %v1639_v12  ;;  %1530 = vmatprep.mubr.msk.bf16.mxu1 %vm244_vm0, %v207_v22  ;;  %v203_v30 = vld [vmem:[%s1712_s28 + $0x40] sm:$0xff]  ;;  %v204_v31 = vld [vmem:[%s1712_s28 + $0x50] sm:$0xff]  ;;  %v208_v35 = vpack.c.bf16 %v202_v27, %v201_v26  ;;  %v534_v49 = vpack.c.bf16 %v201_v26, %v200_v19 }
  0x18   : > { %1542 = vmatprep.mubr.msk.bf16.mxu0 %vm244_vm0, %v419_v23  ;;  %v1792_v33 = vld [vmem:[%s1712_s28 + $0x42] sm:$0xff]  ;;  %v1795_v34 = vld [vmem:[%s1712_s28 + $0x52] sm:$0xff]  ;;  %v1797_v36 = vpack.c.bf16 %v204_v31, %v203_v30  ;;  %v535_v51 = vpack.c.bf16 %v203_v30, %v202_v27 }
  0x19   : > { %1541 = vmatpush3.bf16.msra.mxu0 %v1640_v7  ;;  %v1801_v37 = vpack.c.bf16 %v1795_v34, %v1792_v33  ;;  %v205_v39 = vld [vmem:[%s1712_s28 + $0x60] sm:$0xff]  ;;  %v206_v40 = vld [vmem:[%s1712_s28 + $0x70] sm:$0xff]  ;;  %v763_v63 = vpack.c.bf16 %v1792_v33, %v1773_v25 }
  0x1a   : > { %1529 = vmatpush3.bf16.msra.mxu1 %v1639_v12  ;;  %1562 = vmatprep.subr.bf16.mxu0 %v1642_v28  ;;  %v417_v42 = vld [vmem:[%s1712_s28 + $0x62] sm:$0xff]  ;;  %v1816_v43 = vld [vmem:[%s1712_s28 + $0x72] sm:$0xff]  ;;  %v210_v47 = vpack.c.bf16 %v206_v40, %v205_v39  ;;  %v536_v52 = vpack.c.bf16 %v205_v39, %v204_v31 }
  0x1b   : > { %1550 = vmatprep.subr.bf16.mxu1 %v1641_v29  ;;  %v1829_v46 = vpack.c.bf16 %v1816_v43, %v417_v42  ;;  %v1647_v54 = vld [vmem:[%s1972_s1 + $0x50] sm:$0xff]   ;;  %v1648_v55 = vld [vmem:[%s1972_s1 + $0x60] sm:$0xff]   ;;  %v764_v0 = vpack.c.bf16 %v417_v42, %v1795_v34 }
  0x1c   : > { %1543 = vmatmul.mubr.msk.bf16.vlgmr.msra.gmra.mxu0 %vm244_vm0, %v1789_v32  ;;  %v1372_v56 = vld [vmem:[%s1712_s28 + $0x81] sm:$0xff]  ;;  %v1651_v1 = vld [vmem:[%s1972_s1 + $0x70] sm:$0xff]  }
  0x1d   : > { %1531 = vmatmul.mubr.msk.bf16.vlgmr.msra.gmra.mxu1 %vm244_vm0, %v208_v35  ;;  %1563 = vmatpush3.bf16.msra.mxu0 %v1642_v28  ;;  %v1354_v57 = vld [vmem:[%s1712_s28 + $0x80] sm:$0xff]  ;;  %v651_v60 = vpack.c.bf16 %v1372_v56, %v1749_v16  ;;  %v1408_v3 = vld [vmem:[%s1712_s28 + $0x90] sm:$0xff] }
  0x1e   : > { %1551 = vmatpush3.bf16.msra.mxu1 %v1641_v29  ;;  %1534 = vmatprep.mubr.msk.bf16.mxu1 %vm244_vm0, %v1797_v36  ;;  %v537_v61 = vpack.c.bf16 %v1354_v57, %v206_v40  ;;  %v1652_v2 = vld [vmem:[%s1972_s1 + $0x80] sm:$0xff]   ;;  %v880_v5 = vpack.c.bf16 %v1408_v3, %v1354_v57  ;;  %v1444_v7 = vld [vmem:[%s1712_s28 + $0x92] sm:$0xff] }
  0x1f   : > { %1546 = vmatprep.mubr.msk.bf16.mxu0 %vm244_vm0, %v1801_v37  ;;  %1552 = vmatprep.subr.bf16.mxu1 %v1643_v38  ;;  %v1390_v4 = vld [vmem:[%s1712_s28 + $0x82] sm:$0xff]  ;;  %v1426_v8 = vld [vmem:[%s1712_s28 + $0x91] sm:$0xff] }
  0x20   : > { %1564 = vmatprep.subr.bf16.mxu0 %v1644_v41  ;;  %v765_v6 = vpack.c.bf16 %v1390_v4, %v1816_v43  ;;  %v1108_v9 = vpack.c.bf16 %v1444_v7, %v1390_v4  ;;  %v994_v10 = vpack.c.bf16 %v1426_v8, %v1372_v56 }
  0x21   : > { %1565 = vmatpush3.bf16.msra.mxu0 %v1644_v41 }
  0x22   : > { %1553 = vmatpush3.bf16.msra.mxu1 %v1643_v38  ;;  %1586 = vmatprep.subr.bf16.mxu0 %v1646_v44 }
  0x23   : > { %1574 = vmatprep.subr.bf16.mxu1 %v1645_v45 }
  0x24   : > { %1547 = vmatmul.mubr.msk.bf16.gmra.mxu0 %vm244_vm0, %v1829_v46 }
  0x25   : > { %1535 = vmatmul.mubr.msk.bf16.gmra.mxu1 %vm244_vm0, %v210_v47  ;;  %1566 = vmatprep.mubr.msk.bf16.mxu0 %vm244_vm0, %v648_v48 }
  0x26   : > { %1554 = vmatprep.mubr.msk.bf16.mxu1 %vm244_vm0, %v534_v49 }
  0x2c   : > { %1567 = vmatmul.mubr.msk.bf16.vlgmr.msra.gmra.mxu0 %vm244_vm0, %v649_v50 }
  0x2d   : > { %1555 = vmatmul.mubr.msk.bf16.vlgmr.msra.gmra.mxu1 %vm244_vm0, %v535_v51  ;;  %1587 = vmatpush3.bf16.msra.mxu0 %v1646_v44 }
  0x2e   : > { %1575 = vmatpush3.bf16.msra.mxu1 %v1645_v45  ;;  %1558 = vmatprep.mubr.msk.bf16.mxu1 %vm244_vm0, %v536_v52 }
  0x2f   : > { %1570 = vmatprep.mubr.msk.bf16.mxu0 %vm244_vm0, %v650_v53  ;;  %1576 = vmatprep.subr.bf16.mxu1 %v1647_v54 }
  0x30   : > { %1588 = vmatprep.subr.bf16.mxu0 %v1648_v55 }
  0x31   : > { %1589 = vmatpush3.bf16.msra.mxu0 %v1648_v55 }
  0x32   : > { %1577 = vmatpush3.bf16.msra.mxu1 %v1647_v54  ;;  %1610 = vmatprep.subr.bf16.mxu0 %v1650_v58 }
  0x33   : > { %1598 = vmatprep.subr.bf16.mxu1 %v1649_v59 }
  0x34   : > { %1571 = vmatmul.mubr.msk.bf16.gmra.mxu0 %vm244_vm0, %v651_v60 }
  0x35   : > { %1559 = vmatmul.mubr.msk.bf16.gmra.mxu1 %vm244_vm0, %v537_v61  ;;  %1590 = vmatprep.mubr.msk.bf16.mxu0 %vm244_vm0, %v208_v35 }
  0x36   : > { %1578 = vmatprep.mubr.msk.bf16.mxu1 %vm244_vm0, %v762_v62 }
  0x3c   : > { %1591 = vmatmul.mubr.msk.bf16.vlgmr.msra.gmra.mxu0 %vm244_vm0, %v1797_v36 }
  0x3d   : > { %1579 = vmatmul.mubr.msk.bf16.vlgmr.msra.gmra.mxu1 %vm244_vm0, %v763_v63  ;;  %1611 = vmatpush3.bf16.msra.mxu0 %v1650_v58 }
  0x3e   : > { %1599 = vmatpush3.bf16.msra.mxu1 %v1649_v59  ;;  %1582 = vmatprep.mubr.msk.bf16.mxu1 %vm244_vm0, %v764_v0 }
  0x3f   : > { %1594 = vmatprep.mubr.msk.bf16.mxu0 %vm244_vm0, %v210_v47  ;;  %1600 = vmatprep.subr.bf16.mxu1 %v1651_v1 }
  0x40   : > { %1612 = vmatprep.subr.bf16.mxu0 %v1652_v2 }
  0x41   : > { %1613 = vmatpush3.bf16.msra.mxu0 %v1652_v2 }
  0x42   : > { %1601 = vmatpush3.bf16.msra.mxu1 %v1651_v1 }
  0x44   : > { %1595 = vmatmul.mubr.msk.bf16.gmra.mxu0 %vm244_vm0, %v880_v5 }
  0x45   : > { %1583 = vmatmul.mubr.msk.bf16.gmra.mxu1 %vm244_vm0, %v765_v6  ;;  %1614 = vmatprep.mubr.msk.bf16.mxu0 %vm244_vm0, %v1789_v32 }
  0x46   : > { %1602 = vmatprep.mubr.msk.bf16.mxu1 %vm244_vm0, %v1743_v14 }
  0x4c   : > { %1615 = vmatmul.mubr.msk.bf16.vlgmr.msra.gmra.mxu0 %vm244_vm0, %v1801_v37 }
  0x4d   : > { %1603 = vmatmul.mubr.msk.bf16.vlgmr.msra.gmra.mxu1 %vm244_vm0, %v1739_v13  ;;  %1618 = vmatprep.mubr.msk.bf16.mxu0 %vm244_vm0, %v1829_v46 }
  0x4e   : > { %1606 = vmatprep.mubr.msk.bf16.mxu1 %vm244_vm0, %v1755_v18 }
  0x54   : > { %1619 = vmatmul.mubr.msk.bf16.gmra.mxu0 %vm244_vm0, %v1108_v9 }
  0x55   : > { %1607 = vmatmul.mubr.msk.bf16.gmra.mxu1 %vm244_vm0, %v994_v10 }
  0xd4   : > { %v1520_v11 = vpop.f32.mrf.mxu0 }
  0xd5   : > { %v1524_v12 = vpop.f32.mrf.mxu1 }
  0xd6   : > { %v291_v14 = vpop.f32.mrf.mxu0 }
  0xd7   : > { %v307_v15 = vpop.f32.mrf.mxu1 }
  0xd8   : > { %v1521_v16 = vpop.f32.mrf.mxu0 }
  0xd9   : > { %v1525_v13 = vpop.f32.mrf.mxu1 }
  0xda   : > { %v294_v17 = vpop.f32.mrf.mxu0 }
  0xdb   : > { %v1902_v19 = vpop.f32.mrf.mxu1 }
  0xdc   : > { %v1544_v20 = vpop.f32.mrf.mxu0 }
  0xdd   : > { %v1532_v21 = vpop.f32.mrf.mxu1 }
  0xde   : > { %v486_v22 = vpop.f32.mrf.mxu0  ;;  %v389_v51 = vadd.f32 %v1532_v21, %v1520_v11 }
  0xdf   : > { %v380_v18 = vpop.f32.mrf.mxu1 }
  0xe0   : > { %v1545_v23 = vpop.f32.mrf.mxu0  ;;  %v381_v54 = vadd.f32 %v380_v18, %v291_v14  ;;  %v519_v57 = vadd.f32 %v1544_v20, %v389_v51 }
  0xe1   : > { %v1533_v24 = vpop.f32.mrf.mxu1 }
  0xe2   : > { %v489_v25 = vpop.f32.mrf.mxu0  ;;  %v392_v58 = vadd.f32 %v1533_v24, %v1521_v16  ;;  %v517_v61 = vadd.f32 %v486_v22, %v381_v54 }
  0xe3   : > { %v383_v26 = vpop.f32.mrf.mxu1 }
  0xe4   : > { %v1548_v27 = vpop.f32.mrf.mxu0  ;;  %v384_v62 = vadd.f32 %v383_v26, %v294_v17  ;;  %v520_v2 = vadd.f32 %v1545_v23, %v392_v58 }
  0xe5   : > { %v1536_v28 = vpop.f32.mrf.mxu1 }
  0xe6   : > { %v502_v29 = vpop.f32.mrf.mxu0  ;;  %v405_v5 = vadd.f32 %v1536_v28, %v1524_v12  ;;  %v518_v8 = vadd.f32 %v489_v25, %v384_v62 }
  0xe7   : > { %v396_v30 = vpop.f32.mrf.mxu1 }
  0xe8   : > { %v1549_v31 = vpop.f32.mrf.mxu0  ;;  %v397_v6 = vadd.f32 %v396_v30, %v307_v15  ;;  %v523_v18 = vadd.f32 %v1548_v27, %v405_v5 }
  0xe9   : > { %v1537_v32 = vpop.f32.mrf.mxu1 }
  0xea   : > { %v1904_v33 = vpop.f32.mrf.mxu0  ;;  %v408_v14 = vadd.f32 %v1537_v32, %v1525_v13  ;;  %v521_v24 = vadd.f32 %v502_v29, %v397_v6 }
  0xeb   : > { %v399_v34 = vpop.f32.mrf.mxu1 }
  0xec   : > { %v1568_v35 = vpop.f32.mrf.mxu0  ;;  %v400_v23 = vadd.f32 %v399_v34, %v1902_v19  ;;  %v524_v15 = vadd.f32 %v1549_v31, %v408_v14  ;;  %v1919_v31 = vld [vmem:[%s1973_s2] ss:$0 sm:$0xff] }
  0xed   : > { %v1556_v36 = vpop.f32.mrf.mxu1 }
  0xee   : > { %v715_v37 = vpop.f32.mrf.mxu0  ;;  %v634_v63 = vadd.f32 %v1556_v36, %v519_v57 }
  0xef   : > { %v601_v38 = vpop.f32.mrf.mxu1 }
  0xf0   : > { %v1569_v39 = vpop.f32.mrf.mxu0  ;;  %v632_v3 = vadd.f32 %v601_v38, %v517_v61  ;;  %v748_v9 = vadd.f32 %v1568_v35, %v634_v63 }
  0xf1   : > { %v1557_v40 = vpop.f32.mrf.mxu1 }
  0xf2   : > { %v718_v41 = vpop.f32.mrf.mxu0  ;;  %v635_v10 = vadd.f32 %v1557_v40, %v520_v2  ;;  %v746_v20 = vadd.f32 %v715_v37, %v632_v3  ;;  %v522_v40 = vadd.f32 %v1904_v33, %v400_v23 }
  0xf3   : > { %v604_v42 = vpop.f32.mrf.mxu1 }
  0xf4   : > { %v1572_v43 = vpop.f32.mrf.mxu0  ;;  %v633_v21 = vadd.f32 %v604_v42, %v518_v8  ;;  %v749_v36 = vadd.f32 %v1569_v39, %v635_v10 }
  0xf5   : > { %v1560_v44 = vpop.f32.mrf.mxu1 }
  0xf6   : > { %v731_v45 = vpop.f32.mrf.mxu0  ;;  %v638_v25 = vadd.f32 %v1560_v44, %v523_v18  ;;  %v747_v35 = vadd.f32 %v718_v41, %v633_v21 }
  0xf7   : > { %v617_v46 = vpop.f32.mrf.mxu1 }
  0xf8   : > { %v1906_v47 = vpop.f32.mrf.mxu0  ;;  %v636_v28 = vadd.f32 %v617_v46, %v521_v24  ;;  %v752_v39 = vadd.f32 %v1572_v43, %v638_v25  ;;  %v1925_v43 = vld [vmem:[%s1974_s3] ss:$0 sm:$0xff] }
  0xf9   : > { %v1561_v48 = vpop.f32.mrf.mxu1 }
  0xfa   : > { %v1908_v49 = vpop.f32.mrf.mxu0  ;;  %v639_v42 = vadd.f32 %v1561_v48, %v524_v15 }
  0xfb   : > { %v620_v50 = vpop.f32.mrf.mxu1 }
  0xfc   : > { %v1592_v52 = vpop.f32.mrf.mxu0  ;;  %v637_v54 = vadd.f32 %v620_v50, %v522_v40  ;;  %v753_v48 = vadd.f32 %v1906_v47, %v639_v42 }
  0xfd   : > { %v1580_v53 = vpop.f32.mrf.mxu1 }
  0xfe   : > { %v944_v55 = vpop.f32.mrf.mxu0  ;;  %v862_v22 = vadd.f32 %v1580_v53, %v748_v9  ;;  %v750_v53 = vadd.f32 %v731_v45, %v636_v28  ;;  %v751_v61 = vadd.f32 %v1908_v49, %v637_v54 }
  0xff   : > { %v829_v56 = vpop.f32.mrf.mxu1 }
 0x100   : > { %v1593_v59 = vpop.f32.mrf.mxu0  ;;  %v860_v38 = vadd.f32 %v829_v56, %v746_v20  ;;  %v977_v13 = vadd.f32 %v1592_v52, %v862_v22 }
 0x101   : > { %v1581_v60 = vpop.f32.mrf.mxu1 }
 0x102   : > { %v947_v0 = vpop.f32.mrf.mxu0  ;;  %v863_v32 = vadd.f32 %v1581_v60, %v749_v36  ;;  %v975_v29 = vadd.f32 %v944_v55, %v860_v38 }
 0x103   : > { %v832_v1 = vpop.f32.mrf.mxu1 }
 0x104   : > { %v1910_v4 = vpop.f32.mrf.mxu0  ;;  %v861_v51 = vadd.f32 %v832_v1, %v747_v35  ;;  %v978_v44 = vadd.f32 %v1593_v59, %v863_v32 }
 0x105   : > { %v1584_v7 = vpop.f32.mrf.mxu1 }
 0x106   : > { %v960_v11 = vpop.f32.mrf.mxu0  ;;  %v866_v55 = vadd.f32 %v1584_v7, %v752_v39  ;;  %v976_v50 = vadd.f32 %v947_v0, %v861_v51 }
 0x107   : > { %v845_v16 = vpop.f32.mrf.mxu1 }
 0x108   : > { %v1597_v17 = vpop.f32.mrf.mxu0  ;;  %v864_v56 = vadd.f32 %v845_v16, %v750_v53  ;;  %v981_v6 = vadd.f32 %v1910_v4, %v866_v55 }
 0x109   : > { %v1585_v26 = vpop.f32.mrf.mxu1 }
 0x10a   : > { %v1913_v12 = vpop.f32.mrf.mxu0  ;;  %v867_v62 = vadd.f32 %v1585_v26, %v753_v48  ;;  %v979_v0 = vadd.f32 %v960_v11, %v864_v56 }
 0x10b   : > { %v848_v30 = vpop.f32.mrf.mxu1 }
 0x10c   : > { %v1616_v37 = vpop.f32.mrf.mxu0  ;;  %v865_v7 = vadd.f32 %v848_v30, %v751_v61  ;;  %v982_v20 = vadd.f32 %v1597_v17, %v867_v62 }
 0x10d   : > { %v1604_v27 = vpop.f32.mrf.mxu1 }
 0x10e   : > { %v1091_v19 = vadd.f32 %v1604_v27, %v977_v13  ;;  %v1172_v34 = vpop.f32.mrf.mxu0  ;;  %v980_v23 = vadd.f32 %v1913_v12, %v865_v7 }
 0x10f   : > { %v1058_v41 = vpop.f32.mrf.mxu1 }
 0x110   : > { %v1205_v46 = vadd.f32 %v1616_v37, %v1091_v19  ;;  %v1089_v52 = vadd.f32 %v1058_v41, %v975_v29  ;;  %v1617_v33 = vpop.f32.mrf.mxu0 }
 0x111   : > { %v1605_v45 = vpop.f32.mrf.mxu1 }
 0x112   : > { %v1220_v57 = vmul.f32 %v1919_v31, %v1205_v46  ;;  %v1203_v58 = vadd.f32 %v1172_v34, %v1089_v52  ;;  %v1092_v60 = vadd.f32 %v1605_v45, %v978_v44  ;;  %v1175_v59 = vpop.f32.mrf.mxu0 }
 0x113   : > { %v1061_v63 = vpop.f32.mrf.mxu1 }
 0x114   : > { %v1235_v47 = vadd.f32 %v1925_v43, %v1220_v57  ;;  %v1218_v1 = vmul.f32 %v1919_v31, %v1203_v58  ;;  %v1206_v2 = vadd.f32 %v1617_v33, %v1092_v60  ;;  %v1090_v3 = vadd.f32 %v1061_v63, %v976_v50  ;;  %v1620_v5 = vpop.f32.mrf.mxu0 }
 0x115   : > { %v1608_v49 = vpop.f32.mrf.mxu1 }
 0x116   : > { %v1243_v8 = vmax.f32 %v1235_v47, 0.0  ;;  %v1233_v9 = vadd.f32 %v1925_v43, %v1218_v1  ;;  %v1221_v10 = vmul.f32 %v1919_v31, %v1206_v2  ;;  %v1204_v14 = vadd.f32 %v1175_v59, %v1090_v3  ;;  %v1188_v16 = vpop.f32.mrf.mxu0 }
 0x117   : > { %v1095_v4 = vadd.f32 %v1608_v49, %v981_v6  ;;  %v1074_v11 = vpop.f32.mrf.mxu1 }
 0x118   : > { %1252 = vst.msk [vmem:[%s1936_s13 + $0x10] sm:$0xff] %vm1249_vm1, %v1243_v8  ;;  %v1241_v21 = vmax.f32 %v1233_v9, 0.0  ;;  %v1236_v22 = vadd.f32 %v1925_v43, %v1221_v10  ;;  %v1219_v18 = vmul.f32 %v1919_v31, %v1204_v14  ;;  %v1093_v24 = vadd.f32 %v1074_v11, %v979_v0  ;;  %v1621_v38 = vpop.f32.mrf.mxu0 }
 0x119   : > { %v1209_v26 = vadd.f32 %v1620_v5, %v1095_v4  ;;  %v1609_v36 = vpop.f32.mrf.mxu1 }
 0x11a   : > { %1250 = vst.msk [vmem:[%s1936_s13] sm:$0xff] %vm1249_vm1, %v1241_v21  ;;  %v1244_v17 = vmax.f32 %v1236_v22, 0.0  ;;  %v1234_v15 = vadd.f32 %v1925_v43, %v1219_v18  ;;  %v1207_v25 = vadd.f32 %v1188_v16, %v1093_v24  ;;  %v1096_v28 = vadd.f32 %v1609_v36, %v982_v20  ;;  %v1191_v42 = vpop.f32.mrf.mxu0 }
 0x11b   : > { %v1224_v30 = vmul.f32 %v1919_v31, %v1209_v26  ;;  %v1077_v35 = vpop.f32.mrf.mxu1 }
 0x11c   : > { %1253 = vst.msk [vmem:[%s1936_s13 + $0x18] sm:$0xff] %vm1249_vm1, %v1244_v17  ;;  %v1242_v13 = vmax.f32 %v1234_v15, 0.0  ;;  %v1222_v12 = vmul.f32 %v1919_v31, %v1207_v25  ;;  %v1210_v32 = vadd.f32 %v1621_v38, %v1096_v28  ;;  %v1094_v37 = vadd.f32 %v1077_v35, %v980_v23 }
 0x11d   : > { %v1239_v40 = vadd.f32 %v1925_v43, %v1224_v30 }
 0x11e   : > { %1251 = vst.msk [vmem:[%s1936_s13 + $0x8] sm:$0xff] %vm1249_vm1, %v1242_v13  ;;  %v1237_v27 = vadd.f32 %v1925_v43, %v1222_v12  ;;  %v1225_v29 = vmul.f32 %v1919_v31, %v1210_v32  ;;  %v1208_v51 = vadd.f32 %v1191_v42, %v1094_v37 }
 0x11f   : > { %v1247_v19 = vmax.f32 %v1239_v40, 0.0 }
 0x120   : > { %v1245_v34 = vmax.f32 %v1237_v27, 0.0  ;;  %v1240_v39 = vadd.f32 %v1925_v43, %v1225_v29  ;;  %v1223_v53 = vmul.f32 %v1919_v31, %v1208_v51 }
 0x121   : > { %1256 = vst.msk [vmem:[%s1936_s13 + $0x30] sm:$0xff] %vm1249_vm1, %v1247_v19 }
 0x122   : > { %1254 = vst.msk [vmem:[%s1936_s13 + $0x20] sm:$0xff] %vm1249_vm1, %v1245_v34  ;;  %v1248_v54 = vmax.f32 %v1240_v39, 0.0  ;;  %v1238_v41 = vadd.f32 %v1925_v43, %v1223_v53 }
 0x124   : > { %1257 = vst.msk [vmem:[%s1936_s13 + $0x38] sm:$0xff] %vm1249_vm1, %v1248_v54  ;;  %v1246_v44 = vmax.f32 %v1238_v41, 0.0 }
 0x126   : > { %1255 = vst.msk [vmem:[%s1936_s13 + $0x28] sm:$0xff] %vm1249_vm1, %v1246_v44 }
 0x127 PF: > { %s14_s15 = sadd.s32 1, %s1659_s15  }
 0x128   : > { %p11_p4 = scmp.ge.s32.totalorder %s14_s15, 4  }
 0x12a   :  { %13 = sbr.rel (!%p11_p4) target bundleno = 1 (0x1), region = 76 }

// kernel: _lambda_.17
= control target key start
LH: loop header
LB: loop body
LE: loop exit
PB: predicated region body
PF: predicated region fallthrough
CT: control target
= control target key end

     0   :  { %vm40_vm0 = vcmask 261120   ;;  %vm118_vm1 = vcmask 523264   ;;  %s208_s1 = inlined_call_operand.vmem [shape: bf16[32,64], index: 1, kind: input, shape index: {}]   ;;  %s209_s0 = inlined_call_operand.vmem [shape: f32[32,32], index: 0, kind: input, shape index: {}]   ;;  %s210_s2 = inlined_call_operand.vmem [shape: f32[1,64], index: 2, kind: input, shape index: {}]   ;;  %s211_s3 = inlined_call_operand.vmem [shape: f32[1,64], index: 3, kind: input, shape index: {}]   ;;  %s212_s4 = inlined_call_operand.vmem [shape: f32[32,64], index: 4, kind: output, shape index: {}]  }
   0x1   :  { %v145_v0 = vld [vmem:[%s208_s1 + $0x8] sm:$0xff]   ;;  %v146_v1 = vld [vmem:[%s208_s1] sm:$0xff]   ;;  %v20_v5 = vld [vmem:[%s209_s0 + $0x10] sm:$0xff] }
   0x2   :  { %137 = vmatprep.subr.bf16.mxu0 %v145_v0  ;;  %v18_v2 = vld [vmem:[%s209_s0] sm:$0xff]  ;;  %v19_v3 = vld [vmem:[%s209_s0 + $0x8] sm:$0xff]  ;;  %v21_v6 = vld [vmem:[%s209_s0 + $0x18] sm:$0xff] }
   0x3   :  { %138 = vmatpush3.bf16.msra.mxu0 %v145_v0  ;;  %v22_v4 = vpack.c.bf16 %v19_v3, %v18_v2  ;;  %v23_v7 = vpack.c.bf16 %v21_v6, %v20_v5  ;;  %v131_v8 = vld [vmem:[%s210_s2] ss:$0 sm:$0xff] }
   0x4   :  { %139 = vmatprep.subr.bf16.mxu0 %v146_v1  ;;  %v132_v10 = vld [vmem:[%s211_s3] ss:$0 sm:$0xff] }
   0x5   :  { %141 = vmatprep.mubr.msk.bf16.mxu0 %vm40_vm0, %v22_v4 }
   0x7   :  { %140 = vmatpush3.bf16.msra.mxu0 %v146_v1 }
   0xa   :  { %142 = vmatmul.mubr.msk.bf16.vlgmr.msra.gmra.mxu0 %vm40_vm0, %v23_v7 }
  0xca   :  { %v143_v9 = vpop.f32.mrf.mxu0 }
  0xcb   :  { %v105_v11 = vmul.f32 %v143_v9, %v131_v8 }
  0xcc   :  { %v81_v12 = vpop.f32.mrf.mxu0 }
  0xcd   :  { %v116_v13 = vadd.f32 %v132_v10, %v105_v11  ;;  %v103_v14 = vmul.f32 %v131_v8, %v81_v12 }
  0xce   :  { %v144_v15 = vpop.f32.mrf.mxu0 }
  0xcf   :  { %121 = vst.msk [vmem:[%s212_s4 + $0x10] sm:$0xff] %vm118_vm1, %v116_v13  ;;  %v114_v16 = vadd.f32 %v132_v10, %v103_v14  ;;  %v106_v17 = vmul.f32 %v144_v15, %v131_v8 }
  0xd0   :  { %v84_v18 = vpop.f32.mrf.mxu0 }
  0xd1   :  { %119 = vst.msk [vmem:[%s212_s4] sm:$0xff] %vm118_vm1, %v114_v16  ;;  %v117_v19 = vadd.f32 %v132_v10, %v106_v17  ;;  %v104_v20 = vmul.f32 %v131_v8, %v84_v18 }
  0xd3   :  { %122 = vst.msk [vmem:[%s212_s4 + $0x18] sm:$0xff] %vm118_vm1, %v117_v19  ;;  %v115_v21 = vadd.f32 %v132_v10, %v104_v20 }
  0xd5   :  { %120 = vst.msk [vmem:[%s212_s4 + $0x8] sm:$0xff] %vm118_vm1, %v115_v21 }

// kernel: _lambda_.15
= control target key start
LH: loop header
LB: loop body
LE: loop exit
PB: predicated region body
PF: predicated region fallthrough
CT: control target
= control target key end

     0   :  { %s1768_s18 = smov 0   ;;  %s2079_s0 = inlined_call_operand.vmem [shape: f32[2,10,10,32], index: 0, kind: input, shape index: {}]   ;;  %s2080_s1 = inlined_call_operand.vmem [shape: bf16[9,32,32], index: 1, kind: input, shape index: {}]   ;;  %s2081_s2 = inlined_call_operand.vmem [shape: f32[1,32], index: 2, kind: input, shape index: {}]   ;;  %s2082_s3 = inlined_call_operand.vmem [shape: f32[1,32], index: 3, kind: input, shape index: {}]   ;;  %s2083_s4 = inlined_call_operand.vmem [shape: f32[2,8,8,32], index: 4, kind: input, shape index: {}]   ;;  %s2084_s5 = inlined_call_operand.vmem [shape: f32[2,8,8,32], index: 5, kind: output, shape index: {}]  }
   0x1 LB: > { %s1387_s19 = sadd.s32 4294967295, %s1736_s18   ;;  %p1391_p0 = scmp.ge.s32.totalorder %s1736_s18, 1  ;;  %s1736_s18 = sphi %s1768_s18, %s15_s18  }
   0x2   : > { %p197_p1 = scmp.lt.s32.totalorder %s1736_s18, 3 }
   0x4   : > { %p198_p2 = pnand %p1391_p0, %p197_p1 }
   0x5   : > { %p230_p3 = scmp.lt.s32.totalorder (!%p198_p2), %s1387_s19, 1 }
   0x6   : > { %201 = sbr.rel (%p198_p2) target bundleno = 297 (0x129), region = 40 }
   0xb   : > { %v1712_v0 = vld [vmem:[%s2080_s1 + $0x18] sm:$0xff]   ;;  %v1713_v1 = vld [vmem:[%s2080_s1 + $0x10] sm:$0xff]   ;;  %s2086_s19 = smov (!%p230_p3, %s1387_s19), 1  ;;  %v1714_v2 = vld [vmem:[%s2080_s1 + $0x8] sm:$0xff]   ;;  %vm291_vm0 = vcmask 261120  }
   0xc   : > { %1591 = vmatprep.subr.bf16.mxu0 %v1712_v0  ;;  %1699 = vmatprep.subr.bf16.mxu1 %v1712_v0  ;;  %s1703_s26 = smul.u32 160, %s2086_s19  ;;  %v1715_v3 = vld [vmem:[%s2080_s1 + $0x28] sm:$0xff]   ;;  %v1717_v7 = vld [vmem:[%s2080_s1 + $0x20] sm:$0xff]   ;;  %v1718_v29 = vld [vmem:[%s2080_s1 + $0x38] sm:$0xff]  }
   0xd   : > { %1592 = vmatpush3.bf16.msra.mxu0 %v1712_v0  ;;  %1701 = vmatpush3.bf16.msra.mxu1 %v1712_v0  ;;  %v1716_v12 = vld [vmem:[%s2080_s1] sm:$0xff]   ;;  %v1719_v28 = vld [vmem:[%s2080_s1 + $0x48] sm:$0xff]   ;;  %v1720_v38 = vld [vmem:[%s2080_s1 + $0x30] sm:$0xff]  }
   0xe   : > { %1593 = vmatprep.subr.bf16.mxu0 %v1713_v1  ;;  %1700 = vmatprep.subr.bf16.mxu1 %v1713_v1  ;;  %s1794_s6 = scalar_lea.vmem %s2079_s0, %s1703_s26  ;;  %v1721_v41 = vld [vmem:[%s2080_s1 + $0x40] sm:$0xff]   ;;  %v1723_v44 = vld [vmem:[%s2080_s1 + $0x68] sm:$0xff]   ;;  %v1722_v45 = vld [vmem:[%s2080_s1 + $0x58] sm:$0xff]  }
   0xf   : > { %v262_v4 = vld [vmem:[%s1794_s6 + $0x1] sm:$0xff]  ;;  %v1798_v5 = vld [vmem:[%s1794_s6 + $0x11] sm:$0xff] }
  0x10   : > { %v1801_v6 = vld [vmem:[%s1794_s6 + $0x41] sm:$0xff]  ;;  %v270_v8 = vpack.c.bf16 %v1798_v5, %v262_v4  ;;  %v1808_v9 = vld [vmem:[%s1794_s6 + $0x51] sm:$0xff] }
  0x11   : > { %1594 = vmatpush3.bf16.msra.mxu0 %v1713_v1  ;;  %1702 = vmatpush3.bf16.msra.mxu1 %v1713_v1  ;;  %v1811_v10 = vld [vmem:[%s1794_s6 + $0x21] sm:$0xff]  ;;  %v1814_v11 = vld [vmem:[%s1794_s6 + $0x31] sm:$0xff]  ;;  %v1821_v13 = vpack.c.bf16 %v1808_v9, %v1801_v6 }
  0x12   : > { %1603 = vmatprep.subr.bf16.mxu1 %v1714_v2  ;;  %1615 = vmatprep.subr.bf16.mxu0 %v1715_v3  ;;  %v1825_v14 = vpack.c.bf16 %v1814_v11, %v1811_v10  ;;  %v1828_v15 = vld [vmem:[%s1794_s6 + $0x61] sm:$0xff]  ;;  %v1831_v16 = vld [vmem:[%s1794_s6 + $0x71] sm:$0xff]  ;;  %v695_v48 = vpack.c.bf16 %v1811_v10, %v1798_v5  ;;  %v696_v50 = vpack.c.bf16 %v1801_v6, %v1814_v11 }
  0x13   : > { %v246_v17 = vld [vmem:[%s1794_s6] sm:$0xff]  ;;  %1595 = vmatprep.mubr.msk.bf16.mxu0 %vm291_vm0, %v270_v8  ;;  %v1837_v18 = vpack.c.bf16 %v1831_v16, %v1828_v15  ;;  %v247_v19 = vld [vmem:[%s1794_s6 + $0x10] sm:$0xff]  ;;  %1599 = vmatprep.mubr.msk.bf16.mxu1 %vm291_vm0, %v1821_v13  ;;  %v697_v53 = vpack.c.bf16 %v1828_v15, %v1808_v9  ;;  %v1727_v58 = vld [vmem:[%s2080_s1 + $0x88] sm:$0xff]  }
  0x14   : > { %v458_v20 = vld [vmem:[%s1794_s6 + $0x2] sm:$0xff]  ;;  %v1842_v21 = vld [vmem:[%s1794_s6 + $0x12] sm:$0xff]  ;;  %1596 = vmatmul.mubr.msk.bf16.vlgmr.msra.gmra.mxu0 %vm291_vm0, %v1825_v14  ;;  %v254_v22 = vpack.c.bf16 %v247_v19, %v246_v17 }
  0x15   : > { %v466_v23 = vpack.c.bf16 %v1842_v21, %v458_v20  ;;  %v1850_v24 = vld [vmem:[%s1794_s6 + $0x22] sm:$0xff]  ;;  %1600 = vmatmul.mubr.msk.bf16.vlgmr.msra.gmra.mxu1 %vm291_vm0, %v1837_v18  ;;  %1616 = vmatpush3.bf16.msra.mxu0 %v1715_v3  ;;  %v1855_v25 = vld [vmem:[%s1794_s6 + $0x32] sm:$0xff] }
  0x16   : > { %1604 = vmatpush3.bf16.msra.mxu1 %v1714_v2  ;;  %1617 = vmatprep.subr.bf16.mxu0 %v1717_v7  ;;  %v248_v26 = vld [vmem:[%s1794_s6 + $0x20] sm:$0xff]  ;;  %v249_v27 = vld [vmem:[%s1794_s6 + $0x30] sm:$0xff]  ;;  %v1871_v32 = vpack.c.bf16 %v1855_v25, %v1850_v24  ;;  %v1726_v59 = vld [vmem:[%s2080_s1 + $0x78] sm:$0xff]   ;;  %v809_v62 = vpack.c.bf16 %v1850_v24, %v1842_v21 }
  0x17   : > { %1605 = vmatprep.subr.bf16.mxu1 %v1716_v12  ;;  %1607 = vmatprep.mubr.msk.bf16.mxu1 %vm291_vm0, %v254_v22  ;;  %v250_v30 = vld [vmem:[%s1794_s6 + $0x40] sm:$0xff]  ;;  %v251_v31 = vld [vmem:[%s1794_s6 + $0x50] sm:$0xff]  ;;  %v255_v35 = vpack.c.bf16 %v249_v27, %v248_v26  ;;  %v581_v49 = vpack.c.bf16 %v248_v26, %v247_v19 }
  0x18   : > { %1619 = vmatprep.mubr.msk.bf16.mxu0 %vm291_vm0, %v466_v23  ;;  %v1874_v33 = vld [vmem:[%s1794_s6 + $0x42] sm:$0xff]  ;;  %v1877_v34 = vld [vmem:[%s1794_s6 + $0x52] sm:$0xff]  ;;  %v1879_v36 = vpack.c.bf16 %v251_v31, %v250_v30  ;;  %v582_v51 = vpack.c.bf16 %v250_v30, %v249_v27 }
  0x19   : > { %1618 = vmatpush3.bf16.msra.mxu0 %v1717_v7  ;;  %v1883_v37 = vpack.c.bf16 %v1877_v34, %v1874_v33  ;;  %v252_v39 = vld [vmem:[%s1794_s6 + $0x60] sm:$0xff]  ;;  %v253_v40 = vld [vmem:[%s1794_s6 + $0x70] sm:$0xff]  ;;  %v810_v63 = vpack.c.bf16 %v1874_v33, %v1855_v25 }
  0x1a   : > { %1606 = vmatpush3.bf16.msra.mxu1 %v1716_v12  ;;  %1639 = vmatprep.subr.bf16.mxu0 %v1719_v28  ;;  %v464_v42 = vld [vmem:[%s1794_s6 + $0x62] sm:$0xff]  ;;  %v1898_v43 = vld [vmem:[%s1794_s6 + $0x72] sm:$0xff]  ;;  %v257_v47 = vpack.c.bf16 %v253_v40, %v252_v39  ;;  %v583_v52 = vpack.c.bf16 %v252_v39, %v251_v31 }
  0x1b   : > { %1627 = vmatprep.subr.bf16.mxu1 %v1718_v29  ;;  %v1911_v46 = vpack.c.bf16 %v1898_v43, %v464_v42  ;;  %v1724_v54 = vld [vmem:[%s2080_s1 + $0x50] sm:$0xff]   ;;  %v1725_v55 = vld [vmem:[%s2080_s1 + $0x60] sm:$0xff]   ;;  %v811_v0 = vpack.c.bf16 %v464_v42, %v1877_v34 }
  0x1c   : > { %1620 = vmatmul.mubr.msk.bf16.vlgmr.msra.gmra.mxu0 %vm291_vm0, %v1871_v32  ;;  %v1448_v56 = vld [vmem:[%s1794_s6 + $0x81] sm:$0xff]  ;;  %v1728_v1 = vld [vmem:[%s2080_s1 + $0x70] sm:$0xff]  }
  0x1d   : > { %1608 = vmatmul.mubr.msk.bf16.vlgmr.msra.gmra.mxu1 %vm291_vm0, %v255_v35  ;;  %1640 = vmatpush3.bf16.msra.mxu0 %v1719_v28  ;;  %v1430_v57 = vld [vmem:[%s1794_s6 + $0x80] sm:$0xff]  ;;  %v698_v60 = vpack.c.bf16 %v1448_v56, %v1831_v16  ;;  %v1484_v3 = vld [vmem:[%s1794_s6 + $0x90] sm:$0xff] }
  0x1e   : > { %1628 = vmatpush3.bf16.msra.mxu1 %v1718_v29  ;;  %1611 = vmatprep.mubr.msk.bf16.mxu1 %vm291_vm0, %v1879_v36  ;;  %v584_v61 = vpack.c.bf16 %v1430_v57, %v253_v40  ;;  %v1729_v2 = vld [vmem:[%s2080_s1 + $0x80] sm:$0xff]   ;;  %v927_v5 = vpack.c.bf16 %v1484_v3, %v1430_v57  ;;  %v1520_v7 = vld [vmem:[%s1794_s6 + $0x92] sm:$0xff] }
  0x1f   : > { %1623 = vmatprep.mubr.msk.bf16.mxu0 %vm291_vm0, %v1883_v37  ;;  %1629 = vmatprep.subr.bf16.mxu1 %v1720_v38  ;;  %v1466_v4 = vld [vmem:[%s1794_s6 + $0x82] sm:$0xff]  ;;  %v1502_v8 = vld [vmem:[%s1794_s6 + $0x91] sm:$0xff]  ;;  %s1535_s6 = sshll.u32 %s2086_s19, 6 }
  0x20   : > { %1641 = vmatprep.subr.bf16.mxu0 %v1721_v41  ;;  %v812_v6 = vpack.c.bf16 %v1466_v4, %v1898_v43  ;;  %v1155_v9 = vpack.c.bf16 %v1520_v7, %v1466_v4  ;;  %v1041_v10 = vpack.c.bf16 %v1502_v8, %v1448_v56  ;;  %s2015_s17 = scalar_lea.vmem %s2083_s4, %s1535_s6  ;;  %s2040_s24 = scalar_lea.vmem %s2084_s5, %s1535_s6 }
  0x21   : > { %1642 = vmatpush3.bf16.msra.mxu0 %v1721_v41 }
  0x22   : > { %1630 = vmatpush3.bf16.msra.mxu1 %v1720_v38  ;;  %1663 = vmatprep.subr.bf16.mxu0 %v1723_v44 }
  0x23   : > { %1651 = vmatprep.subr.bf16.mxu1 %v1722_v45 }
  0x24   : > { %1624 = vmatmul.mubr.msk.bf16.gmra.mxu0 %vm291_vm0, %v1911_v46 }
  0x25   : > { %1612 = vmatmul.mubr.msk.bf16.gmra.mxu1 %vm291_vm0, %v257_v47  ;;  %1643 = vmatprep.mubr.msk.bf16.mxu0 %vm291_vm0, %v695_v48 }
  0x26   : > { %1631 = vmatprep.mubr.msk.bf16.mxu1 %vm291_vm0, %v581_v49 }
  0x2c   : > { %1644 = vmatmul.mubr.msk.bf16.vlgmr.msra.gmra.mxu0 %vm291_vm0, %v696_v50 }
  0x2d   : > { %1632 = vmatmul.mubr.msk.bf16.vlgmr.msra.gmra.mxu1 %vm291_vm0, %v582_v51  ;;  %1664 = vmatpush3.bf16.msra.mxu0 %v1723_v44 }
  0x2e   : > { %1652 = vmatpush3.bf16.msra.mxu1 %v1722_v45  ;;  %1635 = vmatprep.mubr.msk.bf16.mxu1 %vm291_vm0, %v583_v52 }
  0x2f   : > { %1647 = vmatprep.mubr.msk.bf16.mxu0 %vm291_vm0, %v697_v53  ;;  %1653 = vmatprep.subr.bf16.mxu1 %v1724_v54 }
  0x30   : > { %1665 = vmatprep.subr.bf16.mxu0 %v1725_v55 }
  0x31   : > { %1666 = vmatpush3.bf16.msra.mxu0 %v1725_v55 }
  0x32   : > { %1654 = vmatpush3.bf16.msra.mxu1 %v1724_v54  ;;  %1687 = vmatprep.subr.bf16.mxu0 %v1727_v58 }
  0x33   : > { %1675 = vmatprep.subr.bf16.mxu1 %v1726_v59 }
  0x34   : > { %1648 = vmatmul.mubr.msk.bf16.gmra.mxu0 %vm291_vm0, %v698_v60 }
  0x35   : > { %1636 = vmatmul.mubr.msk.bf16.gmra.mxu1 %vm291_vm0, %v584_v61  ;;  %1667 = vmatprep.mubr.msk.bf16.mxu0 %vm291_vm0, %v255_v35 }
  0x36   : > { %1655 = vmatprep.mubr.msk.bf16.mxu1 %vm291_vm0, %v809_v62 }
  0x3c   : > { %1668 = vmatmul.mubr.msk.bf16.vlgmr.msra.gmra.mxu0 %vm291_vm0, %v1879_v36 }
  0x3d   : > { %1656 = vmatmul.mubr.msk.bf16.vlgmr.msra.gmra.mxu1 %vm291_vm0, %v810_v63  ;;  %1688 = vmatpush3.bf16.msra.mxu0 %v1727_v58 }
  0x3e   : > { %1676 = vmatpush3.bf16.msra.mxu1 %v1726_v59  ;;  %1659 = vmatprep.mubr.msk.bf16.mxu1 %vm291_vm0, %v811_v0 }
  0x3f   : > { %1671 = vmatprep.mubr.msk.bf16.mxu0 %vm291_vm0, %v257_v47  ;;  %1677 = vmatprep.subr.bf16.mxu1 %v1728_v1 }
  0x40   : > { %1689 = vmatprep.subr.bf16.mxu0 %v1729_v2 }
  0x41   : > { %1690 = vmatpush3.bf16.msra.mxu0 %v1729_v2 }
  0x42   : > { %1678 = vmatpush3.bf16.msra.mxu1 %v1728_v1 }
  0x44   : > { %1672 = vmatmul.mubr.msk.bf16.gmra.mxu0 %vm291_vm0, %v927_v5 }
  0x45   : > { %1660 = vmatmul.mubr.msk.bf16.gmra.mxu1 %vm291_vm0, %v812_v6  ;;  %1691 = vmatprep.mubr.msk.bf16.mxu0 %vm291_vm0, %v1871_v32 }
  0x46   : > { %1679 = vmatprep.mubr.msk.bf16.mxu1 %vm291_vm0, %v1825_v14 }
  0x4c   : > { %1692 = vmatmul.mubr.msk.bf16.vlgmr.msra.gmra.mxu0 %vm291_vm0, %v1883_v37 }
  0x4d   : > { %1680 = vmatmul.mubr.msk.bf16.vlgmr.msra.gmra.mxu1 %vm291_vm0, %v1821_v13  ;;  %1695 = vmatprep.mubr.msk.bf16.mxu0 %vm291_vm0, %v1911_v46 }
  0x4e   : > { %1683 = vmatprep.mubr.msk.bf16.mxu1 %vm291_vm0, %v1837_v18 }
  0x54   : > { %1696 = vmatmul.mubr.msk.bf16.gmra.mxu0 %vm291_vm0, %v1155_v9 }
  0x55   : > { %1684 = vmatmul.mubr.msk.bf16.gmra.mxu1 %vm291_vm0, %v1041_v10 }
  0xd4   : > { %v1597_v11 = vpop.f32.mrf.mxu0 }
  0xd5   : > { %v1601_v12 = vpop.f32.mrf.mxu1 }
  0xd6   : > { %v338_v14 = vpop.f32.mrf.mxu0 }
  0xd7   : > { %v354_v15 = vpop.f32.mrf.mxu1 }
  0xd8   : > { %v1598_v16 = vpop.f32.mrf.mxu0 }
  0xd9   : > { %v1602_v13 = vpop.f32.mrf.mxu1 }
  0xda   : > { %v341_v17 = vpop.f32.mrf.mxu0 }
  0xdb   : > { %v1984_v19 = vpop.f32.mrf.mxu1 }
  0xdc   : > { %v1621_v20 = vpop.f32.mrf.mxu0 }
  0xdd   : > { %v1609_v21 = vpop.f32.mrf.mxu1 }
  0xde   : > { %v533_v22 = vpop.f32.mrf.mxu0  ;;  %v436_v51 = vadd.f32 %v1609_v21, %v1597_v11 }
  0xdf   : > { %v427_v18 = vpop.f32.mrf.mxu1 }
  0xe0   : > { %v1622_v23 = vpop.f32.mrf.mxu0  ;;  %v428_v54 = vadd.f32 %v427_v18, %v338_v14  ;;  %v566_v57 = vadd.f32 %v1621_v20, %v436_v51 }
  0xe1   : > { %v1610_v24 = vpop.f32.mrf.mxu1 }
  0xe2   : > { %v536_v25 = vpop.f32.mrf.mxu0  ;;  %v439_v58 = vadd.f32 %v1610_v24, %v1598_v16  ;;  %v564_v61 = vadd.f32 %v533_v22, %v428_v54  ;;  %v2022_v54 = vld [vmem:[%s2082_s3] ss:$0 sm:$0xff] }
  0xe3   : > { %v430_v26 = vpop.f32.mrf.mxu1 }
  0xe4   : > { %v1625_v27 = vpop.f32.mrf.mxu0  ;;  %v431_v62 = vadd.f32 %v430_v26, %v341_v17  ;;  %v567_v2 = vadd.f32 %v1622_v23, %v439_v58 }
  0xe5   : > { %v1613_v28 = vpop.f32.mrf.mxu1 }
  0xe6   : > { %v549_v29 = vpop.f32.mrf.mxu0  ;;  %v452_v5 = vadd.f32 %v1613_v28, %v1601_v12  ;;  %v565_v7 = vadd.f32 %v536_v25, %v431_v62 }
  0xe7   : > { %v443_v30 = vpop.f32.mrf.mxu1 }
  0xe8   : > { %v1626_v31 = vpop.f32.mrf.mxu0  ;;  %v444_v11 = vadd.f32 %v443_v30, %v354_v15  ;;  %v570_v18 = vadd.f32 %v1625_v27, %v452_v5 }
  0xe9   : > { %v1614_v32 = vpop.f32.mrf.mxu1 }
  0xea   : > { %v1986_v33 = vpop.f32.mrf.mxu0  ;;  %v455_v14 = vadd.f32 %v1614_v32, %v1602_v13  ;;  %v568_v28 = vadd.f32 %v549_v29, %v444_v11 }
  0xeb   : > { %v446_v34 = vpop.f32.mrf.mxu1 }
  0xec   : > { %v1645_v35 = vpop.f32.mrf.mxu0  ;;  %v447_v23 = vadd.f32 %v446_v34, %v1984_v19 }
  0xed   : > { %v1633_v36 = vpop.f32.mrf.mxu1 }
  0xee   : > { %v762_v37 = vpop.f32.mrf.mxu0  ;;  %v681_v63 = vadd.f32 %v1633_v36, %v566_v57 }
  0xef   : > { %v648_v38 = vpop.f32.mrf.mxu1 }
  0xf0   : > { %v1646_v39 = vpop.f32.mrf.mxu0  ;;  %v679_v3 = vadd.f32 %v648_v38, %v564_v61  ;;  %v795_v8 = vadd.f32 %v1645_v35, %v681_v63  ;;  %v571_v35 = vadd.f32 %v1626_v31, %v455_v14  ;;  %v569_v38 = vadd.f32 %v1986_v33, %v447_v23  ;;  %v2008_v31 = vld [vmem:[%s2081_s2] ss:$0 sm:$0xff]  ;;  %v1290_v63 = vld [vmem:[%s2015_s17 + $0x10] sm:$0xff] }
  0xf1   : > { %v1634_v40 = vpop.f32.mrf.mxu1 }
  0xf2   : > { %v765_v41 = vpop.f32.mrf.mxu0  ;;  %v682_v9 = vadd.f32 %v1634_v40, %v567_v2  ;;  %v793_v20 = vadd.f32 %v762_v37, %v679_v3 }
  0xf3   : > { %v651_v42 = vpop.f32.mrf.mxu1 }
  0xf4   : > { %v1649_v43 = vpop.f32.mrf.mxu0  ;;  %v680_v21 = vadd.f32 %v651_v42, %v565_v7  ;;  %v796_v12 = vadd.f32 %v1646_v39, %v682_v9 }
  0xf5   : > { %v1637_v44 = vpop.f32.mrf.mxu1 }
  0xf6   : > { %v1988_v45 = vpop.f32.mrf.mxu0  ;;  %v685_v36 = vadd.f32 %v1637_v44, %v570_v18  ;;  %v794_v13 = vadd.f32 %v765_v41, %v680_v21 }
  0xf7   : > { %v664_v46 = vpop.f32.mrf.mxu1 }
  0xf8   : > { %v1990_v47 = vpop.f32.mrf.mxu0  ;;  %v683_v27 = vadd.f32 %v664_v46, %v568_v28 }
  0xf9   : > { %v1638_v48 = vpop.f32.mrf.mxu1 }
  0xfa   : > { %v1992_v49 = vpop.f32.mrf.mxu0  ;;  %v686_v40 = vadd.f32 %v1638_v48, %v571_v35 }
  0xfb   : > { %v667_v50 = vpop.f32.mrf.mxu1 }
  0xfc   : > { %v1669_v52 = vpop.f32.mrf.mxu0  ;;  %v684_v29 = vadd.f32 %v667_v50, %v569_v38  ;;  %v800_v50 = vadd.f32 %v1990_v47, %v686_v40 }
  0xfd   : > { %v1657_v53 = vpop.f32.mrf.mxu1 }
  0xfe   : > { %v991_v55 = vpop.f32.mrf.mxu0  ;;  %v909_v17 = vadd.f32 %v1657_v53, %v795_v8  ;;  %v799_v53 = vadd.f32 %v1649_v43, %v685_v36  ;;  %v797_v43 = vadd.f32 %v1988_v45, %v683_v27  ;;  %v798_v61 = vadd.f32 %v1992_v49, %v684_v29  ;;  %v1288_v8 = vld [vmem:[%s2015_s17] sm:$0xff] }
  0xff   : > { %v876_v56 = vpop.f32.mrf.mxu1 }
 0x100   : > { %v1670_v59 = vpop.f32.mrf.mxu0  ;;  %v907_v26 = vadd.f32 %v876_v56, %v793_v20  ;;  %v1024_v30 = vadd.f32 %v1669_v52, %v909_v17 }
 0x101   : > { %v1658_v60 = vpop.f32.mrf.mxu1 }
 0x102   : > { %v994_v0 = vpop.f32.mrf.mxu0  ;;  %v910_v32 = vadd.f32 %v1658_v60, %v796_v12  ;;  %v1022_v34 = vadd.f32 %v991_v55, %v907_v26 }
 0x103   : > { %v879_v1 = vpop.f32.mrf.mxu1 }
 0x104   : > { %v1994_v4 = vpop.f32.mrf.mxu0  ;;  %v908_v39 = vadd.f32 %v879_v1, %v794_v13  ;;  %v1025_v44 = vadd.f32 %v1670_v59, %v910_v32 }
 0x105   : > { %v1661_v6 = vpop.f32.mrf.mxu1 }
 0x106   : > { %v1996_v10 = vpop.f32.mrf.mxu0  ;;  %v913_v52 = vadd.f32 %v1661_v6, %v799_v53  ;;  %v1023_v56 = vadd.f32 %v994_v0, %v908_v39  ;;  %v1294_v39 = vld [vmem:[%s2015_s17 + $0x30] sm:$0xff] }
 0x107   : > { %v892_v16 = vpop.f32.mrf.mxu1 }
 0x108   : > { %v1998_v22 = vpop.f32.mrf.mxu0  ;;  %v911_v62 = vadd.f32 %v892_v16, %v797_v43  ;;  %v1028_v6 = vadd.f32 %v1994_v4, %v913_v52  ;;  %v1291_v4 = vld [vmem:[%s2015_s17 + $0x18] sm:$0xff] }
 0x109   : > { %v1662_v24 = vpop.f32.mrf.mxu1  ;;  %v1295_v52 = vld [vmem:[%s2015_s17 + $0x38] sm:$0xff] }
 0x10a   : > { %v2001_v25 = vpop.f32.mrf.mxu0  ;;  %v914_v45 = vadd.f32 %v1662_v24, %v800_v50  ;;  %v1026_v21 = vadd.f32 %v1996_v10, %v911_v62 }
 0x10b   : > { %v895_v15 = vpop.f32.mrf.mxu1 }
 0x10c   : > { %v1693_v37 = vpop.f32.mrf.mxu0  ;;  %v912_v7 = vadd.f32 %v895_v15, %v798_v61  ;;  %v1029_v17 = vadd.f32 %v1998_v22, %v914_v45  ;;  %v1289_v22 = vld [vmem:[%s2015_s17 + $0x8] sm:$0xff] }
 0x10d   : > { %v1681_v19 = vpop.f32.mrf.mxu1 }
 0x10e   : > { %v1138_v42 = vadd.f32 %v1681_v19, %v1024_v30  ;;  %v1219_v51 = vpop.f32.mrf.mxu0  ;;  %v1027_v10 = vadd.f32 %v2001_v25, %v912_v7 }
 0x10f   : > { %v1105_v41 = vpop.f32.mrf.mxu1 }
 0x110   : > { %v1252_v33 = vadd.f32 %v1693_v37, %v1138_v42  ;;  %v1136_v46 = vadd.f32 %v1105_v41, %v1022_v34  ;;  %v1694_v48 = vpop.f32.mrf.mxu0 }
 0x111   : > { %v1682_v55 = vpop.f32.mrf.mxu1 }
 0x112   : > { %v1267_v57 = vmul.f32 %v2008_v31, %v1252_v33  ;;  %v1250_v58 = vadd.f32 %v1219_v51, %v1136_v46  ;;  %v1139_v59 = vadd.f32 %v1682_v55, %v1025_v44  ;;  %v1222_v60 = vpop.f32.mrf.mxu0  ;;  %v1292_v33 = vld [vmem:[%s2015_s17 + $0x20] sm:$0xff] }
 0x113   : > { %v1108_v47 = vpop.f32.mrf.mxu1 }
 0x114   : > { %v1282_v1 = vadd.f32 %v2022_v54, %v1267_v57  ;;  %v1265_v2 = vmul.f32 %v2008_v31, %v1250_v58  ;;  %v1253_v3 = vadd.f32 %v1694_v48, %v1139_v59  ;;  %v1137_v0 = vadd.f32 %v1108_v47, %v1023_v56  ;;  %v1697_v5 = vpop.f32.mrf.mxu0  ;;  %v1293_v59 = vld [vmem:[%s2015_s17 + $0x28] sm:$0xff] }
 0x115   : > { %v1685_v9 = vpop.f32.mrf.mxu1 }
 0x116   : > { %v1298_v11 = vadd.f32 %v1290_v63, %v1282_v1  ;;  %v1280_v49 = vadd.f32 %v2022_v54, %v1265_v2  ;;  %v1268_v14 = vmul.f32 %v2008_v31, %v1253_v3  ;;  %v1251_v16 = vadd.f32 %v1222_v60, %v1137_v0  ;;  %v1235_v20 = vpop.f32.mrf.mxu0 }
 0x117   : > { %v1142_v18 = vadd.f32 %v1685_v9, %v1028_v6  ;;  %v1121_v23 = vpop.f32.mrf.mxu1 }
 0x118   : > { %v1306_v24 = vmax.f32 %v1298_v11, 0.0  ;;  %v1296_v12 = vadd.f32 %v1288_v8, %v1280_v49  ;;  %v1283_v26 = vadd.f32 %v2022_v54, %v1268_v14  ;;  %v1266_v28 = vmul.f32 %v2008_v31, %v1251_v16  ;;  %v1698_v13 = vpop.f32.mrf.mxu0 }
 0x119   : > { %v1256_v35 = vadd.f32 %v1697_v5, %v1142_v18  ;;  %v1140_v36 = vadd.f32 %v1121_v23, %v1026_v21  ;;  %v1686_v15 = vpop.f32.mrf.mxu1 }
 0x11a   : > { %1314 = vst.msk [vmem:[%s2040_s24 + $0x10] sm:$0xff] %vm291_vm0, %v1306_v24  ;;  %v1304_v30 = vmax.f32 %v1296_v12, 0.0  ;;  %v1299_v32 = vadd.f32 %v1291_v4, %v1283_v26  ;;  %v1281_v37 = vadd.f32 %v2022_v54, %v1266_v28  ;;  %v1143_v38 = vadd.f32 %v1686_v15, %v1029_v17  ;;  %v1238_v41 = vpop.f32.mrf.mxu0 }
 0x11b   : > { %v1271_v27 = vmul.f32 %v2008_v31, %v1256_v35  ;;  %v1254_v40 = vadd.f32 %v1235_v20, %v1140_v36  ;;  %v1124_v19 = vpop.f32.mrf.mxu1 }
 0x11c   : > { %1312 = vst.msk [vmem:[%s2040_s24] sm:$0xff] %vm291_vm0, %v1304_v30  ;;  %v1307_v25 = vmax.f32 %v1299_v32, 0.0  ;;  %v1297_v34 = vadd.f32 %v1289_v22, %v1281_v37  ;;  %v1257_v42 = vadd.f32 %v1698_v13, %v1143_v38  ;;  %v1141_v51 = vadd.f32 %v1124_v19, %v1027_v10 }
 0x11d   : > { %v1286_v53 = vadd.f32 %v2022_v54, %v1271_v27  ;;  %v1269_v29 = vmul.f32 %v2008_v31, %v1254_v40 }
 0x11e   : > { %1315 = vst.msk [vmem:[%s2040_s24 + $0x18] sm:$0xff] %vm291_vm0, %v1307_v25  ;;  %v1305_v44 = vmax.f32 %v1297_v34, 0.0  ;;  %v1272_v46 = vmul.f32 %v2008_v31, %v1257_v42  ;;  %v1255_v48 = vadd.f32 %v1238_v41, %v1141_v51 }
 0x11f   : > { %v1302_v43 = vadd.f32 %v1294_v39, %v1286_v53  ;;  %v1284_v50 = vadd.f32 %v2022_v54, %v1269_v29 }
 0x120   : > { %1313 = vst.msk [vmem:[%s2040_s24 + $0x8] sm:$0xff] %vm291_vm0, %v1305_v44  ;;  %v1287_v55 = vadd.f32 %v2022_v54, %v1272_v46  ;;  %v1270_v56 = vmul.f32 %v2008_v31, %v1255_v48 }
 0x121   : > { %v1310_v57 = vmax.f32 %v1302_v43, 0.0  ;;  %v1300_v58 = vadd.f32 %v1292_v33, %v1284_v50 }
 0x122   : > { %v1303_v60 = vadd.f32 %v1295_v52, %v1287_v55  ;;  %v1285_v61 = vadd.f32 %v2022_v54, %v1270_v56 }
 0x123   : > { %1318 = vst.msk [vmem:[%s2040_s24 + $0x30] sm:$0xff] %vm291_vm0, %v1310_v57  ;;  %v1308_v62 = vmax.f32 %v1300_v58, 0.0 }
 0x124   : > { %v1311_v45 = vmax.f32 %v1303_v60, 0.0  ;;  %v1301_v63 = vadd.f32 %v1293_v59, %v1285_v61 }
 0x125   : > { %1316 = vst.msk [vmem:[%s2040_s24 + $0x20] sm:$0xff] %vm291_vm0, %v1308_v62 }
 0x126   : > { %1319 = vst.msk [vmem:[%s2040_s24 + $0x38] sm:$0xff] %vm291_vm0, %v1311_v45  ;;  %v1309_v47 = vmax.f32 %v1301_v63, 0.0 }
 0x128   : > { %1317 = vst.msk [vmem:[%s2040_s24 + $0x28] sm:$0xff] %vm291_vm0, %v1309_v47 }
 0x129 PF: > { %s15_s18 = sadd.s32 1, %s1736_s18  }
 0x12a   : > { %p12_p4 = scmp.ge.s32.totalorder %s15_s18, 4  }
 0x12c   :  { %14 = sbr.rel (!%p12_p4) target bundleno = 1 (0x1), region = 83 }

// kernel: _lambda_.18
= control target key start
LH: loop header
LB: loop body
LE: loop exit
PB: predicated region body
PF: predicated region fallthrough
CT: control target
= control target key end

     0   :  { %s1593_s18 = smov 0   ;;  %s1822_s0 = inlined_call_operand.vmem [shape: f32[2,6,6,64], index: 0, kind: input, shape index: {}]   ;;  %s1823_s1 = inlined_call_operand.vmem [shape: bf16[9,64,64], index: 1, kind: input, shape index: {}]   ;;  %s1824_s2 = inlined_call_operand.vmem [shape: f32[1,64], index: 2, kind: input, shape index: {}]   ;;  %s1825_s3 = inlined_call_operand.vmem [shape: f32[1,64], index: 3, kind: input, shape index: {}]   ;;  %s1826_s4 = inlined_call_operand.vmem [shape: f32[2,4,4,64], index: 4, kind: input, shape index: {}]   ;;  %s1827_s5 = inlined_call_operand.vmem [shape: f32[2,4,4,64], index: 5, kind: output, shape index: {}]  }
   0x1 LB: > { %s1184_s19 = sadd.s32 4294967295, %s1559_s18   ;;  %p1188_p0 = scmp.ge.s32.totalorder %s1559_s18, 1  ;;  %s1559_s18 = sphi %s1593_s18, %s15_s18  }
   0x2   : > { %p197_p1 = scmp.lt.s32.totalorder %s1559_s18, 3 }
   0x4   : > { %p198_p2 = pnand %p1188_p0, %p197_p1 }
   0x5   : > { %p230_p3 = scmp.lt.s32.totalorder (!%p198_p2), %s1184_s19, 1 }
   0x6   : > { %201 = sbr.rel (%p198_p2) target bundleno = 302 (0x12e), region = 40 }
   0xb   : > { %v1497_v0 = vld [vmem:[%s1823_s1 + $0x38] sm:$0xff]   ;;  %v1561_v1 = vmov 0.0   ;;  %v1499_v3 = vld [vmem:[%s1823_s1 + $0x30] sm:$0xff]   ;;  %vm1562_vm0 = vmmov 0   ;;  %s1829_s19 = smov (!%p230_p3, %s1184_s19), 1  ;;  %v1501_v5 = vld [vmem:[%s1823_s1 + $0x28] sm:$0xff]  }
   0xc   : > { %1378 = vmatprep.subr.bf16.mxu0 %v1561_v1  ;;  %1390 = vmatprep.subr.bf16.mxu1 %v1561_v1  ;;  %v1498_v2 = vld [vmem:[%s1823_s1 + $0x18] sm:$0xff]   ;;  %v1500_v4 = vld [vmem:[%s1823_s1 + $0x10] sm:$0xff]   ;;  %s1486_s30 = smul.u32 48, %s1829_s19  ;;  %v1502_v6 = vld [vmem:[%s1823_s1 + $0x8] sm:$0xff]   ;;  %vm313_vm1 = vcmask 523264   ;;  %s1331_s29 = sshll.u32 %s1829_s19, 4 }
   0xd   : > { %1379 = vmatpush3.bf16.msra.mxu0 %v1497_v0  ;;  %1386 = vmatprep.mubr.msk.bf16.mxu0 %vm1562_vm0, %v1561_v1  ;;  %v1503_v7 = vld [vmem:[%s1823_s1 + $0x20] sm:$0xff]   ;;  %v1509_v15 = vld [vmem:[%s1823_s1 + $0x58] sm:$0xff]   ;;  %v1511_v17 = vld [vmem:[%s1823_s1 + $0x50] sm:$0xff]   ;;  %s1804_s7 = scalar_lea.vmem %s1826_s4, %s1331_s29  ;;  %s244_s14 = scalar_lea.vmem %s1827_s5, %s1331_s29  ;;  %vm1112_vm2 = vcmask 519168  }
   0xe   : > { %1391 = vmatpush3.bf16.msra.mxu1 %v1498_v2  ;;  %1380 = vmatprep.subr.bf16.mxu0 %v1561_v1  ;;  %s1638_s12 = scalar_lea.vmem %s1822_s0, %s1486_s30  ;;  %v1504_v8 = vld [vmem:[%s1823_s1] sm:$0xff]   ;;  %v1510_v16 = vld [vmem:[%s1823_s1 + $0x78] sm:$0xff]   ;;  %v1512_v18 = vld [vmem:[%s1823_s1 + $0x70] sm:$0xff]  }
   0xf   : > { %1392 = vmatprep.subr.bf16.mxu1 %v1561_v1  ;;  %1398 = vmatprep.mubr.msk.bf16.mxu1 %vm1562_vm0, %v1561_v1  ;;  %v1505_v9 = vld [vmem:[%s1638_s12 + $0x1] ss:$8 sps:$4 sm:$0xff]   ;;  %v1506_v10 = vld [vmem:[%s1638_s12 + $0x11] ss:$8 sps:$4 sm:$0xff]  }
  0x10   : > { %v1507_v11 = vld [vmem:[%s1638_s12] ss:$8 sps:$4 sm:$0xff]   ;;  %v1508_v12 = vld [vmem:[%s1638_s12 + $0x10] ss:$8 sps:$4 sm:$0xff]   ;;  %v279_v13 = vpack.c.bf16 %v1506_v10, %v1505_v9 }
  0x11   : > { %1381 = vmatpush3.bf16.msra.mxu0 %v1499_v3  ;;  %v258_v14 = vpack.c.bf16 %v1508_v12, %v1507_v11  ;;  %v1513_v19 = vld [vmem:[%s1823_s1 + $0x48] sm:$0xff]   ;;  %v1515_v21 = vld [vmem:[%s1823_s1 + $0x40] sm:$0xff]   ;;  %v1518_v23 = vld [vmem:[%s1638_s12 + $0x12] ss:$8 sps:$4 sm:$0xff]  }
  0x12   : > { %1393 = vmatpush3.bf16.msra.mxu1 %v1500_v4  ;;  %1382 = vmatprep.subr.bf16.mxu0 %v1561_v1  ;;  %v1514_v20 = vld [vmem:[%s1823_s1 + $0x68] sm:$0xff]   ;;  %v1521_v25 = vld [vmem:[%s1638_s12 + $0x18] ss:$8 sps:$4 sm:$0xff]   ;;  %v1523_v31 = vld [vmem:[%s1823_s1 + $0x90] sm:$0xff]  }
  0x13   : > { %1394 = vmatprep.subr.bf16.mxu1 %v1561_v1  ;;  %v1517_v22 = vld [vmem:[%s1638_s12 + $0x2] ss:$8 sps:$4 sm:$0xff]   ;;  %v1519_v28 = vld [vmem:[%s1823_s1 + $0x98] sm:$0xff]   ;;  %v1524_v32 = vld [vmem:[%s1823_s1 + $0xb0] sm:$0xff]  }
  0x14   : > { %v1520_v24 = vld [vmem:[%s1638_s12 + $0x8] ss:$8 sps:$4 sm:$0xff]   ;;  %v1516_v26 = vld [vmem:[%s1823_s1 + $0x60] sm:$0xff]   ;;  %v438_v27 = vpack.c.bf16 %v1518_v23, %v1517_v22  ;;  %v1522_v30 = vld [vmem:[%s1823_s1 + $0xb8] sm:$0xff]  }
  0x15   : > { %1383 = vmatpush3.bf16.msra.mxu0 %v1501_v5  ;;  %v531_v29 = vpack.c.bf16 %v1521_v25, %v1520_v24  ;;  %v1525_v33 = vld [vmem:[%s1823_s1 + $0x88] sm:$0xff]   ;;  %v1527_v36 = vld [vmem:[%s1823_s1 + $0x80] sm:$0xff]   ;;  %v1531_v42 = vld [vmem:[%s1823_s1 + $0xd8] sm:$0xff]  }
  0x16   : > { %1395 = vmatpush3.bf16.msra.mxu1 %v1502_v6  ;;  %1384 = vmatprep.subr.bf16.mxu0 %v1561_v1  ;;  %v1526_v34 = vld [vmem:[%s1823_s1 + $0xa8] sm:$0xff]   ;;  %v1530_v37 = vld [vmem:[%s1638_s12 + $0x19] ss:$8 sps:$4 sm:$0xff]   ;;  %v1535_v45 = vld [vmem:[%s1823_s1 + $0xd0] sm:$0xff]  }
  0x17   : > { %1396 = vmatprep.subr.bf16.mxu1 %v1561_v1  ;;  %v1529_v35 = vld [vmem:[%s1638_s12 + $0x9] ss:$8 sps:$4 sm:$0xff]   ;;  %v1533_v39 = vld [vmem:[%s1638_s12 + $0x1a] ss:$8 sps:$4 sm:$0xff]  }
  0x18   : > { %v1532_v38 = vld [vmem:[%s1638_s12 + $0xa] ss:$8 sps:$4 sm:$0xff]   ;;  %v1528_v40 = vld [vmem:[%s1823_s1 + $0xa0] sm:$0xff]   ;;  %v623_v41 = vpack.c.bf16 %v1530_v37, %v1529_v35  ;;  %v1534_v44 = vld [vmem:[%s1823_s1 + $0xf8] sm:$0xff]  }
  0x19   : > { %1385 = vmatpush3.bf16.msra.mxu0 %v1503_v7  ;;  %v715_v43 = vpack.c.bf16 %v1533_v39, %v1532_v38  ;;  %v1536_v46 = vld [vmem:[%s1823_s1 + $0xf0] sm:$0xff]   ;;  %v1537_v47 = vld [vmem:[%s1823_s1 + $0xc8] sm:$0xff]   ;;  %v1539_v51 = vld [vmem:[%s1823_s1 + $0xc0] sm:$0xff]  }
  0x1a   : > { %1397 = vmatpush3.bf16.msra.mxu1 %v1504_v8  ;;  %1402 = vmatprep.subr.bf16.mxu0 %v1561_v1  ;;  %v1538_v48 = vld [vmem:[%s1823_s1 + $0xe8] sm:$0xff]   ;;  %v1541_v49 = vld [vmem:[%s1638_s12 + $0x10] ss:$8 sps:$4 sm:$0xff]   ;;  %v1540_v54 = vld [vmem:[%s1823_s1 + $0xe0] sm:$0xff]  }
  0x1b   : > { %1414 = vmatprep.subr.bf16.mxu1 %v1561_v1  ;;  %v1542_v50 = vld [vmem:[%s1638_s12 + $0x20] ss:$8 sps:$4 sm:$0xff]   ;;  %v1544_v52 = vld [vmem:[%s1638_s12 + $0x11] ss:$8 sps:$4 sm:$0xff]  }
  0x1c   : > { %1387 = vmatmul.mubr.msk.bf16.vlgmr.msra.gmra.mxu0 %vm313_vm1, %v279_v13  ;;  %v1545_v53 = vld [vmem:[%s1638_s12 + $0x21] ss:$8 sps:$4 sm:$0xff]   ;;  %v808_v55 = vpack.c.bf16 %v1542_v50, %v1541_v49  ;;  %v1543_v56 = vld [vmem:[%s1823_s1 + $0x118] sm:$0xff]   ;;  %v1546_v58 = vld [vmem:[%s1823_s1 + $0x110] sm:$0xff]  }
  0x1d   : > { %1399 = vmatmul.mubr.msk.bf16.vlgmr.msra.gmra.mxu1 %vm313_vm1, %v258_v14  ;;  %1403 = vmatpush3.bf16.msra.mxu0 %v1509_v15  ;;  %v900_v57 = vpack.c.bf16 %v1545_v53, %v1544_v52  ;;  %v1547_v59 = vld [vmem:[%s1823_s1 + $0x108] sm:$0xff]   ;;  %v1549_v60 = vld [vmem:[%s1638_s12 + $0x12] ss:$8 sps:$4 sm:$0xff]   ;;  %v1548_v62 = vld [vmem:[%s1823_s1 + $0x100] sm:$0xff]  }
  0x1e   : > { %1415 = vmatpush3.bf16.msra.mxu1 %v1510_v16  ;;  %1404 = vmatprep.subr.bf16.mxu0 %v1561_v1  ;;  %v1550_v61 = vld [vmem:[%s1638_s12 + $0x22] ss:$8 sps:$4 sm:$0xff]  }
  0x1f   : > { %1416 = vmatprep.subr.bf16.mxu1 %v1561_v1  ;;  %1410 = vmatprep.mubr.msk.bf16.mxu0 %vm1562_vm0, %v1561_v1  ;;  %v992_v63 = vpack.c.bf16 %v1550_v61, %v1549_v60  ;;  %v1551_v52 = vld [vmem:[%s1804_s7] sm:$0xff]  }
  0x20   : > { %1422 = vmatprep.mubr.msk.bf16.mxu1 %vm1562_vm0, %v1561_v1 }
  0x21   : > { %1405 = vmatpush3.bf16.msra.mxu0 %v1511_v17 }
  0x22   : > { %1417 = vmatpush3.bf16.msra.mxu1 %v1512_v18  ;;  %1406 = vmatprep.subr.bf16.mxu0 %v1561_v1 }
  0x23   : > { %1418 = vmatprep.subr.bf16.mxu1 %v1561_v1 }
  0x25   : > { %1407 = vmatpush3.bf16.msra.mxu0 %v1513_v19 }
  0x26   : > { %1419 = vmatpush3.bf16.msra.mxu1 %v1514_v20  ;;  %1408 = vmatprep.subr.bf16.mxu0 %v1561_v1 }
  0x27   : > { %1420 = vmatprep.subr.bf16.mxu1 %v1561_v1 }
  0x29   : > { %1409 = vmatpush3.bf16.msra.mxu0 %v1515_v21 }
  0x2a   : > { %1421 = vmatpush3.bf16.msra.mxu1 %v1516_v26  ;;  %1426 = vmatprep.subr.bf16.mxu0 %v1561_v1 }
  0x2b   : > { %1438 = vmatprep.subr.bf16.mxu1 %v1561_v1 }
  0x2c   : > { %1411 = vmatmul.mubr.msk.bf16.vlgmr.msra.gmra.mxu0 %vm313_vm1, %v438_v27 }
  0x2d   : > { %1427 = vmatpush3.bf16.msra.mxu0 %v1519_v28  ;;  %1423 = vmatmul.mubr.msk.bf16.vlgmr.msra.gmra.mxu1 %vm313_vm1, %v531_v29 }
  0x2e   : > { %1439 = vmatpush3.bf16.msra.mxu1 %v1522_v30  ;;  %1428 = vmatprep.subr.bf16.mxu0 %v1561_v1 }
  0x2f   : > { %1440 = vmatprep.subr.bf16.mxu1 %v1561_v1  ;;  %1434 = vmatprep.mubr.msk.bf16.mxu0 %vm1562_vm0, %v1561_v1 }
  0x30   : > { %1446 = vmatprep.mubr.msk.bf16.mxu1 %vm1562_vm0, %v1561_v1 }
  0x31   : > { %1429 = vmatpush3.bf16.msra.mxu0 %v1523_v31 }
  0x32   : > { %1441 = vmatpush3.bf16.msra.mxu1 %v1524_v32  ;;  %1430 = vmatprep.subr.bf16.mxu0 %v1561_v1 }
  0x33   : > { %1442 = vmatprep.subr.bf16.mxu1 %v1561_v1 }
  0x35   : > { %1431 = vmatpush3.bf16.msra.mxu0 %v1525_v33 }
  0x36   : > { %1443 = vmatpush3.bf16.msra.mxu1 %v1526_v34  ;;  %1432 = vmatprep.subr.bf16.mxu0 %v1561_v1 }
  0x37   : > { %1444 = vmatprep.subr.bf16.mxu1 %v1561_v1 }
  0x39   : > { %1433 = vmatpush3.bf16.msra.mxu0 %v1527_v36 }
  0x3a   : > { %1445 = vmatpush3.bf16.msra.mxu1 %v1528_v40  ;;  %1450 = vmatprep.subr.bf16.mxu0 %v1561_v1 }
  0x3b   : > { %1462 = vmatprep.subr.bf16.mxu1 %v1561_v1 }
  0x3c   : > { %1435 = vmatmul.mubr.msk.bf16.vlgmr.msra.gmra.mxu0 %vm313_vm1, %v623_v41 }
  0x3d   : > { %1451 = vmatpush3.bf16.msra.mxu0 %v1531_v42  ;;  %1447 = vmatmul.mubr.msk.bf16.vlgmr.msra.gmra.mxu1 %vm313_vm1, %v715_v43 }
  0x3e   : > { %1463 = vmatpush3.bf16.msra.mxu1 %v1534_v44  ;;  %1452 = vmatprep.subr.bf16.mxu0 %v1561_v1 }
  0x3f   : > { %1464 = vmatprep.subr.bf16.mxu1 %v1561_v1  ;;  %1458 = vmatprep.mubr.msk.bf16.mxu0 %vm1562_vm0, %v1561_v1 }
  0x40   : > { %1470 = vmatprep.mubr.msk.bf16.mxu1 %vm1562_vm0, %v1561_v1 }
  0x41   : > { %1453 = vmatpush3.bf16.msra.mxu0 %v1535_v45 }
  0x42   : > { %1465 = vmatpush3.bf16.msra.mxu1 %v1536_v46  ;;  %1454 = vmatprep.subr.bf16.mxu0 %v1561_v1  ;;  %v1327_v46 = vld [vmem:[%s1824_s2] ss:$0 sm:$0xff] }
  0x43   : > { %1466 = vmatprep.subr.bf16.mxu1 %v1561_v1 }
  0x45   : > { %1455 = vmatpush3.bf16.msra.mxu0 %v1537_v47 }
  0x46   : > { %1467 = vmatpush3.bf16.msra.mxu1 %v1538_v48  ;;  %1456 = vmatprep.subr.bf16.mxu0 %v1561_v1  ;;  %v1328_v48 = vld [vmem:[%s1825_s3] ss:$0 sm:$0xff] }
  0x47   : > { %1468 = vmatprep.subr.bf16.mxu1 %v1561_v1 }
  0x49   : > { %1457 = vmatpush3.bf16.msra.mxu0 %v1539_v51 }
  0x4a   : > { %1469 = vmatpush3.bf16.msra.mxu1 %v1540_v54  ;;  %1474 = vmatprep.subr.bf16.mxu0 %v1561_v1 }
  0x4c   : > { %1459 = vmatmul.mubr.msk.bf16.vlgmr.msra.gmra.mxu0 %vm313_vm1, %v808_v55 }
  0x4d   : > { %1475 = vmatpush3.bf16.msra.mxu0 %v1543_v56  ;;  %1471 = vmatmul.mubr.msk.bf16.vlgmr.msra.gmra.mxu1 %vm313_vm1, %v900_v57 }
  0x4e   : > { %1476 = vmatprep.subr.bf16.mxu0 %v1561_v1  ;;  %1482 = vmatprep.mubr.msk.bf16.mxu0 %vm1562_vm0, %v1561_v1 }
  0x51   : > { %1477 = vmatpush3.bf16.msra.mxu0 %v1546_v58 }
  0x52   : > { %1478 = vmatprep.subr.bf16.mxu0 %v1561_v1 }
  0x55   : > { %1479 = vmatpush3.bf16.msra.mxu0 %v1547_v59  ;;  %v1552_v59 = vld [vmem:[%s1804_s7 + $0x8] sm:$0xff]  }
  0x56   : > { %1480 = vmatprep.subr.bf16.mxu0 %v1561_v1 }
  0x59   : > { %1481 = vmatpush3.bf16.msra.mxu0 %v1548_v62 }
  0x5c   : > { %1483 = vmatmul.mubr.msk.bf16.vlgmr.msra.gmra.mxu0 %vm313_vm1, %v992_v63 }
  0xdc   : > { %v351_v0 = vpop.f32.mrf.mxu0 }
  0xdd   : > { %v419_v2 = vpop.f32.mrf.mxu1 }
  0xde   : > { %v1388_v3 = vpop.f32.mrf.mxu0  ;;  %v420_v24 = vadd.f32 %v419_v2, %v351_v0 }
  0xdf   : > { %v1400_v4 = vpop.f32.mrf.mxu1 }
  0xe0   : > { %v354_v5 = vpop.f32.mrf.mxu0 }
  0xe1   : > { %v422_v6 = vpop.f32.mrf.mxu1 }
  0xe2   : > { %v1389_v7 = vpop.f32.mrf.mxu0  ;;  %v423_v27 = vadd.f32 %v422_v6, %v354_v5 }
  0xe3   : > { %v1401_v8 = vpop.f32.mrf.mxu1 }
  0xec   : > { %v509_v1 = vpop.f32.mrf.mxu0 }
  0xed   : > { %v602_v9 = vpop.f32.mrf.mxu1  ;;  %v516_v25 = vadd.f32 %v509_v1, %v420_v24 }
  0xee   : > { %v1412_v10 = vpop.f32.mrf.mxu0 }
  0xef   : > { %v1424_v11 = vpop.f32.mrf.mxu1  ;;  %v609_v30 = vadd.f32 %v602_v9, %v516_v25 }
  0xf0   : > { %v512_v12 = vpop.f32.mrf.mxu0 }
  0xf1   : > { %v605_v13 = vpop.f32.mrf.mxu1  ;;  %v517_v31 = vadd.f32 %v512_v12, %v423_v27 }
  0xf2   : > { %v1413_v14 = vpop.f32.mrf.mxu0 }
  0xf3   : > { %v1425_v15 = vpop.f32.mrf.mxu1  ;;  %v610_v37 = vadd.f32 %v605_v13, %v517_v31 }
  0xfc   : > { %v694_v16 = vpop.f32.mrf.mxu0 }
  0xfd   : > { %v786_v17 = vpop.f32.mrf.mxu1  ;;  %v701_v34 = vadd.f32 %v694_v16, %v609_v30 }
  0xfe   : > { %v1436_v18 = vpop.f32.mrf.mxu0 }
  0xff   : > { %v1448_v19 = vpop.f32.mrf.mxu1  ;;  %v793_v39 = vadd.f32 %v786_v17, %v701_v34 }
 0x100   : > { %v697_v20 = vpop.f32.mrf.mxu0 }
 0x101   : > { %v789_v21 = vpop.f32.mrf.mxu1  ;;  %v702_v40 = vadd.f32 %v697_v20, %v610_v37 }
 0x102   : > { %v1437_v22 = vpop.f32.mrf.mxu0 }
 0x103   : > { %v1449_v23 = vpop.f32.mrf.mxu1  ;;  %v794_v42 = vadd.f32 %v789_v21, %v702_v40 }
 0x10c   : > { %v879_v26 = vpop.f32.mrf.mxu0 }
 0x10d   : > { %v971_v28 = vpop.f32.mrf.mxu1  ;;  %v886_v41 = vadd.f32 %v879_v26, %v793_v39 }
 0x10e   : > { %v1460_v29 = vpop.f32.mrf.mxu0 }
 0x10f   : > { %v1472_v32 = vpop.f32.mrf.mxu1  ;;  %v978_v43 = vadd.f32 %v971_v28, %v886_v41 }
 0x110   : > { %v882_v33 = vpop.f32.mrf.mxu0 }
 0x111   : > { %v974_v35 = vpop.f32.mrf.mxu1  ;;  %v887_v44 = vadd.f32 %v882_v33, %v794_v42 }
 0x112   : > { %v1461_v36 = vpop.f32.mrf.mxu0 }
 0x113   : > { %v1473_v38 = vpop.f32.mrf.mxu1  ;;  %v979_v50 = vadd.f32 %v974_v35, %v887_v44 }
 0x11c   : > { %v1063_v45 = vpop.f32.mrf.mxu0 }
 0x11d   : > { %v1070_v47 = vadd.f32 %v1063_v45, %v978_v43 }
 0x11e   : > { %v1484_v49 = vpop.f32.mrf.mxu0 }
 0x11f   : > { %v1079_v51 = vmul.f32 %v1327_v46, %v1070_v47 }
 0x120   : > { %v1066_v53 = vpop.f32.mrf.mxu0 }
 0x121   : > { %v1088_v54 = vadd.f32 %v1328_v48, %v1079_v51  ;;  %v1071_v55 = vadd.f32 %v1066_v53, %v979_v50 }
 0x122   : > { %v1485_v56 = vpop.f32.mrf.mxu0 }
 0x123   : > { %v1102_v57 = vadd.f32 %v1551_v52, %v1088_v54  ;;  %v1080_v58 = vmul.f32 %v1327_v46, %v1071_v55 }
 0x125   : > { %v1104_v60 = vmax.f32 %v1102_v57, 0.0  ;;  %v1089_v61 = vadd.f32 %v1328_v48, %v1080_v58 }
 0x127   : > { %v1108_v62 = vcombine.high %v1104_v60, %v1104_v60  ;;  %1113 = vst.msk [vmem:[%s244_s14] sm:$0xf] %vm1112_vm2, %v1104_v60  ;;  %v1103_v63 = vadd.f32 %v1552_v59, %v1089_v61 }
 0x129   : > { %1114 = vst.msk [vmem:[%s244_s14 + $0x4] sm:$0xf] %vm1112_vm2, %v1108_v62  ;;  %v1105_v0 = vmax.f32 %v1103_v63, 0.0 }
 0x12b   : > { %v1109_v2 = vcombine.high %v1105_v0, %v1105_v0  ;;  %1115 = vst.msk [vmem:[%s244_s14 + $0x8] sm:$0xf] %vm1112_vm2, %v1105_v0 }
 0x12d   : > { %1116 = vst.msk [vmem:[%s244_s14 + $0xc] sm:$0xf] %vm1112_vm2, %v1109_v2 }
 0x12e PF: > { %s15_s18 = sadd.s32 1, %s1559_s18  }
 0x12f   : > { %p12_p4 = scmp.ge.s32.totalorder %s15_s18, 4  }
 0x131   :  { %14 = sbr.rel (!%p12_p4) target bundleno = 1 (0x1), region = 83 }

// kernel: _lambda_.19
= control target key start
LH: loop header
LB: loop body
LE: loop exit
PB: predicated region body
PF: predicated region fallthrough
CT: control target
= control target key end

     0   :  { %v201_v1 = vmov 0.0   ;;  %vm202_vm0 = vmmov 0   ;;  %vm20_vm1 = vcmask 523264   ;;  %s259_s0 = inlined_call_operand.vmem [shape: f32[2,16,64], index: 0, kind: input, shape index: {}]   ;;  %s260_s1 = inlined_call_operand.vmem [shape: bf16[64,10], index: 1, kind: input, shape index: {}]   ;;  %s261_s2 = inlined_call_operand.vmem [shape: f32[1,10], index: 2, kind: input, shape index: {}]   ;;  %s262_s3 = inlined_call_operand.hbm [shape: f32[2,10], index: 3, kind: output, shape index: {}]  }
   0x1   :  { %v175_v0 = vld [vmem:[%s260_s1 + $0x18] sm:$0xff]   ;;  %160 = vmatprep.subr.bf16.mxu0 %v201_v1  ;;  %v176_v2 = vld [vmem:[%s260_s1 + $0x10] sm:$0xff]   ;;  %168 = vmatprep.mubr.msk.bf16.mxu0 %vm202_vm0, %v201_v1  ;;  %v16_v3 = vld [vmem:[%s259_s0] sm:$0xff] }
   0x2   :  { %161 = vmatpush3.bf16.msra.mxu0 %v175_v0  ;;  %v17_v4 = vld [vmem:[%s259_s0 + $0x8] sm:$0xff]  ;;  %v18_v5 = vld [vmem:[%s259_s0 + $0x10] sm:$0xff]  ;;  %v19_v6 = vld [vmem:[%s259_s0 + $0x18] sm:$0xff]  ;;  %v21_v7 = vsel %vm20_vm1, %v16_v3, 0.0 }
   0x3   :  { %162 = vmatprep.subr.bf16.mxu0 %v201_v1  ;;  %v22_v8 = vsel %vm20_vm1, %v17_v4, 0.0  ;;  %v30_v9 = vsel %vm20_vm1, %v18_v5, 0.0  ;;  %v177_v10 = vld [vmem:[%s260_s1 + $0x8] sm:$0xff]   ;;  %v31_v12 = vsel %vm20_vm1, %v19_v6, 0.0 }
   0x4   :  { %v23_v11 = vadd.f32 %v22_v8, %v21_v7 }
   0x6   :  { %163 = vmatpush3.bf16.msra.mxu0 %v176_v2 }
   0x7   :  { %8 = vsyncpa [#allocation3], 0  ;;  %164 = vmatprep.subr.bf16.mxu0 %v201_v1  ;;  %v32_v13 = vadd.f32 %v31_v12, %v30_v9  ;;  %v24_v14 = vrot.slane %v23_v11, 4  ;;  %v178_v16 = vld [vmem:[%s260_s1] sm:$0xff]   ;;  %vm63_vm2 = vcmask 1041409   ;;  %s203_s28 = smov [#allocation2]  }
   0x8   :  { %v149_v35 = vld [vmem:[%s261_s2] ss:$0 sm:$0xff]  ;;  %s141_s29 = sshll.u32 %s203_s28, 4  ;;  %vm133_vm3 = vcmask 74752   ;;  %s142_s29 = int_to_ptr.vmem [resolvable:$true] %s141_s29 }
   0x9   :  { %v33_v15 = vrot.slane %v32_v13, 4  ;;  %v25_v17 = vadd.f32 %v24_v14, %v23_v11  ;;  %s179_s30 = scalar_lea.vmem %s142_s29, 32  ;;  %p184_p1 = scmp.lt.s32.totalorder %s142_s29, %s142_s29 }
   0xa   :  { %165 = vmatpush3.bf16.msra.mxu0 %v177_v10  ;;  %p180_p0 = scmp.ne.s32.totalorder %s142_s29, %s179_s30  ;;  %p185_p2 = scmp.lt.s32.totalorder %s179_s30, %s179_s30 }
   0xb   :  { %166 = vmatprep.subr.bf16.mxu0 %v201_v1  ;;  %v34_v18 = vadd.f32 %v33_v15, %v32_v13  ;;  %v26_v19 = vrot.slane %v25_v17, 2 }
   0xc   :  { %p186_p3 = por %p185_p2, %p184_p1 }
   0xd   :  { %v35_v20 = vrot.slane %v34_v18, 2  ;;  %v27_v21 = vadd.f32 %v26_v19, %v25_v17 }
   0xe   :  { %167 = vmatpush3.bf16.msra.mxu0 %v178_v16  ;;  %p187_p4 = pnand %p186_p3, %p180_p0 }
   0xf   :  { %v36_v22 = vadd.f32 %v35_v20, %v34_v18  ;;  %v28_v23 = vrot.slane %v27_v21, 1 }
  0x11   :  { %v37_v24 = vrot.slane %v36_v22, 1  ;;  %v29_v25 = vadd.f32 %v28_v23, %v27_v21 }
  0x13   :  { %v38_v26 = vadd.f32 %v37_v24, %v36_v22  ;;  %v40_v27 = vmul.f32 0.0625, %v29_v25 }
  0x15   :  { %v41_v28 = vmul.f32 0.0625, %v38_v26  ;;  %v42_v29 = vpack.c.bf16 %v40_v27, %v40_v27 }
  0x17   :  { %v43_v30 = vpack.c.bf16 %v41_v28, %v41_v28  ;;  %v61_v31 = vunpack.c.l.b16 %v42_v29 }
  0x19   :  { %v62_v32 = vunpack.c.l.b16 %v43_v30 }
  0x1b   :  { %v64_v33 = vsel %vm63_vm2, %v62_v32, %v61_v31 }
  0x1c   :  { %v65_v34 = vpack.c.b16 %v64_v33, %v64_v33 }
  0x1e   :  { %169 = vmatmul.mubr.msk.bf16.vlgmr.msra.gmra.mxu0 %vm20_vm1, %v65_v34 }
  0xde   :  { %v127_v36 = vpop.f32.mrf.mxu0 }
  0xdf   :  { %v128_v37 = vadd.f32 %v149_v35, %v127_v36 }
  0xe0   :  { %v170_v38 = vpop.f32.mrf.mxu0 }
  0xe1   :  { %134 = vst.msk [vmem:[#allocation2] sm:$0x3] %vm133_vm3, %v128_v37 }
  0xe2   :  { %v130_v39 = vpop.f32.mrf.mxu0 }
  0xe3   :  { %190 = shalt.err (!%p187_p4)
}
  0xe4   :  { %144 = dma.vmem_to_hbm [thread:$0]  %s142_s29, 32, %s262_s3, [#allocation3]   ;;  %v171_v40 = vpop.f32.mrf.mxu0 }
  0xe5   :  { %199 = dma.done.wait [#allocation3], 32  }
  0xe6   :  { %200 = vsyncadd [#allocation3], 4294967264 }
  0xe7   :  { %148 = vsyncpa [#allocation3], 1 }

</bundles_post_ra>
